<compile_context>
chip_gen: v7x
topology: tpu7x:2x2x1
jax: 0.10.0
libtpu: 0.0.40
codegen_flags: <defaults>
</compile_context>

<pallas_src>
import functools

import jax
import jax.numpy as jnp
import numpy as np
from jax import lax
from jax.experimental import pallas as pl
from jax.experimental.pallas import tpu as pltpu

_EPS = 1e-5
_LANES = 128


def _round_up(x, m):
    return (x + m - 1) // m * m


# -----------------------------------------------------------------------------
# Kernel
# -----------------------------------------------------------------------------
def _basic_block_kernel(*refs, H, W, Ho, Wo, stride, has_shortcut, mxu_k):
    if has_shortcut:
        (x_ref, w1_ref, b1_ref, w2_ref, b2_ref, wsc_ref, bsc_ref,
         out_ref, xpad, mid) = refs
    else:
        (x_ref, w1_ref, b1_ref, w2_ref, b2_ref, out_ref, xpad, mid) = refs

    Cp = x_ref.shape[-1]          # lane-padded input channels
    Pp = out_ref.shape[-1]        # lane-padded output channels
    M = Ho * Wo

    def zero_halo(slab):
        """Zero the 1-pixel halo ring (plays the role of conv zero padding)."""
        _, hs, ws, c = slab.shape
        zr = jnp.zeros((1, ws, c), slab.dtype)
        zc = jnp.zeros((hs, 1, c), slab.dtype)
        slab[0, pl.ds(0, 1), :, :] = zr
        slab[0, pl.ds(hs - 1, 1), :, :] = zr
        slab[0, :, pl.ds(0, 1), :] = zc
        slab[0, :, pl.ds(ws - 1, 1), :] = zc

    def tap(scr, kh, kw, s, c):
        """One 3x3 tap window of the padded slab, (M, c) bf16."""
        if s == 1:
            p = scr[0, pl.ds(kh, Ho), pl.ds(kw, Wo), :]
        else:
            p = scr[0, pl.ds(kh, Ho, stride=s), pl.ds(kw, Wo, stride=s), :]
        return p.reshape(M, c)

    def conv3x3(scr, s, w_ref, b_ref):
        """3x3 'same' conv + bias via per-tap MXU accumulation (no 9C im2col)."""
        c = scr.shape[-1]
        group = max(1, mxu_k // c)            # taps per dot so K ~= mxu_k
        acc = None
        t = 0
        while t < 9:
            g = min(group, 9 - t)
            if g == 1:
                lhs = tap(scr, t // 3, t % 3, s, c)
            else:
                lhs = jnp.concatenate(
                    [tap(scr, (t + i) // 3, (t + i) % 3, s, c) for i in range(g)],
                    axis=-1)
            rhs = w_ref[pl.ds(t * c, g * c), :]
            d = jnp.dot(lhs, rhs, preferred_element_type=jnp.float32)
            acc = d if acc is None else acc + d
            t += g
        return acc + b_ref[...]               # (M, Pp) f32

    zero_halo(xpad)
    zero_halo(mid)

    # ---- conv1 (3x3, stride, pad=1) + BN1 (scale folded into w1) + ReLU --------
    xpad[0, pl.ds(1, H), pl.ds(1, W), :] = x_ref[0]
    out1 = jnp.maximum(conv3x3(xpad, stride, w1_ref, b1_ref), 0.0)
    mid[0, pl.ds(1, Ho), pl.ds(1, Wo), :] = (
        out1.reshape(Ho, Wo, Pp).astype(mid.dtype))

    # ---- conv2 (3x3, stride=1, pad=1) + BN2 -------------------------------------
    out2 = conv3x3(mid, 1, w2_ref, b2_ref)

    # ---- shortcut ---------------------------------------------------------------
    if has_shortcut:                                   # 1x1 conv (stride) + BN
        if stride == 1:
            xs = x_ref[0]
        else:
            xs = x_ref[0, pl.ds(0, Ho, stride=stride),
                       pl.ds(0, Wo, stride=stride), :]
        sc = jnp.dot(xs.reshape(M, Cp), wsc_ref[...],
                     preferred_element_type=jnp.float32) + bsc_ref[...]
    else:                                              # identity: just add x
        sc = x_ref[0].reshape(M, Pp).astype(jnp.float32)

    # ---- residual add + ReLU (lane-dense bf16 store) ----------------------------
    out_ref[0] = jnp.maximum(out2 + sc, 0.0).reshape(Ho, Wo, Pp).astype(out_ref.dtype)


# -----------------------------------------------------------------------------
# Wrapper
# -----------------------------------------------------------------------------
def basic_block_2d(x, params, *, stride=1, mxu_k=256, trim_output=False):
    """x: (N, H, W, Cin) NHWC (f32 or bf16; may already be lane-padded).

    Returns (N, Ho, Wo, Pp) bf16 with channels lane-padded to a multiple of 128
    (padded tail channels are exactly zero, so blocks chain directly).  Pass
    trim_output=True to get the PyTorch-shaped (N, Ho, Wo, planes) f32 result.
    Set mxu_k=128 on v5e (128-deep MXU); 256 matches v6e/v7x.
    """
    N, H, W, Cin = x.shape
    P = params["w1"].shape[-1]
    Ho = (H - 1) // stride + 1
    Wo = (W - 1) // stride + 1
    assert H % 8 == 0 and W % 8 == 0 and Ho % 8 == 0 and Wo % 8 == 0, \
        "spatial extents must be sublane-aligned"
    has_sc = (stride != 1) or (Cin != P)

    Cp = _round_up(Cin, _LANES)
    Pp = _round_up(P, _LANES)

    def pad_c(a, c_to, axis=-1):
        pad = [(0, 0)] * a.ndim
        pad[axis] = (0, c_to - a.shape[axis])
        return jnp.pad(a, pad)

    xb = pad_c(x, Cp).astype(jnp.bfloat16)                               # (N,H,W,Cp)

    # Fold BN scale into weights (per output channel); bias stays separate.
    s1 = params["s1"].reshape(-1)
    s2 = params["s2"].reshape(-1)
    w1 = pad_c(pad_c(params["w1"] * s1, Cp, axis=2), Pp).astype(
        jnp.bfloat16).reshape(9 * Cp, Pp)
    w2 = pad_c(pad_c(params["w2"] * s2, Pp, axis=2), Pp).astype(
        jnp.bfloat16).reshape(9 * Pp, Pp)
    b1 = pad_c(params["b1"], Pp)
    b2 = pad_c(params["b2"], Pp)

    inputs = [xb, w1, b1, w2, b2]
    if has_sc:
        ssc = params["ssc"].reshape(-1)
        wsc = pad_c(pad_c(params["wsc"] * ssc, Cp, axis=0), Pp).astype(jnp.bfloat16)
        inputs += [wsc, pad_c(params["bsc"], Pp)]

    x_spec = pl.BlockSpec((1, H, W, Cp), lambda n: (n, 0, 0, 0))
    prm_specs = [pl.BlockSpec(a.shape, lambda n, nd=a.ndim: (0,) * nd)
                 for a in inputs[1:]]
    out_spec = pl.BlockSpec((1, Ho, Wo, Pp), lambda n: (n, 0, 0, 0))

    kernel = functools.partial(_basic_block_kernel, H=H, W=W, Ho=Ho, Wo=Wo,
                               stride=stride, has_shortcut=has_sc, mxu_k=mxu_k)

    # Generation-aware scoped-VMEM limit (v7x: 64 MiB physical; v5e/v6e: 128 MiB).
    try:
        cap = pltpu.get_tpu_info().vmem_capacity_bytes
        vmem_limit = min(int(cap * 3 // 4), 96 * 1024 * 1024)
    except Exception:
        vmem_limit = 32 * 1024 * 1024

    flops = int(2 * N * Ho * Wo * Pp * (9 * Cp + 9 * Pp + (Cp if has_sc else 0)))
    bytes_accessed = int(xb.size * 2
                         + sum(a.size * a.dtype.itemsize for a in inputs[1:])
                         + N * Ho * Wo * Pp * 2)

    out = pl.pallas_call(
        kernel,
        out_shape=jax.ShapeDtypeStruct((N, Ho, Wo, Pp), jnp.bfloat16),
        grid_spec=pltpu.PrefetchScalarGridSpec(
            num_scalar_prefetch=0,
            grid=(N,),
            in_specs=[x_spec] + prm_specs,
            out_specs=out_spec,
            scratch_shapes=[
                pltpu.VMEM((1, H + 2, W + 2, Cp), jnp.bfloat16),    # padded input
                pltpu.VMEM((1, Ho + 2, Wo + 2, Pp), jnp.bfloat16),  # padded conv1 out
            ]),
        compiler_params=pltpu.CompilerParams(
            dimension_semantics=("parallel",),
            vmem_limit_bytes=vmem_limit),
        cost_estimate=pl.CostEstimate(flops=flops, transcendentals=0,
                                      bytes_accessed=bytes_accessed),
    )(*inputs)

    if trim_output:
        return out[..., :P].astype(jnp.float32)
    return out


# -----------------------------------------------------------------------------
# Parameters / reference
# -----------------------------------------------------------------------------
def _fold_bn(gamma, beta, mean, var):
    scale = gamma / jnp.sqrt(var + _EPS)
    bias = beta - mean * scale
    return (scale.reshape(1, -1).astype(jnp.float32),
            bias.reshape(1, -1).astype(jnp.float32))


def init_params(key, in_planes, planes, stride):
    """Deterministic synthetic parameters matching BasicBlock2d's shapes."""
    ks = jax.random.split(key, 16)

    def bn(k0, k1, k2, k3, c):
        gamma = 1.0 + 0.1 * jax.random.normal(k0, (c,), jnp.float32)
        beta = 0.1 * jax.random.normal(k1, (c,), jnp.float32)
        mean = 0.1 * jax.random.normal(k2, (c,), jnp.float32)
        var = jnp.abs(jax.random.normal(k3, (c,), jnp.float32)) + 0.5
        return _fold_bn(gamma, beta, mean, var)

    p = {}
    p["w1"] = 0.2 * jax.random.normal(ks[0], (3, 3, in_planes, planes), jnp.float32)
    p["s1"], p["b1"] = bn(ks[1], ks[2], ks[3], ks[4], planes)
    p["w2"] = 0.2 * jax.random.normal(ks[5], (3, 3, planes, planes), jnp.float32)
    p["s2"], p["b2"] = bn(ks[6], ks[7], ks[8], ks[9], planes)
    if stride != 1 or in_planes != planes:
        p["wsc"] = 0.2 * jax.random.normal(ks[10], (in_planes, planes), jnp.float32)
        p["ssc"], p["bsc"] = bn(ks[11], ks[12], ks[13], ks[14], planes)
    return p


def reference_basic_block(x, params, *, stride=1):
    """Pure-JAX/XLA reference mirroring the kernel's bf16-matmul / folded-BN policy."""
    dn = ("NHWC", "HWIO", "NHWC")
    xb = x.astype(jnp.bfloat16)
    s1 = params["s1"].reshape(-1)
    s2 = params["s2"].reshape(-1)

    def conv3x3(y, w, s):
        return lax.conv_general_dilated(
            y, w.astype(jnp.bfloat16), (s, s), ((1, 1), (1, 1)),
            dimension_numbers=dn, preferred_element_type=jnp.float32)

    out = conv3x3(xb, params["w1"] * s1, stride) + params["b1"]
    out = jnp.maximum(out, 0.0).astype(jnp.bfloat16)
    out = conv3x3(out, params["w2"] * s2, 1) + params["b2"]

    if "wsc" in params:
        ssc = params["ssc"].reshape(-1)
        wsc = (params["wsc"] * ssc).astype(jnp.bfloat16)[None, None]
        sc = lax.conv_general_dilated(xb, wsc, (stride, stride), "VALID",
                                      dimension_numbers=dn,
                                      preferred_element_type=jnp.float32)
        sc = sc + params["bsc"]
    else:
        sc = xb.astype(jnp.float32)
    return jnp.maximum(out + sc, 0.0)


if __name__ == "__main__":
    key = jax.random.PRNGKey(0)

    configs = [
        # (N, H, W, in_planes, planes, stride)
        (2, 16, 16, 4, 8, 1),   # 1x1-conv + BN projection shortcut
        (2, 16, 16, 8, 8, 1),   # identity (nn.Sequential()) shortcut
    ]
    # NOTE: tiny channel counts are lane-padded to 128 — correct, but heavily
    # over-computes; real ResNet stages (C multiples of 128) are the perf target.
    for (N, H, W, cin, planes, stride) in configs:
        kx, kp, key = jax.random.split(key, 3)
        x = jax.random.normal(kx, (N, H, W, cin), jnp.float32)   # NHWC
        params = init_params(kp, cin, planes, stride)

        out = jax.block_until_ready(basic_block_2d(x, params, stride=stride))
        ref = jax.block_until_ready(reference_basic_block(x, params, stride=stride))

        got = np.asarray(out[..., :planes], dtype=np.float32)
        want = np.asarray(ref.astype(jnp.bfloat16).astype(jnp.float32))
        np.testing.assert_allclose(got, want, rtol=2e-2, atol=2e-2)

    print("KERNEL_OK")
</pallas_src>

<mosaic_0001>
module attributes {stable_mosaic.version = 11 : i64} {
  func.func @_basic_block_kernel(%arg0: i32, %arg1: memref<1x16x16x128xbf16, #tpu.memory_space<vmem>>, %arg2: memref<1152x128xbf16, #tpu.memory_space<vmem>>, %arg3: memref<1x128xf32, #tpu.memory_space<vmem>>, %arg4: memref<1152x128xbf16, #tpu.memory_space<vmem>>, %arg5: memref<1x128xf32, #tpu.memory_space<vmem>>, %arg6: memref<128x128xbf16, #tpu.memory_space<vmem>>, %arg7: memref<1x128xf32, #tpu.memory_space<vmem>>, %arg8: memref<1x16x16x128xbf16, #tpu.memory_space<vmem>>, %arg9: memref<1x18x18x128xbf16, #tpu.memory_space<vmem>>, %arg10: memref<1x18x18x128xbf16, #tpu.memory_space<vmem>>) attributes {dimension_semantics = [#tpu.dimension_semantics<parallel>], iteration_bounds = array<i64: 2>, scalar_prefetch = 0 : i64, scratch_operands = 2 : i64, tpu.core_type = #tpu.core_type<tc>, window_params = [{transform_indices = @transform_0, window_bounds = array<i64: 1, 16, 16, 128>}, {pipeline_mode = #tpu.pipeline_mode<synchronous>, transform_indices = @transform_1, window_bounds = array<i64: 1152, 128>}, {pipeline_mode = #tpu.pipeline_mode<synchronous>, transform_indices = @transform_2, window_bounds = array<i64: 1, 128>}, {pipeline_mode = #tpu.pipeline_mode<synchronous>, transform_indices = @transform_3, window_bounds = array<i64: 1152, 128>}, {pipeline_mode = #tpu.pipeline_mode<synchronous>, transform_indices = @transform_4, window_bounds = array<i64: 1, 128>}, {pipeline_mode = #tpu.pipeline_mode<synchronous>, transform_indices = @transform_5, window_bounds = array<i64: 128, 128>}, {pipeline_mode = #tpu.pipeline_mode<synchronous>, transform_indices = @transform_6, window_bounds = array<i64: 1, 128>}, {transform_indices = @transform_7, window_bounds = array<i64: 1, 16, 16, 128>}]} {
    %cst = arith.constant 0.000000e+00 : bf16
    %0 = vector.broadcast %cst : bf16 to vector<1x18x128xbf16>
    %cst_0 = arith.constant 0.000000e+00 : bf16
    %1 = vector.broadcast %cst_0 : bf16 to vector<18x1x128xbf16>
    %c0 = arith.constant 0 : index
    %c0_1 = arith.constant 0 : index
    %c0_2 = arith.constant 0 : index
    %c0_3 = arith.constant 0 : index
    %2 = vector.load %arg9[%c0, %c0_1, %c0_2, %c0_3] : memref<1x18x18x128xbf16, #tpu.memory_space<vmem>>, vector<1x1x18x128xbf16>
    %3 = vector.shape_cast %2 : vector<1x1x18x128xbf16> to vector<1x18x128xbf16>
    %4 = vector.shape_cast %0 : vector<1x18x128xbf16> to vector<1x1x18x128xbf16>
    tpu.vector_store %arg9[%c0, %c0_1, %c0_2, %c0_3], %4 {strides = array<i32>} : memref<1x18x18x128xbf16, #tpu.memory_space<vmem>>, vector<1x1x18x128xbf16>,
    %c0_4 = arith.constant 0 : index
    %c17 = arith.constant 17 : index
    %c0_5 = arith.constant 0 : index
    %c0_6 = arith.constant 0 : index
    %5 = vector.load %arg9[%c0_4, %c17, %c0_5, %c0_6] : memref<1x18x18x128xbf16, #tpu.memory_space<vmem>>, vector<1x1x18x128xbf16>
    %6 = vector.shape_cast %5 : vector<1x1x18x128xbf16> to vector<1x18x128xbf16>
    %7 = vector.shape_cast %0 : vector<1x18x128xbf16> to vector<1x1x18x128xbf16>
    tpu.vector_store %arg9[%c0_4, %c17, %c0_5, %c0_6], %7 {strides = array<i32>} : memref<1x18x18x128xbf16, #tpu.memory_space<vmem>>, vector<1x1x18x128xbf16>,
    %c0_7 = arith.constant 0 : index
    %c0_8 = arith.constant 0 : index
    %c0_9 = arith.constant 0 : index
    %c0_10 = arith.constant 0 : index
    %8 = vector.load %arg9[%c0_7, %c0_8, %c0_9, %c0_10] : memref<1x18x18x128xbf16, #tpu.memory_space<vmem>>, vector<1x18x1x128xbf16>
    %9 = vector.shape_cast %8 : vector<1x18x1x128xbf16> to vector<18x1x128xbf16>
    %10 = vector.shape_cast %1 : vector<18x1x128xbf16> to vector<1x18x1x128xbf16>
    tpu.vector_store %arg9[%c0_7, %c0_8, %c0_9, %c0_10], %10 {strides = array<i32>} : memref<1x18x18x128xbf16, #tpu.memory_space<vmem>>, vector<1x18x1x128xbf16>,
    %c0_11 = arith.constant 0 : index
    %c0_12 = arith.constant 0 : index
    %c17_13 = arith.constant 17 : index
    %c0_14 = arith.constant 0 : index
    %11 = vector.load %arg9[%c0_11, %c0_12, %c17_13, %c0_14] : memref<1x18x18x128xbf16, #tpu.memory_space<vmem>>, vector<1x18x1x128xbf16>
    %12 = vector.shape_cast %11 : vector<1x18x1x128xbf16> to vector<18x1x128xbf16>
    %13 = vector.shape_cast %1 : vector<18x1x128xbf16> to vector<1x18x1x128xbf16>
    tpu.vector_store %arg9[%c0_11, %c0_12, %c17_13, %c0_14], %13 {strides = array<i32>} : memref<1x18x18x128xbf16, #tpu.memory_space<vmem>>, vector<1x18x1x128xbf16>,
    %cst_15 = arith.constant 0.000000e+00 : bf16
    %14 = vector.broadcast %cst_15 : bf16 to vector<1x18x128xbf16>
    %cst_16 = arith.constant 0.000000e+00 : bf16
    %15 = vector.broadcast %cst_16 : bf16 to vector<18x1x128xbf16>
    %c0_17 = arith.constant 0 : index
    %c0_18 = arith.constant 0 : index
    %c0_19 = arith.constant 0 : index
    %c0_20 = arith.constant 0 : index
    %16 = vector.load %arg10[%c0_17, %c0_18, %c0_19, %c0_20] : memref<1x18x18x128xbf16, #tpu.memory_space<vmem>>, vector<1x1x18x128xbf16>
    %17 = vector.shape_cast %16 : vector<1x1x18x128xbf16> to vector<1x18x128xbf16>
    %18 = vector.shape_cast %14 : vector<1x18x128xbf16> to vector<1x1x18x128xbf16>
    tpu.vector_store %arg10[%c0_17, %c0_18, %c0_19, %c0_20], %18 {strides = array<i32>} : memref<1x18x18x128xbf16, #tpu.memory_space<vmem>>, vector<1x1x18x128xbf16>,
    %c0_21 = arith.constant 0 : index
    %c17_22 = arith.constant 17 : index
    %c0_23 = arith.constant 0 : index
    %c0_24 = arith.constant 0 : index
    %19 = vector.load %arg10[%c0_21, %c17_22, %c0_23, %c0_24] : memref<1x18x18x128xbf16, #tpu.memory_space<vmem>>, vector<1x1x18x128xbf16>
    %20 = vector.shape_cast %19 : vector<1x1x18x128xbf16> to vector<1x18x128xbf16>
    %21 = vector.shape_cast %14 : vector<1x18x128xbf16> to vector<1x1x18x128xbf16>
    tpu.vector_store %arg10[%c0_21, %c17_22, %c0_23, %c0_24], %21 {strides = array<i32>} : memref<1x18x18x128xbf16, #tpu.memory_space<vmem>>, vector<1x1x18x128xbf16>,
    %c0_25 = arith.constant 0 : index
    %c0_26 = arith.constant 0 : index
    %c0_27 = arith.constant 0 : index
    %c0_28 = arith.constant 0 : index
    %22 = vector.load %arg10[%c0_25, %c0_26, %c0_27, %c0_28] : memref<1x18x18x128xbf16, #tpu.memory_space<vmem>>, vector<1x18x1x128xbf16>
    %23 = vector.shape_cast %22 : vector<1x18x1x128xbf16> to vector<18x1x128xbf16>
    %24 = vector.shape_cast %15 : vector<18x1x128xbf16> to vector<1x18x1x128xbf16>
    tpu.vector_store %arg10[%c0_25, %c0_26, %c0_27, %c0_28], %24 {strides = array<i32>} : memref<1x18x18x128xbf16, #tpu.memory_space<vmem>>, vector<1x18x1x128xbf16>,
    %c0_29 = arith.constant 0 : index
    %c0_30 = arith.constant 0 : index
    %c17_31 = arith.constant 17 : index
    %c0_32 = arith.constant 0 : index
    %25 = vector.load %arg10[%c0_29, %c0_30, %c17_31, %c0_32] : memref<1x18x18x128xbf16, #tpu.memory_space<vmem>>, vector<1x18x1x128xbf16>
    %26 = vector.shape_cast %25 : vector<1x18x1x128xbf16> to vector<18x1x128xbf16>
    %27 = vector.shape_cast %15 : vector<18x1x128xbf16> to vector<1x18x1x128xbf16>
    tpu.vector_store %arg10[%c0_29, %c0_30, %c17_31, %c0_32], %27 {strides = array<i32>} : memref<1x18x18x128xbf16, #tpu.memory_space<vmem>>, vector<1x18x1x128xbf16>,
    %c0_33 = arith.constant 0 : index
    %c0_34 = arith.constant 0 : index
    %c0_35 = arith.constant 0 : index
    %c0_36 = arith.constant 0 : index
    %28 = vector.load %arg1[%c0_33, %c0_34, %c0_35, %c0_36] : memref<1x16x16x128xbf16, #tpu.memory_space<vmem>>, vector<1x16x16x128xbf16>
    %29 = vector.shape_cast %28 : vector<1x16x16x128xbf16> to vector<16x16x128xbf16>
    %c0_37 = arith.constant 0 : index
    %c1 = arith.constant 1 : index
    %c1_38 = arith.constant 1 : index
    %c0_39 = arith.constant 0 : index
    %30 = vector.load %arg9[%c0_37, %c1, %c1_38, %c0_39] : memref<1x18x18x128xbf16, #tpu.memory_space<vmem>>, vector<1x16x16x128xbf16>
    %31 = vector.shape_cast %30 : vector<1x16x16x128xbf16> to vector<16x16x128xbf16>
    %32 = vector.shape_cast %29 : vector<16x16x128xbf16> to vector<1x16x16x128xbf16>
    tpu.vector_store %arg9[%c0_37, %c1, %c1_38, %c0_39], %32 {strides = array<i32>} : memref<1x18x18x128xbf16, #tpu.memory_space<vmem>>, vector<1x16x16x128xbf16>,
    %c0_40 = arith.constant 0 : index
    %c0_41 = arith.constant 0 : index
    %c0_42 = arith.constant 0 : index
    %c0_43 = arith.constant 0 : index
    %33 = vector.load %arg9[%c0_40, %c0_41, %c0_42, %c0_43] : memref<1x18x18x128xbf16, #tpu.memory_space<vmem>>, vector<1x16x16x128xbf16>
    %34 = vector.shape_cast %33 : vector<1x16x16x128xbf16> to vector<16x16x128xbf16>
    %35 = vector.shape_cast %34 : vector<16x16x128xbf16> to vector<256x128xbf16>
    %c0_44 = arith.constant 0 : index
    %c0_45 = arith.constant 0 : index
    %c1_46 = arith.constant 1 : index
    %c0_47 = arith.constant 0 : index
    %36 = vector.load %arg9[%c0_44, %c0_45, %c1_46, %c0_47] : memref<1x18x18x128xbf16, #tpu.memory_space<vmem>>, vector<1x16x16x128xbf16>
    %37 = vector.shape_cast %36 : vector<1x16x16x128xbf16> to vector<16x16x128xbf16>
    %38 = vector.shape_cast %37 : vector<16x16x128xbf16> to vector<256x128xbf16>
    %39 = tpu.concatenate %35, %38 in 1 : vector<256x128xbf16>, vector<256x128xbf16> -> vector<256x256xbf16>
    %c0_48 = arith.constant 0 : index
    %c0_49 = arith.constant 0 : index
    %40 = vector.load %arg2[%c0_48, %c0_49] : memref<1152x128xbf16, #tpu.memory_space<vmem>>, vector<256x128xbf16>
    %cst_50 = arith.constant dense<0.000000e+00> : vector<256x128xf32>
    %41 = tpu.matmul %39, %40, %cst_50 {dimension_numbers = #tpu.dot_dimension_numbers<[1], [0], [0], [1], [0, 0, 1, 1], [], []>} : vector<256x256xbf16>, vector<256x128xbf16>, vector<256x128xf32> -> vector<256x128xf32>
    %c0_51 = arith.constant 0 : index
    %c0_52 = arith.constant 0 : index
    %c2 = arith.constant 2 : index
    %c0_53 = arith.constant 0 : index
    %42 = vector.load %arg9[%c0_51, %c0_52, %c2, %c0_53] : memref<1x18x18x128xbf16, #tpu.memory_space<vmem>>, vector<1x16x16x128xbf16>
    %43 = vector.shape_cast %42 : vector<1x16x16x128xbf16> to vector<16x16x128xbf16>
    %44 = vector.shape_cast %43 : vector<16x16x128xbf16> to vector<256x128xbf16>
    %c0_54 = arith.constant 0 : index
    %c1_55 = arith.constant 1 : index
    %c0_56 = arith.constant 0 : index
    %c0_57 = arith.constant 0 : index
    %45 = vector.load %arg9[%c0_54, %c1_55, %c0_56, %c0_57] : memref<1x18x18x128xbf16, #tpu.memory_space<vmem>>, vector<1x16x16x128xbf16>
    %46 = vector.shape_cast %45 : vector<1x16x16x128xbf16> to vector<16x16x128xbf16>
    %47 = vector.shape_cast %46 : vector<16x16x128xbf16> to vector<256x128xbf16>
    %48 = tpu.concatenate %44, %47 in 1 : vector<256x128xbf16>, vector<256x128xbf16> -> vector<256x256xbf16>
    %c256 = arith.constant 256 : index
    %c0_58 = arith.constant 0 : index
    %49 = vector.load %arg2[%c256, %c0_58] : memref<1152x128xbf16, #tpu.memory_space<vmem>>, vector<256x128xbf16>
    %cst_59 = arith.constant dense<0.000000e+00> : vector<256x128xf32>
    %50 = tpu.matmul %48, %49, %cst_59 {dimension_numbers = #tpu.dot_dimension_numbers<[1], [0], [0], [1], [0, 0, 1, 1], [], []>} : vector<256x256xbf16>, vector<256x128xbf16>, vector<256x128xf32> -> vector<256x128xf32>
    %51 = arith.addf %41, %50 : vector<256x128xf32>
    %c0_60 = arith.constant 0 : index
    %c1_61 = arith.constant 1 : index
    %c1_62 = arith.constant 1 : index
    %c0_63 = arith.constant 0 : index
    %52 = vector.load %arg9[%c0_60, %c1_61, %c1_62, %c0_63] : memref<1x18x18x128xbf16, #tpu.memory_space<vmem>>, vector<1x16x16x128xbf16>
    %53 = vector.shape_cast %52 : vector<1x16x16x128xbf16> to vector<16x16x128xbf16>
    %54 = vector.shape_cast %53 : vector<16x16x128xbf16> to vector<256x128xbf16>
    %c0_64 = arith.constant 0 : index
    %c1_65 = arith.constant 1 : index
    %c2_66 = arith.constant 2 : index
    %c0_67 = arith.constant 0 : index
    %55 = vector.load %arg9[%c0_64, %c1_65, %c2_66, %c0_67] : memref<1x18x18x128xbf16, #tpu.memory_space<vmem>>, vector<1x16x16x128xbf16>
    %56 = vector.shape_cast %55 : vector<1x16x16x128xbf16> to vector<16x16x128xbf16>
    %57 = vector.shape_cast %56 : vector<16x16x128xbf16> to vector<256x128xbf16>
    %58 = tpu.concatenate %54, %57 in 1 : vector<256x128xbf16>, vector<256x128xbf16> -> vector<256x256xbf16>
    %c512 = arith.constant 512 : index
    %c0_68 = arith.constant 0 : index
    %59 = vector.load %arg2[%c512, %c0_68] : memref<1152x128xbf16, #tpu.memory_space<vmem>>, vector<256x128xbf16>
    %cst_69 = arith.constant dense<0.000000e+00> : vector<256x128xf32>
    %60 = tpu.matmul %58, %59, %cst_69 {dimension_numbers = #tpu.dot_dimension_numbers<[1], [0], [0], [1], [0, 0, 1, 1], [], []>} : vector<256x256xbf16>, vector<256x128xbf16>, vector<256x128xf32> -> vector<256x128xf32>
    %61 = arith.addf %51, %60 : vector<256x128xf32>
    %c0_70 = arith.constant 0 : index
    %c2_71 = arith.constant 2 : index
    %c0_72 = arith.constant 0 : index
    %c0_73 = arith.constant 0 : index
    %62 = vector.load %arg9[%c0_70, %c2_71, %c0_72, %c0_73] : memref<1x18x18x128xbf16, #tpu.memory_space<vmem>>, vector<1x16x16x128xbf16>
    %63 = vector.shape_cast %62 : vector<1x16x16x128xbf16> to vector<16x16x128xbf16>
    %64 = vector.shape_cast %63 : vector<16x16x128xbf16> to vector<256x128xbf16>
    %c0_74 = arith.constant 0 : index
    %c2_75 = arith.constant 2 : index
    %c1_76 = arith.constant 1 : index
    %c0_77 = arith.constant 0 : index
    %65 = vector.load %arg9[%c0_74, %c2_75, %c1_76, %c0_77] : memref<1x18x18x128xbf16, #tpu.memory_space<vmem>>, vector<1x16x16x128xbf16>
    %66 = vector.shape_cast %65 : vector<1x16x16x128xbf16> to vector<16x16x128xbf16>
    %67 = vector.shape_cast %66 : vector<16x16x128xbf16> to vector<256x128xbf16>
    %68 = tpu.concatenate %64, %67 in 1 : vector<256x128xbf16>, vector<256x128xbf16> -> vector<256x256xbf16>
    %c768 = arith.constant 768 : index
    %c0_78 = arith.constant 0 : index
    %69 = vector.load %arg2[%c768, %c0_78] : memref<1152x128xbf16, #tpu.memory_space<vmem>>, vector<256x128xbf16>
    %cst_79 = arith.constant dense<0.000000e+00> : vector<256x128xf32>
    %70 = tpu.matmul %68, %69, %cst_79 {dimension_numbers = #tpu.dot_dimension_numbers<[1], [0], [0], [1], [0, 0, 1, 1], [], []>} : vector<256x256xbf16>, vector<256x128xbf16>, vector<256x128xf32> -> vector<256x128xf32>
    %71 = arith.addf %61, %70 : vector<256x128xf32>
    %c0_80 = arith.constant 0 : index
    %c2_81 = arith.constant 2 : index
    %c2_82 = arith.constant 2 : index
    %c0_83 = arith.constant 0 : index
    %72 = vector.load %arg9[%c0_80, %c2_81, %c2_82, %c0_83] : memref<1x18x18x128xbf16, #tpu.memory_space<vmem>>, vector<1x16x16x128xbf16>
    %73 = vector.shape_cast %72 : vector<1x16x16x128xbf16> to vector<16x16x128xbf16>
    %74 = vector.shape_cast %73 : vector<16x16x128xbf16> to vector<256x128xbf16>
    %c1024 = arith.constant 1024 : index
    %c0_84 = arith.constant 0 : index
    %75 = vector.load %arg2[%c1024, %c0_84] : memref<1152x128xbf16, #tpu.memory_space<vmem>>, vector<128x128xbf16>
    %cst_85 = arith.constant dense<0.000000e+00> : vector<256x128xf32>
    %76 = tpu.matmul %74, %75, %cst_85 {dimension_numbers = #tpu.dot_dimension_numbers<[1], [0], [0], [1], [0, 0, 1, 1], [], []>} : vector<256x128xbf16>, vector<128x128xbf16>, vector<256x128xf32> -> vector<256x128xf32>
    %77 = arith.addf %71, %76 : vector<256x128xf32>
    %c0_86 = arith.constant 0 : index
    %c0_87 = arith.constant 0 : index
    %78 = vector.load %arg3[%c0_86, %c0_87] : memref<1x128xf32, #tpu.memory_space<vmem>>, vector<1x128xf32>
    %79 = vector.broadcast %78 : vector<1x128xf32> to vector<256x128xf32>
    %80 = arith.addf %77, %79 : vector<256x128xf32>
    %cst_88 = arith.constant 0.000000e+00 : f32
    %81 = vector.broadcast %cst_88 : f32 to vector<256x128xf32>
    %82 = arith.maximumf %80, %81 : vector<256x128xf32>
    %83 = vector.shape_cast %82 : vector<256x128xf32> to vector<16x16x128xf32>
    %84 = arith.truncf %83 : vector<16x16x128xf32> to vector<16x16x128xbf16>
    %c0_89 = arith.constant 0 : index
    %c1_90 = arith.constant 1 : index
    %c1_91 = arith.constant 1 : index
    %c0_92 = arith.constant 0 : index
    %85 = vector.load %arg10[%c0_89, %c1_90, %c1_91, %c0_92] : memref<1x18x18x128xbf16, #tpu.memory_space<vmem>>, vector<1x16x16x128xbf16>
    %86 = vector.shape_cast %85 : vector<1x16x16x128xbf16> to vector<16x16x128xbf16>
    %87 = vector.shape_cast %84 : vector<16x16x128xbf16> to vector<1x16x16x128xbf16>
    tpu.vector_store %arg10[%c0_89, %c1_90, %c1_91, %c0_92], %87 {strides = array<i32>} : memref<1x18x18x128xbf16, #tpu.memory_space<vmem>>, vector<1x16x16x128xbf16>,
    %c0_93 = arith.constant 0 : index
    %c0_94 = arith.constant 0 : index
    %c0_95 = arith.constant 0 : index
    %c0_96 = arith.constant 0 : index
    %88 = vector.load %arg10[%c0_93, %c0_94, %c0_95, %c0_96] : memref<1x18x18x128xbf16, #tpu.memory_space<vmem>>, vector<1x16x16x128xbf16>
    %89 = vector.shape_cast %88 : vector<1x16x16x128xbf16> to vector<16x16x128xbf16>
    %90 = vector.shape_cast %89 : vector<16x16x128xbf16> to vector<256x128xbf16>
    %c0_97 = arith.constant 0 : index
    %c0_98 = arith.constant 0 : index
    %c1_99 = arith.constant 1 : index
    %c0_100 = arith.constant 0 : index
    %91 = vector.load %arg10[%c0_97, %c0_98, %c1_99, %c0_100] : memref<1x18x18x128xbf16, #tpu.memory_space<vmem>>, vector<1x16x16x128xbf16>
    %92 = vector.shape_cast %91 : vector<1x16x16x128xbf16> to vector<16x16x128xbf16>
    %93 = vector.shape_cast %92 : vector<16x16x128xbf16> to vector<256x128xbf16>
    %94 = tpu.concatenate %90, %93 in 1 : vector<256x128xbf16>, vector<256x128xbf16> -> vector<256x256xbf16>
    %c0_101 = arith.constant 0 : index
    %c0_102 = arith.constant 0 : index
    %95 = vector.load %arg4[%c0_101, %c0_102] : memref<1152x128xbf16, #tpu.memory_space<vmem>>, vector<256x128xbf16>
    %cst_103 = arith.constant dense<0.000000e+00> : vector<256x128xf32>
    %96 = tpu.matmul %94, %95, %cst_103 {dimension_numbers = #tpu.dot_dimension_numbers<[1], [0], [0], [1], [0, 0, 1, 1], [], []>} : vector<256x256xbf16>, vector<256x128xbf16>, vector<256x128xf32> -> vector<256x128xf32>
    %c0_104 = arith.constant 0 : index
    %c0_105 = arith.constant 0 : index
    %c2_106 = arith.constant 2 : index
    %c0_107 = arith.constant 0 : index
    %97 = vector.load %arg10[%c0_104, %c0_105, %c2_106, %c0_107] : memref<1x18x18x128xbf16, #tpu.memory_space<vmem>>, vector<1x16x16x128xbf16>
    %98 = vector.shape_cast %97 : vector<1x16x16x128xbf16> to vector<16x16x128xbf16>
    %99 = vector.shape_cast %98 : vector<16x16x128xbf16> to vector<256x128xbf16>
    %c0_108 = arith.constant 0 : index
    %c1_109 = arith.constant 1 : index
    %c0_110 = arith.constant 0 : index
    %c0_111 = arith.constant 0 : index
    %100 = vector.load %arg10[%c0_108, %c1_109, %c0_110, %c0_111] : memref<1x18x18x128xbf16, #tpu.memory_space<vmem>>, vector<1x16x16x128xbf16>
    %101 = vector.shape_cast %100 : vector<1x16x16x128xbf16> to vector<16x16x128xbf16>
    %102 = vector.shape_cast %101 : vector<16x16x128xbf16> to vector<256x128xbf16>
    %103 = tpu.concatenate %99, %102 in 1 : vector<256x128xbf16>, vector<256x128xbf16> -> vector<256x256xbf16>
    %c256_112 = arith.constant 256 : index
    %c0_113 = arith.constant 0 : index
    %104 = vector.load %arg4[%c256_112, %c0_113] : memref<1152x128xbf16, #tpu.memory_space<vmem>>, vector<256x128xbf16>
    %cst_114 = arith.constant dense<0.000000e+00> : vector<256x128xf32>
    %105 = tpu.matmul %103, %104, %cst_114 {dimension_numbers = #tpu.dot_dimension_numbers<[1], [0], [0], [1], [0, 0, 1, 1], [], []>} : vector<256x256xbf16>, vector<256x128xbf16>, vector<256x128xf32> -> vector<256x128xf32>
    %106 = arith.addf %96, %105 : vector<256x128xf32>
    %c0_115 = arith.constant 0 : index
    %c1_116 = arith.constant 1 : index
    %c1_117 = arith.constant 1 : index
    %c0_118 = arith.constant 0 : index
    %107 = vector.load %arg10[%c0_115, %c1_116, %c1_117, %c0_118] : memref<1x18x18x128xbf16, #tpu.memory_space<vmem>>, vector<1x16x16x128xbf16>
    %108 = vector.shape_cast %107 : vector<1x16x16x128xbf16> to vector<16x16x128xbf16>
    %109 = vector.shape_cast %108 : vector<16x16x128xbf16> to vector<256x128xbf16>
    %c0_119 = arith.constant 0 : index
    %c1_120 = arith.constant 1 : index
    %c2_121 = arith.constant 2 : index
    %c0_122 = arith.constant 0 : index
    %110 = vector.load %arg10[%c0_119, %c1_120, %c2_121, %c0_122] : memref<1x18x18x128xbf16, #tpu.memory_space<vmem>>, vector<1x16x16x128xbf16>
    %111 = vector.shape_cast %110 : vector<1x16x16x128xbf16> to vector<16x16x128xbf16>
    %112 = vector.shape_cast %111 : vector<16x16x128xbf16> to vector<256x128xbf16>
    %113 = tpu.concatenate %109, %112 in 1 : vector<256x128xbf16>, vector<256x128xbf16> -> vector<256x256xbf16>
    %c512_123 = arith.constant 512 : index
    %c0_124 = arith.constant 0 : index
    %114 = vector.load %arg4[%c512_123, %c0_124] : memref<1152x128xbf16, #tpu.memory_space<vmem>>, vector<256x128xbf16>
    %cst_125 = arith.constant dense<0.000000e+00> : vector<256x128xf32>
    %115 = tpu.matmul %113, %114, %cst_125 {dimension_numbers = #tpu.dot_dimension_numbers<[1], [0], [0], [1], [0, 0, 1, 1], [], []>} : vector<256x256xbf16>, vector<256x128xbf16>, vector<256x128xf32> -> vector<256x128xf32>
    %116 = arith.addf %106, %115 : vector<256x128xf32>
    %c0_126 = arith.constant 0 : index
    %c2_127 = arith.constant 2 : index
    %c0_128 = arith.constant 0 : index
    %c0_129 = arith.constant 0 : index
    %117 = vector.load %arg10[%c0_126, %c2_127, %c0_128, %c0_129] : memref<1x18x18x128xbf16, #tpu.memory_space<vmem>>, vector<1x16x16x128xbf16>
    %118 = vector.shape_cast %117 : vector<1x16x16x128xbf16> to vector<16x16x128xbf16>
    %119 = vector.shape_cast %118 : vector<16x16x128xbf16> to vector<256x128xbf16>
    %c0_130 = arith.constant 0 : index
    %c2_131 = arith.constant 2 : index
    %c1_132 = arith.constant 1 : index
    %c0_133 = arith.constant 0 : index
    %120 = vector.load %arg10[%c0_130, %c2_131, %c1_132, %c0_133] : memref<1x18x18x128xbf16, #tpu.memory_space<vmem>>, vector<1x16x16x128xbf16>
    %121 = vector.shape_cast %120 : vector<1x16x16x128xbf16> to vector<16x16x128xbf16>
    %122 = vector.shape_cast %121 : vector<16x16x128xbf16> to vector<256x128xbf16>
    %123 = tpu.concatenate %119, %122 in 1 : vector<256x128xbf16>, vector<256x128xbf16> -> vector<256x256xbf16>
    %c768_134 = arith.constant 768 : index
    %c0_135 = arith.constant 0 : index
    %124 = vector.load %arg4[%c768_134, %c0_135] : memref<1152x128xbf16, #tpu.memory_space<vmem>>, vector<256x128xbf16>
    %cst_136 = arith.constant dense<0.000000e+00> : vector<256x128xf32>
    %125 = tpu.matmul %123, %124, %cst_136 {dimension_numbers = #tpu.dot_dimension_numbers<[1], [0], [0], [1], [0, 0, 1, 1], [], []>} : vector<256x256xbf16>, vector<256x128xbf16>, vector<256x128xf32> -> vector<256x128xf32>
    %126 = arith.addf %116, %125 : vector<256x128xf32>
    %c0_137 = arith.constant 0 : index
    %c2_138 = arith.constant 2 : index
    %c2_139 = arith.constant 2 : index
    %c0_140 = arith.constant 0 : index
    %127 = vector.load %arg10[%c0_137, %c2_138, %c2_139, %c0_140] : memref<1x18x18x128xbf16, #tpu.memory_space<vmem>>, vector<1x16x16x128xbf16>
    %128 = vector.shape_cast %127 : vector<1x16x16x128xbf16> to vector<16x16x128xbf16>
    %129 = vector.shape_cast %128 : vector<16x16x128xbf16> to vector<256x128xbf16>
    %c1024_141 = arith.constant 1024 : index
    %c0_142 = arith.constant 0 : index
    %130 = vector.load %arg4[%c1024_141, %c0_142] : memref<1152x128xbf16, #tpu.memory_space<vmem>>, vector<128x128xbf16>
    %cst_143 = arith.constant dense<0.000000e+00> : vector<256x128xf32>
    %131 = tpu.matmul %129, %130, %cst_143 {dimension_numbers = #tpu.dot_dimension_numbers<[1], [0], [0], [1], [0, 0, 1, 1], [], []>} : vector<256x128xbf16>, vector<128x128xbf16>, vector<256x128xf32> -> vector<256x128xf32>
    %132 = arith.addf %126, %131 : vector<256x128xf32>
    %c0_144 = arith.constant 0 : index
    %c0_145 = arith.constant 0 : index
    %133 = vector.load %arg5[%c0_144, %c0_145] : memref<1x128xf32, #tpu.memory_space<vmem>>, vector<1x128xf32>
    %134 = vector.broadcast %133 : vector<1x128xf32> to vector<256x128xf32>
    %135 = arith.addf %132, %134 : vector<256x128xf32>
    %c0_146 = arith.constant 0 : index
    %c0_147 = arith.constant 0 : index
    %c0_148 = arith.constant 0 : index
    %c0_149 = arith.constant 0 : index
    %136 = vector.load %arg1[%c0_146, %c0_147, %c0_148, %c0_149] : memref<1x16x16x128xbf16, #tpu.memory_space<vmem>>, vector<1x16x16x128xbf16>
    %137 = vector.shape_cast %136 : vector<1x16x16x128xbf16> to vector<16x16x128xbf16>
    %138 = vector.shape_cast %137 : vector<16x16x128xbf16> to vector<256x128xbf16>
    %c0_150 = arith.constant 0 : index
    %c0_151 = arith.constant 0 : index
    %139 = vector.load %arg6[%c0_150, %c0_151] : memref<128x128xbf16, #tpu.memory_space<vmem>>, vector<128x128xbf16>
    %cst_152 = arith.constant dense<0.000000e+00> : vector<256x128xf32>
    %140 = tpu.matmul %138, %139, %cst_152 {dimension_numbers = #tpu.dot_dimension_numbers<[1], [0], [0], [1], [0, 0, 1, 1], [], []>} : vector<256x128xbf16>, vector<128x128xbf16>, vector<256x128xf32> -> vector<256x128xf32>
    %c0_153 = arith.constant 0 : index
    %c0_154 = arith.constant 0 : index
    %141 = vector.load %arg7[%c0_153, %c0_154] : memref<1x128xf32, #tpu.memory_space<vmem>>, vector<1x128xf32>
    %142 = vector.broadcast %141 : vector<1x128xf32> to vector<256x128xf32>
    %143 = arith.addf %140, %142 : vector<256x128xf32>
    %144 = arith.addf %135, %143 : vector<256x128xf32>
    %cst_155 = arith.constant 0.000000e+00 : f32
    %145 = vector.broadcast %cst_155 : f32 to vector<256x128xf32>
    %146 = arith.maximumf %144, %145 : vector<256x128xf32>
    %147 = vector.shape_cast %146 : vector<256x128xf32> to vector<16x16x128xf32>
    %148 = arith.truncf %147 : vector<16x16x128xf32> to vector<16x16x128xbf16>
    %c0_156 = arith.constant 0 : index
    %c0_157 = arith.constant 0 : index
    %c0_158 = arith.constant 0 : index
    %c0_159 = arith.constant 0 : index
    %149 = vector.load %arg8[%c0_156, %c0_157, %c0_158, %c0_159] : memref<1x16x16x128xbf16, #tpu.memory_space<vmem>>, vector<1x16x16x128xbf16>
    %150 = vector.shape_cast %149 : vector<1x16x16x128xbf16> to vector<16x16x128xbf16>
    %151 = vector.shape_cast %148 : vector<16x16x128xbf16> to vector<1x16x16x128xbf16>
    tpu.vector_store %arg8[%c0_156, %c0_157, %c0_158, %c0_159], %151 {strides = array<i32>} : memref<1x16x16x128xbf16, #tpu.memory_space<vmem>>, vector<1x16x16x128xbf16>,
    return
  }
  func.func @transform_0(%arg0: i32) -> (i32, i32, i32, i32) {
    %c0_i32 = arith.constant 0 : i32
    %c0_i32_0 = arith.constant 0 : i32
    %c0_i32_1 = arith.constant 0 : i32
    %c0_i32_2 = arith.constant 0 : i32
    return %arg0, %c0_i32, %c0_i32_0, %c0_i32_1 : i32, i32, i32, i32
  }
  func.func @transform_1(%arg0: i32) -> (i32, i32) {
    %c0_i32 = arith.constant 0 : i32
    %c0_i32_0 = arith.constant 0 : i32
    %c0_i32_1 = arith.constant 0 : i32
    return %c0_i32, %c0_i32_0 : i32, i32
  }
  func.func @transform_2(%arg0: i32) -> (i32, i32) {
    %c0_i32 = arith.constant 0 : i32
    %c0_i32_0 = arith.constant 0 : i32
    %c0_i32_1 = arith.constant 0 : i32
    return %c0_i32, %c0_i32_0 : i32, i32
  }
  func.func @transform_3(%arg0: i32) -> (i32, i32) {
    %c0_i32 = arith.constant 0 : i32
    %c0_i32_0 = arith.constant 0 : i32
    %c0_i32_1 = arith.constant 0 : i32
    return %c0_i32, %c0_i32_0 : i32, i32
  }
  func.func @transform_4(%arg0: i32) -> (i32, i32) {
    %c0_i32 = arith.constant 0 : i32
    %c0_i32_0 = arith.constant 0 : i32
    %c0_i32_1 = arith.constant 0 : i32
    return %c0_i32, %c0_i32_0 : i32, i32
  }
  func.func @transform_5(%arg0: i32) -> (i32, i32) {
    %c0_i32 = arith.constant 0 : i32
    %c0_i32_0 = arith.constant 0 : i32
    %c0_i32_1 = arith.constant 0 : i32
    return %c0_i32, %c0_i32_0 : i32, i32
  }
  func.func @transform_6(%arg0: i32) -> (i32, i32) {
    %c0_i32 = arith.constant 0 : i32
    %c0_i32_0 = arith.constant 0 : i32
    %c0_i32_1 = arith.constant 0 : i32
    return %c0_i32, %c0_i32_0 : i32, i32
  }
  func.func @transform_7(%arg0: i32) -> (i32, i32, i32, i32) {
    %c0_i32 = arith.constant 0 : i32
    %c0_i32_0 = arith.constant 0 : i32
    %c0_i32_1 = arith.constant 0 : i32
    %c0_i32_2 = arith.constant 0 : i32
    return %arg0, %c0_i32, %c0_i32_0, %c0_i32_1 : i32, i32, i32, i32
  }
}

</mosaic_0001>

<bundles_post_ra>
// kernel: tpu_custom_call.1
= control target key start
LH: loop header
LB: loop body
LE: loop exit
PB: predicated region body
PF: predicated region fallthrough
CT: control target
= control target key end

     0   :  { %12 = vsyncpa [#allocation5], 0  ;;  %s17239_s0 = inlined_call_operand.hbm [shape: bf16[2,16,16,128], index: 0, kind: input, shape index: {}]   ;;  %s17240_s1 = inlined_call_operand.hbm [shape: bf16[1152,128], index: 1, kind: input, shape index: {}]   ;;  %s17241_s2 = inlined_call_operand.vmem [shape: f32[1,128], index: 2, kind: input, shape index: {}]   ;;  %s17242_s3 = inlined_call_operand.hbm [shape: bf16[1152,128], index: 3, kind: input, shape index: {}]   ;;  %s17243_s4 = inlined_call_operand.vmem [shape: f32[1,128], index: 4, kind: input, shape index: {}]   ;;  %s17244_s5 = inlined_call_operand.hbm [shape: bf16[128,128], index: 5, kind: input, shape index: {}]   ;;  %s17245_s6 = inlined_call_operand.vmem [shape: f32[1,128], index: 6, kind: input, shape index: {}]   ;;  %s17246_s7 = inlined_call_operand.hbm [shape: bf16[2,16,16,128], index: 7, kind: output, shape index: {}]  }
   0x1   :  { %14 = vsyncpa [#allocation5 + $0x1], 0 }
   0x2   :  { %15 = vsyncpa [#allocation8], 0 }
   0x3   :  { %16 = vsyncpa [#allocation11], 0 }
   0x4   :  { %17 = vsyncpa [#allocation6], 0 }
   0x5   :  { %19 = vsyncpa [#allocation6 + $0x1], 0  ;;  %s13037_s24 = smov 0   ;;  %s13039_s25 = smov 0  }
   0x6   :  { %s13041_s26 = smov 0   ;;  %s13043_s27 = smov 0  }
   0x7 LB: > { %s13058_s28 = sadd.s32 4294967295, %s12985_s27   ;;  %s10339_s29 = sadd.s32 4294967294, %s12985_s27   ;;  %s12985_s27 = sphi %s13043_s27, %s17381_s27   ;;  %s12981_s26 = sphi %s13041_s26, %s17380_s26   ;;  %s12977_s25 = sphi %s13039_s25, %s17379_s25   ;;  %s12973_s24 = sphi %s13037_s24, %s17378_s24  }
   0x8   : > { %p45_p0 = scmp.ne.s32.totalorder %s12977_s25, %s12973_s24  ;;  %p17247_p1 = scmp.eq.s32.totalorder %s13058_s28, 0 }
   0x9   : > { %p201_p3 = scmp.eq.s32.totalorder %s10339_s29, 1  ;;  %p10340_p5 = scmp.ge.s32.totalorder %s12985_s27, 1 }
   0xa   : > { %p13067_p4 = por %p17247_p1, %p45_p0  ;;  %p208_p7 = scmp.lt.s32.totalorder %s12985_s27, 3 }
   0xb   : > { %p13072_p6 = por %p201_p3, %p45_p0  ;;  %s12987_s10 = smov [#allocation7]  }
   0xc   : > { %s17262_s30 = scalar_select %p13067_p4, 1, 0 }
   0xd   : > { %s17263_s8 = scalar_select %p13072_p6, 1, 0 }
   0xe   : > { %p13077_p8 = pnand %p10340_p5, %p208_p7  ;;  %s220_s11 = sshll.u32 %s12987_s10, 4  ;;  %s13081_s11 = int_to_ptr.vmem [resolvable:$true] %s220_s11 }
   0xf   : > { %17264 = sst [smem:[#allocation17_spill]] %s17263_s8  ;;  %s12988_s13 = smov [#allocation9]  }
  0x10   : > { %s17265_s9 = scalar_select %p13077_p8, 1, 0 }
  0x11   : > { %p12411_p9 = pneg %p13077_p8  ;;  %s236_s14 = sshll.u32 %s12988_s13, 4  ;;  %s13092_s14 = int_to_ptr.vmem [resolvable:$true] %s236_s14 }
  0x12   : > { %s12989_s15 = smov [#allocation10]   ;;  %s12797_s19 = scalar_lea.hbm %s17240_s1, 9216 }
  0x13   : > { %p13088_p11 = pnand %p12411_p9, %p17247_p1  ;;  %s13094_s16 = sshll.u32 %s12989_s15, 4  ;;  %s253_s16 = int_to_ptr.vmem [resolvable:$true] %s13094_s16 }
  0x14   : > { %p12798_p12 = scmp.ne.s32.totalorder %s17240_s1, %s12797_s19  ;;  %p12804_p5 = scmp.lt.u32.totalorder %s12797_s19, %s17240_s1 }
  0x15   : > { %p13104_p13 = pneg %p13088_p11 }
  0x17   : > { %p12800_p0 = pnand %p13104_p13, %p12798_p12 }
  0x19   : > { %p12801_p3 = pneg %p12800_p0 }
  0x1b   : > { %p12806_p7 = pnand %p12804_p5, %p12801_p3 }
  0x1d   : > { %12809 = shalt.err (!%p12806_p7)
}
  0x1e   : > { %s12810_s10 = scalar_lea.vmem %s13081_s11, 9216  ;;  %p12818_p2 = scmp.lt.s32.totalorder %s13081_s11, %s13081_s11 }
  0x1f   : > { %p12811_p9 = scmp.ne.s32.totalorder %s13081_s11, %s12810_s10  ;;  %p12819_p6 = scmp.lt.s32.totalorder %s12810_s10, %s12810_s10 }
  0x21   : > { %p12813_p10 = pnand %p12811_p9, %p13104_p13  ;;  %p12820_p12 = por %p12819_p6, %p12818_p2 }
  0x23   : > { %p12814_p1 = pneg %p12813_p10 }
  0x25   : > { %p12821_p0 = pnand %p12820_p12, %p12814_p1 }
  0x27   : > { %12824 = shalt.err (!%p12821_p0)
}
  0x28   : > { %s12990_s13 = smov 64   ;;  %s12991_s15 = smov 4  }
  0x29   : > { %12414 = dma.hbm_to_vmem [thread:$0]  (!%p13088_p11), %s17240_s1, 9216, %s13081_s11, [#allocation8], %s12990_s13, %s12990_s13, %s12991_s15  }
  0x2a   : > { %s12825_s21 = scalar_lea.hbm %s17242_s3, 9216 }
  0x2b   : > { %p12826_p1 = scmp.ne.s32.totalorder %s17242_s3, %s12825_s21  ;;  %p12832_p10 = scmp.lt.u32.totalorder %s12825_s21, %s17242_s3 }
  0x2d   : > { %p12828_p2 = pnand %p12826_p1, %p13104_p13 }
  0x2f   : > { %p12829_p6 = pneg %p12828_p2 }
  0x31   : > { %p12834_p3 = pnand %p12832_p10, %p12829_p6 }
  0x33   : > { %12837 = shalt.err (!%p12834_p3)
}
  0x34   : > { %s12838_s11 = scalar_lea.vmem %s13092_s14, 9216  ;;  %p12846_p12 = scmp.lt.s32.totalorder %s13092_s14, %s13092_s14 }
  0x35   : > { %p12839_p5 = scmp.ne.s32.totalorder %s13092_s14, %s12838_s11  ;;  %p12847_p0 = scmp.lt.s32.totalorder %s12838_s11, %s12838_s11 }
  0x37   : > { %p12841_p7 = pnand %p12839_p5, %p13104_p13  ;;  %p12848_p1 = por %p12847_p0, %p12846_p12 }
  0x39   : > { %p12842_p9 = pneg %p12841_p7 }
  0x3b   : > { %p12849_p2 = pnand %p12848_p1, %p12842_p9 }
  0x3d   : > { %12852 = shalt.err (!%p12849_p2)
}
  0x3e   : > { %12417 = dma.hbm_to_vmem [thread:$0]  (!%p13088_p11), %s17242_s3, 9216, %s13092_s14, [#allocation8], %s12990_s13, %s12990_s13, %s12991_s15  }
  0x3f   : > { %s12853_s20 = scalar_lea.hbm %s17244_s5, 1024 }
  0x40   : > { %p12854_p6 = scmp.ne.s32.totalorder %s17244_s5, %s12853_s20  ;;  %p12860_p5 = scmp.lt.u32.totalorder %s12853_s20, %s17244_s5 }
  0x42   : > { %p12856_p10 = pnand %p12854_p6, %p13104_p13 }
  0x44   : > { %p12857_p3 = pneg %p12856_p10 }
  0x46   : > { %p12862_p7 = pnand %p12860_p5, %p12857_p3 }
  0x48   : > { %12865 = shalt.err (!%p12862_p7)
}
  0x49   : > { %s12866_s11 = scalar_lea.vmem %s253_s16, 1024  ;;  %p12874_p1 = scmp.lt.s32.totalorder %s253_s16, %s253_s16 }
  0x4a   : > { %p12867_p9 = scmp.ne.s32.totalorder %s253_s16, %s12866_s11  ;;  %p12875_p2 = scmp.lt.s32.totalorder %s12866_s11, %s12866_s11 }
  0x4c   : > { %p12869_p12 = pnand %p12867_p9, %p13104_p13  ;;  %p12876_p4 = por %p12875_p2, %p12874_p1 }
  0x4e   : > { %p12870_p0 = pneg %p12869_p12 }
  0x50   : > { %p12877_p8 = pnand %p12876_p4, %p12870_p0 }
  0x52   : > { %12880 = shalt.err (!%p12877_p8)
}
  0x53   : > { %12420 = dma.hbm_to_vmem [thread:$0]  (!%p13088_p11), %s17244_s5, 1024, %s253_s16, [#allocation11], %s12990_s13, %s12990_s13, %s12991_s15  }
  0x54   : > { %s13177_s22 = sadd.s32 1, %s12985_s27   ;;  %s32_s17 = sadd.s32 1, %s12981_s26 }
  0x55   : > { %s29_s12 = ssub.s32 %s12985_s27, %s13177_s22  ;;  %p39_p8 = scmp.ne.s32.totalorder %s12981_s26, %s12977_s25 }
  0x56   : > { %p30_p4 = scmp.eq.s32.totalorder %s29_s12, 0  ;;  %p40_p13 = scmp.eq.s32.totalorder %s12985_s27, 0 }
  0x57   : > { %p12432_p6 = scmp.lt.s32.totalorder %s12985_s27, 2  ;;  %p17268_p3 = scmp.eq.s32.totalorder %s13058_s28, 1 }
  0x58   : > { %s13187_s18 = scalar_select %p30_p4, %s12981_s26, %s32_s17  }
  0x59   : > { %p41_p10 = por %p40_p13, %p39_p8  ;;  %p13191_p5 = por %p17268_p3, %p39_p8 }
  0x5a   : > { %s269_s20 = sand.u32 1, %s12981_s26   ;;  %s10978_s21 = sshll.u32 %s12985_s27, 11 }
  0x5b   : > { %s10345_s16 = sshll.u32 %s269_s20, 7  ;;  %s13200_s10 = scalar_lea.hbm %s17239_s0, %s10978_s21 }
  0x5c   : > { %s273_s11 = scalar_lea.vmem [#allocation4], %s10345_s16  ;;  %p13202_p11 = pnand %p12432_p6, %p41_p10 }
  0x5d   : > { %s280_s14 = sshll.u32 %s273_s11, 4  ;;  %s13208_s12 = scalar_lea.sflag [#allocation5], %s269_s20  ;;  %s13206_s14 = int_to_ptr.vmem [resolvable:$true] %s280_s14 }
  0x5e   : > { %s12881_s17 = scalar_lea.hbm %s13200_s10, 2048  ;;  %p12883_p9 = pneg %p13202_p11 }
  0x5f   : > { %p12882_p7 = scmp.ne.s32.totalorder %s13200_s10, %s12881_s17  ;;  %s12886_s23 = scalar_lea.hbm %s17239_s0, 4096 }
  0x60   : > { %p12887_p1 = scmp.lt.u32.totalorder %s13200_s10, %s17239_s0  ;;  %p12888_p2 = scmp.lt.u32.totalorder %s12886_s23, %s12881_s17 }
  0x61   : > { %p12884_p12 = pnand %p12883_p9, %p12882_p7  ;;  %p12890_p8 = scmp.lt.u32.totalorder %s12881_s17, %s13200_s10 }
  0x62   : > { %p12889_p4 = por %p12888_p2, %p12887_p1 }
  0x63   : > { %p12885_p0 = pneg %p12884_p12 }
  0x64   : > { %p12891_p13 = por %p12890_p8, %p12889_p4 }
  0x66   : > { %p12892_p6 = pnand %p12891_p13, %p12885_p0 }
  0x68   : > { %12895 = shalt.err (!%p12892_p6)
}
  0x69   : > { %s12896_s20 = scalar_lea.vmem %s13206_s14, 2048  ;;  %s12992_s21 = smov [#allocation4]  }
  0x6a   : > { %p12897_p10 = scmp.ne.s32.totalorder %s13206_s14, %s12896_s20  ;;  %s12901_s16 = sshll.u32 %s12992_s21, 4  ;;  %s12902_s16 = int_to_ptr.vmem [resolvable:$false] %s12901_s16 }
  0x6b   : > { %s12903_s29 = scalar_lea.vmem %s12902_s16, 4096  ;;  %p12904_p12 = scmp.lt.s32.totalorder %s13206_s14, %s12902_s16 }
  0x6c   : > { %p12899_p3 = pnand %p12897_p10, %p12883_p9  ;;  %p12905_p1 = scmp.lt.s32.totalorder %s12903_s29, %s12896_s20 }
  0x6e   : > { %p12900_p7 = pneg %p12899_p3  ;;  %p12906_p2 = por %p12905_p1, %p12904_p12 }
  0x70   : > { %p12907_p4 = pnand %p12906_p2, %p12900_p7 }
  0x72   : > { %12910 = shalt.err (!%p12907_p4)
}
  0x73   : > { %12424 = dma.hbm_to_vmem [thread:$0]  (!%p13202_p11), %s13200_s10, 2048, %s13206_s14, %s13208_s12, %s12990_s13, %s12990_s13, %s12991_s15  }
  0x74   : > { %p17271_p9 = scmp.ne.s32.totalorder %s17265_s9, 0 }
  0x76   : > { %292 = sbr.rel (%p17271_p9) target bundleno = 1460 (0x5b4), region = 48 }
  0x7d   : > { %s13242_s17 = sand.u32 1, %s12977_s25   ;;  %p17272_p0 = scmp.ne.s32.totalorder %s17262_s30, 0 }
  0x7e   : > { %s10349_s23 = sshll.u32 %s13242_s17, 7  ;;  %s295_s11 = scalar_lea.sflag [#allocation5], %s13242_s17 }
  0x7f   : > { %s13248_s8 = scalar_lea.vmem [#allocation4], %s10349_s23 }
  0x80   : > { %12956 = dma.done.wait (%p17272_p0), %s295_s11, 2048  }
  0x81   : > { %12958 = vsyncadd (%p17272_p0), %s295_s11, 4294965248  ;;  %p17273_p11 = scmp.eq.s32.totalorder %s13058_s28, 0 }
  0x83   : > { %12960 = dma.done.wait (%p17273_p11), [#allocation8], 18432   ;;  %p17274_p8 = pmov %p17273_p11 }
  0x85   : > { %12962 = vsyncadd (%p17274_p8), [#allocation8], 4294948864  ;;  %p17275_p13 = pmov %p17274_p8 }
  0x86   : > { %p17276_p6 = pmov %p17274_p8 }
  0x87   : > { %12964 = dma.done.wait (%p17275_p13), [#allocation11], 1024  }
  0x88   : > { %12966 = vsyncadd (%p17276_p6), [#allocation11], 4294966272  ;;  %v12993_v0 = vmov 0   ;;  %v12477_v1 = vld [vmem:[#allocation7 + $0xc0] sm:$0xff]   ;;  %v12479_v3 = vld [vmem:[#allocation7 + $0xc8] sm:$0xff]   ;;  %vm349_vm1 = vcmask 1040384  }
  0x89   : > { %342 = vst [vmem:[#allocation2] sm:$0xf] %v12993_v0  ;;  %343 = vst [vmem:[#allocation2 + $0x4] sm:$0xf] %v12993_v0  ;;  %v12478_v2 = vld [vmem:[#allocation7 + $0x80] sm:$0xff]   ;;  %11139 = vmatprep.subr.bf16.mxu0 %v12477_v1  ;;  %v12480_v4 = vld [vmem:[#allocation7 + $0x88] sm:$0xff]  }
  0x8a   : > { %344 = vst [vmem:[#allocation2 + $0x8] sm:$0x1] %v12993_v0  ;;  %346 = vst [vmem:[#allocation2 + $0xcc] sm:$0xf] %v12993_v0  ;;  %11140 = vmatpush3.bf16.msra.mxu0 %v12478_v2  ;;  %v12481_v5 = vld [vmem:[#allocation7 + $0xd0] sm:$0xff]   ;;  %v12483_v7 = vld [vmem:[#allocation7 + $0xd8] sm:$0xff]  }
  0x8b   : > { %347 = vst [vmem:[#allocation2 + $0xd0] sm:$0xf] %v12993_v0  ;;  %348 = vst [vmem:[#allocation2 + $0xd4] sm:$0x1] %v12993_v0  ;;  %11141 = vmatprep.subr.bf16.mxu0 %v12479_v3  ;;  %vm350_vm0 = vsmask.f32 256 }
  0x8c   : > { %462 = vst [vmem:[#allocation3] sm:$0xf] %v12993_v0  ;;  %463 = vst [vmem:[#allocation3 + $0x4] sm:$0xf] %v12993_v0  ;;  %v12482_v6 = vld [vmem:[#allocation7 + $0x90] sm:$0xff]   ;;  %v17277_v8 = vmov 0 }
  0x8d   : > { %464 = vst [vmem:[#allocation3 + $0x8] sm:$0x1] %v12993_v0  ;;  %466 = vst [vmem:[#allocation3 + $0xcc] sm:$0xf] %v12993_v0  ;;  %vm406_vm3 = vsmask.f32 7938 }
  0x8e   : > { %467 = vst [vmem:[#allocation3 + $0xd0] sm:$0xf] %v12993_v0  ;;  %468 = vst [vmem:[#allocation3 + $0xd4] sm:$0x1] %v12993_v0  ;;  %11142 = vmatpush3.bf16.msra.mxu0 %v12480_v4  ;;  %v12484_v9 = vld [vmem:[#allocation7 + $0x98] sm:$0xff]   ;;  %v12485_v10 = vld [vmem:[#allocation7 + $0xe0] sm:$0xff]  }
  0x8f   : > { %11143 = vmatprep.subr.bf16.mxu0 %v12481_v5  ;;  %vm13263_vm2 = vmand %vm349_vm1, %vm350_vm0  ;;  %v17280_v11 = vmov 0  ;;  %vm609_vm5 = vsmask.f32 4368  ;;  %v12486_v12 = vld [vmem:[#allocation7 + $0xa0] sm:$0xff]   ;;  %v12487_v13 = vld [vmem:[#allocation7 + $0xe8] sm:$0xff]   ;;  %vm932_vm6 = vcmask 1043456  }
  0x90   : > { %v17278_v8 = vsel %vm13263_vm2, 4294967295, %v17277_v8  ;;  %vm13268_vm4 = vmand %vm349_vm1, %vm406_vm3  ;;  %v355_v14 = vld [vmem:[#allocation2 + $0xc] sm:$0x1]  ;;  %v411_v15 = vld [vmem:[#allocation2 + $0x14] sm:$0x1]  ;;  %vm1721_vm7 = vcmask 1042432  }
  0x91   : > { %17279 = vst [vmem:[#allocation18_spill] sm:$0xff] %v17278_v8  ;;  %v17281_v11 = vsel %vm13268_vm4, 4294967295, %v17280_v11  ;;  %v577_v16 = vld [vmem:[%s13248_s8] sm:$0xf]  ;;  %vm1722_vm8 = vcmask 1046532   ;;  %v12488_v17 = vld [vmem:[#allocation7 + $0xa8] sm:$0xff]   ;;  %vm13280_vm9 = vmor %vm350_vm0, %vm609_vm5 }
  0x92   : > { %11144 = vmatpush3.bf16.msra.mxu0 %v12482_v6  ;;  %17282 = vst [vmem:[#allocation19_spill] sm:$0xff] %v17281_v11  ;;  %v356_v18 = vsel %vm13263_vm2, 0, %v355_v14  ;;  %v412_v19 = vsel %vm13268_vm4, 0, %v411_v15  ;;  %v578_v20 = vld [vmem:[%s13248_s8 + $0x4] sm:$0xf]  ;;  %v612_v21 = vshrl.u32 %v577_v16, 16  ;;  %vm13290_vm10 = vmand %vm932_vm6, %vm406_vm3 }
  0x93   : > { %11145 = vmatprep.subr.bf16.mxu0 %v12483_v7  ;;  %v615_v22 = vshll.u32 %v577_v16, 16  ;;  %v12489_v23 = vld [vmem:[#allocation7 + $0xf0] sm:$0xff]   ;;  %357 = vst [vmem:[#allocation2 + $0xc] sm:$0x1] %v356_v18  ;;  %413 = vst [vmem:[#allocation2 + $0x14] sm:$0x1] %v412_v19 }
  0x94   : > { %v620_v24 = vshrl.u32 %v578_v20, 16  ;;  %v623_v25 = vshll.u32 %v578_v20, 16  ;;  %v352_v26 = vld [vmem:[#allocation2] sm:$0x1]  ;;  %v408_v27 = vld [vmem:[#allocation2 + $0x8] sm:$0x1]  ;;  %vm13316_vm11 = vmor %vm1721_vm7, %vm1722_vm8 }
  0x95   : > { %v17283_v28 = vmov 0  ;;  %v614_v29 = vrot.slane %v612_v21, 7  ;;  %v353_v30 = vsel %vm13263_vm2, 0, %v352_v26  ;;  %v409_v31 = vsel %vm13268_vm4, 0, %v408_v27  ;;  %v1047_v32 = vld [vmem:[#allocation2 + $0x4] sm:$0xf] }
  0x96   : > { %11146 = vmatpush3.bf16.msra.mxu0 %v12484_v9  ;;  %v17284_v28 = vsel %vm13280_vm9, 4294967295, %v17283_v28  ;;  %v12494_v33 = vld [vmem:[#allocation7 + $0x40] sm:$0xff]   ;;  %v622_v34 = vrot.slane %v620_v24, 7  ;;  %v17286_v35 = vmov 0  ;;  %354 = vst [vmem:[#allocation2] sm:$0x1] %v353_v30 }
  0x97   : > { %11147 = vmatprep.subr.bf16.mxu0 %v12485_v10  ;;  %17285 = vst [vmem:[#allocation20_spill] sm:$0xff] %v17284_v28  ;;  %v17287_v35 = vsel %vm13290_vm10, 4294967295, %v17286_v35  ;;  %410 = vst [vmem:[#allocation2 + $0x8] sm:$0x1] %v409_v31  ;;  %v1673_v36 = vld [vmem:[#allocation2] sm:$0xe]  ;;  %12251 = vmatprep.subr.bf16.mxu1 %v12494_v33  ;;  %v617_v41 = vor.u32 %v615_v22, %v614_v29 }
  0x98   : > { %17288 = vst [vmem:[#allocation21_spill] sm:$0xff] %v17287_v35  ;;  %v1726_v37 = vrot.slane %v1047_v32, 5  ;;  %v12490_v38 = vld [vmem:[#allocation7 + $0xb0] sm:$0xff]   ;;  %v618_v39 = vrot.slane %v614_v29, 4  ;;  %v12491_v40 = vld [vmem:[#allocation7 + $0xf8] sm:$0xff]   ;;  %v625_v42 = vor.u32 %v623_v25, %v622_v34  ;;  %v627_v43 = vrot.slane %v622_v34, 4 }
  0x99   : > { %v10386_v44 = vrot.slane %v1673_v36, 9  ;;  %v13294_v45 = vld [vmem:[#allocation7] sm:$0xff]   ;;  %v13296_v46 = vld [vmem:[#allocation7 + $0x48] sm:$0xff]   ;;  %v12492_v51 = vld [vmem:[#allocation7 + $0xb8] sm:$0xff]   ;;  %vm1094_vm12 = vsmask.f32 3328 }
  0x9a   : > { %11148 = vmatpush3.bf16.msra.mxu0 %v12486_v12  ;;  %v626_v47 = vsel %vm13280_vm9, %v618_v39, %v625_v42  ;;  %v1728_v48 = vrot.slane %v1726_v37, 4  ;;  %12259 = vmatpush3.bf16.msra.mxu1 %v13294_v45  ;;  %v13301_v49 = vld [vmem:[#allocation7 + $0x8] sm:$0xff]   ;;  %v934_v52 = vld [vmem:[#allocation2 + $0xc] sm:$0xf]  ;;  %v938_v53 = vld [vmem:[#allocation2 + $0x14] sm:$0x1] }
  0x9b   : > { %11149 = vmatprep.subr.bf16.mxu0 %v12487_v13  ;;  %v358_v50 = vld [vmem:[#allocation2 + $0x18] sm:$0x1]  ;;  %937 = vst [vmem:[#allocation2 + $0x10] sm:$0xf] %v626_v47  ;;  %12252 = vmatprep.subr.bf16.mxu1 %v13296_v46  ;;  %v13306_v55 = vld [vmem:[#allocation7 + $0x50] sm:$0xff]   ;;  %v935_v56 = vsel %vm13290_vm10, %v617_v41, %v934_v52  ;;  %v939_v57 = vsel %vm13263_vm2, %v627_v43, %v938_v53  ;;  %v13330_v9 = vld [vmem:[#allocation7 + $0x58] sm:$0xff]  }
  0x9c   : > { %v359_v54 = vsel %vm13263_vm2, 0, %v358_v50  ;;  %v579_v58 = vld [vmem:[%s13248_s8 + $0x8] sm:$0xf]  ;;  %v580_v59 = vld [vmem:[%s13248_s8 + $0xc] sm:$0xf]  ;;  %v13321_v3 = vld [vmem:[#allocation7 + $0x10] sm:$0xff]   ;;  %v1727_v6 = vsel %vm13316_vm11, %v10386_v44, %v1726_v37 }
  0x9d   : > { %360 = vst [vmem:[#allocation2 + $0x18] sm:$0x1] %v359_v54  ;;  %936 = vst [vmem:[#allocation2 + $0xc] sm:$0xf] %v935_v56  ;;  %v629_v62 = vshrl.u32 %v579_v58, 16  ;;  %v632_v63 = vshll.u32 %v579_v58, 16 }
  0x9e   : > { %11150 = vmatpush3.bf16.msra.mxu0 %v12488_v17  ;;  %940 = vst [vmem:[#allocation2 + $0x14] sm:$0x1] %v939_v57  ;;  %v1078_v60 = vld [vmem:[#allocation2 + $0x8] sm:$0x1]  ;;  %v637_v0 = vshrl.u32 %v580_v59, 16  ;;  %v640_v1 = vshll.u32 %v580_v59, 16  ;;  %12260 = vmatpush3.bf16.msra.mxu1 %v13301_v49 }
  0x9f   : > { %11151 = vmatprep.subr.bf16.mxu0 %v12489_v23  ;;  %v1729_v2 = vrot.slane %v1078_v60, 5  ;;  %v631_v4 = vrot.slane %v629_v62, 7  ;;  %12253 = vmatprep.subr.bf16.mxu1 %v13306_v55  ;;  %v361_v14 = vld [vmem:[#allocation2 + $0x24] sm:$0x1]  ;;  %v13334_v16 = vld [vmem:[#allocation7 + $0x18] sm:$0xff]   ;;  %v13342_v23 = vld [vmem:[#allocation7 + $0x60] sm:$0xff]  }
  0xa0   : > { %v13323_v5 = vrot.slane %v637_v0, 7  ;;  %v362_v17 = vsel %vm13263_vm2, 0, %v361_v14  ;;  %v581_v22 = vld [vmem:[%s13248_s8 + $0x10] sm:$0xf]  ;;  %v582_v32 = vld [vmem:[%s13248_s8 + $0x14] sm:$0xf] }
  0xa1   : > { %v1730_v7 = vsel %vm13316_vm11, %v1728_v48, %v1729_v2  ;;  %v634_v10 = vor.u32 %v632_v63, %v631_v4  ;;  %v635_v12 = vrot.slane %v631_v4, 4  ;;  %363 = vst [vmem:[#allocation2 + $0x24] sm:$0x1] %v362_v17  ;;  %v646_v27 = vshrl.u32 %v581_v22, 16  ;;  %v13359_v48 = vld [vmem:[#allocation7 + $0x20] sm:$0xff]   ;;  %v13362_v52 = vld [vmem:[#allocation7 + $0x68] sm:$0xff]  }
  0xa2   : > { %11152 = vmatpush3.bf16.msra.mxu0 %v12490_v38  ;;  %v642_v13 = vor.u32 %v640_v1, %v13323_v5  ;;  %v1049_v15 = vld [vmem:[#allocation2 + $0x10] sm:$0xf]  ;;  %12261 = vmatpush3.bf16.msra.mxu1 %v13321_v3  ;;  %v10402_v18 = vcombine.low %v1727_v6, %v1730_v7  ;;  %v649_v36 = vshll.u32 %v581_v22, 16  ;;  %v654_v37 = vshrl.u32 %v582_v32, 16  ;;  %v414_v38 = vld [vmem:[#allocation2 + $0x20] sm:$0x1] }
  0xa3   : > { %11153 = vmatprep.subr.bf16.mxu0 %v12491_v40  ;;  %v1733_v21 = vrot.slane %v1049_v15, 5  ;;  %12254 = vmatprep.subr.bf16.mxu1 %v13330_v9  ;;  %v648_v34 = vrot.slane %v646_v27, 7  ;;  %v657_v40 = vshll.u32 %v582_v32, 16  ;;  %v415_v41 = vsel %vm13268_vm4, 0, %v414_v38  ;;  %v13372_v57 = vld [vmem:[#allocation7 + $0x28] sm:$0xff]   ;;  %v13390_v15 = vld [vmem:[#allocation7 + $0x30] sm:$0xff]  }
  0xa4   : > { %v643_v19 = vsel %vm13280_vm9, %v635_v12, %v642_v13  ;;  %v941_v20 = vld [vmem:[#allocation2 + $0x18] sm:$0xf]  ;;  %v12493_v24 = vld [vmem:[#allocation2 + $0xc] sm:$0xff]   ;;  %v13356_v47 = vrot.slane %v654_v37, 7  ;;  %416 = vst [vmem:[#allocation2 + $0x20] sm:$0x1] %v415_v41 }
  0xa5   : > { %v942_v25 = vsel %vm13290_vm10, %v634_v10, %v941_v20  ;;  %944 = vst [vmem:[#allocation2 + $0x1c] sm:$0xf] %v643_v19  ;;  %v1079_v26 = vld [vmem:[#allocation2 + $0x14] sm:$0x1]  ;;  %v1674_v29 = vld [vmem:[#allocation2 + $0xc] sm:$0xe]  ;;  %2188 = vmatprep.mubr.bf16.mxu0 %v12493_v24  ;;  %v651_v43 = vor.u32 %v649_v36, %v648_v34 }
  0xa6   : > { %11154 = vmatpush3.bf16.msra.mxu0 %v12492_v51  ;;  %943 = vst [vmem:[#allocation2 + $0x18] sm:$0xf] %v942_v25  ;;  %v1735_v30 = vrot.slane %v1733_v21, 4  ;;  %v1736_v31 = vrot.slane %v1079_v26, 5  ;;  %12262 = vmatpush3.bf16.msra.mxu1 %v13334_v16  ;;  %v652_v44 = vrot.slane %v648_v34, 4  ;;  %v659_v50 = vor.u32 %v657_v40, %v13356_v47  ;;  %v13387_v13 = vld [vmem:[#allocation7 + $0x70] sm:$0xff]  }
  0xa7   : > { %11251 = vmatprep.subr.bf16.mxu0 %v12494_v33  ;;  %v10387_v33 = vrot.slane %v1674_v29, 9  ;;  %12255 = vmatprep.subr.bf16.mxu1 %v13342_v23  ;;  %v644_v54 = vrot.slane %v13323_v5, 4  ;;  %v364_v58 = vld [vmem:[#allocation2 + $0x30] sm:$0x1]  ;;  %v583_v59 = vld [vmem:[%s13248_s8 + $0x18] sm:$0xf] }
  0xa8   : > { %v1737_v39 = vsel %vm13316_vm11, %v1735_v30, %v1736_v31  ;;  %v948_v51 = vld [vmem:[#allocation2 + $0x24] sm:$0xf]  ;;  %v365_v62 = vsel %vm13263_vm2, 0, %v364_v58  ;;  %v584_v63 = vld [vmem:[%s13248_s8 + $0x1c] sm:$0xf]  ;;  %v663_v0 = vshrl.u32 %v583_v59, 16 }
  0xa9   : > { %2189 = vmatmul.mubr.bf16.vlgmr.msra.gmra.mrb[0].mxu0 %v10402_v18  ;;  %v1734_v42 = vsel %vm13316_vm11, %v10387_v33, %v1733_v21  ;;  %v666_v1 = vshll.u32 %v583_v59, 16  ;;  %366 = vst [vmem:[#allocation2 + $0x30] sm:$0x1] %v365_v62  ;;  %v671_v4 = vshrl.u32 %v584_v63, 16  ;;  %v674_v5 = vshll.u32 %v584_v63, 16  ;;  %v13394_v20 = vld [vmem:[#allocation7 + $0x78] sm:$0xff]  }
  0xaa   : > { %11252 = vmatpush3.bf16.msra.mxu0 %v13294_v45  ;;  %v10403_v53 = vcombine.low %v1734_v42, %v1737_v39  ;;  %v949_v45 = vsel %vm13290_vm10, %v651_v43, %v948_v51  ;;  %12263 = vmatpush3.bf16.msra.mxu1 %v13359_v48  ;;  %v417_v6 = vld [vmem:[#allocation2 + $0x2c] sm:$0x1]  ;;  %v665_v7 = vrot.slane %v663_v0, 7  ;;  %v367_v27 = vld [vmem:[#allocation2 + $0x3c] sm:$0x1]  ;;  %s17096_s21 = scalar_lea.vmem [#allocation12], %s10349_s23 }
  0xab   : > { %11253 = vmatprep.subr.bf16.mxu0 %v13296_v46  ;;  %v660_v46 = vsel %vm13280_vm9, %v652_v44, %v659_v50  ;;  %950 = vst [vmem:[#allocation2 + $0x24] sm:$0xf] %v949_v45  ;;  %12256 = vmatprep.subr.bf16.mxu1 %v13362_v52  ;;  %v945_v2 = vld [vmem:[#allocation2 + $0x20] sm:$0x1]  ;;  %v418_v10 = vsel %vm13268_vm4, 0, %v417_v6  ;;  %v13385_v12 = vrot.slane %v671_v4, 7 }
  0xac   : > { %951 = vst [vmem:[#allocation2 + $0x28] sm:$0xf] %v660_v46  ;;  %v1051_v60 = vld [vmem:[#allocation2 + $0x1c] sm:$0xf]  ;;  %419 = vst [vmem:[#allocation2 + $0x2c] sm:$0x1] %v418_v10  ;;  %v668_v18 = vor.u32 %v666_v1, %v665_v7 }
  0xad   : > { %v12498_v56 = vld [vmem:[#allocation2 + $0x18] sm:$0xff]   ;;  %v669_v14 = vrot.slane %v665_v7, 4  ;;  %v1740_v17 = vrot.slane %v1051_v60, 5  ;;  %v676_v19 = vor.u32 %v674_v5, %v13385_v12  ;;  %v13404_v25 = vld [vmem:[#allocation7 + $0x38] sm:$0xff]   ;;  %v585_v29 = vld [vmem:[%s13248_s8 + $0x20] sm:$0xf] }
  0xae   : > { %11254 = vmatpush3.bf16.msra.mxu0 %v13301_v49  ;;  %2196 = vmatprep.mubr.bf16.mxu0 %v12498_v56  ;;  %v1675_v49 = vld [vmem:[#allocation2 + $0x18] sm:$0xe]  ;;  %v368_v31 = vsel %vm13263_vm2, 0, %v367_v27  ;;  %v586_v32 = vld [vmem:[%s13248_s8 + $0x24] sm:$0xf]  ;;  %v680_v37 = vshrl.u32 %v585_v29, 16 }
  0xaf   : > { %11255 = vmatprep.subr.bf16.mxu0 %v13306_v55  ;;  %12264 = vmatpush3.bf16.msra.mxu1 %v13372_v57  ;;  %v946_v55 = vsel %vm13263_vm2, %v644_v54, %v945_v2  ;;  %v10388_v21 = vrot.slane %v1675_v49, 9  ;;  %v677_v22 = vsel %vm13280_vm9, %v669_v14, %v676_v19  ;;  %v1742_v30 = vrot.slane %v1740_v17, 4  ;;  %v420_v33 = vld [vmem:[#allocation2 + $0x38] sm:$0x1]  ;;  %369 = vst [vmem:[#allocation2 + $0x3c] sm:$0x1] %v368_v31 }
  0xb0   : > { %947 = vst [vmem:[#allocation2 + $0x20] sm:$0x1] %v946_v55  ;;  %12257 = vmatprep.subr.bf16.mxu1 %v13387_v13  ;;  %v955_v26 = vld [vmem:[#allocation2 + $0x30] sm:$0xf]  ;;  %958 = vst [vmem:[#allocation2 + $0x34] sm:$0xf] %v677_v22 }
  0xb1   : > { %2197 = vmatmul.mubr.bf16.gmra.mrb[4].mxu0 %v10403_v53  ;;  %v1741_v36 = vsel %vm13316_vm11, %v10388_v21, %v1740_v17  ;;  %v683_v38 = vshll.u32 %v585_v29, 16  ;;  %v688_v42 = vshrl.u32 %v586_v32, 16  ;;  %v691_v43 = vshll.u32 %v586_v32, 16  ;;  %v370_v44 = vld [vmem:[#allocation2 + $0x48] sm:$0x1]  ;;  %s11043_s16 = sshll.u32 %s13058_s28, 11 }
  0xb2   : > { %11256 = vmatpush3.bf16.msra.mxu0 %v13321_v3  ;;  %v1676_v41 = vld [vmem:[#allocation2 + $0x24] sm:$0xe]  ;;  %v682_v50 = vrot.slane %v680_v37, 7  ;;  %v421_v51 = vsel %vm13268_vm4, 0, %v420_v33  ;;  %v587_v53 = vld [vmem:[%s13248_s8 + $0x28] sm:$0xf] }
  0xb3   : > { %11257 = vmatprep.subr.bf16.mxu0 %v13330_v9  ;;  %v12503_v3 = vld [vmem:[#allocation2 + $0x24] sm:$0xff]   ;;  %12265 = vmatpush3.bf16.msra.mxu1 %v13390_v15  ;;  %v661_v9 = vrot.slane %v13356_v47, 4  ;;  %v13428_v54 = vrot.slane %v688_v42, 7  ;;  %422 = vst [vmem:[#allocation2 + $0x38] sm:$0x1] %v421_v51  ;;  %v700_v46 = vshll.u32 %v587_v53, 16 }
  0xb4   : > { %v13401_v24 = vld [vmem:[#allocation2 + $0x28] sm:$0xf]  ;;  %12258 = vmatprep.subr.bf16.mxu1 %v13394_v20  ;;  %2204 = vmatprep.mubr.bf16.mxu0 %v12503_v3  ;;  %v588_v56 = vld [vmem:[%s13248_s8 + $0x2c] sm:$0xf]  ;;  %v685_v59 = vor.u32 %v683_v38, %v682_v50  ;;  %v686_v60 = vrot.slane %v682_v50, 4  ;;  %v678_v2 = vrot.slane %v13385_v12, 4 }
  0xb5   : > { %v1747_v47 = vrot.slane %v13401_v24, 5  ;;  %v705_v62 = vshrl.u32 %v588_v56, 16  ;;  %v693_v63 = vor.u32 %v691_v43, %v13428_v54  ;;  %v10389_v49 = vrot.slane %v1676_v41, 9  ;;  %v423_v12 = vld [vmem:[#allocation2 + $0x44] sm:$0x1]  ;;  %s10237_s29 = sshll.u32 %s17096_s21, 4  ;;  %s17193_s29 = int_to_ptr.vmem [resolvable:$true] %s10237_s29 }
  0xb6   : > { %11258 = vmatpush3.bf16.msra.mxu0 %v13334_v16  ;;  %v956_v16 = vsel %vm13290_vm10, %v668_v18, %v955_v26  ;;  %v962_v55 = vld [vmem:[#allocation2 + $0x3c] sm:$0xf]  ;;  %v373_v22 = vld [vmem:[#allocation2 + $0x54] sm:$0x1]  ;;  %vm1095_vm13 = vsmask.f32 7440 }
  0xb7   : > { %11259 = vmatprep.subr.bf16.mxu0 %v13342_v23  ;;  %v1080_v34 = vld [vmem:[#allocation2 + $0x20] sm:$0x1]  ;;  %957 = vst [vmem:[#allocation2 + $0x30] sm:$0xf] %v956_v16  ;;  %v952_v23 = vld [vmem:[#allocation2 + $0x2c] sm:$0x1]  ;;  %12266 = vmatpush3.bf16.msra.mxu1 %v13404_v25  ;;  %v694_v6 = vsel %vm13280_vm9, %v686_v60, %v693_v63  ;;  %v963_v10 = vsel %vm13290_vm10, %v685_v59, %v962_v55  ;;  %vm13484_vm14 = vmor %vm1094_vm12, %vm1095_vm13 }
  0xb8   : > { %v1743_v39 = vrot.slane %v1080_v34, 5  ;;  %v953_v40 = vsel %vm13263_vm2, %v661_v9, %v952_v23  ;;  %v13433_v0 = vld [vmem:[#allocation2 + $0x34] sm:$0xf]  ;;  %v1749_v7 = vrot.slane %v1747_v47, 4  ;;  %965 = vst [vmem:[#allocation2 + $0x40] sm:$0xf] %v694_v6  ;;  %v1748_v24 = vsel %vm13316_vm11, %v10389_v49, %v1747_v47 }
  0xb9   : > { %954 = vst [vmem:[#allocation2 + $0x2c] sm:$0x1] %v953_v40  ;;  %v1203_v4 = vshll.u32 %v13433_v0, 16  ;;  %v13445_v17 = vrot.slane %v705_v62, 7  ;;  %964 = vst [vmem:[#allocation2 + $0x3c] sm:$0xf] %v963_v10 }
  0xba   : > { %11260 = vmatpush3.bf16.msra.mxu0 %v13359_v48  ;;  %v371_v48 = vsel %vm13263_vm2, 0, %v370_v44  ;;  %v1744_v45 = vsel %vm13316_vm11, %v1742_v30, %v1743_v39  ;;  %v959_v27 = vld [vmem:[#allocation2 + $0x38] sm:$0x1]  ;;  %v424_v39 = vsel %vm13268_vm4, 0, %v423_v12  ;;  %v1754_v41 = vrot.slane %v13433_v0, 5  ;;  %s10224_s28 = scalar_lea.sflag [#allocation6], %s13242_s17 }
  0xbb   : > { %11261 = vmatprep.subr.bf16.mxu0 %v13362_v52  ;;  %372 = vst [vmem:[#allocation2 + $0x48] sm:$0x1] %v371_v48  ;;  %v697_v52 = vshrl.u32 %v587_v53, 16  ;;  %v10404_v58 = vcombine.low %v1741_v36, %v1744_v45  ;;  %v13450_v21 = vrot.slane %v1203_v4, 5  ;;  %v960_v30 = vsel %vm13263_vm2, %v678_v2, %v959_v27  ;;  %v589_v36 = vld [vmem:[%s13248_s8 + $0x30] sm:$0xf] }
  0xbc   : > { %961 = vst [vmem:[#allocation2 + $0x38] sm:$0x1] %v960_v30  ;;  %425 = vst [vmem:[#allocation2 + $0x44] sm:$0x1] %v424_v39  ;;  %v374_v43 = vsel %vm13263_vm2, 0, %v373_v22  ;;  %v714_v50 = vshrl.u32 %v589_v36, 16 }
  0xbd   : > { %v699_v1 = vrot.slane %v697_v52, 7  ;;  %2205 = vmatmul.mubr.bf16.gmra.mrb[8].mxu0 %v10404_v58  ;;  %375 = vst [vmem:[#allocation2 + $0x54] sm:$0x1] %v374_v43  ;;  %v717_v51 = vshll.u32 %v589_v36, 16  ;;  %v695_v59 = vrot.slane %v13428_v54, 4  ;;  %v1756_v62 = vrot.slane %v1754_v41, 4 }
  0xbe   : > { %11262 = vmatpush3.bf16.msra.mxu0 %v13372_v57  ;;  %v12508_v5 = vld [vmem:[#allocation2 + $0x30] sm:$0xff]   ;;  %v1207_v57 = vshrl.u32 %v13433_v0, 16  ;;  %v716_v6 = vrot.slane %v714_v50, 7  ;;  %s12911_s30 = scalar_lea.vmem %s17193_s29, 2048  ;;  %s12994_s9 = smov [#allocation12]  }
  0xbf   : > { %11263 = vmatprep.subr.bf16.mxu0 %v13387_v13  ;;  %v13443_v14 = vld [vmem:[#allocation2 + $0x30] sm:$0xf]  ;;  %v702_v13 = vor.u32 %v700_v46, %v699_v1  ;;  %2212 = vmatprep.mubr.bf16.mxu0 %v12508_v5  ;;  %v703_v9 = vrot.slane %v699_v1, 4  ;;  %v13473_v47 = vld [vmem:[#allocation2 + $0x40] sm:$0xf]  ;;  %p12912_p10 = scmp.ne.s32.totalorder %s17193_s29, %s12911_s30  ;;  %s12915_s13 = sshll.u32 %s12994_s9, 4  ;;  %s12916_s13 = int_to_ptr.vmem [resolvable:$false] %s12915_s13 }
  0xc0   : > { %v1081_v18 = vld [vmem:[#allocation2 + $0x2c] sm:$0x1]  ;;  %v1194_v19 = vshrl.u32 %v13443_v14, 16  ;;  %v1197_v3 = vshll.u32 %v13443_v14, 16  ;;  %v1209_v32 = vrot.slane %v1207_v57, 4  ;;  %v12513_v48 = vld [vmem:[#allocation2 + $0x3c] sm:$0xff]   ;;  %v10358_v63 = vcombine.low %v13443_v14, %v13433_v0  ;;  %p12918_p12 = scmp.lt.s32.totalorder %s17193_s29, %s12916_s13 }
  0xc1   : > { %v1750_v26 = vrot.slane %v1081_v18, 5  ;;  %v1677_v33 = vld [vmem:[#allocation2 + $0x30] sm:$0xe]  ;;  %v13475_v53 = vld [vmem:[#allocation2 + $0x3c] sm:$0xf]  ;;  %v1227_v45 = vshll.u32 %v13473_v47, 16  ;;  %p12913_p3 = pnand %p12912_p10, %p13191_p5 }
  0xc2   : > { %11264 = vmatpush3.bf16.msra.mxu0 %v13390_v15  ;;  %v708_v15 = vshll.u32 %v588_v56, 16  ;;  %v969_v29 = vld [vmem:[#allocation2 + $0x48] sm:$0xf]  ;;  %v1196_v16 = vrot.slane %v1194_v19, 4  ;;  %v1199_v31 = vrot.slane %v1197_v3, 5  ;;  %v10390_v40 = vrot.slane %v1677_v33, 9 }
  0xc3   : > { %11265 = vmatprep.subr.bf16.mxu0 %v13394_v20  ;;  %v1751_v34 = vsel %vm13316_vm11, %v1749_v7, %v1750_v26  ;;  %v970_v38 = vsel %vm13290_vm10, %v702_v13, %v969_v29  ;;  %v1210_v44 = vor.u32 %v1209_v32, %v13450_v21  ;;  %v1218_v52 = vshrl.u32 %v13475_v53, 16  ;;  %v13490_v1 = vld [vmem:[#allocation2 + $0x3c] sm:$0xe]  ;;  %v1082_v49 = vld [vmem:[#allocation2 + $0x38] sm:$0x1]  ;;  %p12914_p7 = pneg %p12913_p3  ;;  %s12917_s15 = scalar_lea.vmem %s12916_s13, 4096 }
  0xc4   : > { %v710_v20 = vor.u32 %v708_v15, %v13445_v17  ;;  %v10405_v23 = vcombine.low %v1748_v24, %v1751_v34  ;;  %v1200_v37 = vor.u32 %v1199_v31, %v1196_v16  ;;  %971 = vst [vmem:[#allocation2 + $0x48] sm:$0xf] %v970_v38  ;;  %v1221_v46 = vshll.u32 %v13475_v53, 16  ;;  %v426_v13 = vld [vmem:[#allocation2 + $0x50] sm:$0x1]  ;;  %p12919_p1 = scmp.lt.s32.totalorder %s12917_s15, %s12911_s30 }
  0xc5   : > { %v1231_v58 = vshrl.u32 %v13473_v47, 16  ;;  %v1211_v4 = vrot.slane %v1210_v44, 4  ;;  %v1755_v5 = vsel %vm13316_vm11, %v10390_v40, %v1754_v41  ;;  %v13494_v54 = vrot.slane %v1227_v45, 5  ;;  %v966_v14 = vld [vmem:[#allocation2 + $0x44] sm:$0x1]  ;;  %v12538_v16 = vld [vmem:[#allocation7 + $0x140] sm:$0xff]  }
  0xc6   : > { %11266 = vmatpush3.bf16.msra.mxu0 %v13404_v25  ;;  %v711_v42 = vsel %vm13280_vm9, %v703_v9, %v710_v20  ;;  %v590_v25 = vld [vmem:[%s13248_s8 + $0x34] sm:$0xf]  ;;  %v1201_v56 = vrot.slane %v1200_v37, 4  ;;  %v1213_v55 = vshll.u32 %v1082_v49, 16  ;;  %v1757_v57 = vrot.slane %v1082_v49, 5  ;;  %v12540_v49 = vld [vmem:[#allocation7 + $0x1c0] sm:$0xff]   ;;  %p12920_p2 = por %p12919_p1, %p12918_p12 }
  0xc7   : > { %2213 = vmatmul.mubr.bf16.gmra.mrb[12].mxu0 %v10405_v23  ;;  %972 = vst [vmem:[#allocation2 + $0x4c] sm:$0xf] %v711_v42  ;;  %v722_v2 = vshrl.u32 %v590_v25, 16  ;;  %v1220_v7 = vrot.slane %v1218_v52, 4  ;;  %v1223_v10 = vrot.slane %v1221_v46, 5  ;;  %v1233_v12 = vrot.slane %v1231_v58, 4  ;;  %11363 = vmatprep.subr.bf16.mxu0 %v12538_v16 }
  0xc8   : > { %2220 = vmatprep.mubr.bf16.mxu0 %v12513_v48  ;;  %v1206_v0 = vsel %vm13484_vm14, %v1201_v56, %v13450_v21  ;;  %v10391_v18 = vrot.slane %v13490_v1, 9  ;;  %v719_v19 = vor.u32 %v717_v51, %v716_v6  ;;  %v1215_v3 = vrot.slane %v1213_v55, 5  ;;  %v976_v30 = vld [vmem:[#allocation2 + $0x54] sm:$0xf]  ;;  %v376_v40 = vld [vmem:[#allocation2 + $0x60] sm:$0x1]  ;;  %11475 = vmatprep.subr.bf16.mxu1 %v12540_v49  ;;  %p12921_p4 = pnand %p12920_p2, %p12914_p7 }
  0xc9   : > { %v1758_v9 = vsel %vm13316_vm11, %v1756_v62, %v1757_v57  ;;  %v967_v24 = vsel %vm13263_vm2, %v695_v59, %v966_v14  ;;  %v13504_v26 = vrot.slane %v722_v2, 7  ;;  %v1761_v15 = vrot.slane %v13473_v47, 5  ;;  %v592_v48 = vld [vmem:[%s13248_s8 + $0x3c] sm:$0xf]  ;;  %v429_v58 = vld [vmem:[#allocation2 + $0x5c] sm:$0x1] }
  0xca   : > { %v10406_v27 = vcombine.low %v1755_v5, %v1758_v9  ;;  %968 = vst [vmem:[#allocation2 + $0x44] sm:$0x1] %v967_v24  ;;  %v720_v21 = vrot.slane %v716_v6, 4  ;;  %v725_v29 = vshll.u32 %v590_v25, 16  ;;  %v1216_v31 = vsel %vm13484_vm14, %v1211_v4, %v1215_v3  ;;  %v591_v25 = vld [vmem:[%s13248_s8 + $0x38] sm:$0xf] }
  0xcb   : > { %v1224_v32 = vor.u32 %v1223_v10, %v1220_v7  ;;  %v977_v33 = vsel %vm13290_vm10, %v719_v19, %v976_v30  ;;  %v427_v34 = vsel %vm13268_vm4, 0, %v426_v13  ;;  %v13513_v20 = vld [vmem:[#allocation2 + $0x48] sm:$0xf]  ;;  %v10374_v23 = vcombine.low %v1206_v0, %v1216_v31  ;;  %v14845_v8 = vld [vmem:[#allocation2 + $0x3c] sm:$0xe] }
  0xcc   : > { %v1234_v37 = vor.u32 %v1233_v12, %v13494_v54  ;;  %v727_v38 = vor.u32 %v725_v29, %v13504_v26  ;;  %978 = vst [vmem:[#allocation2 + $0x54] sm:$0xf] %v977_v33  ;;  %428 = vst [vmem:[#allocation2 + $0x50] sm:$0x1] %v427_v34  ;;  %v1242_v39 = vshrl.u32 %v13513_v20, 16  ;;  %v1245_v41 = vshll.u32 %v13513_v20, 16 }
  0xcd   : > { %2477 = vmatprep.mubr.bf16.mxu1 %v10374_v23  ;;  %v712_v44 = vrot.slane %v13445_v17, 4  ;;  %v1763_v50 = vrot.slane %v1761_v15, 4  ;;  %v1225_v45 = vrot.slane %v1224_v32, 4  ;;  %v377_v46 = vsel %vm13263_vm2, 0, %v376_v40  ;;  %v13532_v1 = vld [vmem:[#allocation2 + $0x48] sm:$0xe] }
  0xce   : > { %v12515_v22 = vld [vmem:[#allocation2 + $0x48] sm:$0xff]   ;;  %v728_v51 = vsel %vm13280_vm9, %v720_v21, %v727_v38  ;;  %2478 = vmatmul.mubr.bf16.vlgmr.msra.gmra.mrb[0].mxu1 %v10358_v63  ;;  %v1244_v56 = vrot.slane %v1242_v39, 4  ;;  %v1247_v52 = vrot.slane %v1245_v41, 5  ;;  %v1235_v59 = vrot.slane %v1234_v37, 4  ;;  %378 = vst [vmem:[#allocation2 + $0x60] sm:$0x1] %v377_v46 }
  0xcf   : > { %v13515_v36 = vld [vmem:[#allocation2 + $0x4c] sm:$0xf]  ;;  %2221 = vmatmul.mubr.bf16.gmra.mrb[16].mxu0 %v10406_v27  ;;  %979 = vst [vmem:[#allocation2 + $0x58] sm:$0xf] %v728_v51  ;;  %v1762_v62 = vsel %vm13316_vm11, %v10391_v18, %v1761_v15  ;;  %v731_v17 = vshrl.u32 %v591_v25, 16  ;;  %v734_v2 = vshll.u32 %v591_v25, 16  ;;  %v1230_v0 = vsel %vm13484_vm14, %v1225_v45, %v13494_v54 }
  0xd0   : > { %2228 = vmatprep.mubr.bf16.mxu0 %v12515_v22  ;;  %v1251_v42 = vshll.u32 %v13515_v36, 16  ;;  %v1255_v43 = vshrl.u32 %v13515_v36, 16  ;;  %v729_v63 = vrot.slane %v13504_v26, 4  ;;  %v739_v55 = vshrl.u32 %v592_v48, 16  ;;  %v12541_v15 = vld [vmem:[#allocation7 + $0x180] sm:$0xff]  }
  0xd1   : > { %v1083_v4 = vld [vmem:[#allocation2 + $0x44] sm:$0x1]  ;;  %v733_v10 = vrot.slane %v731_v17, 7  ;;  %v430_v13 = vsel %vm13268_vm4, 0, %v429_v58  ;;  %v1248_v12 = vor.u32 %v1247_v52, %v1244_v56  ;;  %v10392_v18 = vrot.slane %v13532_v1, 9  ;;  %11476 = vmatpush3.bf16.msra.mxu1 %v12541_v15  ;;  %v12544_v17 = vld [vmem:[#allocation7 + $0x1c8] sm:$0xff]  }
  0xd2   : > { %v13535_v5 = vrot.slane %v1251_v42, 5  ;;  %v1257_v6 = vrot.slane %v1255_v43, 4  ;;  %v1237_v57 = vshll.u32 %v1083_v4, 16  ;;  %v1764_v7 = vrot.slane %v1083_v4, 5  ;;  %431 = vst [vmem:[#allocation2 + $0x5c] sm:$0x1] %v430_v13  ;;  %11477 = vmatprep.subr.bf16.mxu1 %v12544_v17 }
  0xd3   : > { %v973_v14 = vld [vmem:[#allocation2 + $0x50] sm:$0x1]  ;;  %v742_v19 = vshll.u32 %v592_v48, 16  ;;  %v736_v24 = vor.u32 %v734_v2, %v733_v10  ;;  %v13547_v27 = vld [vmem:[#allocation2 + $0x54] sm:$0xf]  ;;  %v1768_v54 = vrot.slane %v13515_v36, 5  ;;  %v10359_v31 = vcombine.low %v13475_v53, %v13473_v47 }
  0xd4   : > { %v1239_v3 = vrot.slane %v1237_v57, 5  ;;  %v1765_v9 = vsel %vm13316_vm11, %v1763_v50, %v1764_v7  ;;  %v974_v22 = vsel %vm13263_vm2, %v712_v44, %v973_v14  ;;  %v737_v29 = vrot.slane %v733_v10, 4  ;;  %v379_v47 = vld [vmem:[#allocation2 + $0x6c] sm:$0x1]  ;;  %v593_v25 = vld [vmem:[%s13248_s8 + $0x40] sm:$0xf] }
  0xd5   : > { %v10407_v21 = vcombine.low %v1762_v62, %v1765_v9  ;;  %975 = vst [vmem:[#allocation2 + $0x50] sm:$0x1] %v974_v22  ;;  %v13550_v30 = vrot.slane %v739_v55, 7  ;;  %v1258_v33 = vor.u32 %v1257_v6, %v13535_v5  ;;  %v1266_v23 = vshrl.u32 %v13547_v27, 16  ;;  %v983_v40 = vld [vmem:[#allocation2 + $0x60] sm:$0xf] }
  0xd6   : > { %v1240_v16 = vsel %vm13484_vm14, %v1235_v59, %v1239_v3  ;;  %v12517_v32 = vld [vmem:[#allocation2 + $0x54] sm:$0xff]   ;;  %v13560_v38 = vrot.slane %v1248_v12, 4  ;;  %v1269_v41 = vshll.u32 %v13547_v27, 16  ;;  %v984_v53 = vsel %vm13290_vm10, %v736_v24, %v983_v40  ;;  %v432_v52 = vld [vmem:[#allocation2 + $0x68] sm:$0x1]  ;;  %v12550_v17 = vld [vmem:[#allocation7 + $0x190] sm:$0xff]  }
  0xd7   : > { %v13557_v34 = vld [vmem:[#allocation2 + $0x58] sm:$0xf]  ;;  %v10375_v37 = vcombine.low %v1230_v0, %v1240_v16  ;;  %2229 = vmatmul.mubr.bf16.gmra.mrb[20].mxu0 %v10407_v21  ;;  %v744_v39 = vor.u32 %v742_v19, %v13550_v30  ;;  %v594_v44 = vld [vmem:[%s13248_s8 + $0x44] sm:$0xf]  ;;  %v1770_v50 = vrot.slane %v1768_v54, 4  ;;  %v1268_v48 = vrot.slane %v1266_v23, 4 }
  0xd8   : > { %2236 = vmatprep.mubr.bf16.mxu0 %v12517_v32  ;;  %v1275_v42 = vshll.u32 %v13557_v34, 16  ;;  %v1279_v43 = vshrl.u32 %v13557_v34, 16  ;;  %985 = vst [vmem:[#allocation2 + $0x60] sm:$0xf] %v984_v53  ;;  %v1271_v45 = vrot.slane %v1269_v41, 5  ;;  %v1259_v46 = vrot.slane %v1258_v33, 4 }
  0xd9   : > { %2485 = vmatprep.mubr.bf16.mxu1 %v10375_v37  ;;  %v745_v51 = vsel %vm13280_vm9, %v737_v29, %v744_v39  ;;  %v13572_v56 = vld [vmem:[#allocation2 + $0x54] sm:$0xe]  ;;  %v1769_v58 = vsel %vm13316_vm11, %v10392_v18, %v1768_v54  ;;  %v980_v59 = vld [vmem:[#allocation2 + $0x5c] sm:$0x1]  ;;  %v1775_v62 = vrot.slane %v13557_v34, 5  ;;  %v380_v1 = vsel %vm13263_vm2, 0, %v379_v47 }
  0xda   : > { %2486 = vmatmul.mubr.bf16.gmra.mrb[4].mxu1 %v10359_v31  ;;  %986 = vst [vmem:[#allocation2 + $0x64] sm:$0xf] %v745_v51  ;;  %v1254_v2 = vsel %vm13484_vm14, %v13560_v38, %v13535_v5  ;;  %v981_v49 = vsel %vm13263_vm2, %v729_v63, %v980_v59  ;;  %v13587_v4 = vrot.slane %v1275_v42, 5  ;;  %v1281_v6 = vrot.slane %v1279_v43, 4  ;;  %381 = vst [vmem:[#allocation2 + $0x6c] sm:$0x1] %v380_v1 }
  0xdb   : > { %v382_v55 = vld [vmem:[#allocation2 + $0x78] sm:$0x1]  ;;  %982 = vst [vmem:[#allocation2 + $0x5c] sm:$0x1] %v981_v49  ;;  %v10393_v10 = vrot.slane %v13572_v56, 9  ;;  %v748_v13 = vshrl.u32 %v593_v25, 16  ;;  %v1272_v26 = vor.u32 %v1271_v45, %v1268_v48  ;;  %v10360_v23 = vcombine.low %v13513_v20, %v13515_v36 }
  0xdc   : > { %v12545_v57 = vld [vmem:[#allocation7 + $0x188] sm:$0xff]   ;;  %v1084_v7 = vld [vmem:[#allocation2 + $0x50] sm:$0x1]  ;;  %v751_v0 = vshll.u32 %v593_v25, 16  ;;  %v756_v14 = vshrl.u32 %v594_v44, 16  ;;  %v759_v18 = vshll.u32 %v594_v44, 16  ;;  %v1282_v15 = vor.u32 %v1281_v6, %v13587_v4 }
  0xdd   : > { %v1261_v5 = vshll.u32 %v1084_v7, 16  ;;  %v1771_v12 = vrot.slane %v1084_v7, 5  ;;  %11478 = vmatpush3.bf16.msra.mxu1 %v12545_v57  ;;  %v1777_v63 = vrot.slane %v1775_v62, 4  ;;  %v750_v19 = vrot.slane %v748_v13, 7  ;;  %v595_v43 = vld [vmem:[%s13248_s8 + $0x48] sm:$0xf] }
  0xde   : > { %v13590_v3 = vrot.slane %v756_v14, 7  ;;  %v433_v9 = vsel %vm13268_vm4, 0, %v432_v52  ;;  %v383_v21 = vsel %vm13263_vm2, 0, %v382_v55  ;;  %v1273_v38 = vrot.slane %v1272_v26, 4  ;;  %v12549_v51 = vld [vmem:[#allocation7 + $0x1d0] sm:$0xff]  }
  0xdf   : > { %v1263_v22 = vrot.slane %v1261_v5, 5  ;;  %v1772_v24 = vsel %vm13316_vm11, %v1770_v50, %v1771_v12  ;;  %434 = vst [vmem:[#allocation2 + $0x68] sm:$0x1] %v433_v9  ;;  %v753_v29 = vor.u32 %v751_v0, %v750_v19  ;;  %v754_v16 = vrot.slane %v750_v19, 4  ;;  %v13600_v32 = vld [vmem:[#allocation2 + $0x60] sm:$0xf]  ;;  %11479 = vmatprep.subr.bf16.mxu1 %v12549_v51 }
  0xe0   : > { %v10408_v54 = vcombine.low %v1769_v58, %v1772_v24  ;;  %v761_v31 = vor.u32 %v759_v18, %v13590_v3  ;;  %384 = vst [vmem:[#allocation2 + $0x78] sm:$0x1] %v383_v21  ;;  %v1290_v53 = vshrl.u32 %v13600_v32, 16  ;;  %v1293_v42 = vshll.u32 %v13600_v32, 16  ;;  %v596_v1 = vld [vmem:[%s13248_s8 + $0x4c] sm:$0xf] }
  0xe1   : > { %v1264_v33 = vsel %vm13484_vm14, %v1259_v46, %v1263_v22  ;;  %v12519_v37 = vld [vmem:[#allocation2 + $0x60] sm:$0xff]   ;;  %v990_v47 = vld [vmem:[#allocation2 + $0x6c] sm:$0xf]  ;;  %v746_v25 = vrot.slane %v13550_v30, 4  ;;  %v1283_v48 = vrot.slane %v1282_v15, 4  ;;  %v1776_v56 = vsel %vm13316_vm11, %v10393_v10, %v1775_v62  ;;  %11480 = vmatpush3.bf16.msra.mxu1 %v12550_v17 }
  0xe2   : > { %v13606_v39 = vld [vmem:[#allocation2 + $0x64] sm:$0xf]  ;;  %v10376_v40 = vcombine.low %v1254_v2, %v1264_v33  ;;  %2237 = vmatmul.mubr.bf16.gmra.mrb[24].mxu0 %v10408_v54  ;;  %v762_v41 = vsel %vm13280_vm9, %v754_v16, %v761_v31  ;;  %v1085_v44 = vld [vmem:[#allocation2 + $0x5c] sm:$0x1]  ;;  %v991_v20 = vsel %vm13290_vm10, %v753_v29, %v990_v47  ;;  %v1278_v30 = vsel %vm13484_vm14, %v1273_v38, %v13587_v4  ;;  %v435_v10 = vld [vmem:[#allocation2 + $0x74] sm:$0x1] }
  0xe3   : > { %2244 = vmatprep.mubr.bf16.mxu0 %v12519_v37  ;;  %993 = vst [vmem:[#allocation2 + $0x70] sm:$0xf] %v762_v41  ;;  %v1299_v36 = vshll.u32 %v13606_v39, 16  ;;  %v1303_v50 = vshrl.u32 %v13606_v39, 16  ;;  %v1285_v45 = vshll.u32 %v1085_v44, 16  ;;  %v1778_v52 = vrot.slane %v1085_v44, 5 }
  0xe4   : > { %2493 = vmatprep.mubr.bf16.mxu1 %v10376_v40  ;;  %992 = vst [vmem:[#allocation2 + $0x6c] sm:$0xf] %v991_v20  ;;  %v1292_v46 = vrot.slane %v1290_v53, 4  ;;  %v1295_v58 = vrot.slane %v1293_v42, 5  ;;  %v765_v55 = vshrl.u32 %v595_v43, 16  ;;  %v10361_v13 = vcombine.low %v13547_v27, %v13557_v34  ;;  %v12553_v21 = vld [vmem:[#allocation7 + $0x1d8] sm:$0xff]  }
  0xe5   : > { %2494 = vmatmul.mubr.bf16.gmra.mrb[8].mxu1 %v10360_v23  ;;  %v13623_v59 = vrot.slane %v1299_v36, 5  ;;  %v1287_v2 = vrot.slane %v1285_v45, 5  ;;  %v1779_v49 = vsel %vm13316_vm11, %v1777_v63, %v1778_v52  ;;  %v1305_v62 = vrot.slane %v1303_v50, 4  ;;  %v1681_v26 = vld [vmem:[#allocation2 + $0x60] sm:$0xe]  ;;  %11481 = vmatprep.subr.bf16.mxu1 %v12553_v21 }
  0xe6   : > { %v987_v6 = vld [vmem:[#allocation2 + $0x68] sm:$0x1]  ;;  %v10409_v57 = vcombine.low %v1776_v56, %v1779_v49  ;;  %v1782_v0 = vrot.slane %v13606_v39, 5  ;;  %v767_v14 = vrot.slane %v765_v55, 7  ;;  %v1296_v12 = vor.u32 %v1295_v58, %v1292_v46  ;;  %v385_v47 = vld [vmem:[#allocation2 + $0x84] sm:$0x1] }
  0xe7   : > { %v988_v7 = vsel %vm13263_vm2, %v746_v25, %v987_v6  ;;  %v1288_v4 = vsel %vm13484_vm14, %v1283_v48, %v1287_v2  ;;  %v768_v18 = vshll.u32 %v595_v43, 16  ;;  %v773_v63 = vshrl.u32 %v596_v1, 16  ;;  %v997_v19 = vld [vmem:[#allocation2 + $0x78] sm:$0xf]  ;;  %v597_v53 = vld [vmem:[%s13248_s8 + $0x50] sm:$0xf] }
  0xe8   : > { %989 = vst [vmem:[#allocation2 + $0x68] sm:$0x1] %v988_v7  ;;  %v10377_v5 = vcombine.low %v1278_v30, %v1288_v4  ;;  %v1306_v9 = vor.u32 %v1305_v62, %v13623_v59  ;;  %v771_v22 = vrot.slane %v767_v14, 4  ;;  %v776_v24 = vshll.u32 %v596_v1, 16  ;;  %v598_v48 = vld [vmem:[%s13248_s8 + $0x54] sm:$0xf] }
  0xe9   : > { %v436_v15 = vsel %vm13268_vm4, 0, %v435_v10  ;;  %v770_v34 = vor.u32 %v768_v18, %v767_v14  ;;  %v13638_v54 = vrot.slane %v773_v63, 7  ;;  %v763_v16 = vrot.slane %v13590_v3, 4  ;;  %v12554_v46 = vld [vmem:[#allocation7 + $0x198] sm:$0xff]   ;;  %v438_v49 = vld [vmem:[#allocation2 + $0x80] sm:$0x1] }
  0xea   : > { %2245 = vmatmul.mubr.bf16.gmra.mrb[28].mxu0 %v10409_v57  ;;  %2501 = vmatprep.mubr.bf16.mxu1 %v10377_v5  ;;  %437 = vst [vmem:[#allocation2 + $0x74] sm:$0x1] %v436_v15  ;;  %v10394_v31 = vrot.slane %v1681_v26, 9  ;;  %v13643_v33 = vld [vmem:[#allocation2 + $0x70] sm:$0xf]  ;;  %v10362_v38 = vcombine.low %v13600_v32, %v13606_v39  ;;  %v1297_v42 = vrot.slane %v1296_v12, 4 }
  0xeb   : > { %v12521_v27 = vld [vmem:[#allocation2 + $0x6c] sm:$0xff]   ;;  %v778_v40 = vor.u32 %v776_v24, %v13638_v54  ;;  %v998_v41 = vsel %vm13290_vm10, %v770_v34, %v997_v19  ;;  %v1323_v3 = vshll.u32 %v13643_v33, 16  ;;  %v1307_v43 = vrot.slane %v1306_v9, 4  ;;  %11482 = vmatpush3.bf16.msra.mxu1 %v12554_v46 }
  0xec   : > { %v13640_v29 = vld [vmem:[#allocation2 + $0x6c] sm:$0xf]  ;;  %2252 = vmatprep.mubr.bf16.mxu0 %v12521_v27  ;;  %v1784_v25 = vrot.slane %v1782_v0, 4  ;;  %999 = vst [vmem:[#allocation2 + $0x78] sm:$0xf] %v998_v41  ;;  %v1327_v44 = vshrl.u32 %v13643_v33, 16  ;;  %v1783_v56 = vsel %vm13316_vm11, %v10394_v31, %v1782_v0  ;;  %v1302_v6 = vsel %vm13484_vm14, %v1297_v42, %v13623_v59 }
  0xed   : > { %v1314_v23 = vshrl.u32 %v13640_v29, 16  ;;  %v1317_v37 = vshll.u32 %v13640_v29, 16  ;;  %2502 = vmatmul.mubr.bf16.gmra.mrb[12].mxu1 %v10361_v13  ;;  %v13655_v20 = vld [vmem:[#allocation2 + $0x6c] sm:$0xe]  ;;  %v779_v32 = vsel %vm13280_vm9, %v771_v22, %v778_v40  ;;  %v13659_v51 = vrot.slane %v1323_v3, 5 }
  0xee   : > { %1000 = vst [vmem:[#allocation2 + $0x7c] sm:$0xf] %v779_v32  ;;  %v1329_v30 = vrot.slane %v1327_v44, 4  ;;  %v780_v58 = vrot.slane %v13638_v54, 4  ;;  %v10395_v1 = vrot.slane %v13655_v20, 9  ;;  %v386_v17 = vsel %vm13263_vm2, 0, %v385_v47 }
  0xef   : > { %v1086_v36 = vld [vmem:[#allocation2 + $0x68] sm:$0x1]  ;;  %v1316_v39 = vrot.slane %v1314_v23, 4  ;;  %v1319_v50 = vrot.slane %v1317_v37, 5  ;;  %v782_v2 = vshrl.u32 %v597_v53, 16  ;;  %v1789_v7 = vrot.slane %v13643_v33, 5 }
  0xf0   : > { %v1309_v45 = vshll.u32 %v1086_v36, 16  ;;  %v1785_v52 = vrot.slane %v1086_v36, 5  ;;  %387 = vst [vmem:[#allocation2 + $0x84] sm:$0x1] %v386_v17  ;;  %v785_v0 = vshll.u32 %v597_v53, 16  ;;  %v1330_v5 = vor.u32 %v1329_v30, %v13659_v51  ;;  %v12558_v20 = vld [vmem:[#allocation7 + $0x1e0] sm:$0xff]  }
  0xf1   : > { %v994_v57 = vld [vmem:[#allocation2 + $0x74] sm:$0x1]  ;;  %v784_v13 = vrot.slane %v782_v2, 7  ;;  %v1320_v59 = vor.u32 %v1319_v50, %v1316_v39  ;;  %v790_v12 = vshrl.u32 %v598_v48, 16  ;;  %v793_v19 = vshll.u32 %v598_v48, 16  ;;  %11483 = vmatprep.subr.bf16.mxu1 %v12558_v20 }
  0xf2   : > { %v1311_v62 = vrot.slane %v1309_v45, 5  ;;  %v1786_v55 = vsel %vm13316_vm11, %v1784_v25, %v1785_v52  ;;  %v995_v4 = vsel %vm13263_vm2, %v763_v16, %v994_v57  ;;  %v439_v24 = vsel %vm13268_vm4, 0, %v438_v49  ;;  %v388_v27 = vld [vmem:[#allocation2 + $0x90] sm:$0x1]  ;;  %v599_v23 = vld [vmem:[%s13248_s8 + $0x58] sm:$0xf] }
  0xf3   : > { %v10410_v10 = vcombine.low %v1783_v56, %v1786_v55  ;;  %996 = vst [vmem:[#allocation2 + $0x74] sm:$0x1] %v995_v4  ;;  %v787_v18 = vor.u32 %v785_v0, %v784_v13  ;;  %v788_v63 = vrot.slane %v784_v13, 4  ;;  %v13679_v9 = vld [vmem:[#allocation2 + $0x78] sm:$0xf]  ;;  %v13681_v22 = vrot.slane %v790_v12, 7 }
  0xf4   : > { %v1312_v14 = vsel %vm13484_vm14, %v1307_v43, %v1311_v62  ;;  %v1338_v15 = vshrl.u32 %v13679_v9, 16  ;;  %v1341_v21 = vshll.u32 %v13679_v9, 16  ;;  %v1791_v16 = vrot.slane %v1789_v7, 4  ;;  %440 = vst [vmem:[#allocation2 + $0x80] sm:$0x1] %v439_v24  ;;  %v12559_v50 = vld [vmem:[#allocation7 + $0x1a0] sm:$0xff]  }
  0xf5   : > { %v10378_v26 = vcombine.low %v1302_v6, %v1312_v14  ;;  %2253 = vmatmul.mubr.bf16.gmra.mrb[32].mxu0 %v10410_v10  ;;  %v12523_v34 = vld [vmem:[#allocation2 + $0x78] sm:$0xff]   ;;  %v795_v37 = vor.u32 %v793_v19, %v13681_v22  ;;  %v600_v47 = vld [vmem:[%s13248_s8 + $0x5c] sm:$0xf]  ;;  %v1321_v53 = vrot.slane %v1320_v59, 4  ;;  %v1331_v42 = vrot.slane %v1330_v5, 4  ;;  %11484 = vmatpush3.bf16.msra.mxu1 %v12559_v50 }
  0xf6   : > { %v13687_v31 = vld [vmem:[#allocation2 + $0x7c] sm:$0xf]  ;;  %v1340_v40 = vrot.slane %v1338_v15, 4  ;;  %v1343_v41 = vrot.slane %v1341_v21, 5  ;;  %v1683_v3 = vld [vmem:[#allocation2 + $0x78] sm:$0xe]  ;;  %2260 = vmatprep.mubr.bf16.mxu0 %v12523_v34  ;;  %v10363_v43 = vcombine.low %v13640_v29, %v13643_v33  ;;  %v1790_v36 = vsel %vm13316_vm11, %v10395_v1, %v1789_v7 }
  0xf7   : > { %2509 = vmatprep.mubr.bf16.mxu1 %v10378_v26  ;;  %v1004_v25 = vld [vmem:[#allocation2 + $0x84] sm:$0xf]  ;;  %v1347_v44 = vshll.u32 %v13687_v31, 16  ;;  %v389_v39 = vsel %vm13263_vm2, 0, %v388_v27  ;;  %v797_v29 = vrot.slane %v13681_v22, 4  ;;  %v1351_v33 = vshrl.u32 %v13687_v31, 16 }
  0xf8   : > { %2510 = vmatmul.mubr.bf16.gmra.mrb[16].mxu1 %v10362_v38  ;;  %v796_v38 = vsel %vm13280_vm9, %v788_v63, %v795_v37  ;;  %v1005_v32 = vsel %vm13290_vm10, %v787_v18, %v1004_v25  ;;  %v10396_v45 = vrot.slane %v1683_v3, 9  ;;  %v1796_v56 = vrot.slane %v13687_v31, 5  ;;  %390 = vst [vmem:[#allocation2 + $0x90] sm:$0x1] %v389_v39  ;;  %v441_v52 = vld [vmem:[#allocation2 + $0x8c] sm:$0x1] }
  0xf9   : > { %1006 = vst [vmem:[#allocation2 + $0x84] sm:$0xf] %v1005_v32  ;;  %1007 = vst [vmem:[#allocation2 + $0x88] sm:$0xf] %v796_v38  ;;  %v1344_v1 = vor.u32 %v1343_v41, %v1340_v40  ;;  %v799_v17 = vshrl.u32 %v599_v23, 16  ;;  %v13706_v49 = vrot.slane %v1347_v44, 5  ;;  %v1326_v57 = vsel %vm13484_vm14, %v1321_v53, %v13659_v51 }
  0xfa   : > { %v1087_v48 = vld [vmem:[#allocation2 + $0x74] sm:$0x1]  ;;  %v391_v2 = vld [vmem:[#allocation2 + $0x9c] sm:$0x1]  ;;  %v802_v6 = vshll.u32 %v599_v23, 16  ;;  %v807_v62 = vshrl.u32 %v600_v47, 16  ;;  %v13732_v34 = vsel %vm13316_vm11, %v10396_v45, %v1796_v56 }
  0xfb   : > { %v1333_v30 = vshll.u32 %v1087_v48, 16  ;;  %v1792_v46 = vrot.slane %v1087_v48, 5  ;;  %v810_v55 = vshll.u32 %v600_v47, 16  ;;  %v1001_v4 = vld [vmem:[#allocation2 + $0x80] sm:$0x1]  ;;  %v801_v13 = vrot.slane %v799_v17, 7 }
  0xfc   : > { %v1002_v14 = vsel %vm13263_vm2, %v780_v58, %v1001_v4  ;;  %v1353_v59 = vrot.slane %v1351_v33, 4  ;;  %v13717_v5 = vrot.slane %v807_v62, 7  ;;  %v601_v12 = vld [vmem:[%s13248_s8 + $0x60] sm:$0xf]  ;;  %v442_v63 = vsel %vm13268_vm4, 0, %v441_v52  ;;  %v12562_v44 = vld [vmem:[#allocation7 + $0x1e8] sm:$0xff]  }
  0xfd   : > { %v1335_v7 = vrot.slane %v1333_v30, 5  ;;  %v1793_v10 = vsel %vm13316_vm11, %v1791_v16, %v1792_v46  ;;  %1003 = vst [vmem:[#allocation2 + $0x80] sm:$0x1] %v1002_v14  ;;  %v804_v51 = vor.u32 %v802_v6, %v801_v13  ;;  %v805_v18 = vrot.slane %v801_v13, 4  ;;  %443 = vst [vmem:[#allocation2 + $0x8c] sm:$0x1] %v442_v63  ;;  %11485 = vmatprep.subr.bf16.mxu1 %v12562_v44 }
  0xfe   : > { %v10411_v0 = vcombine.low %v1790_v36, %v1793_v10  ;;  %v13724_v24 = vrot.slane %v1344_v1, 4  ;;  %v812_v54 = vor.u32 %v810_v55, %v13717_v5  ;;  %v392_v58 = vsel %vm13263_vm2, 0, %v391_v2  ;;  %v602_v25 = vld [vmem:[%s13248_s8 + $0x64] sm:$0xf]  ;;  %v12563_v32 = vld [vmem:[#allocation7 + $0x1a8] sm:$0xff]   ;;  %v12567_v13 = vld [vmem:[#allocation7 + $0x1f0] sm:$0xff]  }
  0xff   : > { %v1336_v26 = vsel %vm13484_vm14, %v1331_v42, %v1335_v7  ;;  %393 = vst [vmem:[#allocation2 + $0x9c] sm:$0x1] %v392_v58  ;;  %v816_v21 = vshrl.u32 %v601_v12, 16  ;;  %v1354_v27 = vor.u32 %v1353_v59, %v13706_v49  ;;  %v1011_v23 = vld [vmem:[#allocation2 + $0x90] sm:$0xf]  ;;  %v1798_v20 = vrot.slane %v1796_v56, 4  ;;  %11486 = vmatpush3.bf16.msra.mxu1 %v12563_v32 }
 0x100   : > { %v10379_v19 = vcombine.low %v1326_v57, %v1336_v26  ;;  %2261 = vmatmul.mubr.bf16.gmra.mrb[36].mxu0 %v10411_v0  ;;  %v12525_v15 = vld [vmem:[#allocation2 + $0x84] sm:$0xff]   ;;  %v813_v16 = vsel %vm13280_vm9, %v805_v18, %v812_v54  ;;  %v1012_v41 = vsel %vm13290_vm10, %v804_v51, %v1011_v23  ;;  %v814_v30 = vrot.slane %v13717_v5, 4  ;;  %v444_v17 = vld [vmem:[#allocation2 + $0x98] sm:$0x1]  ;;  %11487 = vmatprep.subr.bf16.mxu1 %v12567_v13 }
 0x101   : > { %v13736_v37 = vld [vmem:[#allocation2 + $0x84] sm:$0xf]  ;;  %v13738_v40 = vld [vmem:[#allocation2 + $0x88] sm:$0xf]  ;;  %2268 = vmatprep.mubr.bf16.mxu0 %v12525_v15  ;;  %1014 = vst [vmem:[#allocation2 + $0x94] sm:$0xf] %v813_v16  ;;  %v10364_v54 = vcombine.low %v13679_v9, %v13687_v31 }
 0x102   : > { %2517 = vmatprep.mubr.bf16.mxu1 %v10379_v19  ;;  %v1362_v3 = vshrl.u32 %v13736_v37, 16  ;;  %v1365_v47 = vshll.u32 %v13736_v37, 16  ;;  %v1371_v53 = vshll.u32 %v13738_v40, 16  ;;  %v13745_v42 = vld [vmem:[#allocation2 + $0x84] sm:$0xe]  ;;  %v1375_v36 = vshrl.u32 %v13738_v40, 16 }
 0x103   : > { %2518 = vmatmul.mubr.bf16.gmra.mrb[20].mxu1 %v10363_v43  ;;  %v1350_v43 = vsel %vm13484_vm14, %v13724_v24, %v13706_v49  ;;  %1013 = vst [vmem:[#allocation2 + $0x90] sm:$0xf] %v1012_v41  ;;  %v1803_v38 = vrot.slane %v13738_v40, 5  ;;  %v818_v33 = vrot.slane %v816_v21, 7  ;;  %v1355_v52 = vrot.slane %v1354_v27, 4  ;;  %v12568_v26 = vld [vmem:[#allocation7 + $0x1b0] sm:$0xff]  }
 0x104   : > { %v1364_v39 = vrot.slane %v1362_v3, 4  ;;  %v1367_v50 = vrot.slane %v1365_v47, 5  ;;  %v13754_v48 = vrot.slane %v1371_v53, 5  ;;  %v1088_v45 = vld [vmem:[#allocation2 + $0x80] sm:$0x1]  ;;  %v1377_v46 = vrot.slane %v1375_v36, 4  ;;  %11488 = vmatpush3.bf16.msra.mxu1 %v12568_v26 }
 0x105   : > { %v819_v1 = vshll.u32 %v601_v12, 16  ;;  %v1357_v56 = vshll.u32 %v1088_v45, 16  ;;  %v1799_v2 = vrot.slane %v1088_v45, 5  ;;  %v1008_v49 = vld [vmem:[#allocation2 + $0x8c] sm:$0x1]  ;;  %v10397_v6 = vrot.slane %v13745_v42, 9 }
 0x106   : > { %v13760_v62 = vrot.slane %v1803_v38, 4  ;;  %v1009_v55 = vsel %vm13263_vm2, %v797_v29, %v1008_v49  ;;  %v1368_v57 = vor.u32 %v1367_v50, %v1364_v39  ;;  %v824_v10 = vshrl.u32 %v602_v25, 16  ;;  %v1018_v4 = vld [vmem:[#allocation2 + $0x9c] sm:$0xf]  ;;  %v394_v19 = vld [vmem:[#allocation2 + $0xa8] sm:$0x1] }
 0x107   : > { %v821_v7 = vor.u32 %v819_v1, %v818_v33  ;;  %v1359_v0 = vrot.slane %v1357_v56, 5  ;;  %v1800_v14 = vsel %vm13316_vm11, %v1798_v20, %v1799_v2  ;;  %1010 = vst [vmem:[#allocation2 + $0x8c] sm:$0x1] %v1009_v55  ;;  %v1378_v59 = vor.u32 %v1377_v46, %v13754_v48  ;;  %v603_v27 = vld [vmem:[%s13248_s8 + $0x68] sm:$0xf] }
 0x108   : > { %v827_v12 = vshll.u32 %v602_v25, 16  ;;  %v10412_v22 = vcombine.low %v13732_v34, %v1800_v14  ;;  %v822_v51 = vrot.slane %v818_v33, 4  ;;  %v13770_v18 = vrot.slane %v824_v10, 7  ;;  %v13774_v63 = vld [vmem:[#allocation2 + $0x94] sm:$0xf] }
 0x109   : > { %v1019_v29 = vsel %vm13290_vm10, %v821_v7, %v1018_v4  ;;  %v1360_v24 = vsel %vm13484_vm14, %v1355_v52, %v1359_v0  ;;  %v445_v15 = vsel %vm13268_vm4, 0, %v444_v17  ;;  %v1369_v16 = vrot.slane %v1368_v57, 4  ;;  %v604_v25 = vld [vmem:[%s13248_s8 + $0x6c] sm:$0xf]  ;;  %v447_v44 = vld [vmem:[#allocation2 + $0xa4] sm:$0x1] }
 0x10a   : > { %v12527_v58 = vld [vmem:[#allocation2 + $0x90] sm:$0xff]   ;;  %1020 = vst [vmem:[#allocation2 + $0x9c] sm:$0xf] %v1019_v29  ;;  %v10380_v34 = vcombine.low %v1350_v43, %v1360_v24  ;;  %2269 = vmatmul.mubr.bf16.gmra.mrb[40].mxu0 %v10412_v22  ;;  %v829_v23 = vor.u32 %v827_v12, %v13770_v18  ;;  %446 = vst [vmem:[#allocation2 + $0x98] sm:$0x1] %v445_v15  ;;  %v1379_v9 = vrot.slane %v1378_v59, 4 }
 0x10b   : > { %v13782_v21 = vld [vmem:[#allocation2 + $0x90] sm:$0xf]  ;;  %2276 = vmatprep.mubr.bf16.mxu0 %v12527_v58  ;;  %v1395_v47 = vshll.u32 %v13774_v63, 16  ;;  %v1399_v53 = vshrl.u32 %v13774_v63, 16  ;;  %v10365_v43 = vcombine.low %v13736_v37, %v13738_v40  ;;  %v831_v36 = vrot.slane %v13770_v18, 4  ;;  %v12571_v29 = vld [vmem:[#allocation7 + $0x1f8] sm:$0xff]  }
 0x10c   : > { %v1386_v41 = vshrl.u32 %v13782_v21, 16  ;;  %v13787_v3 = vld [vmem:[#allocation2 + $0x90] sm:$0xe]  ;;  %v1389_v31 = vshll.u32 %v13782_v21, 16  ;;  %2525 = vmatprep.mubr.bf16.mxu1 %v10380_v34  ;;  %v830_v20 = vsel %vm13280_vm9, %v822_v51, %v829_v23  ;;  %v1810_v32 = vrot.slane %v13774_v63, 5  ;;  %11489 = vmatprep.subr.bf16.mxu1 %v12571_v29 }
 0x10d   : > { %2526 = vmatmul.mubr.bf16.gmra.mrb[24].mxu1 %v10364_v54  ;;  %1021 = vst [vmem:[#allocation2 + $0xa0] sm:$0xf] %v830_v20  ;;  %v10398_v33 = vrot.slane %v13787_v3, 9  ;;  %v395_v45 = vsel %vm13263_vm2, 0, %v394_v19  ;;  %v13804_v46 = vrot.slane %v1395_v47, 5  ;;  %v1401_v1 = vrot.slane %v1399_v53, 4 }
 0x10e   : > { %v13799_v39 = vrot.slane %v1386_v41, 4  ;;  %v1391_v50 = vrot.slane %v1389_v31, 5  ;;  %v1089_v52 = vld [vmem:[#allocation2 + $0x8c] sm:$0x1]  ;;  %396 = vst [vmem:[#allocation2 + $0xa8] sm:$0x1] %v395_v45  ;;  %v1374_v2 = vsel %vm13484_vm14, %v1369_v16, %v13754_v48  ;;  %v1804_v55 = vsel %vm13316_vm11, %v10397_v6, %v1803_v38 }
 0x10f   : > { %v833_v17 = vshrl.u32 %v603_v27, 16  ;;  %v836_v56 = vshll.u32 %v603_v27, 16  ;;  %v1381_v49 = vshll.u32 %v1089_v52, 16  ;;  %v1806_v57 = vrot.slane %v1089_v52, 5  ;;  %v13832_v51 = vld [vmem:[#allocation2] sm:$0xf] }
 0x110   : > { %v13817_v7 = vrot.slane %v1810_v32, 4  ;;  %v841_v4 = vshrl.u32 %v604_v25, 16  ;;  %v448_v13 = vsel %vm13268_vm4, 0, %v447_v44  ;;  %v1392_v42 = vor.u32 %v1391_v50, %v13799_v39  ;;  %v397_v54 = vld [vmem:[#allocation2 + $0xb4] sm:$0x1]  ;;  %v12572_v39 = vld [vmem:[#allocation7 + $0x1b8] sm:$0xff]  }
 0x111   : > { %v835_v10 = vrot.slane %v833_v17, 7  ;;  %v1383_v0 = vrot.slane %v1381_v49, 5  ;;  %v1807_v48 = vsel %vm13316_vm11, %v13760_v62, %v1806_v57  ;;  %v1015_v14 = vld [vmem:[#allocation2 + $0x98] sm:$0x1]  ;;  %v844_v59 = vshll.u32 %v604_v25, 16  ;;  %11490 = vmatpush3.bf16.msra.mxu1 %v12572_v39 }
 0x112   : > { %449 = vst [vmem:[#allocation2 + $0xa4] sm:$0x1] %v448_v13  ;;  %v10413_v38 = vcombine.low %v1804_v55, %v1807_v48  ;;  %v1016_v6 = vsel %vm13263_vm2, %v814_v30, %v1015_v14  ;;  %v1402_v12 = vor.u32 %v1401_v1, %v13804_v46  ;;  %v13830_v22 = vld [vmem:[#allocation2 + $0x9c] sm:$0xf]  ;;  %v13834_v62 = vld [vmem:[#allocation2 + $0xc] sm:$0xf]  ;;  %v10366_v49 = vcombine.low %v13782_v21, %v13774_v63 }
 0x113   : > { %v838_v26 = vor.u32 %v836_v56, %v835_v10  ;;  %v1384_v19 = vsel %vm13484_vm14, %v1379_v9, %v1383_v0  ;;  %1017 = vst [vmem:[#allocation2 + $0x98] sm:$0x1] %v1016_v6  ;;  %v839_v24 = vrot.slane %v835_v10, 4  ;;  %v13838_v5 = vrot.slane %v841_v4, 7  ;;  %v605_v58 = vld [vmem:[%s13248_s8 + $0x70] sm:$0xf] }
 0x114   : > { %v1410_v30 = vshrl.u32 %v13830_v22, 16  ;;  %v10381_v15 = vcombine.low %v1374_v2, %v1384_v19  ;;  %2277 = vmatmul.mubr.bf16.gmra.mrb[44].mxu0 %v10413_v38  ;;  %v12529_v27 = vld [vmem:[#allocation2 + $0x9c] sm:$0xff]   ;;  %v1413_v16 = vshll.u32 %v13830_v22, 16  ;;  %v606_v47 = vld [vmem:[%s13248_s8 + $0x74] sm:$0xf]  ;;  %v1393_v56 = vrot.slane %v1392_v42, 4 }
 0x115   : > { %v13842_v34 = vld [vmem:[#allocation2 + $0xa0] sm:$0xf]  ;;  %v846_v23 = vor.u32 %v844_v59, %v13838_v5  ;;  %v1025_v41 = vld [vmem:[#allocation2 + $0xa8] sm:$0xf]  ;;  %v13847_v31 = vld [vmem:[#allocation2 + $0x9c] sm:$0xe]  ;;  %2284 = vmatprep.mubr.bf16.mxu0 %v12529_v27  ;;  %v1811_v40 = vsel %vm13316_vm11, %v10398_v33, %v1810_v32 }
 0x116   : > { %v1419_v9 = vshll.u32 %v13842_v34, 16  ;;  %v13850_v53 = vld [vmem:[#allocation2 + $0x4] sm:$0xf]  ;;  %v13854_v44 = vld [vmem:[#allocation2 + $0x10] sm:$0xf]  ;;  %2533 = vmatprep.mubr.bf16.mxu1 %v10381_v15  ;;  %v1026_v50 = vsel %vm13290_vm10, %v838_v26, %v1025_v41  ;;  %v1412_v45 = vrot.slane %v1410_v30, 4 }
 0x117   : > { %v10354_v25 = vcombine.low %v13832_v51, %v13850_v53  ;;  %v10355_v20 = vcombine.low %v13834_v62, %v13854_v44  ;;  %v1415_v52 = vrot.slane %v1413_v16, 5  ;;  %v1423_v1 = vshrl.u32 %v13842_v34, 16  ;;  %v450_v17 = vld [vmem:[#allocation2 + $0xb0] sm:$0x1]  ;;  %2534 = vmatmul.mubr.bf16.gmra.mrb[28].mxu1 %v10365_v43  ;;  %1027 = vst [vmem:[#allocation2 + $0xa8] sm:$0xf] %v1026_v50 }
 0x118   : > { %v1403_v2 = vrot.slane %v1402_v12, 4  ;;  %v847_v55 = vsel %vm13280_vm9, %v839_v24, %v846_v23  ;;  %v13868_v10 = vrot.slane %v1419_v9, 5  ;;  %v398_v13 = vsel %vm13263_vm2, 0, %v397_v54  ;;  %v400_v37 = vld [vmem:[#allocation2 + $0xc0] sm:$0x1] }
 0x119   : > { %1028 = vst [vmem:[#allocation2 + $0xac] sm:$0xf] %v847_v55  ;;  %v1022_v57 = vld [vmem:[#allocation2 + $0xa4] sm:$0x1]  ;;  %v1425_v4 = vrot.slane %v1423_v1, 4  ;;  %v850_v0 = vshrl.u32 %v605_v58, 16  ;;  %v1416_v59 = vor.u32 %v1415_v52, %v1412_v45 }
 0x11a   : > { %v1023_v43 = vsel %vm13263_vm2, %v831_v36, %v1022_v57  ;;  %v10399_v48 = vrot.slane %v13847_v31, 9  ;;  %399 = vst [vmem:[#allocation2 + $0xb4] sm:$0x1] %v398_v13  ;;  %v853_v14 = vshll.u32 %v605_v58, 16  ;;  %v1090_v42 = vld [vmem:[#allocation2 + $0x98] sm:$0x1]  ;;  %v1398_v36 = vsel %vm13484_vm14, %v1393_v56, %v13804_v46 }
 0x11b   : > { %1024 = vst [vmem:[#allocation2 + $0xa4] sm:$0x1] %v1023_v43  ;;  %v1817_v38 = vrot.slane %v13842_v34, 5  ;;  %v852_v6 = vrot.slane %v850_v0, 7  ;;  %v858_v12 = vshrl.u32 %v606_v47, 16  ;;  %v1405_v3 = vshll.u32 %v1090_v42, 16 }
 0x11c   : > { %v1813_v26 = vrot.slane %v1090_v42, 5  ;;  %v861_v29 = vshll.u32 %v606_v47, 16  ;;  %v451_v18 = vsel %vm13268_vm4, 0, %v450_v17  ;;  %v1426_v32 = vor.u32 %v1425_v4, %v13868_v10  ;;  %v607_v13 = vld [vmem:[%s13248_s8 + $0x78] sm:$0xf] }
 0x11d   : > { %v855_v33 = vor.u32 %v853_v14, %v852_v6  ;;  %v856_v19 = vrot.slane %v852_v6, 4  ;;  %452 = vst [vmem:[#allocation2 + $0xb0] sm:$0x1] %v451_v18  ;;  %v1407_v24 = vrot.slane %v1405_v3, 5  ;;  %v13893_v54 = vrot.slane %v858_v12, 7 }
 0x11e   : > { %v1814_v30 = vsel %vm13316_vm11, %v13817_v7, %v1813_v26  ;;  %v401_v58 = vsel %vm13263_vm2, 0, %v400_v37  ;;  %v848_v27 = vrot.slane %v13838_v5, 4  ;;  %v1819_v16 = vrot.slane %v1817_v38, 4  ;;  %v13900_v23 = vld [vmem:[#allocation2 + $0xa8] sm:$0xf] }
 0x11f   : > { %v10414_v15 = vcombine.low %v1811_v40, %v1814_v30  ;;  %v10367_v46 = vcombine.low %v13830_v22, %v13842_v34  ;;  %402 = vst [vmem:[#allocation2 + $0xc0] sm:$0x1] %v401_v58  ;;  %v1408_v41 = vsel %vm13484_vm14, %v1403_v2, %v1407_v24  ;;  %v1417_v7 = vrot.slane %v1416_v59, 4  ;;  %v1687_v17 = vld [vmem:[#allocation2 + $0xa8] sm:$0xe] }
 0x120   : > { %v12531_v9 = vld [vmem:[#allocation2 + $0xa8] sm:$0xff]   ;;  %v1818_v31 = vsel %vm13316_vm11, %v10399_v48, %v1817_v38  ;;  %v863_v47 = vor.u32 %v861_v29, %v13893_v54  ;;  %v10382_v5 = vcombine.low %v1398_v36, %v1408_v41  ;;  %v1434_v45 = vshrl.u32 %v13900_v23, 16  ;;  %v453_v18 = vld [vmem:[#allocation2 + $0xbc] sm:$0x1]  ;;  %v13938_v24 = vld [vmem:[#allocation2 + $0x18] sm:$0xf] }
 0x121   : > { %v13907_v39 = vld [vmem:[#allocation2 + $0xac] sm:$0xf]  ;;  %2285 = vmatmul.mubr.bf16.gmra.mrb[48].mxu0 %v10414_v15  ;;  %v1032_v50 = vld [vmem:[#allocation2 + $0xb4] sm:$0xf]  ;;  %v1437_v52 = vshll.u32 %v13900_v23, 16  ;;  %v1427_v2 = vrot.slane %v1426_v32, 4  ;;  %v1422_v14 = vsel %vm13484_vm14, %v1417_v7, %v13868_v10 }
 0x122   : > { %v1443_v1 = vshll.u32 %v13907_v39, 16  ;;  %2292 = vmatprep.mubr.bf16.mxu0 %v12531_v9  ;;  %v1091_v56 = vld [vmem:[#allocation2 + $0xa4] sm:$0x1]  ;;  %v864_v55 = vsel %vm13280_vm9, %v856_v19, %v863_v47  ;;  %v1033_v57 = vsel %vm13290_vm10, %v855_v33, %v1032_v50  ;;  %v1447_v4 = vshrl.u32 %v13907_v39, 16  ;;  %2541 = vmatprep.mubr.bf16.mxu1 %v10382_v5  ;;  %v608_v48 = vld [vmem:[%s13248_s8 + $0x7c] sm:$0xf] }
 0x123   : > { %v1429_v0 = vshll.u32 %v1091_v56, 16  ;;  %v1820_v37 = vrot.slane %v1091_v56, 5  ;;  %1034 = vst [vmem:[#allocation2 + $0xb4] sm:$0xf] %v1033_v57  ;;  %1035 = vst [vmem:[#allocation2 + $0xb8] sm:$0xf] %v864_v55  ;;  %2542 = vmatmul.mubr.bf16.gmra.mrb[32].mxu1 %v10366_v49  ;;  %v10368_v50 = vcombine.low %v13900_v23, %v13907_v39 }
 0x124   : > { %v1436_v40 = vrot.slane %v1434_v45, 4  ;;  %v1439_v43 = vrot.slane %v1437_v52, 5  ;;  %v1029_v42 = vld [vmem:[#allocation2 + $0xb0] sm:$0x1]  ;;  %v13925_v59 = vrot.slane %v1443_v1, 5  ;;  %v1449_v38 = vrot.slane %v1447_v4, 4 }
 0x125   : > { %v1824_v6 = vrot.slane %v13907_v39, 5  ;;  %v1431_v12 = vrot.slane %v1429_v0, 5  ;;  %v1821_v3 = vsel %vm13316_vm11, %v1819_v16, %v1820_v37  ;;  %v1030_v26 = vsel %vm13263_vm2, %v848_v27, %v1029_v42  ;;  %v13949_v52 = vld [vmem:[#allocation2 + $0x1c] sm:$0xf]  ;;  %v13972_v34 = vld [vmem:[#allocation2 + $0x24] sm:$0xf] }
 0x126   : > { %v1440_v29 = vor.u32 %v1439_v43, %v1436_v40  ;;  %v10415_v63 = vcombine.low %v1818_v31, %v1821_v3  ;;  %v865_v21 = vrot.slane %v13893_v54, 4  ;;  %1031 = vst [vmem:[#allocation2 + $0xb0] sm:$0x1] %v1030_v26  ;;  %v1450_v49 = vor.u32 %v1449_v38, %v13925_v59  ;;  %v1039_v9 = vld [vmem:[#allocation2 + $0xc0] sm:$0xf] }
 0x127   : > { %v10400_v10 = vrot.slane %v1687_v17, 9  ;;  %v1432_v36 = vsel %vm13484_vm14, %v1427_v2, %v1431_v12  ;;  %v867_v33 = vshrl.u32 %v607_v13, 16  ;;  %v870_v19 = vshll.u32 %v607_v13, 16  ;;  %v12746_v23 = vld [vmem:[#allocation2 + $0x14] sm:$0x1] }
 0x128   : > { %v13936_v32 = vrot.slane %v1440_v29, 4  ;;  %v10383_v30 = vcombine.low %v1422_v14, %v1432_v36  ;;  %v1826_v58 = vrot.slane %v1824_v6, 4  ;;  %v875_v15 = vshrl.u32 %v608_v48, 16  ;;  %v13982_v36 = vld [vmem:[#allocation2 + $0x28] sm:$0xf] }
 0x129   : > { %v878_v27 = vshll.u32 %v608_v48, 16  ;;  %2293 = vmatmul.mubr.bf16.gmra.mrb[52].mxu0 %v10415_v63  ;;  %v1451_v16 = vrot.slane %v1450_v49, 4  ;;  %v869_v41 = vrot.slane %v867_v33, 7  ;;  %v454_v7 = vsel %vm13268_vm4, 0, %v453_v18 }
 0x12a   : > { %v1098_v31 = vshrl.u32 %v13832_v51, 16  ;;  %2549 = vmatprep.mubr.bf16.mxu1 %v10383_v30  ;;  %v12533_v47 = vld [vmem:[#allocation2 + $0xb4] sm:$0xff]   ;;  %v1825_v5 = vsel %vm13316_vm11, %v10400_v10, %v1824_v6  ;;  %v13947_v45 = vrot.slane %v875_v15, 7  ;;  %455 = vst [vmem:[#allocation2 + $0xbc] sm:$0x1] %v454_v7  ;;  %v10356_v1 = vcombine.low %v13938_v24, %v13949_v52 }
 0x12b   : > { %v1446_v17 = vsel %vm13484_vm14, %v13936_v32, %v13925_v59  ;;  %v872_v56 = vor.u32 %v870_v19, %v869_v41  ;;  %v873_v2 = vrot.slane %v869_v41, 4  ;;  %v13957_v55 = vld [vmem:[#allocation2 + $0xb4] sm:$0xf]  ;;  %v13959_v57 = vld [vmem:[#allocation2 + $0xb8] sm:$0xf]  ;;  %2550 = vmatmul.mubr.bf16.gmra.mrb[36].mxu1 %v10367_v46  ;;  %2300 = vmatprep.mubr.bf16.mxu0 %v12533_v47  ;;  %v1101_v18 = vshll.u32 %v13832_v51, 16 }
 0x12c   : > { %v1100_v4 = vrot.slane %v1098_v31, 4  ;;  %v880_v13 = vor.u32 %v878_v27, %v13947_v45  ;;  %v1458_v37 = vshrl.u32 %v13957_v55, 16  ;;  %v1461_v40 = vshll.u32 %v13957_v55, 16  ;;  %v1688_v43 = vld [vmem:[#allocation2 + $0xb4] sm:$0xe] }
 0x12d   : > { %v1092_v48 = vld [vmem:[#allocation2 + $0xb0] sm:$0x1]  ;;  %v1040_v14 = vsel %vm13290_vm10, %v872_v56, %v1039_v9  ;;  %v1467_v42 = vshll.u32 %v13959_v57, 16  ;;  %v1471_v59 = vshrl.u32 %v13959_v57, 16  ;;  %v10401_v22 = vrot.slane %v1688_v43, 9 }
 0x12e   : > { %v1453_v46 = vshll.u32 %v1092_v48, 16  ;;  %v1827_v38 = vrot.slane %v1092_v48, 5  ;;  %v881_v6 = vsel %vm13280_vm9, %v873_v2, %v880_v13  ;;  %1041 = vst [vmem:[#allocation2 + $0xc0] sm:$0xf] %v1040_v14  ;;  %v1460_v12 = vrot.slane %v1458_v37, 4 }
 0x12f   : > { %1042 = vst [vmem:[#allocation2 + $0xc4] sm:$0xf] %v881_v6  ;;  %v1463_v3 = vrot.slane %v1461_v40, 5  ;;  %v13976_v26 = vrot.slane %v1467_v42, 5  ;;  %v1473_v29 = vrot.slane %v1471_v59, 4  ;;  %v1831_v63 = vrot.slane %v13959_v57, 5 }
 0x130   : > { %v1455_v49 = vrot.slane %v1453_v46, 5  ;;  %v1828_v10 = vsel %vm13316_vm11, %v1826_v58, %v1827_v38  ;;  %v10357_v32 = vcombine.low %v13972_v34, %v13982_v36  ;;  %v10369_v27 = vcombine.low %v13957_v55, %v13959_v57  ;;  %v12745_v13 = vld [vmem:[#allocation2 + $0x8] sm:$0x1]  ;;  %v12542_v57 = vld [vmem:[#allocation7 + $0x148] sm:$0xff]  }
 0x131   : > { %v10416_v33 = vcombine.low %v1825_v5, %v1828_v10  ;;  %v1036_v19 = vld [vmem:[#allocation2 + $0xbc] sm:$0x1]  ;;  %v1464_v30 = vor.u32 %v1463_v3, %v1460_v12  ;;  %v1474_v15 = vor.u32 %v1473_v29, %v13976_v26  ;;  %v13997_v9 = vsel %vm13316_vm11, %v10401_v22, %v1831_v63 }
 0x132   : > { %v1456_v41 = vsel %vm13484_vm14, %v1451_v16, %v1455_v49  ;;  %v1037_v58 = vsel %vm13263_vm2, %v865_v21, %v1036_v19  ;;  %v1103_v7 = vrot.slane %v1101_v18, 5  ;;  %v1833_v5 = vrot.slane %v1831_v63, 4 }
 0x133   : > { %v10384_v31 = vcombine.low %v1446_v17, %v1456_v41  ;;  %2301 = vmatmul.mubr.bf16.gmra.mrb[56].mxu0 %v10416_v33  ;;  %1038 = vst [vmem:[#allocation2 + $0xbc] sm:$0x1] %v1037_v58  ;;  %v1465_v47 = vrot.slane %v1464_v30, 4  ;;  %v1107_v56 = vshll.u32 %v13850_v53, 16  ;;  %v1111_v16 = vshrl.u32 %v13850_v53, 16 }
 0x134   : > { %v1104_v2 = vor.u32 %v1103_v7, %v1100_v4  ;;  %v1117_v54 = vshll.u32 %v12745_v13, 16  ;;  %v1122_v37 = vshrl.u32 %v13834_v62, 16  ;;  %v1475_v21 = vrot.slane %v1474_v15, 4 }
 0x135   : > { %2557 = vmatprep.mubr.bf16.mxu1 %v10384_v31  ;;  %v1109_v40 = vrot.slane %v1107_v56, 5  ;;  %v1125_v43 = vshll.u32 %v13834_v62, 16  ;;  %v1131_v17 = vshll.u32 %v13854_v44, 16  ;;  %v1470_v4 = vsel %vm13484_vm14, %v1465_v47, %v13976_v26 }
 0x136   : > { %2558 = vmatmul.mubr.bf16.gmra.mrb[40].mxu1 %v10368_v50  ;;  %v12535_v48 = vld [vmem:[#allocation2 + $0xc0] sm:$0xff]   ;;  %v1105_v14 = vrot.slane %v1104_v2, 4  ;;  %v1113_v42 = vrot.slane %v1111_v16, 4  ;;  %v1119_v59 = vrot.slane %v1117_v54, 5  ;;  %v1124_v22 = vrot.slane %v1122_v37, 4 }
 0x137   : > { %v1127_v46 = vrot.slane %v1125_v43, 5  ;;  %v1133_v38 = vrot.slane %v1131_v17, 5  ;;  %v1135_v6 = vshrl.u32 %v13854_v44, 16  ;;  %2308 = vmatprep.mubr.bf16.mxu0 %v12535_v48  ;;  %v1141_v39 = vshll.u32 %v12746_v23, 16 }
 0x138   : > { %v1110_v12 = vsel %vm13484_vm14, %v1105_v14, %v1109_v40  ;;  %v1114_v3 = vor.u32 %v1113_v42, %v1109_v40  ;;  %v1146_v50 = vshrl.u32 %v13938_v24, 16  ;;  %v1149_v26 = vshll.u32 %v13938_v24, 16  ;;  %v12747_v42 = vld [vmem:[#allocation2 + $0x20] sm:$0x1] }
 0x139   : > { %v1128_v29 = vor.u32 %v1127_v46, %v1124_v22  ;;  %v1137_v63 = vrot.slane %v1135_v6, 4  ;;  %v1155_v49 = vshll.u32 %v13949_v52, 16  ;;  %v1143_v33 = vrot.slane %v1141_v39, 5 }
 0x13a   : > { %v1093_v10 = vld [vmem:[#allocation2 + $0xbc] sm:$0x1]  ;;  %v1115_v18 = vrot.slane %v1114_v3, 4  ;;  %v1148_v19 = vrot.slane %v1146_v50, 4  ;;  %v1159_v30 = vshrl.u32 %v13949_v52, 16  ;;  %v1151_v47 = vrot.slane %v1149_v26, 5 }
 0x13b   : > { %v1477_v15 = vshll.u32 %v1093_v10, 16  ;;  %v1834_v41 = vrot.slane %v1093_v10, 5  ;;  %v1129_v58 = vrot.slane %v1128_v29, 4  ;;  %v1138_v7 = vor.u32 %v1137_v63, %v1133_v38  ;;  %v12748_v63 = vld [vmem:[#allocation2 + $0x2c] sm:$0x1] }
 0x13c   : > { %v1120_v31 = vsel %vm13484_vm14, %v1115_v18, %v1119_v59  ;;  %v1157_v56 = vrot.slane %v1155_v49, 5  ;;  %v1161_v2 = vrot.slane %v1159_v30, 4  ;;  %v1152_v17 = vor.u32 %v1151_v47, %v1148_v19  ;;  %v2576_v49 = vld [vmem:[#allocation2 + $0x14] sm:$0x1]  ;;  %v3006_v30 = vld [vmem:[#allocation2 + $0xc] sm:$0xe] }
 0x13d   : > { %v1479_v16 = vrot.slane %v1477_v15, 5  ;;  %v1835_v13 = vsel %vm13316_vm11, %v1833_v5, %v1834_v41  ;;  %v10370_v54 = vcombine.low %v1110_v12, %v1120_v31  ;;  %v1134_v37 = vsel %vm13484_vm14, %v1129_v58, %v1133_v38  ;;  %v2574_v31 = vld [vmem:[#allocation2 + $0xc] sm:$0xf]  ;;  %v12539_v47 = vld [vmem:[#allocation7 + $0x100] sm:$0xff]  }
 0x13e   : > { %v10417_v40 = vcombine.low %v13997_v9, %v1835_v13  ;;  %v1139_v43 = vrot.slane %v1138_v7, 4  ;;  %v1162_v48 = vor.u32 %v1161_v2, %v1157_v56  ;;  %v1165_v59 = vshll.u32 %v12747_v42, 16  ;;  %v2575_v9 = vld [vmem:[#allocation2 + $0x10] sm:$0xf]  ;;  %v14048_v42 = vld [vmem:[#allocation2 + $0x1c] sm:$0xf] }
 0x13f   : > { %v1480_v14 = vsel %vm13484_vm14, %v1475_v21, %v1479_v16  ;;  %v1170_v22 = vshrl.u32 %v13972_v34, 16  ;;  %v1173_v46 = vshll.u32 %v13972_v34, 16  ;;  %v1153_v38 = vrot.slane %v1152_v17, 4  ;;  %v2583_v34 = vld [vmem:[#allocation2 + $0x30] sm:$0xf] }
 0x140   : > { %v10385_v6 = vcombine.low %v1470_v4, %v1480_v14  ;;  %2309 = vmatmul.mubr.bf16.gmra.mrb[60].mxu0 %v10417_v40  ;;  %v1144_v5 = vsel %vm13484_vm14, %v1139_v43, %v1143_v33  ;;  %v1163_v12 = vrot.slane %v1162_v48, 4  ;;  %v1167_v23 = vrot.slane %v1165_v59, 5  ;;  %v14043_v40 = vld [vmem:[#allocation2 + $0x18] sm:$0xf] }
 0x141   : > { %2445 = vmatprep.mubr.bf16.mxu0 %v10370_v54  ;;  %v10371_v3 = vcombine.low %v1134_v37, %v1144_v5  ;;  %v1172_v39 = vrot.slane %v1170_v22, 4  ;;  %v1175_v50 = vrot.slane %v1173_v46, 5  ;;  %v1158_v21 = vsel %vm13484_vm14, %v1153_v38, %v1157_v56  ;;  %v12543_v59 = vld [vmem:[#allocation7 + $0x108] sm:$0xff]   ;;  %v12547_v22 = vld [vmem:[#allocation7 + $0x150] sm:$0xff]  }
 0x142   : > { %2565 = vmatprep.mubr.bf16.mxu1 %v10385_v6  ;;  %v1179_v29 = vshll.u32 %v13982_v36, 16  ;;  %v1183_v4 = vshrl.u32 %v13982_v36, 16  ;;  %v1189_v26 = vshll.u32 %v12748_v63, 16  ;;  %v1168_v10 = vsel %vm13484_vm14, %v1163_v12, %v1167_v23  ;;  %v3664_v23 = vld [vmem:[#allocation2 + $0x20] sm:$0x1]  ;;  %v12573_v36 = vld [vmem:[#allocation7 + $0x200] sm:$0xff]  }
 0x143   : > { %2566 = vmatmul.mubr.bf16.gmra.mrb[44].mxu1 %v10369_v27  ;;  %v1176_v18 = vor.u32 %v1175_v50, %v1172_v39  ;;  %v2632_v33 = vshll.u32 %v2575_v9, 16  ;;  %v2636_v19 = vshrl.u32 %v2575_v9, 16  ;;  %v14039_v15 = vcombine.low %v1158_v21, %v1168_v10  ;;  %v2579_v10 = vld [vmem:[#allocation2 + $0x20] sm:$0x1] }
 0x144   : > { %v1181_v41 = vrot.slane %v1179_v29, 5  ;;  %v1185_v58 = vrot.slane %v1183_v4, 4  ;;  %v1191_v7 = vrot.slane %v1189_v26, 5  ;;  %v2642_v55 = vshll.u32 %v2576_v49, 16  ;;  %v2578_v29 = vld [vmem:[#allocation2 + $0x1c] sm:$0xf] }
 0x145   : > { %v1177_v56 = vrot.slane %v1176_v18, 4  ;;  %v14041_v2 = vrot.slane %v2632_v33, 5  ;;  %v2638_v16 = vrot.slane %v2636_v19, 4  ;;  %v10466_v13 = vrot.slane %v3006_v30, 9  ;;  %v2577_v18 = vld [vmem:[#allocation2 + $0x18] sm:$0xf] }
 0x146   : > { %v1186_v27 = vor.u32 %v1185_v58, %v1181_v41  ;;  %v3072_v54 = vrot.slane %v2575_v9, 5  ;;  %v3075_v37 = vrot.slane %v2576_v49, 5  ;;  %v2644_v48 = vrot.slane %v2642_v55, 5  ;;  %v12548_v58 = vld [vmem:[#allocation7 + $0x110] sm:$0xff]  }
 0x147   : > { %v1182_v43 = vsel %vm13484_vm14, %v1177_v56, %v1181_v41  ;;  %v2639_v17 = vor.u32 %v2638_v16, %v14041_v2  ;;  %v2623_v14 = vshrl.u32 %v2574_v31, 16  ;;  %v2626_v38 = vshll.u32 %v2574_v31, 16  ;;  %v12551_v16 = vld [vmem:[#allocation7 + $0x158] sm:$0xff]  }
 0x148   : > { %2446 = vmatmul.mubr.bf16.vlgmr.msra.gmra.mrb[64].mxu0 %v10354_v25  ;;  %v1187_v46 = vrot.slane %v1186_v27, 4  ;;  %v14055_v6 = vsel %vm13316_vm11, %v10466_v13, %v3072_v54  ;;  %v3074_v5 = vrot.slane %v3072_v54, 4  ;;  %v3681_v39 = vshrl.u32 %v14043_v40, 16 }
 0x149   : > { %11364 = vmatpush3.bf16.msra.mxu0 %v12539_v47  ;;  %2453 = vmatprep.mubr.bf16.mxu0 %v10371_v3  ;;  %v2640_v12 = vrot.slane %v2639_v17, 4  ;;  %v2625_v9 = vrot.slane %v2623_v14, 4  ;;  %v3684_v50 = vshll.u32 %v14043_v40, 16  ;;  %v2628_v25 = vrot.slane %v2626_v38, 5  ;;  %v3007_v3 = vld [vmem:[#allocation2 + $0x18] sm:$0xe] }
 0x14a   : > { %11365 = vmatprep.subr.bf16.mxu0 %v12542_v57  ;;  %v1192_v51 = vsel %vm13484_vm14, %v1187_v46, %v1191_v7  ;;  %v14063_v53 = vsel %vm13316_vm11, %v3074_v5, %v3075_v37  ;;  %v3690_v21 = vshll.u32 %v14048_v42, 16  ;;  %v3683_v49 = vrot.slane %v3681_v39, 4 }
 0x14b   : > { %v14066_v4 = vcombine.low %v1182_v43, %v1192_v51  ;;  %v10498_v63 = vcombine.low %v14055_v6, %v14063_v53  ;;  %v2645_v26 = vsel %vm13484_vm14, %v2640_v12, %v2644_v48  ;;  %v2629_v33 = vor.u32 %v2628_v25, %v2625_v9  ;;  %v12557_v25 = vld [vmem:[#allocation7 + $0x120] sm:$0xff]  }
 0x14c   : > { %v3686_v19 = vrot.slane %v3684_v50, 5  ;;  %v3692_v30 = vrot.slane %v3690_v21, 5  ;;  %v3694_v41 = vshrl.u32 %v14048_v42, 16  ;;  %v3700_v7 = vshll.u32 %v3664_v23, 16 }
 0x14d   : > { %11366 = vmatpush3.bf16.msra.mxu0 %v12543_v59  ;;  %v10530_v31 = vcombine.low %v14043_v40, %v14048_v42  ;;  %v10467_v47 = vrot.slane %v3007_v3, 9  ;;  %v3079_v56 = vrot.slane %v2578_v29, 5  ;;  %v2630_v55 = vrot.slane %v2629_v33, 4  ;;  %v14085_v59 = vld [vmem:[#allocation2 + $0x24] sm:$0xf]  ;;  %v12560_v33 = vld [vmem:[#allocation7 + $0x168] sm:$0xff]  }
 0x14e   : > { %11367 = vmatprep.subr.bf16.mxu0 %v12547_v22  ;;  %v3687_v57 = vor.u32 %v3686_v19, %v3683_v49  ;;  %v3696_v27 = vrot.slane %v3694_v41, 4  ;;  %v3082_v13 = vrot.slane %v2579_v10, 5  ;;  %v3702_v54 = vrot.slane %v3700_v7, 5  ;;  %v12552_v22 = vld [vmem:[#allocation7 + $0x118] sm:$0xff]  }
 0x14f   : > { %v14077_v37 = vsel %vm13316_vm11, %v10467_v47, %v3079_v56  ;;  %v3081_v43 = vrot.slane %v3079_v56, 4  ;;  %v2647_v17 = vshrl.u32 %v2577_v18, 16  ;;  %v2635_v40 = vsel %vm13484_vm14, %v2630_v55, %v14041_v2  ;;  %v12556_v2 = vld [vmem:[#allocation7 + $0x160] sm:$0xff]  }
 0x150   : > { %2454 = vmatmul.mubr.bf16.gmra.mrb[68].mxu0 %v10355_v20  ;;  %v3688_v48 = vrot.slane %v3687_v57, 4  ;;  %v3697_v14 = vor.u32 %v3696_v27, %v3692_v30  ;;  %v2650_v42 = vshll.u32 %v2577_v18, 16  ;;  %v14088_v46 = vcombine.low %v2635_v40, %v2645_v26  ;;  %v14094_v20 = vld [vmem:[#allocation2 + $0x28] sm:$0xf]  ;;  %v14103_v26 = vld [vmem:[#allocation2 + $0x2c] sm:$0x1] }
 0x151   : > { %11368 = vmatpush3.bf16.msra.mxu0 %v12548_v58  ;;  %2461 = vmatprep.mubr.bf16.mxu0 %v14039_v15  ;;  %v14092_v5 = vsel %vm13316_vm11, %v3081_v43, %v3082_v13  ;;  %v2649_v62 = vrot.slane %v2647_v17, 4  ;;  %v2656_v44 = vshll.u32 %v2578_v29, 16  ;;  %v2660_v39 = vshrl.u32 %v2578_v29, 16 }
 0x152   : > { %11369 = vmatprep.subr.bf16.mxu0 %v12551_v16  ;;  %v3693_v38 = vsel %vm13484_vm14, %v3688_v48, %v3692_v30  ;;  %v3698_v12 = vrot.slane %v3697_v14, 4  ;;  %v10499_v9 = vcombine.low %v14077_v37, %v14092_v5  ;;  %v2652_v15 = vrot.slane %v2650_v42, 5  ;;  %v2582_v16 = vld [vmem:[#allocation2 + $0x2c] sm:$0x1]  ;;  %v2581_v48 = vld [vmem:[#allocation2 + $0x28] sm:$0xf] }
 0x153   : > { %v2658_v23 = vrot.slane %v2656_v44, 5  ;;  %v2666_v50 = vshll.u32 %v2579_v10, 16  ;;  %v3705_v51 = vshrl.u32 %v14085_v59, 16  ;;  %v3708_v49 = vshll.u32 %v14085_v59, 16  ;;  %v3008_v10 = vld [vmem:[#allocation2 + $0x24] sm:$0xe] }
 0x154   : > { %v3703_v21 = vsel %vm13484_vm14, %v3698_v12, %v3702_v54  ;;  %v2653_v3 = vor.u32 %v2652_v15, %v2649_v62  ;;  %v3714_v18 = vshll.u32 %v14094_v20, 16  ;;  %v2662_v30 = vrot.slane %v2660_v39, 4  ;;  %v2580_v54 = vld [vmem:[#allocation2 + $0x24] sm:$0xf]  ;;  %v12561_v42 = vld [vmem:[#allocation7 + $0x128] sm:$0xff]  }
 0x155   : > { %11370 = vmatpush3.bf16.msra.mxu0 %v12552_v22  ;;  %v10546_v19 = vcombine.low %v3693_v38, %v3703_v21  ;;  %v2668_v41 = vrot.slane %v2666_v50, 5  ;;  %v3707_v29 = vrot.slane %v3705_v51, 4  ;;  %v3710_v7 = vrot.slane %v3708_v49, 5  ;;  %v12565_v38 = vld [vmem:[#allocation7 + $0x170] sm:$0xff]  }
 0x156   : > { %11371 = vmatprep.subr.bf16.mxu0 %v12556_v2  ;;  %v2654_v58 = vrot.slane %v2653_v3, 4  ;;  %v3716_v47 = vrot.slane %v3714_v18, 5  ;;  %v3718_v56 = vshrl.u32 %v14094_v20, 16  ;;  %v2663_v55 = vor.u32 %v2662_v30, %v2658_v23  ;;  %v12566_v3 = vld [vmem:[#allocation7 + $0x130] sm:$0xff]   ;;  %v14134_v30 = vld [vmem:[#allocation2 + $0x34] sm:$0xf] }
 0x157   : > { %4384 = vmatprep.mubr.bf16.mxu1 %v10546_v19  ;;  %v3724_v57 = vshll.u32 %v14103_v26, 16  ;;  %v10531_v13 = vcombine.low %v14085_v59, %v14094_v20  ;;  %v3711_v17 = vor.u32 %v3710_v7, %v3707_v29  ;;  %v10468_v14 = vrot.slane %v3008_v10, 9  ;;  %v3666_v7 = vld [vmem:[#allocation2 + $0x38] sm:$0x1] }
 0x158   : > { %2462 = vmatmul.mubr.bf16.gmra.mrb[72].mxu0 %v10356_v1  ;;  %4385 = vmatmul.mubr.bf16.vlgmr.msra.gmra.mrb[48].mxu1 %v10530_v31  ;;  %v2659_v43 = vsel %vm13484_vm14, %v2654_v58, %v2658_v23  ;;  %v3720_v40 = vrot.slane %v3718_v56, 4  ;;  %v2664_v22 = vrot.slane %v2663_v55, 4  ;;  %v3086_v44 = vrot.slane %v2581_v48, 5  ;;  %v12576_v20 = vld [vmem:[#allocation7 + $0x208] sm:$0xff]  }
 0x159   : > { %11372 = vmatpush3.bf16.msra.mxu0 %v12557_v25  ;;  %2469 = vmatprep.mubr.bf16.mxu0 %v14066_v4  ;;  %v3726_v62 = vrot.slane %v3724_v57, 5  ;;  %v3089_v2 = vrot.slane %v2582_v16, 5  ;;  %v3712_v24 = vrot.slane %v3711_v17, 4  ;;  %v2671_v1 = vshrl.u32 %v2580_v54, 16  ;;  %v14124_v4 = vld [vmem:[#allocation2 + $0x30] sm:$0xf] }
 0x15a   : > { %11373 = vmatprep.subr.bf16.mxu0 %v12560_v33  ;;  %v3721_v52 = vor.u32 %v3720_v40, %v3716_v47  ;;  %v2674_v31 = vshll.u32 %v2580_v54, 16  ;;  %v2669_v12 = vsel %vm13484_vm14, %v2664_v22, %v2668_v41  ;;  %v14122_v15 = vsel %vm13316_vm11, %v10468_v14, %v3086_v44  ;;  %v12569_v41 = vld [vmem:[#allocation7 + $0x178] sm:$0xff]  }
 0x15b   : > { %v3088_v23 = vrot.slane %v3086_v44, 4  ;;  %v2680_v39 = vshll.u32 %v2581_v48, 16  ;;  %v14126_v50 = vcombine.low %v2659_v43, %v2669_v12  ;;  %v3717_v51 = vsel %vm13484_vm14, %v3712_v24, %v3716_v47  ;;  %v3009_v43 = vld [vmem:[#allocation2 + $0x30] sm:$0xe]  ;;  %v12570_v22 = vld [vmem:[#allocation7 + $0x138] sm:$0xff]  }
 0x15c   : > { %v3722_v25 = vrot.slane %v3721_v52, 4  ;;  %v2673_v21 = vrot.slane %v2671_v1, 4  ;;  %v2676_v18 = vrot.slane %v2674_v31, 5  ;;  %v2684_v19 = vshrl.u32 %v2581_v48, 16 }
 0x15d   : > { %11374 = vmatpush3.bf16.msra.mxu0 %v12561_v42  ;;  %v14132_v49 = vsel %vm13316_vm11, %v3088_v23, %v3089_v2  ;;  %v2682_v33 = vrot.slane %v2680_v39, 5  ;;  %v2690_v58 = vshll.u32 %v2582_v16, 16  ;;  %v3729_v47 = vshrl.u32 %v14124_v4, 16  ;;  %v2584_v16 = vld [vmem:[#allocation2 + $0x34] sm:$0xf] }
 0x15e   : > { %11375 = vmatprep.subr.bf16.mxu0 %v12565_v38  ;;  %v3727_v29 = vsel %vm13484_vm14, %v3722_v25, %v3726_v62  ;;  %v10500_v10 = vcombine.low %v14122_v15, %v14132_v49  ;;  %v2677_v55 = vor.u32 %v2676_v18, %v2673_v21  ;;  %v2686_v57 = vrot.slane %v2684_v19, 4  ;;  %v2585_v42 = vld [vmem:[#allocation2 + $0x38] sm:$0x1]  ;;  %v14165_v19 = vld [vmem:[#allocation2 + $0x3c] sm:$0xf]  ;;  %v12585_v15 = vld [vmem:[#allocation7 + $0x220] sm:$0xff]  }
 0x15f   : > { %v10547_v56 = vcombine.low %v3717_v51, %v3727_v29  ;;  %v3732_v54 = vshll.u32 %v14124_v4, 16  ;;  %v2692_v17 = vrot.slane %v2690_v58, 5  ;;  %v3731_v40 = vrot.slane %v3729_v47, 4 }
 0x160   : > { %2470 = vmatmul.mubr.bf16.gmra.mrb[76].mxu0 %v10357_v32  ;;  %v3738_v48 = vshll.u32 %v14134_v30, 16  ;;  %v3742_v14 = vshrl.u32 %v14134_v30, 16  ;;  %v2678_v62 = vrot.slane %v2677_v55, 4  ;;  %v2687_v44 = vor.u32 %v2686_v57, %v2682_v33 }
 0x161   : > { %11376 = vmatpush3.bf16.msra.mxu0 %v12566_v3  ;;  %3470 = vmatprep.mubr.bf16.mxu0 %v10498_v63  ;;  %v3734_v2 = vrot.slane %v3732_v54, 5  ;;  %v3748_v38 = vshll.u32 %v3666_v7, 16  ;;  %v10532_v52 = vcombine.low %v14124_v4, %v14134_v30  ;;  %v10469_v1 = vrot.slane %v3009_v43, 9  ;;  %v14169_v7 = vld [vmem:[#allocation2 + $0x40] sm:$0xf] }
 0x162   : > { %11377 = vmatprep.subr.bf16.mxu0 %v12569_v41  ;;  %4392 = vmatprep.mubr.bf16.mxu1 %v10547_v56  ;;  %v3740_v32 = vrot.slane %v3738_v48, 5  ;;  %v3744_v24 = vrot.slane %v3742_v14, 4  ;;  %v2683_v6 = vsel %vm13484_vm14, %v2678_v62, %v2682_v33  ;;  %v2688_v53 = vrot.slane %v2687_v44, 4  ;;  %v3667_v54 = vld [vmem:[#allocation2 + $0x44] sm:$0x1] }
 0x163   : > { %4393 = vmatmul.mubr.bf16.gmra.mrb[52].mxu1 %v10531_v13  ;;  %v3735_v63 = vor.u32 %v3734_v2, %v3731_v40  ;;  %v3750_v31 = vrot.slane %v3748_v38, 5  ;;  %v3093_v23 = vrot.slane %v2584_v16, 5  ;;  %v3096_v39 = vrot.slane %v2585_v42, 5  ;;  %v12579_v48 = vld [vmem:[#allocation7 + $0x210] sm:$0xff]   ;;  %v3010_v62 = vld [vmem:[#allocation2 + $0x3c] sm:$0xe] }
 0x164   : > { %v3745_v12 = vor.u32 %v3744_v24, %v3740_v32  ;;  %v2695_v51 = vshrl.u32 %v2583_v34, 16  ;;  %v2693_v25 = vsel %vm13484_vm14, %v2688_v53, %v2692_v17  ;;  %v2698_v21 = vshll.u32 %v2583_v34, 16  ;;  %v2588_v2 = vld [vmem:[#allocation2 + $0x44] sm:$0x1]  ;;  %v2587_v24 = vld [vmem:[#allocation2 + $0x40] sm:$0xf] }
 0x165   : > { %11378 = vmatpush3.bf16.msra.mxu0 %v12570_v22  ;;  %v3736_v4 = vrot.slane %v3735_v63, 4  ;;  %v2704_v3 = vshll.u32 %v2584_v16, 16  ;;  %v14159_v59 = vcombine.low %v2683_v6, %v2693_v25  ;;  %v14163_v18 = vsel %vm13316_vm11, %v10469_v1, %v3093_v23  ;;  %v2586_v1 = vld [vmem:[#allocation2 + $0x3c] sm:$0xf] }
 0x166   : > { %12107 = vmatprep.subr.bf16.mxu0 %v12573_v36  ;;  %v3746_v13 = vrot.slane %v3745_v12, 4  ;;  %v3095_v33 = vrot.slane %v3093_v23, 4  ;;  %v2697_v41 = vrot.slane %v2695_v51, 4  ;;  %v2700_v29 = vrot.slane %v2698_v21, 5 }
 0x167   : > { %v3741_v30 = vsel %vm13484_vm14, %v3736_v4, %v3740_v32  ;;  %v2706_v58 = vrot.slane %v2704_v3, 5  ;;  %v2708_v55 = vshrl.u32 %v2584_v16, 16  ;;  %v2714_v57 = vshll.u32 %v2585_v42, 16 }
 0x168   : > { %3471 = vmatmul.mubr.bf16.vlgmr.msra.gmra.mrb[80].mxu0 %v14088_v46  ;;  %v3751_v47 = vsel %vm13484_vm14, %v3746_v13, %v3750_v31  ;;  %v14176_v56 = vsel %vm13316_vm11, %v3095_v33, %v3096_v39  ;;  %v2701_v46 = vor.u32 %v2700_v29, %v2697_v41  ;;  %v3753_v40 = vshrl.u32 %v14165_v19, 16 }
 0x169   : > { %12108 = vmatpush3.bf16.msra.mxu0 %v12573_v36  ;;  %3478 = vmatprep.mubr.bf16.mxu0 %v10499_v9  ;;  %v10548_v43 = vcombine.low %v3741_v30, %v3751_v47  ;;  %v10501_v17 = vcombine.low %v14163_v18, %v14176_v56  ;;  %v2710_v14 = vrot.slane %v2708_v55, 4  ;;  %v2716_v22 = vrot.slane %v2714_v57, 5  ;;  %v14203_v55 = vld [vmem:[#allocation2 + $0x48] sm:$0xf] }
 0x16a   : > { %12109 = vmatprep.subr.bf16.mxu0 %v12576_v20  ;;  %v3756_v16 = vshll.u32 %v14165_v19, 16  ;;  %v3762_v42 = vshll.u32 %v14169_v7, 16  ;;  %v2702_v44 = vrot.slane %v2701_v46, 4  ;;  %v3755_v37 = vrot.slane %v3753_v40, 4  ;;  %v14211_v46 = vld [vmem:[#allocation2 + $0x4c] sm:$0xf] }
 0x16b   : > { %4400 = vmatprep.mubr.bf16.mxu1 %v10548_v43  ;;  %v3766_v5 = vshrl.u32 %v14169_v7, 16  ;;  %v3772_v9 = vshll.u32 %v3667_v54, 16  ;;  %v2711_v38 = vor.u32 %v2710_v14, %v2706_v58  ;;  %v10533_v32 = vcombine.low %v14165_v19, %v14169_v7  ;;  %v3668_v14 = vld [vmem:[#allocation2 + $0x50] sm:$0x1] }
 0x16c   : > { %4401 = vmatmul.mubr.bf16.gmra.mrb[56].mxu1 %v10532_v52  ;;  %v3758_v34 = vrot.slane %v3756_v16, 5  ;;  %v3764_v36 = vrot.slane %v3762_v42, 5  ;;  %v2707_v6 = vsel %vm13484_vm14, %v2702_v44, %v2706_v58  ;;  %v10470_v31 = vrot.slane %v3010_v62, 9  ;;  %v12582_v52 = vld [vmem:[#allocation7 + $0x218] sm:$0xff]  }
 0x16d   : > { %12110 = vmatpush3.bf16.msra.mxu0 %v12576_v20  ;;  %v3768_v53 = vrot.slane %v3766_v5, 4  ;;  %v3774_v63 = vrot.slane %v3772_v9, 5  ;;  %v2712_v12 = vrot.slane %v2711_v38, 4  ;;  %v3100_v39 = vrot.slane %v2587_v24, 5  ;;  %v3011_v5 = vld [vmem:[#allocation2 + $0x48] sm:$0xe] }
 0x16e   : > { %v3759_v23 = vor.u32 %v3758_v34, %v3755_v37  ;;  %v3103_v51 = vrot.slane %v2588_v2, 5  ;;  %12111 = vmatprep.subr.bf16.mxu0 %v12579_v48  ;;  %v2719_v4 = vshrl.u32 %v2586_v1, 16  ;;  %v2722_v21 = vshll.u32 %v2586_v1, 16  ;;  %v14221_v37 = vld [vmem:[#allocation2 + $0x50] sm:$0x1]  ;;  %v12588_v1 = vld [vmem:[#allocation7 + $0x228] sm:$0xff]  }
 0x16f   : > { %v3769_v25 = vor.u32 %v3768_v53, %v3764_v36  ;;  %v2728_v3 = vshll.u32 %v2587_v24, 16  ;;  %v2717_v20 = vsel %vm13484_vm14, %v2712_v12, %v2716_v22  ;;  %v14196_v33 = vsel %vm13316_vm11, %v10470_v31, %v3100_v39  ;;  %v2589_v12 = vld [vmem:[#allocation2 + $0x48] sm:$0xf] }
 0x170   : > { %3479 = vmatmul.mubr.bf16.gmra.mrb[84].mxu0 %v14126_v50  ;;  %v3760_v13 = vrot.slane %v3759_v23, 4  ;;  %v3102_v30 = vrot.slane %v3100_v39, 4  ;;  %v14201_v41 = vcombine.low %v2707_v6, %v2717_v20  ;;  %v2721_v58 = vrot.slane %v2719_v4, 4  ;;  %v2590_v4 = vld [vmem:[#allocation2 + $0x4c] sm:$0xf] }
 0x171   : > { %3486 = vmatprep.mubr.bf16.mxu0 %v10500_v10  ;;  %v3770_v29 = vrot.slane %v3769_v25, 4  ;;  %v2724_v47 = vrot.slane %v2722_v21, 5  ;;  %12112 = vmatpush3.bf16.msra.mxu0 %v12579_v48  ;;  %v2730_v54 = vrot.slane %v2728_v3, 5  ;;  %v2732_v43 = vshrl.u32 %v2587_v24, 16 }
 0x172   : > { %v3765_v50 = vsel %vm13484_vm14, %v3760_v13, %v3764_v36  ;;  %v14209_v57 = vsel %vm13316_vm11, %v3102_v30, %v3103_v51  ;;  %12113 = vmatprep.subr.bf16.mxu0 %v12582_v52  ;;  %v2738_v48 = vshll.u32 %v2588_v2, 16  ;;  %v3777_v62 = vshrl.u32 %v14203_v55, 16 }
 0x173   : > { %v3775_v49 = vsel %vm13484_vm14, %v3770_v29, %v3774_v63  ;;  %v10502_v10 = vcombine.low %v14196_v33, %v14209_v57  ;;  %v2725_v40 = vor.u32 %v2724_v47, %v2721_v58  ;;  %v2734_v42 = vrot.slane %v2732_v43, 4  ;;  %v14243_v29 = vld [vmem:[#allocation2 + $0x54] sm:$0xf] }
 0x174   : > { %v10549_v16 = vcombine.low %v3765_v50, %v3775_v49  ;;  %v3780_v44 = vshll.u32 %v14203_v55, 16  ;;  %v2740_v34 = vrot.slane %v2738_v48, 5  ;;  %v3786_v36 = vshll.u32 %v14211_v46, 16  ;;  %v12591_v50 = vld [vmem:[#allocation7 + $0x230] sm:$0xff]   ;;  %v14257_v48 = vld [vmem:[#allocation2 + $0x58] sm:$0xf] }
 0x175   : > { %v2726_v38 = vrot.slane %v2725_v40, 4  ;;  %v3790_v2 = vshrl.u32 %v14211_v46, 16  ;;  %12114 = vmatpush3.bf16.msra.mxu0 %v12582_v52  ;;  %v2735_v6 = vor.u32 %v2734_v42, %v2730_v54  ;;  %v3779_v53 = vrot.slane %v3777_v62, 4 }
 0x176   : > { %4408 = vmatprep.mubr.bf16.mxu1 %v10549_v16  ;;  %v3782_v63 = vrot.slane %v3780_v44, 5  ;;  %v3796_v31 = vshll.u32 %v3668_v14, 16  ;;  %12115 = vmatprep.subr.bf16.mxu0 %v12585_v15  ;;  %v3788_v51 = vrot.slane %v3786_v36, 5  ;;  %v10534_v25 = vcombine.low %v14203_v55, %v14211_v46 }
 0x177   : > { %4409 = vmatmul.mubr.bf16.gmra.mrb[60].mxu1 %v10533_v32  ;;  %v2731_v39 = vsel %vm13484_vm14, %v2726_v38, %v2730_v54  ;;  %v3792_v52 = vrot.slane %v3790_v2, 4  ;;  %v2736_v21 = vrot.slane %v2735_v6, 4  ;;  %v10471_v13 = vrot.slane %v3011_v5, 9  ;;  %v3669_v5 = vld [vmem:[#allocation2 + $0x5c] sm:$0x1] }
 0x178   : > { %3487 = vmatmul.mubr.bf16.gmra.mrb[88].mxu0 %v14159_v59  ;;  %v3783_v3 = vor.u32 %v3782_v63, %v3779_v53  ;;  %v3798_v20 = vrot.slane %v3796_v31, 5  ;;  %v3107_v7 = vrot.slane %v2590_v4, 5  ;;  %v3110_v32 = vrot.slane %v14221_v37, 5  ;;  %v3012_v53 = vld [vmem:[#allocation2 + $0x54] sm:$0xe] }
 0x179   : > { %3494 = vmatprep.mubr.bf16.mxu0 %v10501_v17  ;;  %v3793_v19 = vor.u32 %v3792_v52, %v3788_v51  ;;  %v2743_v30 = vshrl.u32 %v2589_v12, 16  ;;  %12116 = vmatpush3.bf16.msra.mxu0 %v12585_v15  ;;  %v2741_v58 = vsel %vm13484_vm14, %v2736_v21, %v2740_v34  ;;  %v2746_v47 = vshll.u32 %v2589_v12, 16 }
 0x17a   : > { %v3784_v59 = vrot.slane %v3783_v3, 4  ;;  %v2752_v55 = vshll.u32 %v2590_v4, 16  ;;  %12117 = vmatprep.subr.bf16.mxu0 %v12588_v1  ;;  %v14247_v54 = vcombine.low %v2731_v39, %v2741_v58  ;;  %v14251_v56 = vsel %vm13316_vm11, %v10471_v13, %v3107_v7  ;;  %v2594_v3 = vld [vmem:[#allocation2 + $0x5c] sm:$0x1] }
 0x17b   : > { %v3794_v18 = vrot.slane %v3793_v19, 4  ;;  %v3109_v17 = vrot.slane %v3107_v7, 4  ;;  %v2745_v15 = vrot.slane %v2743_v30, 4  ;;  %v2748_v49 = vrot.slane %v2746_v47, 5 }
 0x17c   : > { %v14217_v22 = vpop.f32.mrb[0].mxu0  ;;  %v3789_v46 = vsel %vm13484_vm14, %v3784_v59, %v3788_v51  ;;  %v2754_v40 = vrot.slane %v2752_v55, 5  ;;  %v2756_v62 = vshrl.u32 %v2590_v4, 16  ;;  %v2762_v44 = vshll.u32 %v14221_v37, 16  ;;  %v12594_v51 = vld [vmem:[#allocation7 + $0x238] sm:$0xff]  }
 0x17d   : > { %v14223_v9 = vpop.f32.mrb[1].mxu0  ;;  %v3799_v16 = vsel %vm13484_vm14, %v3794_v18, %v3798_v20  ;;  %v14265_v42 = vsel %vm13316_vm11, %v3109_v17, %v3110_v32  ;;  %12118 = vmatpush3.bf16.msra.mxu0 %v12588_v1  ;;  %v2749_v2 = vor.u32 %v2748_v49, %v2745_v15  ;;  %v3801_v6 = vshrl.u32 %v14243_v29, 16  ;;  %v2593_v32 = vld [vmem:[#allocation2 + $0x58] sm:$0xf] }
 0x17e   : > { %v14227_v24 = vpop.f32.mrb[2].mxu0  ;;  %v10550_v34 = vcombine.low %v3789_v46, %v3799_v16  ;;  %v10503_v36 = vcombine.low %v14251_v56, %v14265_v42  ;;  %12119 = vmatprep.subr.bf16.mxu0 %v12591_v50  ;;  %v2758_v31 = vrot.slane %v2756_v62, 4  ;;  %v2764_v12 = vrot.slane %v2762_v44, 5  ;;  %v14294_v62 = vld [vmem:[#allocation2 + $0x64] sm:$0xf] }
 0x17f   : > { %v14229_v23 = vpop.f32.mrb[3].mxu0  ;;  %v3804_v39 = vshll.u32 %v14243_v29, 16  ;;  %v3810_v37 = vshll.u32 %v14257_v48, 16  ;;  %v2750_v1 = vrot.slane %v2749_v2, 4  ;;  %v3803_v52 = vrot.slane %v3801_v6, 4 }
 0x180   : > { %3495 = vmatmul.mubr.bf16.gmra.mrb[92].mxu0 %v14201_v41  ;;  %4416 = vmatprep.mubr.bf16.mxu1 %v10550_v34  ;;  %v3814_v4 = vshrl.u32 %v14257_v48, 16  ;;  %v3820_v21 = vshll.u32 %v3669_v5, 16  ;;  %v2759_v20 = vor.u32 %v2758_v31, %v2754_v40  ;;  %v10535_v7 = vcombine.low %v14243_v29, %v14257_v48  ;;  %v2592_v41 = vld [vmem:[#allocation2 + $0x54] sm:$0xf] }
 0x181   : > { %3502 = vmatprep.mubr.bf16.mxu0 %v10502_v10  ;;  %4417 = vmatmul.mubr.bf16.gmra.mrb[64].mxu1 %v10534_v25  ;;  %v3806_v13 = vrot.slane %v3804_v39, 5  ;;  %v3812_v19 = vrot.slane %v3810_v37, 5  ;;  %v2755_v30 = vsel %vm13484_vm14, %v2750_v1, %v2754_v40  ;;  %v10472_v47 = vrot.slane %v3012_v53, 9  ;;  %v14292_v40 = vld [vmem:[#allocation2 + $0x60] sm:$0xf] }
 0x182   : > { %v3816_v58 = vrot.slane %v3814_v4, 4  ;;  %v3822_v59 = vrot.slane %v3820_v21, 5  ;;  %12120 = vmatpush3.bf16.msra.mxu0 %v12591_v50  ;;  %v2760_v55 = vrot.slane %v2759_v20, 4  ;;  %v3114_v33 = vrot.slane %v2593_v32, 5  ;;  %v3670_v39 = vld [vmem:[#allocation2 + $0x68] sm:$0x1] }
 0x183   : > { %v3807_v18 = vor.u32 %v3806_v13, %v3803_v52  ;;  %v3117_v57 = vrot.slane %v2594_v3, 5  ;;  %12121 = vmatprep.subr.bf16.mxu0 %v12594_v51  ;;  %v2767_v25 = vshrl.u32 %v2592_v41, 16  ;;  %v2770_v56 = vshll.u32 %v2592_v41, 16  ;;  %v2597_v13 = vld [vmem:[#allocation2 + $0x68] sm:$0x1] }
 0x184   : > { %v14253_v43 = vpop.f32.mrb[4].mxu0  ;;  %v3817_v10 = vor.u32 %v3816_v58, %v3812_v19  ;;  %v2776_v17 = vshll.u32 %v2593_v32, 16  ;;  %v2765_v29 = vsel %vm13484_vm14, %v2760_v55, %v2764_v12  ;;  %v14290_v15 = vsel %vm13316_vm11, %v10472_v47, %v3114_v33 }
 0x185   : > { %v14259_v14 = vpop.f32.mrb[5].mxu0  ;;  %v3808_v46 = vrot.slane %v3807_v18, 4  ;;  %v3116_v49 = vrot.slane %v3114_v33, 4  ;;  %v10487_v50 = vcombine.low %v2755_v30, %v2765_v29  ;;  %v2769_v16 = vrot.slane %v2767_v25, 4  ;;  %v3013_v30 = vld [vmem:[#allocation2 + $0x60] sm:$0xe] }
 0x186   : > { %v14268_v38 = vpop.f32.mrb[6].mxu0  ;;  %v3818_v48 = vrot.slane %v3817_v10, 4  ;;  %v2772_v42 = vrot.slane %v2770_v56, 5  ;;  %12122 = vmatpush3.bf16.msra.mxu0 %v12594_v51  ;;  %v2778_v34 = vrot.slane %v2776_v17, 5  ;;  %v2780_v2 = vshrl.u32 %v2593_v32, 16 }
 0x187   : > { %v14273_v63 = vpop.f32.mrb[7].mxu0  ;;  %v3813_v44 = vsel %vm13484_vm14, %v3808_v46, %v3812_v19  ;;  %v3118_v5 = vsel %vm13316_vm11, %v3116_v49, %v3117_v57  ;;  %v2786_v12 = vshll.u32 %v2594_v3, 16  ;;  %v3825_v1 = vshrl.u32 %v14292_v40, 16  ;;  %v2595_v33 = vld [vmem:[#allocation2 + $0x60] sm:$0xf] }
 0x188   : > { %3503 = vmatmul.mubr.bf16.gmra.mrb[96].mxu0 %v14247_v54  ;;  %v3823_v6 = vsel %vm13484_vm14, %v3818_v48, %v3822_v59  ;;  %v10504_v53 = vcombine.low %v14290_v15, %v3118_v5  ;;  %v2773_v31 = vor.u32 %v2772_v42, %v2769_v16  ;;  %v2782_v51 = vrot.slane %v2780_v2, 4  ;;  %v2596_v29 = vld [vmem:[#allocation2 + $0x64] sm:$0xf] }
 0x189   : > { %3510 = vmatprep.mubr.bf16.mxu0 %v10503_v36  ;;  %v10551_v37 = vcombine.low %v3813_v44, %v3823_v6  ;;  %v3828_v52 = vshll.u32 %v14292_v40, 16  ;;  %v2788_v21 = vrot.slane %v2786_v12, 5  ;;  %v3834_v20 = vshll.u32 %v14294_v62, 16  ;;  %v14334_v6 = vld [vmem:[#allocation2 + $0x6c] sm:$0xf] }
 0x18a   : > { %v2774_v4 = vrot.slane %v2773_v31, 4  ;;  %v3838_v54 = vshrl.u32 %v14294_v62, 16  ;;  %v2783_v32 = vor.u32 %v2782_v51, %v2778_v34  ;;  %v3827_v3 = vrot.slane %v3825_v1, 4  ;;  %v3671_v51 = vld [vmem:[#allocation2 + $0x74] sm:$0x1] }
 0x18b   : > { %4424 = vmatprep.mubr.bf16.mxu1 %v10551_v37  ;;  %v3830_v41 = vrot.slane %v3828_v52, 5  ;;  %v3844_v36 = vshll.u32 %v3670_v39, 16  ;;  %v3836_v47 = vrot.slane %v3834_v20, 5  ;;  %v10536_v18 = vcombine.low %v14292_v40, %v14294_v62  ;;  %v14340_v37 = vld [vmem:[#allocation2 + $0x70] sm:$0xf] }
 0x18c   : > { %4425 = vmatmul.mubr.bf16.gmra.mrb[68].mxu1 %v10535_v7  ;;  %v2779_v59 = vsel %vm13484_vm14, %v2774_v4, %v2778_v34  ;;  %v3840_v55 = vrot.slane %v3838_v54, 4  ;;  %v2784_v10 = vrot.slane %v2783_v32, 4  ;;  %v14320_v17 = vadd.f32 %v14223_v9, %v14217_v22 }
 0x18d   : > { %v3831_v25 = vor.u32 %v3830_v41, %v3827_v3  ;;  %v3846_v56 = vrot.slane %v3844_v36, 5  ;;  %v14326_v15 = vadd.f32 %v14229_v23, %v14227_v24  ;;  %v10473_v49 = vrot.slane %v3013_v30, 9 }
 0x18e   : > { %17293 = vst [vmem:[#allocation22_spill] sm:$0xff] %v14320_v17  ;;  %v3841_v46 = vor.u32 %v3840_v55, %v3836_v47  ;;  %v3121_v40 = vrot.slane %v2596_v29, 5  ;;  %v2789_v48 = vsel %vm13484_vm14, %v2784_v10, %v2788_v21  ;;  %v3124_v42 = vrot.slane %v2597_v13, 5 }
 0x18f   : > { %17294 = vst [vmem:[#allocation23_spill] sm:$0xff] %v14326_v15  ;;  %v3832_v16 = vrot.slane %v3831_v25, 4  ;;  %v2791_v62 = vshrl.u32 %v2595_v33, 16  ;;  %v10488_v44 = vcombine.low %v2779_v59, %v2789_v48  ;;  %v2794_v34 = vshll.u32 %v2595_v33, 16 }
 0x190   : > { %v14308_v19 = vpop.f32.mrb[8].mxu0  ;;  %3511 = vmatmul.mubr.bf16.gmra.mrb[100].mxu0 %v10487_v50  ;;  %v3842_v22 = vrot.slane %v3841_v46, 4  ;;  %v3122_v9 = vsel %vm13316_vm11, %v10473_v49, %v3121_v40  ;;  %v3123_v5 = vrot.slane %v3121_v40, 4  ;;  %v2800_v2 = vshll.u32 %v2596_v29, 16 }
 0x191   : > { %v14310_v58 = vpop.f32.mrb[9].mxu0  ;;  %3518 = vmatprep.mubr.bf16.mxu0 %v10504_v53  ;;  %v3837_v24 = vsel %vm13484_vm14, %v3832_v16, %v3836_v47  ;;  %v2793_v23 = vrot.slane %v2791_v62, 4  ;;  %v2804_v12 = vshrl.u32 %v2596_v29, 16  ;;  %v2810_v39 = vshll.u32 %v2597_v13, 16  ;;  %v2600_v47 = vld [vmem:[#allocation2 + $0x74] sm:$0x1] }
 0x192   : > { %v14316_v57 = vpop.f32.mrb[10].mxu0  ;;  %v3847_v31 = vsel %vm13484_vm14, %v3842_v22, %v3846_v56  ;;  %v3125_v50 = vsel %vm13316_vm11, %v3123_v5, %v3124_v42  ;;  %v2796_v52 = vrot.slane %v2794_v34, 5  ;;  %v2802_v4 = vrot.slane %v2800_v2, 5  ;;  %v3014_v29 = vld [vmem:[#allocation2 + $0x6c] sm:$0xe] }
 0x193   : > { %v14322_v7 = vpop.f32.mrb[11].mxu0  ;;  %v10552_v53 = vcombine.low %v3837_v24, %v3847_v31  ;;  %v10505_v1 = vcombine.low %v3122_v9, %v3125_v50  ;;  %v2806_v20 = vrot.slane %v2804_v12, 4  ;;  %v2812_v54 = vrot.slane %v2810_v39, 5  ;;  %v2598_v42 = vld [vmem:[#allocation2 + $0x6c] sm:$0xf] }
 0x194   : > { %v3849_v32 = vshrl.u32 %v14334_v6, 16  ;;  %v3852_v3 = vshll.u32 %v14334_v6, 16  ;;  %v2797_v36 = vor.u32 %v2796_v52, %v2793_v23  ;;  %v3858_v13 = vshll.u32 %v14340_v37, 16  ;;  %v2599_v5 = vld [vmem:[#allocation2 + $0x70] sm:$0xf] }
 0x195   : > { %4432 = vmatprep.mubr.bf16.mxu1 %v10552_v53  ;;  %v3862_v30 = vshrl.u32 %v14340_v37, 16  ;;  %v3868_v59 = vshll.u32 %v3671_v51, 16  ;;  %v2807_v33 = vor.u32 %v2806_v20, %v2802_v4  ;;  %v10537_v56 = vcombine.low %v14334_v6, %v14340_v37  ;;  %v14370_v12 = vld [vmem:[#allocation2 + $0x78] sm:$0xf] }
 0x196   : > { %4433 = vmatmul.mubr.bf16.gmra.mrb[72].mxu1 %v10536_v18  ;;  %v3851_v10 = vrot.slane %v3849_v32, 4  ;;  %v3854_v25 = vrot.slane %v3852_v3, 5  ;;  %v2798_v49 = vrot.slane %v2797_v36, 4  ;;  %v3860_v40 = vrot.slane %v3858_v13, 5  ;;  %v3672_v32 = vld [vmem:[#allocation2 + $0x80] sm:$0x1] }
 0x197   : > { %v3864_v48 = vrot.slane %v3862_v30, 4  ;;  %v3870_v16 = vrot.slane %v3868_v59, 5  ;;  %v2808_v62 = vrot.slane %v2807_v33, 4  ;;  %v14358_v18 = vadd.f32 %v14259_v14, %v14253_v43 }
 0x198   : > { %3519 = vmatmul.mubr.bf16.gmra.mrb[104].mxu0 %v10488_v44  ;;  %v3855_v22 = vor.u32 %v3854_v25, %v3851_v10  ;;  %v14362_v9 = vadd.f32 %v14273_v63, %v14268_v38  ;;  %v2803_v24 = vsel %vm13484_vm14, %v2798_v49, %v2802_v4  ;;  %v10474_v34 = vrot.slane %v3014_v29, 9 }
 0x199   : > { %17295 = vst [vmem:[#allocation24_spill] sm:$0xff] %v14358_v18  ;;  %3526 = vmatprep.mubr.bf16.mxu0 %v10505_v1  ;;  %v3865_v23 = vor.u32 %v3864_v48, %v3860_v40  ;;  %v3128_v2 = vrot.slane %v2599_v5, 5  ;;  %v2813_v44 = vsel %vm13484_vm14, %v2808_v62, %v2812_v54  ;;  %v3131_v31 = vrot.slane %v2600_v47, 5  ;;  %v14374_v1 = vld [vmem:[#allocation2 + $0x7c] sm:$0xf] }
 0x19a   : > { %v14342_v21 = vpop.f32.mrb[12].mxu0  ;;  %17296 = vst [vmem:[#allocation25_spill] sm:$0xff] %v14362_v9  ;;  %v3856_v6 = vrot.slane %v3855_v22, 4  ;;  %v2815_v50 = vshrl.u32 %v2598_v42, 16  ;;  %v10489_v43 = vcombine.low %v2803_v24, %v2813_v44  ;;  %v2818_v51 = vshll.u32 %v2598_v42, 16 }
 0x19b   : > { %v14346_v41 = vpop.f32.mrb[13].mxu0  ;;  %v3866_v14 = vrot.slane %v3865_v23, 4  ;;  %v3129_v38 = vsel %vm13316_vm11, %v10474_v34, %v3128_v2  ;;  %v3130_v63 = vrot.slane %v3128_v2, 4  ;;  %v2824_v53 = vshll.u32 %v2599_v5, 16  ;;  %v2603_v22 = vld [vmem:[#allocation2 + $0x80] sm:$0x1] }
 0x19c   : > { %v14350_v55 = vpop.f32.mrb[14].mxu0  ;;  %v3861_v39 = vsel %vm13484_vm14, %v3856_v6, %v3860_v40  ;;  %v2817_v37 = vrot.slane %v2815_v50, 4  ;;  %v2828_v20 = vshrl.u32 %v2599_v5, 16  ;;  %v2834_v54 = vshll.u32 %v2600_v47, 16  ;;  %v3015_v40 = vld [vmem:[#allocation2 + $0x78] sm:$0xe] }
 0x19d   : > { %v14354_v46 = vpop.f32.mrb[15].mxu0  ;;  %v3871_v52 = vsel %vm13484_vm14, %v3866_v14, %v3870_v16  ;;  %v3132_v4 = vsel %vm13316_vm11, %v3130_v63, %v3131_v31  ;;  %v2820_v30 = vrot.slane %v2818_v51, 5  ;;  %v2826_v59 = vrot.slane %v2824_v53, 5  ;;  %v2601_v6 = vld [vmem:[#allocation2 + $0x78] sm:$0xf] }
 0x19e   : > { %v10553_v36 = vcombine.low %v3861_v39, %v3871_v52  ;;  %v10506_v13 = vcombine.low %v3129_v38, %v3132_v4  ;;  %v2830_v10 = vrot.slane %v2828_v20, 4  ;;  %v2836_v25 = vrot.slane %v2834_v54, 5 }
 0x19f   : > { %v3873_v29 = vshrl.u32 %v14370_v12, 16  ;;  %v3876_v49 = vshll.u32 %v14370_v12, 16  ;;  %v2821_v47 = vor.u32 %v2820_v30, %v2817_v37  ;;  %v3882_v16 = vshll.u32 %v14374_v1, 16  ;;  %v14416_v30 = vld [vmem:[#allocation2 + $0x84] sm:$0xf] }
 0x1a0   : > { %3527 = vmatmul.mubr.bf16.gmra.mrb[108].mxu0 %v10489_v43  ;;  %4440 = vmatprep.mubr.bf16.mxu1 %v10553_v36  ;;  %v3886_v42 = vshrl.u32 %v14374_v1, 16  ;;  %v3892_v62 = vshll.u32 %v3672_v32, 16  ;;  %v2831_v23 = vor.u32 %v2830_v10, %v2826_v59  ;;  %v10538_v44 = vcombine.low %v14370_v12, %v14374_v1  ;;  %v2602_v12 = vld [vmem:[#allocation2 + $0x7c] sm:$0xf]  ;;  %v14418_v10 = vld [vmem:[#allocation2 + $0x88] sm:$0xf] }
 0x1a1   : > { %v14390_v5 = vpop.f32.mrb[0].mxu1  ;;  %4441 = vmatmul.mubr.bf16.gmra.mrb[76].mxu1 %v10537_v56  ;;  %3534 = vmatprep.mubr.bf16.mxu0 %v10506_v13  ;;  %v3875_v34 = vrot.slane %v3873_v29, 4  ;;  %v3878_v2 = vrot.slane %v3876_v49, 5  ;;  %v2822_v50 = vrot.slane %v2821_v47, 4  ;;  %v3884_v43 = vrot.slane %v3882_v16, 5 }
 0x1a2   : > { %v14380_v3 = vpop.f32.mrb[16].mxu0  ;;  %v14396_v31 = vpop.f32.mrb[1].mxu1  ;;  %v3888_v14 = vrot.slane %v3886_v42, 4  ;;  %v3894_v38 = vrot.slane %v3892_v62, 5  ;;  %v2832_v39 = vrot.slane %v2831_v23, 4  ;;  %v14402_v56 = vadd.f32 %v14310_v58, %v14308_v19 }
 0x1a3   : > { %v14382_v33 = vpop.f32.mrb[17].mxu0  ;;  %v14398_v63 = vpop.f32.mrb[2].mxu1  ;;  %v3879_v37 = vor.u32 %v3878_v2, %v3875_v34  ;;  %v14406_v51 = vadd.f32 %v14322_v7, %v14316_v57  ;;  %v2827_v1 = vsel %vm13484_vm14, %v2822_v50, %v2826_v59  ;;  %v10475_v4 = vrot.slane %v3015_v40, 9 }
 0x1a4   : > { %v14386_v48 = vpop.f32.mrb[18].mxu0  ;;  %17297 = vst [vmem:[#allocation26_spill] sm:$0xff] %v14402_v56  ;;  %v14408_v53 = vpop.f32.mrb[3].mxu1  ;;  %v3889_v52 = vor.u32 %v3888_v14, %v3884_v43  ;;  %v3135_v20 = vrot.slane %v2602_v12, 5  ;;  %v2837_v54 = vsel %vm13484_vm14, %v2832_v39, %v2836_v25  ;;  %v3138_v36 = vrot.slane %v2603_v22, 5 }
 0x1a5   : > { %v14392_v24 = vpop.f32.mrb[19].mxu0  ;;  %17298 = vst [vmem:[#allocation27_spill] sm:$0xff] %v14406_v51  ;;  %v3880_v32 = vrot.slane %v3879_v37, 4  ;;  %v2839_v19 = vshrl.u32 %v2601_v6, 16  ;;  %v10490_v58 = vcombine.low %v2827_v1, %v2837_v54  ;;  %v2842_v49 = vshll.u32 %v2601_v6, 16 }
 0x1a6   : > { %v3890_v13 = vrot.slane %v3889_v52, 4  ;;  %v3136_v57 = vsel %vm13316_vm11, %v10475_v4, %v3135_v20  ;;  %v3137_v7 = vrot.slane %v3135_v20, 4  ;;  %v2848_v40 = vshll.u32 %v2602_v12, 16  ;;  %v3673_v25 = vld [vmem:[#allocation2 + $0x8c] sm:$0x1] }
 0x1a7   : > { %v3885_v59 = vsel %vm13484_vm14, %v3880_v32, %v3884_v43  ;;  %v2841_v29 = vrot.slane %v2839_v19, 4  ;;  %v2852_v42 = vshrl.u32 %v2602_v12, 16  ;;  %v2858_v62 = vshll.u32 %v2603_v22, 16  ;;  %v2606_v54 = vld [vmem:[#allocation2 + $0x8c] sm:$0x1] }
 0x1a8   : > { %3535 = vmatmul.mubr.bf16.gmra.mrb[112].mxu0 %v10490_v58  ;;  %v3895_v47 = vsel %vm13484_vm14, %v3890_v13, %v3894_v38  ;;  %v3139_v16 = vsel %vm13316_vm11, %v3137_v7, %v3138_v36  ;;  %v2844_v50 = vrot.slane %v2842_v49, 5  ;;  %v2850_v14 = vrot.slane %v2848_v40, 5  ;;  %v3016_v38 = vld [vmem:[#allocation2 + $0x84] sm:$0xe] }
 0x1a9   : > { %v10554_v34 = vcombine.low %v3885_v59, %v3895_v47  ;;  %v10507_v2 = vcombine.low %v3136_v57, %v3139_v16  ;;  %v2854_v6 = vrot.slane %v2852_v42, 4  ;;  %v2860_v39 = vrot.slane %v2858_v62, 5  ;;  %v2604_v7 = vld [vmem:[#allocation2 + $0x84] sm:$0xf] }
 0x1aa   : > { %v14426_v23 = vpop.f32.mrb[20].mxu0  ;;  %v3897_v37 = vshrl.u32 %v14416_v30, 16  ;;  %v3900_v1 = vshll.u32 %v14416_v30, 16  ;;  %v2845_v22 = vor.u32 %v2844_v50, %v2841_v29  ;;  %v3906_v12 = vshll.u32 %v14418_v10, 16 }
 0x1ab   : > { %v14428_v43 = vpop.f32.mrb[21].mxu0  ;;  %4448 = vmatprep.mubr.bf16.mxu1 %v10554_v34  ;;  %3542 = vmatprep.mubr.bf16.mxu0 %v10507_v2  ;;  %v3910_v4 = vshrl.u32 %v14418_v10, 16  ;;  %v3916_v20 = vshll.u32 %v3673_v25, 16  ;;  %v2855_v19 = vor.u32 %v2854_v6, %v2850_v14  ;;  %v10539_v57 = vcombine.low %v14416_v30, %v14418_v10  ;;  %v2605_v30 = vld [vmem:[#allocation2 + $0x88] sm:$0xf] }
 0x1ac   : > { %v14432_v52 = vpop.f32.mrb[22].mxu0  ;;  %4449 = vmatmul.mubr.bf16.gmra.mrb[80].mxu1 %v10538_v44  ;;  %v3899_v58 = vrot.slane %v3897_v37, 4  ;;  %v3902_v13 = vrot.slane %v3900_v1, 5  ;;  %v2846_v29 = vrot.slane %v2845_v22, 4  ;;  %v3908_v49 = vrot.slane %v3906_v12, 5 }
 0x1ad   : > { %v14436_v32 = vpop.f32.mrb[4].mxu1  ;;  %v14438_v36 = vpop.f32.mrb[23].mxu0  ;;  %v3912_v40 = vrot.slane %v3910_v4, 4  ;;  %v3918_v47 = vrot.slane %v3916_v20, 5  ;;  %v2856_v16 = vrot.slane %v2855_v19, 4  ;;  %v14448_v44 = vadd.f32 %v14346_v41, %v14342_v21 }
 0x1ae   : > { %v14442_v59 = vpop.f32.mrb[5].mxu1  ;;  %v3903_v42 = vor.u32 %v3902_v13, %v3899_v58  ;;  %v14452_v62 = vadd.f32 %v14354_v46, %v14350_v55  ;;  %v2851_v34 = vsel %vm13484_vm14, %v2846_v29, %v2850_v14  ;;  %v10476_v50 = vrot.slane %v3016_v38, 9  ;;  %v14460_v41 = vld [vmem:[#allocation2 + $0x90] sm:$0xf]  ;;  %v14464_v20 = vld [vmem:[#allocation2 + $0x94] sm:$0xf] }
 0x1af   : > { %v14444_v25 = vpop.f32.mrb[6].mxu1  ;;  %17299 = vst [vmem:[#allocation28_spill] sm:$0xff] %v14448_v44  ;;  %v3913_v2 = vor.u32 %v3912_v40, %v3908_v49  ;;  %v3142_v6 = vrot.slane %v2605_v30, 5  ;;  %v2861_v37 = vsel %vm13484_vm14, %v2856_v16, %v2860_v39  ;;  %v3145_v22 = vrot.slane %v2606_v54, 5  ;;  %v3674_v14 = vld [vmem:[#allocation2 + $0x98] sm:$0x1] }
 0x1b0   : > { %17300 = vst [vmem:[#allocation29_spill] sm:$0xff] %v14452_v62  ;;  %v14454_v10 = vpop.f32.mrb[7].mxu1  ;;  %v3904_v1 = vrot.slane %v3903_v42, 4  ;;  %v2863_v21 = vshrl.u32 %v2604_v7, 16  ;;  %v10491_v12 = vcombine.low %v2851_v34, %v2861_v37  ;;  %v2866_v58 = vshll.u32 %v2604_v7, 16 }
 0x1b1   : > { %v3914_v55 = vrot.slane %v3913_v2, 4  ;;  %v3143_v46 = vsel %vm13316_vm11, %v10476_v50, %v3142_v6  ;;  %v3144_v4 = vrot.slane %v3142_v6, 4  ;;  %v2872_v39 = vshll.u32 %v2605_v30, 16 }
 0x1b2   : > { %v3909_v38 = vsel %vm13484_vm14, %v3904_v1, %v3908_v49  ;;  %v2865_v19 = vrot.slane %v2863_v21, 4  ;;  %3543 = vmatmul.mubr.bf16.gmra.mrb[116].mxu0 %v10491_v12  ;;  %v2876_v40 = vshrl.u32 %v2605_v30, 16  ;;  %v2882_v16 = vshll.u32 %v2606_v54, 16 }
 0x1b3   : > { %v3919_v13 = vsel %vm13484_vm14, %v3914_v55, %v3918_v47  ;;  %v3146_v29 = vsel %vm13316_vm11, %v3144_v4, %v3145_v22  ;;  %v2868_v50 = vrot.slane %v2866_v58, 5  ;;  %v2874_v6 = vrot.slane %v2872_v39, 5  ;;  %v3017_v55 = vld [vmem:[#allocation2 + $0x90] sm:$0xe] }
 0x1b4   : > { %v10555_v34 = vcombine.low %v3909_v38, %v3919_v13  ;;  %v10508_v2 = vcombine.low %v3143_v46, %v3146_v29  ;;  %v2878_v49 = vrot.slane %v2876_v40, 4  ;;  %v2884_v7 = vrot.slane %v2882_v16, 5  ;;  %v2609_v29 = vld [vmem:[#allocation2 + $0x98] sm:$0x1]  ;;  %v2607_v40 = vld [vmem:[#allocation2 + $0x90] sm:$0xf] }
 0x1b5   : > { %v14472_v42 = vpop.f32.mrb[24].mxu0  ;;  %v3921_v1 = vshrl.u32 %v14460_v41, 16  ;;  %v3924_v21 = vshll.u32 %v14460_v41, 16  ;;  %v2869_v30 = vor.u32 %v2868_v50, %v2865_v19  ;;  %v3930_v54 = vshll.u32 %v14464_v20, 16  ;;  %v2608_v50 = vld [vmem:[#allocation2 + $0x94] sm:$0xf] }
 0x1b6   : > { %v14474_v37 = vpop.f32.mrb[25].mxu0  ;;  %4456 = vmatprep.mubr.bf16.mxu1 %v10555_v34  ;;  %3550 = vmatprep.mubr.bf16.mxu0 %v10508_v2  ;;  %v3934_v22 = vshrl.u32 %v14464_v20, 16  ;;  %v3940_v12 = vshll.u32 %v3674_v14, 16  ;;  %v2879_v38 = vor.u32 %v2878_v49, %v2874_v6  ;;  %v10540_v13 = vcombine.low %v14460_v41, %v14464_v20 }
 0x1b7   : > { %v14478_v47 = vpop.f32.mrb[26].mxu0  ;;  %4457 = vmatmul.mubr.bf16.gmra.mrb[84].mxu1 %v10539_v57  ;;  %v3923_v58 = vrot.slane %v3921_v1, 4  ;;  %v3926_v39 = vrot.slane %v3924_v21, 5  ;;  %v2870_v16 = vrot.slane %v2869_v30, 4  ;;  %v3932_v34 = vrot.slane %v3930_v54, 5 }
 0x1b8   : > { %v14482_v46 = vpop.f32.mrb[8].mxu1  ;;  %v14484_v4 = vpop.f32.mrb[27].mxu0  ;;  %v3936_v2 = vrot.slane %v3934_v22, 4  ;;  %v3942_v14 = vrot.slane %v3940_v12, 5  ;;  %v2880_v0 = vrot.slane %v2879_v38, 4  ;;  %v14494_v57 = vadd.f32 %v14382_v33, %v14380_v3 }
 0x1b9   : > { %v14488_v19 = vpop.f32.mrb[9].mxu1  ;;  %v3927_v28 = vor.u32 %v3926_v39, %v3923_v58  ;;  %v14498_v41 = vadd.f32 %v14396_v31, %v14390_v5  ;;  %v2875_v49 = vsel %vm13484_vm14, %v2870_v16, %v2874_v6  ;;  %v14506_v21 = vadd.f32 %v14392_v24, %v14386_v48  ;;  %v14514_v54 = vld [vmem:[#allocation2 + $0x9c] sm:$0xf]  ;;  %v14518_v48 = vld [vmem:[#allocation2 + $0xa0] sm:$0xf] }
 0x1ba   : > { %v14490_v27 = vpop.f32.mrb[10].mxu1  ;;  %v3937_v1 = vor.u32 %v3936_v2, %v3932_v34  ;;  %v14510_v30 = vadd.f32 %v14408_v53, %v14398_v63  ;;  %v2885_v3 = vsel %vm13484_vm14, %v2880_v0, %v2884_v7  ;;  %v10477_v5 = vrot.slane %v3017_v55, 9  ;;  %v3675_v7 = vld [vmem:[#allocation2 + $0xa4] sm:$0x1] }
 0x1bb   : > { %v14500_v20 = vpop.f32.mrb[11].mxu1  ;;  %v3928_v33 = vrot.slane %v3927_v28, 4  ;;  %v3149_v31 = vrot.slane %v2608_v50, 5  ;;  %v10492_v6 = vcombine.low %v2875_v49, %v2885_v3  ;;  %v3152_v38 = vrot.slane %v2609_v29, 5 }
 0x1bc   : > { %v3938_v12 = vrot.slane %v3937_v1, 4  ;;  %v2887_v58 = vshrl.u32 %v2607_v40, 16  ;;  %v2890_v53 = vshll.u32 %v2607_v40, 16  ;;  %v2896_v2 = vshll.u32 %v2608_v50, 16 }
 0x1bd   : > { %v14516_v22 = vpop.f32.mrb[28].mxu0  ;;  %v3933_v63 = vsel %vm13484_vm14, %v3928_v33, %v3932_v34  ;;  %v3150_v28 = vsel %vm13316_vm11, %v10477_v5, %v3149_v31  ;;  %v3151_v0 = vrot.slane %v3149_v31, 4  ;;  %3551 = vmatmul.mubr.bf16.gmra.mrb[120].mxu0 %v10492_v6  ;;  %v2900_v49 = vshrl.u32 %v2608_v50, 16 }
 0x1be   : > { %v14520_v24 = vpop.f32.mrb[29].mxu0  ;;  %v3943_v39 = vsel %vm13484_vm14, %v3938_v12, %v3942_v14  ;;  %v2889_v16 = vrot.slane %v2887_v58, 4  ;;  %v2892_v5 = vrot.slane %v2890_v53, 5  ;;  %v2906_v40 = vshll.u32 %v2609_v29, 16 }
 0x1bf   : > { %v14526_v55 = vpop.f32.mrb[30].mxu0  ;;  %v10556_v34 = vcombine.low %v3933_v63, %v3943_v39  ;;  %v3153_v33 = vsel %vm13316_vm11, %v3151_v0, %v3152_v38  ;;  %v2898_v6 = vrot.slane %v2896_v2, 5  ;;  %v2902_v62 = vrot.slane %v2900_v49, 4  ;;  %v3018_v39 = vld [vmem:[#allocation2 + $0x9c] sm:$0xe] }
 0x1c0   : > { %v14530_v1 = vpop.f32.mrb[12].mxu1  ;;  %v14532_v3 = vpop.f32.mrb[31].mxu0  ;;  %v10509_v35 = vcombine.low %v3150_v28, %v3153_v33  ;;  %v3945_v14 = vshrl.u32 %v14514_v54, 16  ;;  %v2893_v50 = vor.u32 %v2892_v5, %v2889_v16  ;;  %v2908_v58 = vrot.slane %v2906_v40, 5  ;;  %v2612_v2 = vld [vmem:[#allocation2 + $0xa4] sm:$0x1] }
 0x1c1   : > { %v14536_v31 = vpop.f32.mrb[13].mxu1  ;;  %4464 = vmatprep.mubr.bf16.mxu1 %v10556_v34  ;;  %v3948_v44 = vshll.u32 %v14514_v54, 16  ;;  %v3954_v63 = vshll.u32 %v14518_v48, 16  ;;  %v2903_v29 = vor.u32 %v2902_v62, %v2898_v6  ;;  %v3958_v0 = vshrl.u32 %v14518_v48, 16  ;;  %v2611_v5 = vld [vmem:[#allocation2 + $0xa0] sm:$0xf] }
 0x1c2   : > { %v14539_v12 = vpop.f32.mrb[14].mxu1  ;;  %4465 = vmatmul.mubr.bf16.gmra.mrb[88].mxu1 %v10540_v13  ;;  %3558 = vmatprep.mubr.bf16.mxu0 %v10509_v35  ;;  %v3947_v28 = vrot.slane %v3945_v14, 4  ;;  %v3964_v53 = vshll.u32 %v3675_v7, 16  ;;  %v2894_v49 = vrot.slane %v2893_v50, 4  ;;  %v10541_v16 = vcombine.low %v14514_v54, %v14518_v48  ;;  %v2610_v40 = vld [vmem:[#allocation2 + $0x9c] sm:$0xf] }
 0x1c3   : > { %v14543_v38 = vpop.f32.mrb[15].mxu1  ;;  %v3950_v33 = vrot.slane %v3948_v44, 5  ;;  %v3956_v34 = vrot.slane %v3954_v63, 5  ;;  %v2904_v51 = vrot.slane %v2903_v29, 4  ;;  %v3960_v56 = vrot.slane %v3958_v0, 4 }
 0x1c4   : > { %v3966_v9 = vrot.slane %v3964_v53, 5  ;;  %v14550_v35 = vadd.f32 %v14428_v43, %v14426_v23  ;;  %v2899_v62 = vsel %vm13484_vm14, %v2894_v49, %v2898_v6  ;;  %v14556_v44 = vadd.f32 %v14442_v59, %v14436_v32  ;;  %v14570_v59 = vld [vmem:[#allocation2 + $0xa8] sm:$0xf]  ;;  %v3676_v53 = vld [vmem:[#allocation2 + $0xb0] sm:$0x1] }
 0x1c5   : > { %v3951_v13 = vor.u32 %v3950_v33, %v3947_v28  ;;  %v14560_v54 = vadd.f32 %v14438_v36, %v14432_v52  ;;  %v2909_v48 = vsel %vm13484_vm14, %v2904_v51, %v2908_v58  ;;  %v3961_v7 = vor.u32 %v3960_v56, %v3956_v34  ;;  %v14574_v56 = vld [vmem:[#allocation2 + $0xac] sm:$0xf] }
 0x1c6   : > { %v14566_v23 = vadd.f32 %v14454_v10, %v14444_v25  ;;  %v10478_v43 = vrot.slane %v3018_v39, 9  ;;  %v10493_v6 = vcombine.low %v2899_v62, %v2909_v48  ;;  %v3156_v63 = vrot.slane %v2611_v5, 5 }
 0x1c7   : > { %17301 = vst [vmem:[#allocation30_spill] sm:$0xff] %v14560_v54  ;;  %v3952_v50 = vrot.slane %v3951_v13, 4  ;;  %v3159_v32 = vrot.slane %v2612_v2, 5  ;;  %v3962_v52 = vrot.slane %v3961_v7, 4  ;;  %v2911_v36 = vshrl.u32 %v2610_v40, 16 }
 0x1c8   : > { %17302 = vst [vmem:[#allocation31_spill] sm:$0xff] %v14566_v23  ;;  %v14568_v14 = vpop.f32.mrb[32].mxu0  ;;  %v2914_v28 = vshll.u32 %v2610_v40, 16  ;;  %v2920_v51 = vshll.u32 %v2611_v5, 16  ;;  %3559 = vmatmul.mubr.bf16.gmra.mrb[124].mxu0 %v10493_v6  ;;  %v3157_v10 = vsel %vm13316_vm11, %v10478_v43, %v3156_v63  ;;  %v3158_v39 = vrot.slane %v3156_v63, 4 }
 0x1c9   : > { %v14572_v29 = vpop.f32.mrb[33].mxu0  ;;  %v3957_v25 = vsel %vm13484_vm14, %v3952_v50, %v3956_v34  ;;  %v2924_v0 = vshrl.u32 %v2611_v5, 16  ;;  %v3967_v40 = vsel %vm13484_vm14, %v3962_v52, %v3966_v9  ;;  %v2913_v62 = vrot.slane %v2911_v36, 4 }
 0x1ca   : > { %v14576_v58 = vpop.f32.mrb[34].mxu0  ;;  %v2916_v13 = vrot.slane %v2914_v28, 5  ;;  %v2922_v48 = vrot.slane %v2920_v51, 5  ;;  %v10557_v6 = vcombine.low %v3957_v25, %v3967_v40  ;;  %v3160_v34 = vsel %vm13316_vm11, %v3158_v39, %v3159_v32  ;;  %v3019_v32 = vld [vmem:[#allocation2 + $0xa8] sm:$0xe] }
 0x1cb   : > { %v14582_v49 = vpop.f32.mrb[16].mxu1  ;;  %v14584_v33 = vpop.f32.mrb[35].mxu0  ;;  %v2926_v43 = vrot.slane %v2924_v0, 4  ;;  %v2930_v50 = vshll.u32 %v2612_v2, 16  ;;  %v10510_v63 = vcombine.low %v3157_v10, %v3160_v34  ;;  %v3969_v15 = vshrl.u32 %v14570_v59, 16 }
 0x1cc   : > { %v14588_v7 = vpop.f32.mrb[17].mxu1  ;;  %v2917_v18 = vor.u32 %v2916_v13, %v2913_v62  ;;  %v3972_v17 = vshll.u32 %v14570_v59, 16  ;;  %4472 = vmatprep.mubr.bf16.mxu1 %v10557_v6  ;;  %v3978_v28 = vshll.u32 %v14574_v56, 16  ;;  %v3982_v51 = vshrl.u32 %v14574_v56, 16  ;;  %v2615_v0 = vld [vmem:[#allocation2 + $0xb0] sm:$0x1] }
 0x1cd   : > { %v14592_v5 = vpop.f32.mrb[18].mxu1  ;;  %v2927_v52 = vor.u32 %v2926_v43, %v2922_v48  ;;  %v2932_v36 = vrot.slane %v2930_v50, 5  ;;  %4473 = vmatmul.mubr.bf16.gmra.mrb[92].mxu1 %v10541_v16  ;;  %3566 = vmatprep.mubr.bf16.mxu0 %v10510_v63  ;;  %v3971_v25 = vrot.slane %v3969_v15, 4  ;;  %v3988_v39 = vshll.u32 %v3676_v53, 16  ;;  %v2613_v40 = vld [vmem:[#allocation2 + $0xa8] sm:$0xf] }
 0x1ce   : > { %v14596_v9 = vpop.f32.mrb[19].mxu1  ;;  %v2918_v2 = vrot.slane %v2917_v18, 4  ;;  %v3974_v10 = vrot.slane %v3972_v17, 5  ;;  %v3980_v13 = vrot.slane %v3978_v28, 5  ;;  %v3984_v34 = vrot.slane %v3982_v51, 4 }
 0x1cf   : > { %v2928_v62 = vrot.slane %v2927_v52, 4  ;;  %v10542_v6 = vcombine.low %v14570_v59, %v14574_v56  ;;  %v2614_v43 = vld [vmem:[#allocation2 + $0xac] sm:$0xf]  ;;  %v3990_v54 = vrot.slane %v3988_v39, 5  ;;  %v14606_v18 = vadd.f32 %v14474_v37, %v14472_v42  ;;  %v14622_v37 = vld [vmem:[#allocation2 + $0xb4] sm:$0xf] }
 0x1d0   : > { %v2923_v50 = vsel %vm13484_vm14, %v2918_v2, %v2922_v48  ;;  %v3975_v23 = vor.u32 %v3974_v10, %v3971_v25  ;;  %v3985_v15 = vor.u32 %v3984_v34, %v3980_v13  ;;  %v14612_v16 = vadd.f32 %v14488_v19, %v14482_v46  ;;  %v14626_v19 = vld [vmem:[#allocation2 + $0xb8] sm:$0xf]  ;;  %v14638_v39 = vld [vmem:[#allocation2 + $0xbc] sm:$0x1] }
 0x1d1   : > { %17303 = vst [vmem:[#allocation32_spill] sm:$0xff] %v14606_v18  ;;  %v2933_v17 = vsel %vm13484_vm14, %v2928_v62, %v2932_v36  ;;  %v14616_v59 = vadd.f32 %v14484_v4, %v14478_v47  ;;  %v14620_v48 = vadd.f32 %v14500_v20, %v14490_v27  ;;  %v10479_v42 = vrot.slane %v3019_v32, 9  ;;  %v12602_v18 = vld [vmem:[#allocation9 + $0x90] sm:$0xff]  }
 0x1d2   : > { %17304 = vst [vmem:[#allocation33_spill] sm:$0xff] %v14612_v16  ;;  %v10494_v56 = vcombine.low %v2923_v50, %v2933_v17  ;;  %v3976_v53 = vrot.slane %v3975_v23, 4  ;;  %v3986_v52 = vrot.slane %v3985_v15, 4  ;;  %v3163_v36 = vrot.slane %v2614_v43, 5 }
 0x1d3   : > { %17305 = vst [vmem:[#allocation34_spill] sm:$0xff] %v14616_v59  ;;  %17306 = vst [vmem:[#allocation35_spill] sm:$0xff] %v14620_v48  ;;  %v14624_v63 = vpop.f32.mrb[36].mxu0  ;;  %v3166_v28 = vrot.slane %v2615_v0, 5  ;;  %v2935_v46 = vshrl.u32 %v2613_v40, 16  ;;  %v2938_v4 = vshll.u32 %v2613_v40, 16 }
 0x1d4   : > { %v14628_v51 = vpop.f32.mrb[37].mxu0  ;;  %3567 = vmatmul.mubr.bf16.gmra.mrb[128].mxu0 %v10494_v56  ;;  %v3981_v47 = vsel %vm13484_vm14, %v3976_v53, %v3980_v13  ;;  %v2944_v27 = vshll.u32 %v2614_v43, 16  ;;  %v2948_v20 = vshrl.u32 %v2614_v43, 16  ;;  %v3991_v32 = vsel %vm13484_vm14, %v3986_v52, %v3990_v54  ;;  %v12597_v48 = vld [vmem:[#allocation9 + $0xc0] sm:$0xff]  }
 0x1d5   : > { %v14632_v23 = vpop.f32.mrb[38].mxu0  ;;  %v3164_v2 = vsel %vm13316_vm11, %v10479_v42, %v3163_v36  ;;  %v3165_v25 = vrot.slane %v3163_v36, 4  ;;  %v2937_v10 = vrot.slane %v2935_v46, 4  ;;  %v10558_v13 = vcombine.low %v3981_v47, %v3991_v32  ;;  %v12598_v59 = vld [vmem:[#allocation9 + $0x80] sm:$0xff]   ;;  %11611 = vmatprep.subr.bf16.mxu1 %v12597_v48 }
 0x1d6   : > { %v14640_v62 = vpop.f32.mrb[20].mxu1  ;;  %v14642_v34 = vpop.f32.mrb[39].mxu0  ;;  %v2940_v40 = vrot.slane %v2938_v4, 5  ;;  %v2946_v50 = vrot.slane %v2944_v27, 5  ;;  %v2950_v43 = vrot.slane %v2948_v20, 4  ;;  %v2954_v15 = vshll.u32 %v2615_v0, 16  ;;  %11612 = vmatpush3.bf16.msra.mxu1 %v12598_v59 }
 0x1d7   : > { %v14644_v17 = vpop.f32.mrb[21].mxu1  ;;  %v3167_v54 = vsel %vm13316_vm11, %v3165_v25, %v3166_v28  ;;  %v3993_v56 = vshrl.u32 %v14622_v37, 16  ;;  %v3996_v53 = vshll.u32 %v14622_v37, 16  ;;  %4480 = vmatprep.mubr.bf16.mxu1 %v10558_v13  ;;  %v4002_v47 = vshll.u32 %v14626_v19, 16  ;;  %v2618_v28 = vld [vmem:[#allocation2 + $0xbc] sm:$0x1] }
 0x1d8   : > { %v14650_v42 = vpop.f32.mrb[22].mxu1  ;;  %v10511_v52 = vcombine.low %v3164_v2, %v3167_v54  ;;  %v2941_v36 = vor.u32 %v2940_v40, %v2937_v10  ;;  %v2951_v46 = vor.u32 %v2950_v43, %v2946_v50  ;;  %4481 = vmatmul.mubr.bf16.gmra.mrb[96].mxu1 %v10542_v6  ;;  %v2956_v27 = vrot.slane %v2954_v15, 5  ;;  %v3020_v25 = vld [vmem:[#allocation2 + $0xb4] sm:$0xe] }
 0x1d9   : > { %v14653_v4 = vpop.f32.mrb[23].mxu1  ;;  %v3995_v20 = vrot.slane %v3993_v56, 4  ;;  %v3998_v32 = vrot.slane %v3996_v53, 5  ;;  %v4006_v0 = vshrl.u32 %v14626_v19, 16  ;;  %v4004_v2 = vrot.slane %v4002_v47, 5 }
 0x1da   : > { %3574 = vmatprep.mubr.bf16.mxu0 %v10511_v52  ;;  %v2942_v16 = vrot.slane %v2941_v36, 4  ;;  %v2952_v13 = vrot.slane %v2951_v46, 4  ;;  %v4012_v10 = vshll.u32 %v14638_v39, 16  ;;  %v2616_v40 = vld [vmem:[#allocation2 + $0xb4] sm:$0xf]  ;;  %v10543_v6 = vcombine.low %v14622_v37, %v14626_v19 }
 0x1db   : > { %v3999_v43 = vor.u32 %v3998_v32, %v3995_v20  ;;  %v4008_v54 = vrot.slane %v4006_v0, 4  ;;  %v14661_v15 = vadd.f32 %v14520_v24, %v14516_v22  ;;  %v2617_v56 = vld [vmem:[#allocation2 + $0xb8] sm:$0xf]  ;;  %v14669_v46 = vadd.f32 %v14536_v31, %v14530_v1 }
 0x1dc   : > { %v2947_v53 = vsel %vm13484_vm14, %v2942_v16, %v2946_v50  ;;  %v2957_v52 = vsel %vm13484_vm14, %v2952_v13, %v2956_v27  ;;  %v4014_v36 = vrot.slane %v4012_v10, 5  ;;  %v14673_v22 = vadd.f32 %v14532_v3, %v14526_v55  ;;  %v456_v27 = vld [vmem:[#allocation2 + $0xc8] sm:$0x1]  ;;  %v14683_v13 = vld [vmem:[#allocation2 + $0xc0] sm:$0xf] }
 0x1dd   : > { %17307 = vst [vmem:[#allocation36_spill] sm:$0xff] %v14661_v15  ;;  %17308 = vst [vmem:[#allocation37_spill] sm:$0xff] %v14669_v46  ;;  %v10495_v47 = vcombine.low %v2947_v53, %v2957_v52  ;;  %v4000_v37 = vrot.slane %v3999_v43, 4  ;;  %v4009_v20 = vor.u32 %v4008_v54, %v4004_v2  ;;  %v14677_v24 = vadd.f32 %v14543_v38, %v14539_v12  ;;  %v14679_v32 = vpop.f32.mrb[40].mxu0  ;;  %v14685_v55 = vld [vmem:[#allocation2 + $0xc4] sm:$0xf] }
 0x1de   : > { %17309 = vst [vmem:[#allocation38_spill] sm:$0xff] %v14673_v22  ;;  %v10480_v16 = vrot.slane %v3020_v25, 9  ;;  %v3170_v48 = vrot.slane %v2617_v56, 5  ;;  %v3173_v50 = vrot.slane %v2618_v28, 5  ;;  %v2959_v59 = vshrl.u32 %v2616_v40, 16  ;;  %v14687_v3 = vpop.f32.mrb[41].mxu0 }
 0x1df   : > { %17310 = vst [vmem:[#allocation39_spill] sm:$0xff] %v14677_v24  ;;  %3575 = vmatmul.mubr.bf16.gmra.mrb[132].mxu0 %v10495_v47  ;;  %v4005_v1 = vsel %vm13484_vm14, %v4000_v37, %v4004_v2  ;;  %v4010_v31 = vrot.slane %v4009_v20, 4  ;;  %v2962_v0 = vshll.u32 %v2616_v40, 16  ;;  %v2968_v25 = vshll.u32 %v2617_v56, 16  ;;  %v14691_v43 = vpop.f32.mrb[42].mxu0 }
 0x1e0   : > { %v3171_v12 = vsel %vm13316_vm11, %v10480_v16, %v3170_v48  ;;  %v3172_v38 = vrot.slane %v3170_v48, 4  ;;  %v2972_v10 = vshrl.u32 %v2617_v56, 16  ;;  %v2961_v54 = vrot.slane %v2959_v59, 4  ;;  %v14695_v52 = vpop.f32.mrb[24].mxu1  ;;  %v14697_v47 = vpop.f32.mrb[43].mxu0 }
 0x1e1   : > { %v4015_v2 = vsel %vm13484_vm14, %v4010_v31, %v4014_v36  ;;  %v2964_v53 = vrot.slane %v2962_v0, 5  ;;  %v2978_v40 = vshll.u32 %v2618_v28, 16  ;;  %v2970_v16 = vrot.slane %v2968_v25, 5  ;;  %v14701_v24 = vpop.f32.mrb[25].mxu1  ;;  %v3021_v31 = vld [vmem:[#allocation2 + $0xc0] sm:$0xe] }
 0x1e2   : > { %v10559_v37 = vcombine.low %v4005_v1, %v4015_v2  ;;  %v3174_v20 = vsel %vm13316_vm11, %v3172_v38, %v3173_v50  ;;  %v2974_v48 = vrot.slane %v2972_v10, 4  ;;  %v457_v36 = vsel %vm13268_vm4, 0, %v456_v27  ;;  %v14705_v28 = vpop.f32.mrb[26].mxu1  ;;  %v2619_v10 = vld [vmem:[#allocation2 + $0xc0] sm:$0xf] }
 0x1e3   : > { %v10512_v56 = vcombine.low %v3171_v12, %v3174_v20  ;;  %v2965_v22 = vor.u32 %v2964_v53, %v2961_v54  ;;  %v2980_v46 = vrot.slane %v2978_v40, 5  ;;  %458 = vst [vmem:[#allocation2 + $0xc8] sm:$0x1] %v457_v36  ;;  %v4017_v1 = vshrl.u32 %v14683_v13, 16  ;;  %v14710_v38 = vpop.f32.mrb[27].mxu1 }
 0x1e4   : > { %4488 = vmatprep.mubr.bf16.mxu1 %v10559_v37  ;;  %v2975_v59 = vor.u32 %v2974_v48, %v2970_v16  ;;  %v4020_v50 = vshll.u32 %v14683_v13, 16  ;;  %v4026_v0 = vshll.u32 %v14685_v55, 16  ;;  %v4030_v25 = vshrl.u32 %v14685_v55, 16  ;;  %v2620_v37 = vld [vmem:[#allocation2 + $0xc4] sm:$0xf] }
 0x1e5   : > { %4489 = vmatmul.mubr.bf16.gmra.mrb[100].mxu1 %v10543_v6  ;;  %3582 = vmatprep.mubr.bf16.mxu0 %v10512_v56  ;;  %v2966_v12 = vrot.slane %v2965_v22, 4  ;;  %v11205_v27 = vadd.f32 %v14572_v29, %v14568_v14  ;;  %v4019_v54 = vrot.slane %v4017_v1, 4  ;;  %v11317_v6 = vadd.f32 %v14588_v7, %v14582_v49  ;;  %v459_v1 = vld [vmem:[#allocation2 + $0xd4] sm:$0x1]  ;;  %v14732_v7 = vld [vmem:[#allocation2 + $0xd0] sm:$0xf] }
 0x1e6   : > { %v2976_v2 = vrot.slane %v2975_v59, 4  ;;  %v4022_v53 = vrot.slane %v4020_v50, 5  ;;  %v14715_v40 = vrot.slane %v4026_v0, 5  ;;  %v4032_v48 = vrot.slane %v4030_v25, 4  ;;  %v403_v59 = vld [vmem:[#allocation2 + $0xcc] sm:$0x1] }
 0x1e7   : > { %v2971_v20 = vsel %vm13484_vm14, %v2966_v12, %v2970_v16  ;;  %v11208_v22 = vadd.f32 %v14584_v33, %v14576_v58  ;;  %v11320_v56 = vadd.f32 %v14596_v9, %v14592_v5  ;;  %v10481_v36 = vrot.slane %v3021_v31, 9  ;;  %v14727_v50 = vpop.f32.mrb[44].mxu0  ;;  %v12599_v33 = vld [vmem:[#allocation9 + $0xc8] sm:$0xff]  }
 0x1e8   : > { %v2981_v14 = vsel %vm13484_vm14, %v2976_v2, %v2980_v46  ;;  %v4023_v29 = vor.u32 %v4022_v53, %v4019_v54  ;;  %v4033_v0 = vor.u32 %v4032_v48, %v14715_v40  ;;  %v14730_v12 = vadd.f32 %v11317_v6, %v11205_v27  ;;  %v14734_v58 = vpop.f32.mrb[45].mxu0  ;;  %v12600_v46 = vld [vmem:[#allocation9 + $0x88] sm:$0xff]   ;;  %11613 = vmatprep.subr.bf16.mxu1 %v12599_v33 }
 0x1e9   : > { %v10496_v16 = vcombine.low %v2971_v20, %v2981_v14  ;;  %v3177_v49 = vrot.slane %v2620_v37, 5  ;;  %v14738_v5 = vadd.f32 %v11320_v56, %v11208_v22  ;;  %v2983_v9 = vshrl.u32 %v2619_v10, 16  ;;  %v14740_v2 = vpop.f32.mrb[46].mxu0  ;;  %v4545_v6 = vld [vmem:[#allocation2 + $0x18] sm:$0xe]  ;;  %11614 = vmatpush3.bf16.msra.mxu1 %v12600_v46 }
 0x1ea   : > { %17311 = vst [vmem:[#allocation40_spill] sm:$0xff] %v14730_v12  ;;  %v14736_v25 = vrot.slane %v4023_v29, 4  ;;  %v2986_v31 = vshll.u32 %v2619_v10, 16  ;;  %v1043_v54 = vld [vmem:[#allocation2 + $0xc8] sm:$0x1]  ;;  %v14742_v53 = vrot.slane %v4033_v0, 4  ;;  %v11211_v46 = vadd.f32 %v14628_v51, %v14624_v63 }
 0x1eb   : > { %17312 = vst [vmem:[#allocation41_spill] sm:$0xff] %v14738_v5  ;;  %3583 = vmatmul.mubr.bf16.gmra.mrb[136].mxu0 %v10496_v16  ;;  %v14746_v20 = vrot.slane %v3177_v49, 4  ;;  %v2992_v48 = vshll.u32 %v2620_v37, 16  ;;  %v14748_v14 = vpop.f32.mrb[28].mxu1  ;;  %v17313_v22 = vrot.slane %v13947_v45, 4  ;;  %v14756_v29 = vsel %vm13316_vm11, %v10481_v36, %v3177_v49  ;;  %v14760_v27 = vpop.f32.mrb[47].mxu0 }
 0x1ec   : > { %v2985_v56 = vrot.slane %v2983_v9, 4  ;;  %v2988_v16 = vrot.slane %v2986_v31, 5  ;;  %v14758_v0 = vpop.f32.mrb[29].mxu1  ;;  %v2996_v33 = vshrl.u32 %v2620_v37, 16  ;;  %v404_v45 = vsel %vm13263_vm2, 0, %v403_v59 }
 0x1ed   : > { %v1044_v10 = vsel %vm13263_vm2, %v17313_v22, %v1043_v54  ;;  %v14762_v5 = vrot.slane %v2992_v48, 5  ;;  %v460_v54 = vsel %vm13268_vm4, 0, %v459_v1  ;;  %v14768_v22 = vpop.f32.mrb[30].mxu1  ;;  %405 = vst [vmem:[#allocation2 + $0xcc] sm:$0x1] %v404_v45  ;;  %v4050_v49 = vshll.u32 %v14732_v7, 16 }
 0x1ee   : > { %1045 = vst [vmem:[#allocation2 + $0xc8] sm:$0x1] %v1044_v10  ;;  %v2989_v36 = vor.u32 %v2988_v16, %v2985_v56  ;;  %461 = vst [vmem:[#allocation2 + $0xd4] sm:$0x1] %v460_v54  ;;  %v4054_v9 = vshrl.u32 %v14732_v7, 16  ;;  %v14774_v37 = vpop.f32.mrb[31].mxu1  ;;  %v11323_v59 = vadd.f32 %v14644_v17, %v14640_v62  ;;  %v11214_v1 = vadd.f32 %v14642_v34, %v14632_v23 }
 0x1ef   : > { %v4546_v31 = vld [vmem:[#allocation2 + $0x24] sm:$0xe]  ;;  %v2998_v48 = vrot.slane %v2996_v33, 4  ;;  %v11326_v10 = vadd.f32 %v14653_v4, %v14650_v42  ;;  %v14782_v16 = vrot.slane %v4050_v49, 5  ;;  %v10578_v54 = vrot.slane %v4545_v6, 9 }
 0x1f0   : > { %v2990_v56 = vrot.slane %v2989_v36, 4  ;;  %v4056_v45 = vrot.slane %v4054_v9, 4  ;;  %v14785_v51 = vadd.f32 %v11323_v59, %v11211_v46  ;;  %v12749_v33 = vld [vmem:[#allocation2 + $0x1c] sm:$0xf]  ;;  %v4029_v23 = vsel %vm13484_vm14, %v14736_v25, %v14715_v40  ;;  %v12750_v17 = vld [vmem:[#allocation2 + $0x20] sm:$0x1] }
 0x1f1   : > { %v2999_v63 = vor.u32 %v2998_v48, %v14762_v5  ;;  %v14787_v12 = vadd.f32 %v11326_v10, %v11214_v1  ;;  %v4595_v11 = vrot.slane %v12749_v33, 5  ;;  %v4598_v42 = vrot.slane %v12750_v17, 5  ;;  %v12751_v48 = vld [vmem:[#allocation2 + $0x28] sm:$0xf] }
 0x1f2   : > { %17314 = vst [vmem:[#allocation42_spill] sm:$0xff] %v14785_v51  ;;  %v2995_v62 = vsel %vm13484_vm14, %v2990_v56, %v14762_v5  ;;  %v4057_v34 = vor.u32 %v4056_v45, %v14782_v16  ;;  %v10579_v49 = vrot.slane %v4546_v31, 9  ;;  %v4602_v40 = vrot.slane %v12751_v48, 5 }
 0x1f3   : > { %17315 = vst [vmem:[#allocation43_spill] sm:$0xff] %v14787_v12  ;;  %v3000_v4 = vrot.slane %v2999_v63, 4  ;;  %v14799_v6 = vsel %vm13316_vm11, %v10578_v54, %v4595_v11  ;;  %v4597_v36 = vrot.slane %v4595_v11, 4  ;;  %v11217_v25 = vadd.f32 %v14687_v3, %v14679_v32 }
 0x1f4   : > { %v11329_v5 = vadd.f32 %v14701_v24, %v14695_v52  ;;  %v11220_v59 = vadd.f32 %v14697_v47, %v14691_v43  ;;  %v14809_v1 = vpop.f32.mrb[48].mxu0  ;;  %v14812_v56 = vld [vmem:[#allocation2 + $0xcc] sm:$0xf]  ;;  %v4058_v43 = vrot.slane %v4057_v34, 4  ;;  %v4547_v47 = vld [vmem:[#allocation2 + $0x30] sm:$0xe] }
 0x1f5   : > { %v14801_v9 = vld [vmem:[#allocation2 + $0xc8] sm:$0x1]  ;;  %v4599_v45 = vsel %vm13316_vm11, %v4597_v36, %v4598_v42  ;;  %v14816_v54 = vpop.f32.mrb[49].mxu0  ;;  %v14818_v32 = vld [vmem:[#allocation2 + $0xd4] sm:$0x1]  ;;  %v4041_v24 = vshrl.u32 %v14812_v56, 16 }
 0x1f6   : > { %v2621_v46 = vld [vmem:[#allocation2 + $0xc8] sm:$0x1]  ;;  %v4036_v10 = vshll.u32 %v14801_v9, 16  ;;  %17316 = vst [vmem:[#allocation44_spill] sm:$0xff] %v14818_v32  ;;  %v4044_v3 = vshll.u32 %v14812_v56, 16  ;;  %v10594_v52 = vcombine.low %v14799_v6, %v4599_v45  ;;  %v14823_v63 = vpop.f32.mrb[50].mxu0  ;;  %v14836_v6 = vsel %vm13316_vm11, %v10579_v49, %v4602_v40 }
 0x1f7   : > { %v3180_v11 = vrot.slane %v2621_v46, 5  ;;  %v3002_v31 = vshll.u32 %v2621_v46, 16  ;;  %v4060_v36 = vshll.u32 %v14818_v32, 16  ;;  %v14829_v46 = vpop.f32.mrb[32].mxu1  ;;  %v14831_v48 = vpop.f32.mrb[51].mxu0  ;;  %v4043_v34 = vrot.slane %v4041_v24, 4 }
 0x1f8   : > { %v4038_v33 = vrot.slane %v4036_v10, 5  ;;  %v4046_v51 = vrot.slane %v4044_v3, 5  ;;  %v14838_v10 = vpop.f32.mrb[33].mxu1  ;;  %v4604_v45 = vrot.slane %v4602_v40, 4  ;;  %v12601_v24 = vld [vmem:[#allocation9 + $0xd0] sm:$0xff]   ;;  %v14849_v32 = vadd.f32 %v11329_v5, %v11217_v25 }
 0x1f9   : > { %v3181_v17 = vsel %vm13316_vm11, %v14746_v20, %v3180_v11  ;;  %v3004_v42 = vrot.slane %v3002_v31, 5  ;;  %v4062_v31 = vrot.slane %v4060_v36, 5  ;;  %v11332_v40 = vadd.f32 %v14710_v38, %v14705_v28  ;;  %11615 = vmatprep.subr.bf16.mxu1 %v12601_v24  ;;  %v12753_v25 = vld [vmem:[#allocation2 + $0x38] sm:$0x1] }
 0x1fa   : > { %v10513_v12 = vcombine.low %v14756_v29, %v3181_v17  ;;  %v4039_v20 = vsel %vm13484_vm14, %v14742_v53, %v4038_v33  ;;  %v14847_v29 = vpop.f32.mrb[34].mxu1  ;;  %v4047_v17 = vor.u32 %v4046_v51, %v4043_v34  ;;  %v17317_v53 = vrot.slane %v14103_v26, 5  ;;  %v12754_v34 = vld [vmem:[#allocation2 + $0x40] sm:$0xf]  ;;  %11616 = vmatpush3.bf16.msra.mxu1 %v12602_v18 }
 0x1fb   : > { %v3005_v11 = vsel %vm13484_vm14, %v3000_v4, %v3004_v42  ;;  %v10560_v3 = vcombine.low %v4029_v23, %v4039_v20  ;;  %v11343_v15 = vpop.f32.mrb[35].mxu1  ;;  %v10580_v33 = vrot.slane %v4547_v47, 9  ;;  %v14857_v42 = vld [vmem:[#allocation2 + $0x48] sm:$0xe]  ;;  %v4063_v51 = vsel %vm13484_vm14, %v4058_v43, %v4062_v31  ;;  %v12752_v23 = vld [vmem:[#allocation2 + $0x34] sm:$0xf] }
 0x1fc   : > { %3590 = vmatprep.mubr.bf16.mxu0 %v10513_v12  ;;  %v10497_v49 = vcombine.low %v2995_v62, %v3005_v11  ;;  %v4606_v4 = vsel %vm13316_vm11, %v4604_v45, %v17317_v53  ;;  %v4048_v12 = vrot.slane %v4047_v17, 4  ;;  %v4609_v62 = vrot.slane %v12752_v23, 5  ;;  %v14861_v5 = vpop.f32.mrb[52].mxu0  ;;  %v12755_v45 = vld [vmem:[#allocation2 + $0x44] sm:$0x1] }
 0x1fd   : > { %4496 = vmatprep.mubr.bf16.mxu1 %v10560_v3  ;;  %v4612_v26 = vrot.slane %v12753_v25, 5  ;;  %v17318_v36 = vcombine.low %v14683_v13, %v14685_v55  ;;  %v10595_v28 = vcombine.low %v14836_v6, %v4606_v4  ;;  %v14867_v38 = vadd.f32 %v11332_v40, %v11220_v59  ;;  %v14870_v43 = vpop.f32.mrb[53].mxu0  ;;  %v12757_v23 = vld [vmem:[#allocation2 + $0x50] sm:$0x1] }
 0x1fe   : > { %3591 = vmatmul.mubr.bf16.gmra.mrb[140].mxu0 %v10497_v49  ;;  %v10581_v47 = vrot.slane %v14845_v8, 9  ;;  %v4616_v20 = vrot.slane %v12754_v34, 5  ;;  %v4053_v11 = vsel %vm13484_vm14, %v4048_v12, %v14782_v16  ;;  %v4610_v31 = vsel %vm13316_vm11, %v10580_v33, %v4609_v62  ;;  %v14879_v6 = vpop.f32.mrb[54].mxu0  ;;  %v11345_v49 = vpop.f32.mrb[36].mxu1 }
 0x1ff   : > { %4497 = vmatmul.mubr.bf16.gmra.mrb[104].mxu1 %v17318_v36  ;;  %12123 = vmatprep.mubr.bf16.mxu0 %v10594_v52  ;;  %v4611_v13 = vrot.slane %v4609_v62, 4  ;;  %v11223_v52 = vadd.f32 %v14734_v58, %v14727_v50  ;;  %v10561_v59 = vcombine.low %v4053_v11, %v4063_v51  ;;  %v4619_v24 = vrot.slane %v12755_v45, 5  ;;  %v11237_v17 = vpop.f32.mrb[55].mxu0  ;;  %v11346_v58 = vpop.f32.mrb[37].mxu1  ;;  %v12758_v62 = vld [vmem:[#allocation2 + $0x58] sm:$0xf] }
 0x200   : > { %v4618_v8 = vrot.slane %v4616_v20, 4  ;;  %v11335_v3 = vadd.f32 %v14758_v0, %v14748_v14  ;;  %v11226_v53 = vadd.f32 %v14760_v27, %v14740_v2  ;;  %v11338_v50 = vadd.f32 %v14774_v37, %v14768_v22  ;;  %v12756_v0 = vld [vmem:[#allocation2 + $0x4c] sm:$0xf]  ;;  %v11348_v12 = vpop.f32.mrb[38].mxu1  ;;  %v12760_v11 = vld [vmem:[#allocation2 + $0x5c] sm:$0x1] }
 0x201   : > { %v4613_v16 = vsel %vm13316_vm11, %v4611_v13, %v4612_v26  ;;  %v10582_v18 = vrot.slane %v14857_v42, 9  ;;  %4504 = vmatprep.mubr.bf16.mxu1 %v10561_v59  ;;  %v10545_v4 = vcombine.low %v14812_v56, %v14732_v7  ;;  %v4623_v33 = vrot.slane %v12756_v0, 5  ;;  %v11349_v27 = vpop.f32.mrb[39].mxu1  ;;  %v4550_v42 = vld [vmem:[#allocation2 + $0x54] sm:$0xe] }
 0x202   : > { %v10596_v40 = vcombine.low %v4610_v31, %v4613_v16  ;;  %v14892_v14 = vadd.f32 %v11335_v3, %v11223_v52  ;;  %v14894_v51 = vadd.f32 %v11338_v50, %v11226_v53  ;;  %v4626_v2 = vrot.slane %v12757_v23, 5  ;;  %v4552_v13 = vld [vmem:[#allocation2 + $0x6c] sm:$0xe]  ;;  %v12762_v50 = vld [vmem:[#allocation2 + $0x70] sm:$0xf] }
 0x203   : > { %v4617_v22 = vsel %vm13316_vm11, %v10581_v47, %v4616_v20  ;;  %v4625_v37 = vrot.slane %v4623_v33, 4  ;;  %v4630_v25 = vrot.slane %v12758_v62, 5  ;;  %v11229_v56 = vadd.f32 %v14816_v54, %v14809_v1  ;;  %v4551_v1 = vld [vmem:[#allocation2 + $0x60] sm:$0xe] }
 0x204   : > { %v11341_v26 = vadd.f32 %v14838_v10, %v14829_v46  ;;  %v11232_v36 = vadd.f32 %v14831_v48, %v14823_v63  ;;  %v11344_v34 = vadd.f32 %v11343_v15, %v14847_v29  ;;  %v4620_v47 = vsel %vm13316_vm11, %v4618_v8, %v4619_v24  ;;  %v12759_v10 = vld [vmem:[#allocation2 + $0x64] sm:$0xf]  ;;  %v12761_v24 = vld [vmem:[#allocation2 + $0x68] sm:$0x1] }
 0x205   : > { %v4624_v20 = vsel %vm13316_vm11, %v10582_v18, %v4623_v33  ;;  %v4637_v63 = vrot.slane %v12759_v10, 5  ;;  %v10583_v15 = vrot.slane %v4550_v42, 9  ;;  %v4632_v29 = vrot.slane %v4630_v25, 4 }
 0x206   : > { %12124 = vmatmul.mubr.bf16.vlgmr.msra.gmra.mrb[144].mxu0 %v10595_v28  ;;  %v4627_v28 = vsel %vm13316_vm11, %v4625_v37, %v4626_v2  ;;  %v14911_v54 = vadd.f32 %v11341_v26, %v11229_v56  ;;  %v14913_v46 = vadd.f32 %v11344_v34, %v11232_v36  ;;  %v11239_v48 = vpop.f32.mrb[56].mxu0  ;;  %v4633_v31 = vrot.slane %v12760_v11, 5  ;;  %v14924_v56 = vld [vmem:[#allocation2 + $0x78] sm:$0xe]  ;;  %v12764_v36 = vld [vmem:[#allocation2 + $0x7c] sm:$0xf] }
 0x207   : > { %4505 = vmatmul.mubr.bf16.gmra.mrb[108].mxu1 %v10545_v4  ;;  %12127 = vmatprep.mubr.bf16.mxu0 %v10596_v40  ;;  %v11240_v52 = vpop.f32.mrb[57].mxu0  ;;  %v10597_v59 = vcombine.low %v4617_v22, %v4620_v47  ;;  %v10598_v8 = vcombine.low %v4624_v20, %v4627_v28  ;;  %v10584_v45 = vrot.slane %v4551_v1, 9  ;;  %v4640_v3 = vrot.slane %v12761_v24, 5  ;;  %v14934_v47 = vld [vmem:[#allocation2 + $0x88] sm:$0xf] }
 0x208   : > { %v11242_v16 = vpop.f32.mrb[58].mxu0  ;;  %v4639_v53 = vrot.slane %v4637_v63, 4  ;;  %v4644_v18 = vrot.slane %v12762_v50, 5  ;;  %v11235_v4 = vadd.f32 %v14870_v43, %v14861_v5  ;;  %v11347_v40 = vadd.f32 %v11346_v58, %v11345_v49  ;;  %v12763_v49 = vld [vmem:[#allocation2 + $0x74] sm:$0x1]  ;;  %v12603_v11 = vld [vmem:[#allocation9 + $0xd8] sm:$0xff]  }
 0x209   : > { %v11351_v0 = vpop.f32.mrb[40].mxu1  ;;  %v11243_v33 = vpop.f32.mrb[59].mxu0  ;;  %v11238_v23 = vadd.f32 %v11237_v17, %v14879_v6  ;;  %v11350_v2 = vadd.f32 %v11349_v27, %v11348_v12  ;;  %v4631_v22 = vsel %vm13316_vm11, %v10583_v15, %v4630_v25  ;;  %v4634_v42 = vsel %vm13316_vm11, %v4632_v29, %v4633_v31  ;;  %v14930_v58 = vld [vmem:[#allocation2 + $0x84] sm:$0xe]  ;;  %v14937_v15 = vld [vmem:[#allocation2 + $0x90] sm:$0xe]  ;;  %11617 = vmatprep.subr.bf16.mxu1 %v12603_v11 }
 0x20a   : > { %v11352_v37 = vpop.f32.mrb[41].mxu1  ;;  %v14922_v62 = vadd.f32 %v11347_v40, %v11235_v4  ;;  %v4638_v5 = vsel %vm13316_vm11, %v10584_v45, %v4637_v63  ;;  %v10585_v43 = vrot.slane %v4552_v13, 9  ;;  %v4647_v6 = vrot.slane %v12763_v49, 5  ;;  %v14939_v29 = vld [vmem:[#allocation2 + $0x9c] sm:$0xe]  ;;  %v12604_v31 = vld [vmem:[#allocation9 + $0x98] sm:$0xff]  }
 0x20b   : > { %v11354_v26 = vpop.f32.mrb[42].mxu1  ;;  %v14928_v17 = vadd.f32 %v11350_v2, %v11238_v23  ;;  %v4641_v27 = vsel %vm13316_vm11, %v4639_v53, %v4640_v3  ;;  %v4646_v25 = vrot.slane %v4644_v18, 4  ;;  %v4651_v34 = vrot.slane %v12764_v36, 5  ;;  %v12767_v50 = vld [vmem:[#allocation2 + $0x8c] sm:$0x1]  ;;  %11618 = vmatpush3.bf16.msra.mxu1 %v12604_v31 }
 0x20c   : > { %v11355_v12 = vpop.f32.mrb[43].mxu1  ;;  %v4658_v20 = vrot.slane %v14934_v47, 5  ;;  %v11241_v28 = vadd.f32 %v11240_v52, %v11239_v48  ;;  %v11353_v1 = vadd.f32 %v11352_v37, %v11351_v0  ;;  %v11244_v10 = vadd.f32 %v11243_v33, %v11242_v16  ;;  %v12766_v52 = vld [vmem:[#allocation2 + $0x80] sm:$0x1]  ;;  %v12768_v23 = vld [vmem:[#allocation2 + $0x94] sm:$0xf] }
 0x20d   : > { %v11356_v63 = vadd.f32 %v11355_v12, %v11354_v26  ;;  %v10599_v13 = vcombine.low %v4631_v22, %v4634_v42  ;;  %v10586_v45 = vrot.slane %v14924_v56, 9  ;;  %v4653_v48 = vrot.slane %v4651_v34, 4  ;;  %v12769_v22 = vld [vmem:[#allocation2 + $0x98] sm:$0x1]  ;;  %v14957_v49 = vld [vmem:[#allocation2 + $0xa0] sm:$0xf] }
 0x20e   : > { %12128 = vmatmul.mubr.bf16.gmra.mrb[148].mxu0 %v10597_v59  ;;  %v4558_v59 = vld [vmem:[#allocation2 + $0xb4] sm:$0xe]  ;;  %v14942_v24 = vadd.f32 %v11353_v1, %v11241_v28  ;;  %v4654_v16 = vrot.slane %v12766_v52, 5  ;;  %v10587_v53 = vrot.slane %v14930_v58, 9  ;;  %v4661_v4 = vrot.slane %v12767_v50, 5 }
 0x20f   : > { %12131 = vmatprep.mubr.bf16.mxu0 %v10598_v8  ;;  %v10600_v8 = vcombine.low %v4638_v5, %v4641_v27  ;;  %v14944_v3 = vadd.f32 %v11356_v63, %v11244_v10  ;;  %v4645_v40 = vsel %vm13316_vm11, %v10585_v43, %v4644_v18  ;;  %v4648_v0 = vsel %vm13316_vm11, %v4646_v25, %v4647_v6  ;;  %v14955_v5 = vld [vmem:[#allocation2 + $0xa8] sm:$0xe]  ;;  %v14961_v36 = vld [vmem:[#allocation2 + $0xac] sm:$0xf]  ;;  %v14964_v1 = vld [vmem:[#allocation2 + $0xc0] sm:$0xe] }
 0x210   : > { %v4660_v33 = vrot.slane %v4658_v20, 4  ;;  %v4665_v2 = vrot.slane %v12768_v23, 5  ;;  %v10588_v37 = vrot.slane %v14937_v15, 9  ;;  %v4668_v42 = vrot.slane %v12769_v22, 5 }
 0x211   : > { %v10589_v56 = vrot.slane %v14939_v29, 9  ;;  %v4672_v18 = vrot.slane %v14957_v49, 5  ;;  %v10591_v6 = vrot.slane %v4558_v59, 9  ;;  %v4686_v58 = vrot.slane %v14626_v19, 5 }
 0x212   : > { %v10601_v12 = vcombine.low %v4645_v40, %v4648_v0  ;;  %v4679_v28 = vrot.slane %v14961_v36, 5  ;;  %v4652_v10 = vsel %vm13316_vm11, %v10586_v45, %v4651_v34  ;;  %v4655_v63 = vsel %vm13316_vm11, %v4653_v48, %v4654_v16  ;;  %v12773_v16 = vld [vmem:[#allocation2 + $0xb0] sm:$0x1] }
 0x213   : > { %v11245_v26 = vpop.f32.mrb[60].mxu0  ;;  %v4667_v15 = vrot.slane %v4665_v2, 4  ;;  %v4688_v19 = vrot.slane %v4686_v58, 4  ;;  %v14972_v50 = vsel %vm13316_vm11, %v10591_v6, %v4686_v58  ;;  %v4689_v40 = vrot.slane %v14638_v39, 5 }
 0x214   : > { %v11246_v43 = vpop.f32.mrb[61].mxu0  ;;  %v4674_v34 = vrot.slane %v4672_v18, 4  ;;  %v10590_v48 = vrot.slane %v14955_v5, 9  ;;  %v4682_v23 = vrot.slane %v12773_v16, 5  ;;  %v10602_v22 = vcombine.low %v4652_v10, %v4655_v63  ;;  %v17328_v16 = vld [vmem:[#allocation39_spill] sm:$0xff] }
 0x215   : > { %v11247_v27 = vadd.f32 %v11246_v43, %v11245_v26  ;;  %v11248_v25 = vpop.f32.mrb[62].mxu0  ;;  %v4659_v26 = vsel %vm13316_vm11, %v10587_v53, %v4658_v20  ;;  %v4681_v6 = vrot.slane %v4679_v28, 4  ;;  %v14986_v39 = vsel %vm13316_vm11, %v4688_v19, %v4689_v40 }
 0x216   : > { %12132 = vmatmul.mubr.bf16.gmra.mrb[152].mxu0 %v10599_v13  ;;  %v11357_v11 = vpop.f32.mrb[44].mxu1  ;;  %v11249_v31 = vpop.f32.mrb[63].mxu0  ;;  %v12772_v13 = vld [vmem:[#allocation2 + $0xa4] sm:$0x1]  ;;  %v10607_v5 = vcombine.low %v14972_v50, %v14986_v39  ;;  %v10592_v10 = vrot.slane %v14964_v1, 9  ;;  %v4662_v47 = vsel %vm13316_vm11, %v4660_v33, %v4661_v4  ;;  %v4693_v53 = vrot.slane %v14685_v55, 5 }
 0x217   : > { %12135 = vmatprep.mubr.bf16.mxu0 %v10600_v8  ;;  %v4675_v59 = vrot.slane %v12772_v13, 5  ;;  %v11358_v8 = vpop.f32.mrb[45].mxu1  ;;  %v11250_v52 = vadd.f32 %v11249_v31, %v11248_v25  ;;  %v14998_v63 = vadd.f32 %v14498_v41, %v14494_v57  ;;  %v4669_v31 = vsel %vm13316_vm11, %v4667_v15, %v4668_v42  ;;  %v4560_v15 = vld [vmem:[#allocation2 + $0xcc] sm:$0xe] }
 0x218   : > { %v11359_v45 = vadd.f32 %v11358_v8, %v11357_v11  ;;  %v11360_v0 = vpop.f32.mrb[46].mxu1  ;;  %v4666_v11 = vsel %vm13316_vm11, %v10588_v37, %v4665_v2  ;;  %v4696_v55 = vrot.slane %v14801_v9, 5  ;;  %v15013_v41 = vadd.f32 %v14556_v44, %v14550_v35  ;;  %v17321_v2 = vld [vmem:[#allocation32_spill] sm:$0xff]  ;;  %v17322_v37 = vld [vmem:[#allocation33_spill] sm:$0xff]  ;;  %v17323_v9 = vld [vmem:[#allocation34_spill] sm:$0xff] }
 0x219   : > { %v11361_v43 = vpop.f32.mrb[47].mxu1  ;;  %v15021_v13 = vadd.f32 %v17322_v37, %v17321_v2  ;;  %v4700_v8 = vrot.slane %v14732_v7, 5  ;;  %v17327_v44 = vld [vmem:[#allocation38_spill] sm:$0xff]  ;;  %v10593_v2 = vrot.slane %v4560_v15, 9  ;;  %v4683_v29 = vsel %vm13316_vm11, %v4681_v6, %v4682_v23 }
 0x21a   : > { %v14988_v58 = vadd.f32 %v11359_v45, %v11247_v27  ;;  %v11362_v25 = vadd.f32 %v11361_v43, %v11360_v0  ;;  %v15002_v27 = vadd.f32 %v14510_v30, %v14506_v21  ;;  %v17319_v21 = vld [vmem:[#allocation30_spill] sm:$0xff]  ;;  %v17320_v30 = vld [vmem:[#allocation31_spill] sm:$0xff]  ;;  %v17325_v45 = vld [vmem:[#allocation36_spill] sm:$0xff] }
 0x21b   : > { %v11267_v20 = vpop.f32.mrb[64].mxu0  ;;  %v17326_v0 = vld [vmem:[#allocation37_spill] sm:$0xff]  ;;  %v17329_v43 = vld [vmem:[#allocation22_spill] sm:$0xff]  ;;  %v4702_v49 = vrot.slane %v4700_v8, 4 }
 0x21c   : > { %v15008_v19 = vadd.f32 %v11362_v25, %v11250_v52  ;;  %v11268_v4 = vpop.f32.mrb[65].mxu0  ;;  %v17324_v52 = vld [vmem:[#allocation35_spill] sm:$0xff]  ;;  %v15030_v35 = vadd.f32 %v17326_v0, %v17325_v45  ;;  %v12606_v15 = vld [vmem:[#allocation9 + $0xa0] sm:$0xff]   ;;  %v4680_v45 = vsel %vm13316_vm11, %v10590_v48, %v4679_v28 }
 0x21d   : > { %v11269_v33 = vadd.f32 %v11268_v4, %v11267_v20  ;;  %v11270_v57 = vpop.f32.mrb[66].mxu0  ;;  %v15026_v40 = vadd.f32 %v17324_v52, %v17323_v9  ;;  %v10603_v4 = vcombine.low %v4659_v26, %v4662_v47  ;;  %v4695_v9 = vrot.slane %v4693_v53, 4  ;;  %v17331_v47 = vld [vmem:[#allocation44_spill] sm:$0xff] }
 0x21e   : > { %12136 = vmatmul.mubr.bf16.gmra.mrb[156].mxu0 %v10601_v12  ;;  %v15017_v12 = vadd.f32 %v17320_v30, %v17319_v21  ;;  %v11271_v42 = vpop.f32.mrb[67].mxu0  ;;  %v10604_v21 = vcombine.low %v4666_v11, %v4669_v31  ;;  %v17330_v30 = vld [vmem:[#allocation23_spill] sm:$0xff]  ;;  %v4676_v26 = vsel %vm13316_vm11, %v4674_v34, %v4675_v59  ;;  %v4703_v11 = vrot.slane %v17331_v47, 5 }
 0x21f   : > { %12139 = vmatprep.mubr.bf16.mxu0 %v10602_v22  ;;  %v15034_v22 = vadd.f32 %v17328_v16, %v17327_v44  ;;  %v15037_v25 = vadd.f32 %v11269_v33, %v17329_v43  ;;  %v11272_v20 = vadd.f32 %v11271_v42, %v11270_v57  ;;  %v4673_v33 = vsel %vm13316_vm11, %v10589_v56, %v4672_v18  ;;  %v12605_v42 = vld [vmem:[#allocation9 + $0xe0] sm:$0xff]   ;;  %v17332_v56 = vld [vmem:[#allocation24_spill] sm:$0xff]  ;;  %v17333_v16 = vld [vmem:[#allocation25_spill] sm:$0xff] }
 0x220   : > { %11619 = vmatprep.subr.bf16.mxu1 %v12605_v42  ;;  %v10605_v34 = vcombine.low %v4673_v33, %v4676_v26  ;;  %v10606_v44 = vcombine.low %v4680_v45, %v4683_v29  ;;  %v17334_v26 = vld [vmem:[#allocation26_spill] sm:$0xff] }
 0x221   : > { %v15040_v7 = vadd.f32 %v11272_v20, %v17330_v30  ;;  %11620 = vmatpush3.bf16.msra.mxu1 %v12606_v15  ;;  %v4694_v30 = vsel %vm13316_vm11, %v10592_v10, %v4693_v53  ;;  %v17335_v15 = vld [vmem:[#allocation27_spill] sm:$0xff]  ;;  %v4701_v10 = vsel %vm13316_vm11, %v10593_v2, %v4700_v8  ;;  %v4704_v53 = vsel %vm13316_vm11, %v4702_v49, %v4703_v11 }
 0x222   : > { %v12607_v49 = vld [vmem:[#allocation9 + $0xe8] sm:$0xff]  }
 0x223   : > { %v11273_v37 = vpop.f32.mrb[68].mxu0  ;;  %11621 = vmatprep.subr.bf16.mxu1 %v12607_v49 }
 0x224   : > { %v11274_v52 = vpop.f32.mrb[69].mxu0 }
 0x225   : > { %v11275_v31 = vadd.f32 %v11274_v52, %v11273_v37  ;;  %v11276_v57 = vpop.f32.mrb[70].mxu0  ;;  %v4697_v37 = vsel %vm13316_vm11, %v4695_v9, %v4696_v55 }
 0x226   : > { %12140 = vmatmul.mubr.bf16.gmra.mrb[160].mxu0 %v10603_v4  ;;  %v11277_v0 = vpop.f32.mrb[71].mxu0  ;;  %v10608_v42 = vcombine.low %v4694_v30, %v4697_v37 }
 0x227   : > { %12143 = vmatprep.mubr.bf16.mxu0 %v10604_v21  ;;  %v15058_v18 = vadd.f32 %v11275_v31, %v17332_v56  ;;  %v11278_v59 = vadd.f32 %v11277_v0, %v11276_v57 }
 0x229   : > { %v15061_v43 = vadd.f32 %v11278_v59, %v17333_v16  ;;  %v17336_v59 = vld [vmem:[#allocation28_spill] sm:$0xff] }
 0x22b   : > { %v11279_v36 = vpop.f32.mrb[72].mxu0  ;;  %v11491_v20 = vpop.f32.mrb[48].mxu1 }
 0x22c   : > { %v11280_v28 = vpop.f32.mrb[73].mxu0  ;;  %v11492_v48 = vpop.f32.mrb[49].mxu1 }
 0x22d   : > { %v11281_v23 = vadd.f32 %v11280_v28, %v11279_v36  ;;  %v11282_v6 = vpop.f32.mrb[74].mxu0  ;;  %v11493_v4 = vadd.f32 %v11492_v48, %v11491_v20  ;;  %v11494_v21 = vpop.f32.mrb[50].mxu1  ;;  %v10609_v36 = vcombine.low %v4701_v10, %v4704_v53  ;;  %v12608_v48 = vld [vmem:[#allocation9 + $0xa8] sm:$0xff]  }
 0x22e   : > { %12144 = vmatmul.mubr.bf16.gmra.mrb[164].mxu0 %v10605_v34  ;;  %v11283_v52 = vpop.f32.mrb[75].mxu0  ;;  %v11495_v33 = vpop.f32.mrb[51].mxu1  ;;  %11622 = vmatpush3.bf16.msra.mxu1 %v12608_v48 }
 0x22f   : > { %12147 = vmatprep.mubr.bf16.mxu0 %v10606_v44  ;;  %v15070_v47 = vadd.f32 %v11281_v23, %v17334_v26  ;;  %v11284_v31 = vadd.f32 %v11283_v52, %v11282_v6  ;;  %v11496_v57 = vadd.f32 %v11495_v33, %v11494_v21 }
 0x231   : > { %v15073_v45 = vadd.f32 %v11284_v31, %v17335_v15 }
 0x233   : > { %v11285_v29 = vpop.f32.mrb[76].mxu0 }
 0x234   : > { %v11286_v1 = vpop.f32.mrb[77].mxu0 }
 0x235   : > { %v11287_v55 = vadd.f32 %v11286_v1, %v11285_v29  ;;  %v11288_v9 = vpop.f32.mrb[78].mxu0 }
 0x236   : > { %12148 = vmatmul.mubr.bf16.gmra.mrb[168].mxu0 %v10607_v5  ;;  %v11289_v0 = vpop.f32.mrb[79].mxu0  ;;  %v11497_v56 = vpop.f32.mrb[52].mxu1  ;;  %v17337_v5 = vld [vmem:[#allocation29_spill] sm:$0xff] }
 0x237   : > { %12151 = vmatprep.mubr.bf16.mxu0 %v10608_v42  ;;  %v15083_v34 = vadd.f32 %v11287_v55, %v17336_v59  ;;  %v11290_v44 = vadd.f32 %v11289_v0, %v11288_v9  ;;  %v11498_v16 = vpop.f32.mrb[53].mxu1 }
 0x238   : > { %v11499_v50 = vadd.f32 %v11498_v16, %v11497_v56  ;;  %v11500_v39 = vpop.f32.mrb[54].mxu1 }
 0x239   : > { %v15086_v20 = vadd.f32 %v11290_v44, %v17337_v5  ;;  %v11501_v28 = vpop.f32.mrb[55].mxu1 }
 0x23a   : > { %v11502_v8 = vadd.f32 %v11501_v28, %v11500_v39 }
 0x23b   : > { %v11379_v2 = vpop.f32.mrb[80].mxu0 }
 0x23c   : > { %v11380_v11 = vpop.f32.mrb[81].mxu0 }
 0x23d   : > { %v11381_v23 = vadd.f32 %v11380_v11, %v11379_v2  ;;  %v11382_v6 = vpop.f32.mrb[82].mxu0 }
 0x23e   : > { %12152 = vmatmul.mubr.bf16.gmra.mrb[172].mxu0 %v10609_v36  ;;  %v11383_v21 = vpop.f32.mrb[83].mxu0 }
 0x23f   : > { %v3599_v30 = vadd.f32 %v11381_v23, %v15037_v25  ;;  %v11384_v37 = vadd.f32 %v11383_v21, %v11382_v6  ;;  %v11503_v52 = vpop.f32.mrb[56].mxu1 }
 0x240   : > { %v11504_v33 = vpop.f32.mrb[57].mxu1 }
 0x241   : > { %v3600_v26 = vadd.f32 %v11384_v37, %v15040_v7  ;;  %v11505_v31 = vadd.f32 %v11504_v33, %v11503_v52  ;;  %v11506_v42 = vpop.f32.mrb[58].mxu1  ;;  %v15090_v15 = vadd.f32 %v11493_v4, %v3599_v30 }
 0x242   : > { %v11507_v29 = vpop.f32.mrb[59].mxu1 }
 0x243   : > { %v11385_v1 = vpop.f32.mrb[84].mxu0  ;;  %v11508_v10 = vadd.f32 %v11507_v29, %v11506_v42  ;;  %v15092_v53 = vadd.f32 %v11496_v57, %v3600_v26 }
 0x244   : > { %v11386_v55 = vpop.f32.mrb[85].mxu0 }
 0x245   : > { %v11387_v9 = vadd.f32 %v11386_v55, %v11385_v1  ;;  %v11388_v0 = vpop.f32.mrb[86].mxu0 }
 0x246   : > { %v11389_v56 = vpop.f32.mrb[87].mxu0 }
 0x247   : > { %v3601_v25 = vadd.f32 %v11387_v9, %v15058_v18  ;;  %v11390_v59 = vadd.f32 %v11389_v56, %v11388_v0 }
 0x249   : > { %v3602_v44 = vadd.f32 %v11390_v59, %v15061_v43  ;;  %v15096_v16 = vadd.f32 %v11499_v50, %v3601_v25  ;;  %v12609_v59 = vld [vmem:[#allocation9 + $0xf0] sm:$0xff]  }
 0x24a   : > { %v11509_v7 = vpop.f32.mrb[60].mxu1  ;;  %11623 = vmatprep.subr.bf16.mxu1 %v12609_v59  ;;  %v526_v59 = vld [vmem:[#allocation3 + $0x14] sm:$0x1] }
 0x24b   : > { %v11391_v36 = vpop.f32.mrb[88].mxu0  ;;  %v11510_v4 = vpop.f32.mrb[61].mxu1  ;;  %v15098_v39 = vadd.f32 %v11502_v8, %v3602_v44  ;;  %v12610_v44 = vld [vmem:[#allocation9 + $0x40] sm:$0xff]  }
 0x24c   : > { %v11392_v5 = vpop.f32.mrb[89].mxu0  ;;  %v11511_v28 = vadd.f32 %v11510_v4, %v11509_v7  ;;  %v11512_v57 = vpop.f32.mrb[62].mxu1  ;;  %v12611_v7 = vld [vmem:[#allocation9 + $0xb0] sm:$0xff]   ;;  %11723 = vmatprep.subr.bf16.mxu0 %v12610_v44 }
 0x24d   : > { %v11393_v2 = vadd.f32 %v11392_v5, %v11391_v36  ;;  %v11394_v11 = vpop.f32.mrb[90].mxu0  ;;  %v11513_v49 = vpop.f32.mrb[63].mxu1  ;;  %v12612_v5 = vld [vmem:[#allocation9] sm:$0xff]   ;;  %11624 = vmatpush3.bf16.msra.mxu1 %v12611_v7 }
 0x24e   : > { %v11395_v48 = vpop.f32.mrb[91].mxu0  ;;  %v11514_v23 = vadd.f32 %v11513_v49, %v11512_v57  ;;  %v475_v57 = vld [vmem:[#allocation3 + $0x18] sm:$0x1]  ;;  %11724 = vmatpush3.bf16.msra.mxu0 %v12612_v5 }
 0x24f   : > { %v3603_v18 = vadd.f32 %v11393_v2, %v15070_v47  ;;  %v11396_v6 = vadd.f32 %v11395_v48, %v11394_v11  ;;  %v476_v11 = vsel %vm13263_vm2, 0, %v475_v57 }
 0x250   : > { %477 = vst [vmem:[#allocation3 + $0x18] sm:$0x1] %v476_v11 }
 0x251   : > { %v3604_v43 = vadd.f32 %v11396_v6, %v15073_v45  ;;  %v15102_v50 = vadd.f32 %v11505_v31, %v3603_v18 }
 0x253   : > { %v11397_v21 = vpop.f32.mrb[92].mxu0  ;;  %v15104_v30 = vadd.f32 %v11508_v10, %v3604_v43 }
 0x254   : > { %v11398_v8 = vpop.f32.mrb[93].mxu0  ;;  %v11515_v37 = vpop.f32.mrb[64].mxu1 }
 0x255   : > { %v11399_v52 = vadd.f32 %v11398_v8, %v11397_v21  ;;  %v11400_v33 = vpop.f32.mrb[94].mxu0  ;;  %v11516_v26 = vpop.f32.mrb[65].mxu1 }
 0x256   : > { %v11401_v42 = vpop.f32.mrb[95].mxu0  ;;  %v11517_v29 = vadd.f32 %v11516_v26, %v11515_v37  ;;  %v11518_v1 = vpop.f32.mrb[66].mxu1 }
 0x257   : > { %v3605_v55 = vadd.f32 %v11399_v52, %v15083_v34  ;;  %v11402_v9 = vadd.f32 %v11401_v42, %v11400_v33  ;;  %v11519_v47 = vpop.f32.mrb[67].mxu1 }
 0x258   : > { %v11520_v0 = vadd.f32 %v11519_v47, %v11518_v1  ;;  %v529_v47 = vld [vmem:[#allocation3 + $0x20] sm:$0x1] }
 0x259   : > { %v3606_v45 = vadd.f32 %v11402_v9, %v15086_v20  ;;  %v15108_v31 = vadd.f32 %v11511_v28, %v3605_v55  ;;  %v472_v9 = vld [vmem:[#allocation3 + $0xc] sm:$0x1] }
 0x25b   : > { %v11403_v56 = vpop.f32.mrb[96].mxu0  ;;  %v15110_v10 = vadd.f32 %v11514_v23, %v3606_v45 }
 0x25c   : > { %v11404_v25 = vpop.f32.mrb[97].mxu0 }
 0x25d   : > { %v11405_v36 = vadd.f32 %v11404_v25, %v11403_v56  ;;  %v11406_v4 = vpop.f32.mrb[98].mxu0  ;;  %v12613_v25 = vld [vmem:[#allocation9 + $0x48] sm:$0xff]  }
 0x25e   : > { %v11407_v2 = vpop.f32.mrb[99].mxu0  ;;  %11725 = vmatprep.subr.bf16.mxu0 %v12613_v25 }
 0x25f   : > { %v3607_v20 = vadd.f32 %v11405_v36, %v14998_v63  ;;  %v11408_v28 = vadd.f32 %v11407_v2, %v11406_v4  ;;  %v11521_v49 = vpop.f32.mrb[68].mxu1  ;;  %v12614_v36 = vld [vmem:[#allocation9 + $0x8] sm:$0xff]   ;;  %v12615_v4 = vld [vmem:[#allocation9 + $0x50] sm:$0xff]  }
 0x260   : > { %v11522_v48 = vpop.f32.mrb[69].mxu1  ;;  %11726 = vmatpush3.bf16.msra.mxu0 %v12614_v36 }
 0x261   : > { %v3608_v23 = vadd.f32 %v11408_v28, %v15002_v27  ;;  %v11523_v18 = vadd.f32 %v11522_v48, %v11521_v49  ;;  %v11524_v6 = vpop.f32.mrb[70].mxu1  ;;  %v15116_v43 = vadd.f32 %v11517_v29, %v3607_v20  ;;  %v473_v27 = vsel %vm13263_vm2, 0, %v472_v9  ;;  %v12616_v49 = vld [vmem:[#allocation9 + $0x10] sm:$0xff]   ;;  %11727 = vmatprep.subr.bf16.mxu0 %v12615_v4 }
 0x262   : > { %v11525_v21 = vpop.f32.mrb[71].mxu1  ;;  %474 = vst [vmem:[#allocation3 + $0xc] sm:$0x1] %v473_v27 }
 0x263   : > { %v11409_v8 = vpop.f32.mrb[100].mxu0  ;;  %v11526_v37 = vadd.f32 %v11525_v21, %v11524_v6  ;;  %v15118_v52 = vadd.f32 %v11520_v0, %v3608_v23  ;;  %v530_v0 = vsel %vm13268_vm4, 0, %v529_v47 }
 0x264   : > { %v11410_v33 = vpop.f32.mrb[101].mxu0  ;;  %531 = vst [vmem:[#allocation3 + $0x20] sm:$0x1] %v530_v0  ;;  %11728 = vmatpush3.bf16.msra.mxu0 %v12616_v49  ;;  %v12619_v49 = vld [vmem:[#allocation9 + $0xf8] sm:$0xff]  }
 0x265   : > { %v11411_v26 = vadd.f32 %v11410_v33, %v11409_v8  ;;  %v11412_v63 = vpop.f32.mrb[102].mxu0  ;;  %11625 = vmatprep.subr.bf16.mxu1 %v12619_v49 }
 0x266   : > { %v11413_v42 = vpop.f32.mrb[103].mxu0 }
 0x267   : > { %v3609_v1 = vadd.f32 %v11411_v26, %v15013_v41  ;;  %v11414_v55 = vadd.f32 %v11413_v42, %v11412_v63  ;;  %v527_v41 = vsel %vm13268_vm4, 0, %v526_v59  ;;  %v478_v26 = vld [vmem:[#allocation3 + $0x24] sm:$0x1]  ;;  %v535_v63 = vld [vmem:[#allocation3 + $0x38] sm:$0x1] }
 0x268   : > { %528 = vst [vmem:[#allocation3 + $0x14] sm:$0x1] %v527_v41 }
 0x269   : > { %v3610_v29 = vadd.f32 %v11414_v55, %v15017_v12  ;;  %v11527_v45 = vpop.f32.mrb[72].mxu1  ;;  %v15126_v44 = vadd.f32 %v11523_v18, %v3609_v1  ;;  %v481_v12 = vld [vmem:[#allocation3 + $0x30] sm:$0x1]  ;;  %v536_v1 = vsel %vm13268_vm4, 0, %v535_v63 }
 0x26a   : > { %v11528_v7 = vpop.f32.mrb[73].mxu1  ;;  %v482_v48 = vsel %vm13263_vm2, 0, %v481_v12  ;;  %537 = vst [vmem:[#allocation3 + $0x38] sm:$0x1] %v536_v1 }
 0x26b   : > { %v11415_v5 = vpop.f32.mrb[104].mxu0  ;;  %v11529_v57 = vadd.f32 %v11528_v7, %v11527_v45  ;;  %v11530_v2 = vpop.f32.mrb[74].mxu1  ;;  %v15130_v11 = vadd.f32 %v11526_v37, %v3610_v29  ;;  %483 = vst [vmem:[#allocation3 + $0x30] sm:$0x1] %v482_v48  ;;  %v479_v37 = vsel %vm13263_vm2, 0, %v478_v26  ;;  %v12620_v48 = vld [vmem:[#allocation9 + $0x60] sm:$0xff]  }
 0x26c   : > { %v11416_v20 = vpop.f32.mrb[105].mxu0  ;;  %v11531_v28 = vpop.f32.mrb[75].mxu1  ;;  %480 = vst [vmem:[#allocation3 + $0x24] sm:$0x1] %v479_v37  ;;  %v541_v26 = vld [vmem:[#allocation3 + $0x50] sm:$0x1] }
 0x26d   : > { %v11417_v23 = vadd.f32 %v11416_v20, %v11415_v5  ;;  %v11418_v18 = vpop.f32.mrb[106].mxu0  ;;  %v11532_v6 = vadd.f32 %v11531_v28, %v11530_v2  ;;  %v532_v2 = vld [vmem:[#allocation3 + $0x2c] sm:$0x1]  ;;  %v12618_v28 = vld [vmem:[#allocation9 + $0x18] sm:$0xff]   ;;  %v542_v1 = vsel %vm13268_vm4, 0, %v541_v26 }
 0x26e   : > { %v11419_v21 = vpop.f32.mrb[107].mxu0  ;;  %v533_v20 = vsel %vm13268_vm4, 0, %v532_v2  ;;  %543 = vst [vmem:[#allocation3 + $0x50] sm:$0x1] %v542_v1  ;;  %v17342_v1 = vld [vmem:[#allocation42_spill] sm:$0xff] }
 0x26f   : > { %v3611_v8 = vadd.f32 %v11417_v23, %v15021_v13  ;;  %v11420_v33 = vadd.f32 %v11419_v21, %v11418_v18  ;;  %534 = vst [vmem:[#allocation3 + $0x2c] sm:$0x1] %v533_v20  ;;  %v12621_v18 = vld [vmem:[#allocation9 + $0xb8] sm:$0xff]   ;;  %v493_v20 = vld [vmem:[#allocation3 + $0x60] sm:$0x1] }
 0x270   : > { %11626 = vmatpush3.bf16.msra.mxu1 %v12621_v18  ;;  %v494_v49 = vsel %vm13263_vm2, 0, %v493_v20  ;;  %v490_v18 = vld [vmem:[#allocation3 + $0x54] sm:$0x1]  ;;  %v523_v20 = vld [vmem:[#allocation3 + $0x8] sm:$0x1] }
 0x271   : > { %v3612_v42 = vadd.f32 %v11420_v33, %v15026_v40  ;;  %v15140_v55 = vadd.f32 %v11529_v57, %v3611_v8  ;;  %v12617_v57 = vld [vmem:[#allocation9 + $0x58] sm:$0xff]   ;;  %v484_v33 = vld [vmem:[#allocation3 + $0x3c] sm:$0x1]  ;;  %495 = vst [vmem:[#allocation3 + $0x60] sm:$0x1] %v494_v49 }
 0x272   : > { %11729 = vmatprep.subr.bf16.mxu0 %v12617_v57  ;;  %v12625_v57 = vld [vmem:[#allocation9 + $0x70] sm:$0xff]  }
 0x273   : > { %v11421_v9 = vpop.f32.mrb[108].mxu0  ;;  %v15142_v27 = vadd.f32 %v11532_v6, %v3612_v42  ;;  %v487_v6 = vld [vmem:[#allocation3 + $0x48] sm:$0x1]  ;;  %11730 = vmatpush3.bf16.msra.mxu0 %v12618_v28  ;;  %v485_v42 = vsel %vm13263_vm2, 0, %v484_v33 }
 0x274   : > { %v11422_v13 = vpop.f32.mrb[109].mxu0  ;;  %v11533_v47 = vpop.f32.mrb[76].mxu1  ;;  %11731 = vmatprep.subr.bf16.mxu0 %v12620_v48  ;;  %486 = vst [vmem:[#allocation3 + $0x3c] sm:$0x1] %v485_v42 }
 0x275   : > { %v11423_v29 = vadd.f32 %v11422_v13, %v11421_v9  ;;  %v11424_v45 = vpop.f32.mrb[110].mxu0  ;;  %v11534_v0 = vpop.f32.mrb[77].mxu1  ;;  %v17340_v13 = vld [vmem:[#allocation40_spill] sm:$0xff] }
 0x276   : > { %v11425_v25 = vpop.f32.mrb[111].mxu0  ;;  %v11535_v59 = vadd.f32 %v11534_v0, %v11533_v47  ;;  %v11536_v7 = vpop.f32.mrb[78].mxu1 }
 0x277   : > { %v3613_v40 = vadd.f32 %v11423_v29, %v15030_v35  ;;  %v11426_v41 = vadd.f32 %v11425_v25, %v11424_v45  ;;  %v11537_v36 = vpop.f32.mrb[79].mxu1  ;;  %v12622_v35 = vld [vmem:[#allocation9 + $0x20] sm:$0xff]   ;;  %v12623_v25 = vld [vmem:[#allocation9 + $0x68] sm:$0xff]  }
 0x278   : > { %v11538_v4 = vadd.f32 %v11537_v36, %v11536_v7  ;;  %11732 = vmatpush3.bf16.msra.mxu0 %v12622_v35  ;;  %v17341_v7 = vld [vmem:[#allocation41_spill] sm:$0xff] }
 0x279   : > { %v3614_v5 = vadd.f32 %v11426_v41, %v15034_v22  ;;  %v15146_v12 = vadd.f32 %v11535_v59, %v3613_v40  ;;  %v488_v22 = vsel %vm13263_vm2, 0, %v487_v6  ;;  %v538_v59 = vld [vmem:[#allocation3 + $0x44] sm:$0x1]  ;;  %11733 = vmatprep.subr.bf16.mxu0 %v12623_v25 }
 0x27a   : > { %489 = vst [vmem:[#allocation3 + $0x48] sm:$0x1] %v488_v22  ;;  %v547_v22 = vld [vmem:[#allocation3 + $0x68] sm:$0x1]  ;;  %v17343_v25 = vld [vmem:[#allocation43_spill] sm:$0xff] }
 0x27b   : > { %v11427_v23 = vpop.f32.mrb[112].mxu0  ;;  %v15150_v21 = vadd.f32 %v11538_v4, %v3614_v5  ;;  %v539_v4 = vsel %vm13268_vm4, 0, %v538_v59  ;;  %v12624_v5 = vld [vmem:[#allocation9 + $0x28] sm:$0xff]   ;;  %v548_v26 = vsel %vm13268_vm4, 0, %v547_v22 }
 0x27c   : > { %v11428_v8 = vpop.f32.mrb[113].mxu0  ;;  %540 = vst [vmem:[#allocation3 + $0x44] sm:$0x1] %v539_v4  ;;  %11734 = vmatpush3.bf16.msra.mxu0 %v12624_v5  ;;  %549 = vst [vmem:[#allocation3 + $0x68] sm:$0x1] %v548_v26  ;;  %v12631_v5 = vld [vmem:[#allocation9 + $0x140] sm:$0xff]  }
 0x27d   : > { %v11429_v37 = vadd.f32 %v11428_v8, %v11427_v23  ;;  %v11430_v63 = vpop.f32.mrb[114].mxu0  ;;  %v12626_v23 = vld [vmem:[#allocation9 + $0x30] sm:$0xff]   ;;  %11735 = vmatprep.subr.bf16.mxu0 %v12625_v57  ;;  %v491_v8 = vsel %vm13263_vm2, 0, %v490_v18  ;;  %v469_v4 = vld [vmem:[#allocation3] sm:$0x1]  ;;  %11835 = vmatprep.subr.bf16.mxu1 %v12631_v5 }
 0x27e   : > { %v11431_v9 = vpop.f32.mrb[115].mxu0  ;;  %492 = vst [vmem:[#allocation3 + $0x54] sm:$0x1] %v491_v8  ;;  %v6250_v8 = vld [vmem:[#allocation3] sm:$0xe] }
 0x27f   : > { %v3615_v47 = vadd.f32 %v11429_v37, %v17340_v13  ;;  %v11539_v29 = vpop.f32.mrb[80].mxu1  ;;  %v11432_v45 = vadd.f32 %v11431_v9, %v11430_v63 }
 0x280   : > { %v11540_v0 = vpop.f32.mrb[81].mxu1  ;;  %11736 = vmatpush3.bf16.msra.mxu0 %v12626_v23  ;;  %v524_v23 = vsel %vm13268_vm4, 0, %v523_v20  ;;  %v550_v20 = vld [vmem:[#allocation3 + $0x74] sm:$0x1] }
 0x281   : > { %v3616_v40 = vadd.f32 %v11432_v45, %v17341_v7  ;;  %v11541_v41 = vadd.f32 %v11540_v0, %v11539_v29  ;;  %v11542_v36 = vpop.f32.mrb[82].mxu1  ;;  %v12627_v45 = vld [vmem:[#allocation9 + $0x78] sm:$0xff]   ;;  %v544_v0 = vld [vmem:[#allocation3 + $0x5c] sm:$0x1]  ;;  %525 = vst [vmem:[#allocation3 + $0x8] sm:$0x1] %v524_v23 }
 0x282   : > { %v11543_v2 = vpop.f32.mrb[83].mxu1  ;;  %11737 = vmatprep.subr.bf16.mxu0 %v12627_v45  ;;  %v10683_v45 = vrot.slane %v6250_v8, 9 }
 0x283   : > { %v11544_v28 = vadd.f32 %v11543_v2, %v11542_v36  ;;  %v15164_v48 = vadd.f32 %v11541_v41, %v3615_v47  ;;  %v545_v41 = vsel %vm13268_vm4, 0, %v544_v0  ;;  %v12628_v36 = vld [vmem:[#allocation9 + $0x38] sm:$0xff]   ;;  %v470_v2 = vsel %vm13263_vm2, 0, %v469_v4 }
 0x284   : > { %546 = vst [vmem:[#allocation3 + $0x5c] sm:$0x1] %v545_v41  ;;  %11738 = vmatpush3.bf16.msra.mxu0 %v12628_v36  ;;  %471 = vst [vmem:[#allocation3] sm:$0x1] %v470_v2 }
 0x285   : > { %v15166_v35 = vadd.f32 %v11544_v28, %v3616_v40  ;;  %v11433_v6 = vpop.f32.mrb[116].mxu0  ;;  %v15178_v28 = vld [vmem:[#allocation3 + $0x4] sm:$0xf] }
 0x286   : > { %v11434_v33 = vpop.f32.mrb[117].mxu0  ;;  %v5684_v18 = vshll.u32 %v15178_v28, 16 }
 0x287   : > { %v11435_v37 = vadd.f32 %v11434_v33, %v11433_v6  ;;  %v11436_v63 = vpop.f32.mrb[118].mxu0  ;;  %v5688_v6 = vshrl.u32 %v15178_v28, 16 }
 0x288   : > { %v11437_v42 = vpop.f32.mrb[119].mxu0  ;;  %v5686_v33 = vrot.slane %v5684_v18, 5  ;;  %v5658_v23 = vld [vmem:[#allocation3 + $0x8] sm:$0x1] }
 0x289   : > { %v3617_v9 = vadd.f32 %v11435_v37, %v17342_v1  ;;  %v11438_v47 = vadd.f32 %v11437_v42, %v11436_v63  ;;  %v5690_v26 = vrot.slane %v5688_v6, 4  ;;  %v499_v37 = vld [vmem:[#allocation3 + $0x78] sm:$0x1]  ;;  %v6300_v1 = vrot.slane %v15178_v28, 5 }
 0x28a   : > { %v11545_v13 = vpop.f32.mrb[84].mxu1 }
 0x28b   : > { %v11546_v29 = vpop.f32.mrb[85].mxu1  ;;  %v3618_v59 = vadd.f32 %v11438_v47, %v17343_v25  ;;  %v496_v47 = vld [vmem:[#allocation3 + $0x6c] sm:$0x1]  ;;  %v5691_v41 = vor.u32 %v5690_v26, %v5686_v33  ;;  %v6302_v2 = vrot.slane %v6300_v1, 4  ;;  %v15198_v8 = vsel %vm13316_vm11, %v10683_v45, %v6300_v1 }
 0x28c   : > { %v11547_v7 = vadd.f32 %v11546_v29, %v11545_v13  ;;  %v11548_v40 = vpop.f32.mrb[86].mxu1  ;;  %v500_v13 = vsel %vm13263_vm2, 0, %v499_v37  ;;  %v497_v0 = vsel %vm13263_vm2, 0, %v496_v47  ;;  %v551_v37 = vsel %vm13268_vm4, 0, %v550_v20 }
 0x28d   : > { %v11549_v57 = vpop.f32.mrb[87].mxu1  ;;  %501 = vst [vmem:[#allocation3 + $0x78] sm:$0x1] %v500_v13  ;;  %498 = vst [vmem:[#allocation3 + $0x6c] sm:$0x1] %v497_v0  ;;  %v5694_v13 = vshll.u32 %v5658_v23, 16 }
 0x28e   : > { %v11550_v49 = vadd.f32 %v11549_v57, %v11548_v40  ;;  %v15184_v22 = vadd.f32 %v11547_v7, %v3617_v9  ;;  %v553_v9 = vld [vmem:[#allocation3 + $0x80] sm:$0x1]  ;;  %v6303_v47 = vrot.slane %v5658_v23, 5  ;;  %552 = vst [vmem:[#allocation3 + $0x74] sm:$0x1] %v551_v37 }
 0x28f   : > { %v5626_v57 = vld [vmem:[#allocation3] sm:$0xf]  ;;  %v505_v23 = vld [vmem:[#allocation3 + $0x90] sm:$0x1] }
 0x290   : > { %v15186_v63 = vadd.f32 %v11550_v49, %v3618_v59  ;;  %v11439_v42 = vpop.f32.mrb[120].mxu0  ;;  %v554_v59 = vsel %vm13268_vm4, 0, %v553_v9  ;;  %v5675_v18 = vshrl.u32 %v5626_v57, 16  ;;  %v5678_v6 = vshll.u32 %v5626_v57, 16 }
 0x291   : > { %v11440_v29 = vpop.f32.mrb[121].mxu0  ;;  %555 = vst [vmem:[#allocation3 + $0x80] sm:$0x1] %v554_v59  ;;  %v5696_v59 = vrot.slane %v5694_v13, 5  ;;  %v15205_v1 = vsel %vm13316_vm11, %v6302_v2, %v6303_v47  ;;  %v506_v37 = vsel %vm13263_vm2, 0, %v505_v23 }
 0x292   : > { %v11441_v25 = vadd.f32 %v11440_v29, %v11439_v42  ;;  %v11442_v7 = vpop.f32.mrb[122].mxu0  ;;  %v5677_v0 = vrot.slane %v5675_v18, 4  ;;  %v5680_v9 = vrot.slane %v5678_v6, 5  ;;  %507 = vst [vmem:[#allocation3 + $0x90] sm:$0x1] %v506_v37 }
 0x293   : > { %v11443_v40 = vpop.f32.mrb[123].mxu0 }
 0x294   : > { %v3619_v36 = vadd.f32 %v11441_v25, %v14849_v32  ;;  %v11444_v5 = vadd.f32 %v11443_v40, %v11442_v7  ;;  %v5692_v25 = vrot.slane %v5691_v41, 4  ;;  %v5681_v40 = vor.u32 %v5680_v9, %v5677_v0 }
 0x295   : > { %v11551_v4 = vpop.f32.mrb[88].mxu1 }
 0x296   : > { %v11552_v49 = vpop.f32.mrb[89].mxu1  ;;  %v3620_v26 = vadd.f32 %v11444_v5, %v14867_v38  ;;  %v5682_v20 = vrot.slane %v5681_v40, 4 }
 0x297   : > { %v11553_v42 = vadd.f32 %v11552_v49, %v11551_v4  ;;  %v11554_v32 = vpop.f32.mrb[90].mxu1  ;;  %v5697_v49 = vsel %vm13484_vm14, %v5692_v25, %v5696_v59 }
 0x298   : > { %v11555_v29 = vpop.f32.mrb[91].mxu1  ;;  %v5687_v2 = vsel %vm13484_vm14, %v5682_v20, %v5686_v33  ;;  %v559_v20 = vld [vmem:[#allocation3 + $0x98] sm:$0x1] }
 0x299   : > { %v11556_v7 = vadd.f32 %v11555_v29, %v11554_v32  ;;  %v15207_v45 = vadd.f32 %v11553_v42, %v3619_v36  ;;  %v10651_v36 = vcombine.low %v5626_v57, %v15178_v28 }
 0x29b   : > { %v15211_v4 = vadd.f32 %v11556_v7, %v3620_v26  ;;  %v11445_v5 = vpop.f32.mrb[124].mxu0  ;;  %v10667_v26 = vcombine.low %v5687_v2, %v5697_v49  ;;  %v502_v7 = vld [vmem:[#allocation3 + $0x84] sm:$0x1]  ;;  %v556_v2 = vld [vmem:[#allocation3 + $0x8c] sm:$0x1] }
 0x29c   : > { %v11446_v41 = vpop.f32.mrb[125].mxu0  ;;  %v503_v59 = vsel %vm13263_vm2, 0, %v502_v7  ;;  %v557_v37 = vsel %vm13268_vm4, 0, %v556_v2 }
 0x29d   : > { %v11447_v18 = vadd.f32 %v11446_v41, %v11445_v5  ;;  %v11448_v6 = vpop.f32.mrb[126].mxu0  ;;  %7019 = vmatprep.mubr.bf16.mxu0 %v10667_v26  ;;  %504 = vst [vmem:[#allocation3 + $0x84] sm:$0x1] %v503_v59  ;;  %v560_v41 = vsel %vm13268_vm4, 0, %v559_v20  ;;  %558 = vst [vmem:[#allocation3 + $0x8c] sm:$0x1] %v557_v37 }
 0x29e   : > { %v11449_v42 = vpop.f32.mrb[127].mxu0  ;;  %7020 = vmatmul.mubr.bf16.vlgmr.msra.gmra.mrb[176].mxu0 %v10651_v36  ;;  %561 = vst [vmem:[#allocation3 + $0x98] sm:$0x1] %v560_v41  ;;  %v562_v37 = vld [vmem:[#allocation3 + $0xa4] sm:$0x1] }
 0x29f   : > { %v3621_v32 = vadd.f32 %v11447_v18, %v14892_v14  ;;  %v11450_v13 = vadd.f32 %v11449_v42, %v11448_v6  ;;  %v511_v42 = vld [vmem:[#allocation3 + $0xa8] sm:$0x1] }
 0x2a0   : > { %v11557_v47 = vpop.f32.mrb[92].mxu1 }
 0x2a1   : > { %v3622_v29 = vadd.f32 %v11450_v13, %v14894_v51  ;;  %v11558_v0 = vpop.f32.mrb[93].mxu1  ;;  %v512_v13 = vsel %vm13263_vm2, 0, %v511_v42 }
 0x2a2   : > { %v11559_v9 = vadd.f32 %v11558_v0, %v11557_v47  ;;  %v11560_v25 = vpop.f32.mrb[94].mxu1  ;;  %513 = vst [vmem:[#allocation3 + $0xa8] sm:$0x1] %v512_v13  ;;  %v563_v13 = vsel %vm13268_vm4, 0, %v562_v37 }
 0x2a3   : > { %v11561_v33 = vpop.f32.mrb[95].mxu1  ;;  %564 = vst [vmem:[#allocation3 + $0xa4] sm:$0x1] %v563_v13 }
 0x2a4   : > { %v11562_v28 = vadd.f32 %v11561_v33, %v11560_v25  ;;  %v15222_v57 = vadd.f32 %v11559_v9, %v3621_v32 }
 0x2a6   : > { %v15226_v14 = vadd.f32 %v11562_v28, %v3622_v29  ;;  %v508_v28 = vld [vmem:[#allocation3 + $0x9c] sm:$0x1] }
 0x2a7   : > { %v11451_v40 = vpop.f32.mrb[128].mxu0 }
 0x2a8   : > { %v11452_v5 = vpop.f32.mrb[129].mxu0 }
 0x2a9   : > { %v11453_v49 = vadd.f32 %v11452_v5, %v11451_v40  ;;  %v11454_v51 = vpop.f32.mrb[130].mxu0 }
 0x2aa   : > { %v11455_v23 = vpop.f32.mrb[131].mxu0 }
 0x2ab   : > { %v3623_v18 = vadd.f32 %v11453_v49, %v14911_v54  ;;  %v11456_v6 = vadd.f32 %v11455_v23, %v11454_v51  ;;  %v11563_v36 = vpop.f32.mrb[96].mxu1 }
 0x2ac   : > { %v11564_v32 = vpop.f32.mrb[97].mxu1 }
 0x2ad   : > { %v3624_v26 = vadd.f32 %v11456_v6, %v14913_v46  ;;  %v11565_v47 = vadd.f32 %v11564_v32, %v11563_v36  ;;  %v11566_v29 = vpop.f32.mrb[98].mxu1  ;;  %v509_v46 = vsel %vm13263_vm2, 0, %v508_v28  ;;  %v565_v36 = vld [vmem:[#allocation3 + $0xb0] sm:$0x1] }
 0x2ae   : > { %v11567_v0 = vpop.f32.mrb[99].mxu1  ;;  %510 = vst [vmem:[#allocation3 + $0x9c] sm:$0x1] %v509_v46  ;;  %v566_v32 = vsel %vm13268_vm4, 0, %v565_v36  ;;  %v514_v46 = vld [vmem:[#allocation3 + $0xb4] sm:$0x1] }
 0x2af   : > { %v11568_v9 = vadd.f32 %v11567_v0, %v11566_v29  ;;  %v15236_v54 = vadd.f32 %v11565_v47, %v3623_v18  ;;  %567 = vst [vmem:[#allocation3 + $0xb0] sm:$0x1] %v566_v32 }
 0x2b1   : > { %v15238_v33 = vadd.f32 %v11568_v9, %v3624_v26 }
 0x2b2   : > { %v11457_v25 = vpop.f32.mrb[132].mxu0 }
 0x2b3   : > { %v11458_v7 = vpop.f32.mrb[133].mxu0 }
 0x2b4   : > { %v11459_v59 = vadd.f32 %v11458_v7, %v11457_v25  ;;  %v11460_v40 = vpop.f32.mrb[134].mxu0 }
 0x2b5   : > { %v11461_v5 = vpop.f32.mrb[135].mxu0 }
 0x2b6   : > { %v3625_v20 = vadd.f32 %v11459_v59, %v14922_v62  ;;  %v11462_v49 = vadd.f32 %v11461_v5, %v11460_v40  ;;  %v517_v62 = vld [vmem:[#allocation3 + $0xc0] sm:$0x1]  ;;  %v515_v5 = vsel %vm13263_vm2, 0, %v514_v46 }
 0x2b7   : > { %516 = vst [vmem:[#allocation3 + $0xb4] sm:$0x1] %v515_v5 }
 0x2b8   : > { %v11569_v51 = vpop.f32.mrb[100].mxu1  ;;  %v3626_v41 = vadd.f32 %v11462_v49, %v14928_v17  ;;  %v518_v17 = vsel %vm13263_vm2, 0, %v517_v62 }
 0x2b9   : > { %v11570_v23 = vpop.f32.mrb[101].mxu1  ;;  %519 = vst [vmem:[#allocation3 + $0xc0] sm:$0x1] %v518_v17 }
 0x2ba   : > { %v11571_v18 = vadd.f32 %v11570_v23, %v11569_v51  ;;  %v11572_v6 = vpop.f32.mrb[102].mxu1  ;;  %v568_v51 = vld [vmem:[#allocation3 + $0xbc] sm:$0x1] }
 0x2bb   : > { %v11573_v2 = vpop.f32.mrb[103].mxu1 }
 0x2bc   : > { %v11574_v42 = vadd.f32 %v11573_v2, %v11572_v6  ;;  %v15244_v26 = vadd.f32 %v11571_v18, %v3625_v20  ;;  %v571_v20 = vld [vmem:[#allocation3 + $0xc8] sm:$0x1] }
 0x2bd   : > { %v572_v49 = vsel %vm13268_vm4, 0, %v571_v20 }
 0x2be   : > { %v11463_v47 = vpop.f32.mrb[136].mxu0  ;;  %v15252_v29 = vadd.f32 %v11574_v42, %v3626_v41  ;;  %573 = vst [vmem:[#allocation3 + $0xc8] sm:$0x1] %v572_v49  ;;  %v569_v41 = vsel %vm13268_vm4, 0, %v568_v51 }
 0x2bf   : > { %v11464_v0 = vpop.f32.mrb[137].mxu0  ;;  %570 = vst [vmem:[#allocation3 + $0xbc] sm:$0x1] %v569_v41 }
 0x2c0   : > { %v11465_v9 = vadd.f32 %v11464_v0, %v11463_v47  ;;  %v11466_v25 = vpop.f32.mrb[138].mxu0 }
 0x2c1   : > { %v11467_v7 = vpop.f32.mrb[139].mxu0 }
 0x2c2   : > { %v3627_v28 = vadd.f32 %v11465_v9, %v14942_v24  ;;  %v11468_v59 = vadd.f32 %v11467_v7, %v11466_v25  ;;  %v15271_v7 = vld [vmem:[%s17241_s2] ss:$0 sm:$0xff] }
 0x2c4   : > { %v3628_v40 = vadd.f32 %v11468_v59, %v14944_v3 }
 0x2d1   : > { %v11469_v23 = vpop.f32.mrb[140].mxu0 }
 0x2d2   : > { %v11575_v24 = vpop.f32.mrb[104].mxu1  ;;  %v11470_v18 = vpop.f32.mrb[141].mxu0 }
 0x2d3   : > { %v11576_v6 = vpop.f32.mrb[105].mxu1  ;;  %v11471_v3 = vadd.f32 %v11470_v18, %v11469_v23  ;;  %v11472_v2 = vpop.f32.mrb[142].mxu0 }
 0x2d4   : > { %v11577_v36 = vadd.f32 %v11576_v6, %v11575_v24  ;;  %v11578_v37 = vpop.f32.mrb[106].mxu1  ;;  %v11473_v42 = vpop.f32.mrb[143].mxu0 }
 0x2d5   : > { %v11579_v32 = vpop.f32.mrb[107].mxu1  ;;  %v3629_v13 = vadd.f32 %v11471_v3, %v14988_v58  ;;  %v11474_v62 = vadd.f32 %v11473_v42, %v11472_v2 }
 0x2d6   : > { %v11580_v17 = vadd.f32 %v11579_v32, %v11578_v37  ;;  %v15263_v47 = vadd.f32 %v11577_v36, %v3627_v28 }
 0x2d7   : > { %v3630_v0 = vadd.f32 %v11474_v62, %v15008_v19 }
 0x2d8   : > { %v15266_v9 = vadd.f32 %v11580_v17, %v3628_v40 }
 0x2d9   : > { %v12125_v25 = vpop.f32.mrb[144].mxu0 }
 0x2da   : > { %v11581_v59 = vpop.f32.mrb[108].mxu1  ;;  %v4996_v46 = vadd.f32 %v12125_v25, %v15096_v16  ;;  %v4867_v5 = vpop.f32.mrb[145].mxu0 }
 0x2db   : > { %v11582_v20 = vpop.f32.mrb[109].mxu1  ;;  %v4994_v58 = vadd.f32 %v4867_v5, %v15090_v15  ;;  %v12126_v49 = vpop.f32.mrb[146].mxu0 }
 0x2dc   : > { %v11583_v28 = vadd.f32 %v11582_v20, %v11581_v59  ;;  %v11584_v51 = vpop.f32.mrb[110].mxu1  ;;  %v5035_v19 = vadd.f32 %v15271_v7, %v4996_v46  ;;  %v4997_v40 = vadd.f32 %v12126_v49, %v15098_v39  ;;  %v4870_v41 = vpop.f32.mrb[147].mxu0 }
 0x2dd   : > { %v11585_v23 = vpop.f32.mrb[111].mxu1  ;;  %v5033_v24 = vadd.f32 %v15271_v7, %v4994_v58  ;;  %v4995_v18 = vadd.f32 %v4870_v41, %v15092_v53 }
 0x2de   : > { %v11586_v6 = vadd.f32 %v11585_v23, %v11584_v51  ;;  %v5067_v3 = vmax.f32 %v5035_v19, 0.0  ;;  %v5036_v16 = vadd.f32 %v15271_v7, %v4997_v40  ;;  %v15280_v2 = vadd.f32 %v11583_v28, %v3629_v13  ;;  %v5521_v23 = vld [vmem:[#allocation3 + $0x18] sm:$0xf] }
 0x2df   : > { %v5065_v15 = vmax.f32 %v5033_v24, 0.0  ;;  %v5034_v36 = vadd.f32 %v15271_v7, %v4995_v18 }
 0x2e0   : > { %v10981_v37 = vpack.c.bf16 %v5067_v3, %v5067_v3  ;;  %v5068_v42 = vmax.f32 %v5036_v16, 0.0  ;;  %v15283_v32 = vadd.f32 %v11586_v6, %v3630_v0 }
 0x2e1   : > { %v10979_v39 = vpack.c.bf16 %v5065_v15, %v5065_v15  ;;  %v5066_v62 = vmax.f32 %v5034_v36, 0.0  ;;  %v12129_v17 = vpop.f32.mrb[148].mxu0  ;;  %v5514_v15 = vld [vmem:[#allocation3 + $0xc] sm:$0xf] }
 0x2e2   : > { %v5211_v25 = vshrl.u32 %v10981_v37, 16  ;;  %v5214_v59 = vshll.u32 %v10981_v37, 16  ;;  %v10982_v46 = vpack.c.bf16 %v5068_v42, %v5068_v42  ;;  %v5000_v53 = vadd.f32 %v12129_v17, %v15108_v31  ;;  %v4883_v5 = vpop.f32.mrb[149].mxu0 }
 0x2e3   : > { %v5194_v20 = vshrl.u32 %v10979_v39, 16  ;;  %v5197_v58 = vshll.u32 %v10979_v39, 16  ;;  %v10980_v13 = vpack.c.bf16 %v5066_v62, %v5066_v62  ;;  %v4998_v49 = vadd.f32 %v4883_v5, %v15102_v50  ;;  %v12130_v28 = vpop.f32.mrb[150].mxu0  ;;  %v5525_v39 = vld [vmem:[#allocation3 + $0x20] sm:$0x1] }
 0x2e4   : > { %v5213_v51 = vrot.slane %v5211_v25, 7  ;;  %v5219_v19 = vshrl.u32 %v10982_v46, 16  ;;  %v5222_v40 = vshll.u32 %v10982_v46, 16  ;;  %v5039_v0 = vadd.f32 %v15271_v7, %v5000_v53  ;;  %v4886_v41 = vpop.f32.mrb[151].mxu0 }
 0x2e5   : > { %v5196_v24 = vrot.slane %v5194_v20, 7  ;;  %v5202_v18 = vshrl.u32 %v10980_v13, 16  ;;  %v5205_v6 = vshll.u32 %v10980_v13, 16  ;;  %v5037_v3 = vadd.f32 %v15271_v7, %v4998_v49  ;;  %v5518_v20 = vld [vmem:[#allocation3 + $0x14] sm:$0x1] }
 0x2e6   : > { %v5216_v31 = vor.u32 %v5214_v59, %v5213_v51  ;;  %v5217_v16 = vrot.slane %v5213_v51, 4  ;;  %v5221_v36 = vrot.slane %v5219_v19, 7  ;;  %v5071_v37 = vmax.f32 %v5039_v0, 0.0 }
 0x2e7   : > { %v5199_v42 = vor.u32 %v5197_v58, %v5196_v24  ;;  %v5200_v50 = vrot.slane %v5196_v24, 4  ;;  %v5204_v62 = vrot.slane %v5202_v18, 7  ;;  %v5069_v17 = vmax.f32 %v5037_v3, 0.0 }
 0x2e8   : > { %v5522_v46 = vsel %vm13290_vm10, %v5216_v31, %v5521_v23  ;;  %v5224_v53 = vor.u32 %v5222_v40, %v5221_v36  ;;  %v5226_v5 = vrot.slane %v5221_v36, 4  ;;  %v10985_v38 = vpack.c.bf16 %v5071_v37, %v5071_v37 }
 0x2e9   : > { %5523 = vst [vmem:[#allocation3 + $0x18] sm:$0xf] %v5522_v46  ;;  %v5515_v59 = vsel %vm13290_vm10, %v5199_v42, %v5514_v15  ;;  %v5207_v13 = vor.u32 %v5205_v6, %v5204_v62  ;;  %v5209_v49 = vrot.slane %v5204_v62, 4  ;;  %v10983_v51 = vpack.c.bf16 %v5069_v17, %v5069_v17  ;;  %v12133_v19 = vpop.f32.mrb[152].mxu0  ;;  %v5535_v62 = vld [vmem:[#allocation3 + $0x30] sm:$0xf] }
 0x2ea   : > { %5516 = vst [vmem:[#allocation3 + $0xc] sm:$0xf] %v5515_v59  ;;  %v5225_v0 = vsel %vm13280_vm9, %v5217_v16, %v5224_v53  ;;  %v5526_v24 = vsel %vm13263_vm2, %v5226_v5, %v5525_v39  ;;  %v5245_v23 = vshrl.u32 %v10985_v38, 16  ;;  %v5248_v40 = vshll.u32 %v10985_v38, 16  ;;  %v4899_v18 = vpop.f32.mrb[153].mxu0 }
 0x2eb   : > { %5524 = vst [vmem:[#allocation3 + $0x1c] sm:$0xf] %v5225_v0  ;;  %5527 = vst [vmem:[#allocation3 + $0x20] sm:$0x1] %v5526_v24  ;;  %v5208_v3 = vsel %vm13280_vm9, %v5200_v50, %v5207_v13  ;;  %v5519_v6 = vsel %vm13263_vm2, %v5209_v49, %v5518_v20  ;;  %v5228_v31 = vshrl.u32 %v10983_v51, 16  ;;  %v5231_v15 = vshll.u32 %v10983_v51, 16 }
 0x2ec   : > { %v12134_v36 = vpop.f32.mrb[154].mxu0  ;;  %5517 = vst [vmem:[#allocation3 + $0x10] sm:$0xf] %v5208_v3  ;;  %5520 = vst [vmem:[#allocation3 + $0x14] sm:$0x1] %v5519_v6  ;;  %v15301_v16 = vrot.slane %v5245_v23, 7  ;;  %v5001_v37 = vadd.f32 %v12130_v28, %v15110_v10  ;;  %v4999_v38 = vadd.f32 %v4886_v41, %v15104_v30  ;;  %v5004_v42 = vadd.f32 %v12133_v19, %v15126_v44 }
 0x2ed   : > { %v4902_v39 = vpop.f32.mrb[155].mxu0  ;;  %v15306_v17 = vrot.slane %v5228_v31, 7  ;;  %v5002_v50 = vadd.f32 %v4899_v18, %v15116_v43  ;;  %v5005_v46 = vadd.f32 %v12134_v36, %v15130_v11  ;;  %v5528_v59 = vld [vmem:[#allocation3 + $0x24] sm:$0xf] }
 0x2ee   : > { %v5003_v53 = vadd.f32 %v4902_v39, %v15118_v52  ;;  %v5250_v5 = vor.u32 %v5248_v40, %v15301_v16  ;;  %v5251_v20 = vrot.slane %v15301_v16, 4  ;;  %v5040_v10 = vadd.f32 %v15271_v7, %v5001_v37 }
 0x2ef   : > { %v5038_v30 = vadd.f32 %v15271_v7, %v4999_v38  ;;  %v5233_v44 = vor.u32 %v5231_v15, %v15306_v17  ;;  %v5234_v28 = vrot.slane %v15306_v17, 4  ;;  %v5043_v41 = vadd.f32 %v15271_v7, %v5004_v42 }
 0x2f0   : > { %v5041_v43 = vadd.f32 %v15271_v7, %v5002_v50  ;;  %v5536_v52 = vsel %vm13290_vm10, %v5250_v5, %v5535_v62  ;;  %v5072_v11 = vmax.f32 %v5040_v10, 0.0  ;;  %v5044_v49 = vadd.f32 %v15271_v7, %v5005_v46  ;;  %v12633_v62 = vld [vmem:[#allocation9 + $0x100] sm:$0xff]   ;;  %v12636_v10 = vld [vmem:[#allocation9 + $0x148] sm:$0xff]  }
 0x2f1   : > { %v5070_v13 = vmax.f32 %v5038_v30, 0.0  ;;  %5537 = vst [vmem:[#allocation3 + $0x30] sm:$0xf] %v5536_v52  ;;  %v5529_v51 = vsel %vm13290_vm10, %v5233_v44, %v5528_v59  ;;  %v5075_v19 = vmax.f32 %v5043_v41, 0.0  ;;  %v5042_v24 = vadd.f32 %v15271_v7, %v5003_v53  ;;  %v12137_v23 = vpop.f32.mrb[156].mxu0 }
 0x2f2   : > { %v5073_v0 = vmax.f32 %v5041_v43, 0.0  ;;  %5530 = vst [vmem:[#allocation3 + $0x24] sm:$0xf] %v5529_v51  ;;  %v10986_v40 = vpack.c.bf16 %v5072_v11, %v5072_v11  ;;  %v5076_v3 = vmax.f32 %v5044_v49, 0.0  ;;  %v5008_v6 = vadd.f32 %v12137_v23, %v15146_v12  ;;  %v4915_v31 = vpop.f32.mrb[157].mxu0  ;;  %v12632_v43 = vld [vmem:[#allocation3 + $0x18] sm:$0xff]  }
 0x2f3   : > { %v10984_v18 = vpack.c.bf16 %v5070_v13, %v5070_v13  ;;  %v10989_v15 = vpack.c.bf16 %v5075_v19, %v5075_v19  ;;  %v5074_v37 = vmax.f32 %v5042_v24, 0.0  ;;  %v5006_v38 = vadd.f32 %v4915_v31, %v15140_v55  ;;  %v15327_v42 = vpop.f32.mrb[158].mxu0  ;;  %v12629_v39 = vld [vmem:[#allocation3 + $0xc] sm:$0xff]   ;;  %v5539_v11 = vld [vmem:[#allocation3 + $0x38] sm:$0x1]  ;;  %v12639_v31 = vld [vmem:[#allocation9 + $0x108] sm:$0xff]  }
 0x2f4   : > { %v10987_v36 = vpack.c.bf16 %v5073_v0, %v5073_v0  ;;  %v5253_v50 = vshrl.u32 %v10986_v40, 16  ;;  %v5256_v46 = vshll.u32 %v10986_v40, 16  ;;  %v4918_v59 = vpop.f32.mrb[159].mxu0  ;;  %6762 = vmatprep.mubr.bf16.mxu1 %v12629_v39  ;;  %v5532_v55 = vld [vmem:[#allocation3 + $0x2c] sm:$0x1]  ;;  %v10990_v49 = vpack.c.bf16 %v5076_v3, %v5076_v3 }
 0x2f5   : > { %v5236_v53 = vshrl.u32 %v10984_v18, 16  ;;  %v5239_v5 = vshll.u32 %v10984_v18, 16  ;;  %v5279_v30 = vshrl.u32 %v10989_v15, 16  ;;  %v5282_v44 = vshll.u32 %v10989_v15, 16  ;;  %v5549_v24 = vld [vmem:[#allocation3 + $0x48] sm:$0xf] }
 0x2f6   : > { %v5262_v41 = vshrl.u32 %v10987_v36, 16  ;;  %v5265_v12 = vshll.u32 %v10987_v36, 16  ;;  %v5255_v52 = vrot.slane %v5253_v50, 7  ;;  %v15329_v51 = vpack.c.bf16 %v5074_v37, %v5074_v37  ;;  %v5542_v39 = vld [vmem:[#allocation3 + $0x3c] sm:$0xf] }
 0x2f7   : > { %v5238_v13 = vrot.slane %v5236_v53, 7  ;;  %v17346_v19 = vcombine.low %v15198_v8, %v15205_v1  ;;  %v15334_v0 = vrot.slane %v5279_v30, 7  ;;  %v5047_v40 = vadd.f32 %v15271_v7, %v5008_v6  ;;  %v12642_v8 = vld [vmem:[#allocation9 + $0x150] sm:$0xff]   ;;  %v12776_v34 = vld [vmem:[#allocation3 + $0x1c] sm:$0xf] }
 0x2f8   : > { %v15336_v23 = vrot.slane %v5262_v41, 7  ;;  %v5045_v18 = vadd.f32 %v15271_v7, %v5006_v38  ;;  %v5258_v15 = vor.u32 %v5256_v46, %v5255_v52  ;;  %v5260_v3 = vrot.slane %v5255_v52, 4 }
 0x2f9   : > { %6763 = vmatmul.mubr.bf16.vlgmr.msra.gmra.mrb[112].mxu1 %v17346_v19  ;;  %v5241_v36 = vor.u32 %v5239_v5, %v5238_v13  ;;  %v5243_v37 = vrot.slane %v5238_v13, 4  ;;  %v5284_v1 = vor.u32 %v5282_v44, %v15334_v0  ;;  %v5285_v50 = vrot.slane %v15334_v0, 4  ;;  %v12141_v30 = vpop.f32.mrb[160].mxu0 }
 0x2fa   : > { %6770 = vmatprep.mubr.bf16.mxu1 %v12632_v43  ;;  %11836 = vmatpush3.bf16.msra.mxu1 %v12633_v62  ;;  %v5267_v53 = vor.u32 %v5265_v12, %v15336_v23  ;;  %v5268_v6 = vrot.slane %v15336_v23, 4  ;;  %v5259_v38 = vsel %vm13280_vm9, %v5251_v20, %v5258_v15  ;;  %v5540_v62 = vsel %vm13263_vm2, %v5260_v3, %v5539_v11  ;;  %v12645_v12 = vld [vmem:[#allocation9 + $0x110] sm:$0xff]   ;;  %v5553_v23 = vld [vmem:[#allocation3 + $0x50] sm:$0x1] }
 0x2fb   : > { %11837 = vmatprep.subr.bf16.mxu1 %v12636_v10  ;;  %v5242_v46 = vsel %vm13280_vm9, %v5234_v28, %v5241_v36  ;;  %v5533_v5 = vsel %vm13263_vm2, %v5243_v37, %v5532_v55  ;;  %v4931_v10 = vpop.f32.mrb[161].mxu0  ;;  %5538 = vst [vmem:[#allocation3 + $0x34] sm:$0xf] %v5259_v38  ;;  %5541 = vst [vmem:[#allocation3 + $0x38] sm:$0x1] %v5540_v62  ;;  %v5550_v16 = vsel %vm13290_vm10, %v5284_v1, %v5549_v24  ;;  %v12648_v55 = vld [vmem:[#allocation9 + $0x158] sm:$0xff]  }
 0x2fc   : > { %5531 = vst [vmem:[#allocation3 + $0x28] sm:$0xf] %v5242_v46  ;;  %5534 = vst [vmem:[#allocation3 + $0x2c] sm:$0x1] %v5533_v5  ;;  %v5543_v20 = vsel %vm13290_vm10, %v5267_v53, %v5542_v39  ;;  %v5287_v44 = vshrl.u32 %v10990_v49, 16  ;;  %v5290_v41 = vshll.u32 %v10990_v49, 16  ;;  %v5009_v0 = vadd.f32 %v15327_v42, %v15150_v21 }
 0x2fd   : > { %v12142_v17 = vpop.f32.mrb[162].mxu0  ;;  %5551 = vst [vmem:[#allocation3 + $0x48] sm:$0xf] %v5550_v16  ;;  %5544 = vst [vmem:[#allocation3 + $0x3c] sm:$0xf] %v5543_v20  ;;  %v5270_v28 = vshrl.u32 %v15329_v51, 16  ;;  %v5007_v49 = vadd.f32 %v4918_v59, %v15142_v27  ;;  %v5012_v24 = vadd.f32 %v12141_v30, %v15184_v22 }
 0x2fe   : > { %11838 = vmatpush3.bf16.msra.mxu1 %v12639_v31  ;;  %v5273_v43 = vshll.u32 %v15329_v51, 16  ;;  %v5079_v52 = vmax.f32 %v5047_v40, 0.0  ;;  %v5077_v11 = vmax.f32 %v5045_v18, 0.0  ;;  %v15362_v13 = vpop.f32.mrb[163].mxu0  ;;  %v5289_v19 = vrot.slane %v5287_v44, 7  ;;  %v12654_v22 = vld [vmem:[#allocation9 + $0x160] sm:$0xff]  }
 0x2ff   : > { %11839 = vmatprep.subr.bf16.mxu1 %v12642_v8  ;;  %v5272_v31 = vrot.slane %v5270_v28, 7  ;;  %v5010_v51 = vadd.f32 %v4931_v10, %v15164_v48  ;;  %v5546_v36 = vld [vmem:[#allocation3 + $0x44] sm:$0x1]  ;;  %v5048_v37 = vadd.f32 %v15271_v7, %v5009_v0  ;;  %v5046_v39 = vadd.f32 %v15271_v7, %v5007_v49  ;;  %v12651_v8 = vld [vmem:[#allocation9 + $0x118] sm:$0xff]   ;;  %v5563_v53 = vld [vmem:[#allocation3 + $0x60] sm:$0xf] }
 0x300   : > { %v10993_v15 = vpack.c.bf16 %v5079_v52, %v5079_v52  ;;  %v10991_v3 = vpack.c.bf16 %v5077_v11, %v5077_v11  ;;  %v5292_v40 = vor.u32 %v5290_v41, %v5289_v19  ;;  %v5294_v18 = vrot.slane %v5289_v19, 4  ;;  %v5556_v11 = vld [vmem:[#allocation3 + $0x54] sm:$0xf]  ;;  %v12660_v49 = vld [vmem:[#allocation9 + $0x168] sm:$0xff]  }
 0x301   : > { %v5275_v21 = vor.u32 %v5273_v43, %v5272_v31  ;;  %v5277_v42 = vrot.slane %v5272_v31, 4  ;;  %v15375_v62 = vpop.f32.mrb[164].mxu0  ;;  %v5080_v16 = vmax.f32 %v5048_v37, 0.0  ;;  %v5078_v44 = vmax.f32 %v5046_v39, 0.0 }
 0x302   : > { %11840 = vmatpush3.bf16.msra.mxu1 %v12645_v12  ;;  %v5313_v27 = vshrl.u32 %v10993_v15, 16  ;;  %v5316_v59 = vshll.u32 %v10993_v15, 16  ;;  %v5293_v1 = vsel %vm13280_vm9, %v5285_v50, %v5292_v40  ;;  %v5554_v48 = vsel %vm13263_vm2, %v5294_v18, %v5553_v23  ;;  %v15383_v50 = vpop.f32.mrb[165].mxu0 }
 0x303   : > { %11841 = vmatprep.subr.bf16.mxu1 %v12648_v55  ;;  %v5296_v30 = vshrl.u32 %v10991_v3, 16  ;;  %v5299_v38 = vshll.u32 %v10991_v3, 16  ;;  %5552 = vst [vmem:[#allocation3 + $0x4c] sm:$0xf] %v5293_v1  ;;  %5555 = vst [vmem:[#allocation3 + $0x50] sm:$0x1] %v5554_v48  ;;  %v5276_v46 = vsel %vm13280_vm9, %v5268_v6, %v5275_v21  ;;  %v5547_v5 = vsel %vm13263_vm2, %v5277_v42, %v5546_v36 }
 0x304   : > { %v15381_v10 = vrot.slane %v5313_v27, 7  ;;  %5545 = vst [vmem:[#allocation3 + $0x40] sm:$0xf] %v5276_v46  ;;  %5548 = vst [vmem:[#allocation3 + $0x44] sm:$0x1] %v5547_v5  ;;  %v5051_v41 = vadd.f32 %v15271_v7, %v5012_v24  ;;  %v5049_v12 = vadd.f32 %v15271_v7, %v5010_v51  ;;  %v15389_v28 = vpop.f32.mrb[166].mxu0  ;;  %v10994_v55 = vpack.c.bf16 %v5080_v16, %v5080_v16 }
 0x305   : > { %v15385_v20 = vrot.slane %v5296_v30, 7  ;;  %v12657_v6 = vld [vmem:[#allocation9 + $0x120] sm:$0xff]   ;;  %v5013_v19 = vadd.f32 %v12142_v17, %v15186_v63  ;;  %v15394_v0 = vpop.f32.mrb[167].mxu0  ;;  %v10992_v31 = vpack.c.bf16 %v5078_v44, %v5078_v44  ;;  %v15400_v36 = vld [vmem:[#allocation3 + $0xc] sm:$0xe]  ;;  %v5011_v1 = vadd.f32 %v15362_v13, %v15166_v35 }
 0x306   : > { %11842 = vmatpush3.bf16.msra.mxu1 %v12651_v8  ;;  %v5318_v43 = vor.u32 %v5316_v59, %v15381_v10  ;;  %v5319_v52 = vrot.slane %v15381_v10, 4  ;;  %v5083_v15 = vmax.f32 %v5051_v41, 0.0  ;;  %v5321_v51 = vshrl.u32 %v10994_v55, 16  ;;  %v12663_v8 = vld [vmem:[#allocation9 + $0x128] sm:$0xff]   ;;  %v5567_v42 = vld [vmem:[#allocation3 + $0x68] sm:$0x1] }
 0x307   : > { %11843 = vmatprep.subr.bf16.mxu1 %v12654_v22  ;;  %v5301_v24 = vor.u32 %v5299_v38, %v15385_v20  ;;  %v5302_v23 = vrot.slane %v15385_v20, 4  ;;  %v5324_v40 = vshll.u32 %v10994_v55, 16  ;;  %v5081_v18 = vmax.f32 %v5049_v12, 0.0  ;;  %v5560_v27 = vld [vmem:[#allocation3 + $0x5c] sm:$0x1] }
 0x308   : > { %v5564_v3 = vsel %vm13290_vm10, %v5318_v43, %v5563_v53  ;;  %v5304_v17 = vshrl.u32 %v10992_v31, 16  ;;  %v5307_v37 = vshll.u32 %v10992_v31, 16  ;;  %v10997_v39 = vpack.c.bf16 %v5083_v15, %v5083_v15  ;;  %v5577_v16 = vld [vmem:[#allocation3 + $0x78] sm:$0xf]  ;;  %v15410_v41 = vld [vmem:[#allocation3 + $0x10] sm:$0xf] }
 0x309   : > { %5565 = vst [vmem:[#allocation3 + $0x60] sm:$0xf] %v5564_v3  ;;  %v5557_v63 = vsel %vm13290_vm10, %v5301_v24, %v5556_v11  ;;  %v5323_v21 = vrot.slane %v5321_v51, 7  ;;  %v10995_v59 = vpack.c.bf16 %v5081_v18, %v5081_v18  ;;  %v5052_v22 = vadd.f32 %v15271_v7, %v5013_v19  ;;  %v15408_v46 = vpop.f32.mrb[168].mxu0  ;;  %v5659_v11 = vld [vmem:[#allocation3 + $0x14] sm:$0x1] }
 0x30a   : > { %11844 = vmatpush3.bf16.msra.mxu1 %v12657_v6  ;;  %5558 = vst [vmem:[#allocation3 + $0x54] sm:$0xf] %v5557_v63  ;;  %v5306_v48 = vrot.slane %v5304_v17, 7  ;;  %v5347_v53 = vshrl.u32 %v10997_v39, 16  ;;  %v5350_v30 = vshll.u32 %v10997_v39, 16  ;;  %v10684_v38 = vrot.slane %v15400_v36, 9 }
 0x30b   : > { %11845 = vmatprep.subr.bf16.mxu1 %v12660_v49  ;;  %v5326_v5 = vor.u32 %v5324_v40, %v5323_v21  ;;  %v5328_v10 = vrot.slane %v5323_v21, 4  ;;  %v5330_v20 = vshrl.u32 %v10995_v59, 16  ;;  %v5333_v44 = vshll.u32 %v10995_v59, 16  ;;  %v15412_v12 = vpop.f32.mrb[169].mxu0  ;;  %v15425_v15 = vld [vmem:[#allocation3 + $0xc] sm:$0xf] }
 0x30c   : > { %v5309_v6 = vor.u32 %v5307_v37, %v5306_v48  ;;  %v5311_v43 = vrot.slane %v5306_v48, 4  ;;  %v15414_v35 = vrot.slane %v5347_v53, 7  ;;  %v5084_v13 = vmax.f32 %v5052_v22, 0.0  ;;  %v15416_v55 = vpop.f32.mrb[170].mxu0  ;;  %v5570_v36 = vld [vmem:[#allocation3 + $0x6c] sm:$0xf] }
 0x30d   : > { %v5327_v19 = vsel %vm13280_vm9, %v5319_v52, %v5326_v5  ;;  %v5568_v49 = vsel %vm13263_vm2, %v5328_v10, %v5567_v42  ;;  %v15422_v24 = vrot.slane %v5330_v20, 7  ;;  %v5050_v31 = vadd.f32 %v15271_v7, %v5011_v1  ;;  %v15427_v3 = vpop.f32.mrb[171].mxu0  ;;  %v5581_v53 = vld [vmem:[#allocation3 + $0x80] sm:$0x1] }
 0x30e   : > { %11846 = vmatpush3.bf16.msra.mxu1 %v12663_v8  ;;  %5566 = vst [vmem:[#allocation3 + $0x64] sm:$0xf] %v5327_v19  ;;  %5569 = vst [vmem:[#allocation3 + $0x68] sm:$0x1] %v5568_v49  ;;  %v5310_v51 = vsel %vm13280_vm9, %v5302_v23, %v5309_v6  ;;  %v5561_v40 = vsel %vm13263_vm2, %v5311_v43, %v5560_v27  ;;  %v5352_v52 = vor.u32 %v5350_v30, %v15414_v35  ;;  %v12666_v27 = vld [vmem:[#allocation9 + $0x170] sm:$0xff]  }
 0x30f   : > { %v5353_v18 = vrot.slane %v15414_v35, 4  ;;  %5559 = vst [vmem:[#allocation3 + $0x58] sm:$0xf] %v5310_v51  ;;  %5562 = vst [vmem:[#allocation3 + $0x5c] sm:$0x1] %v5561_v40  ;;  %v5335_v63 = vor.u32 %v5333_v44, %v15422_v24  ;;  %v5336_v17 = vrot.slane %v15422_v24, 4  ;;  %v10998_v37 = vpack.c.bf16 %v5084_v13, %v5084_v13  ;;  %11847 = vmatprep.subr.bf16.mxu1 %v12666_v27 }
 0x310   : > { %v5082_v39 = vmax.f32 %v5050_v31, 0.0  ;;  %v5578_v8 = vsel %vm13290_vm10, %v5352_v52, %v5577_v16  ;;  %v6307_v23 = vrot.slane %v15410_v41, 5  ;;  %v6310_v21 = vrot.slane %v5659_v11, 5  ;;  %v12669_v19 = vld [vmem:[#allocation9 + $0x130] sm:$0xff]   ;;  %v5574_v49 = vld [vmem:[#allocation3 + $0x74] sm:$0x1] }
 0x311   : > { %v5699_v42 = vshrl.u32 %v15425_v15, 16  ;;  %5579 = vst [vmem:[#allocation3 + $0x78] sm:$0xf] %v5578_v8  ;;  %v5571_v59 = vsel %vm13290_vm10, %v5335_v63, %v5570_v36  ;;  %v5355_v22 = vshrl.u32 %v10998_v37, 16  ;;  %v5358_v1 = vshll.u32 %v10998_v37, 16  ;;  %v15446_v20 = vpop.f32.mrb[172].mxu0 }
 0x312   : > { %v10996_v48 = vpack.c.bf16 %v5082_v39, %v5082_v39  ;;  %5572 = vst [vmem:[#allocation3 + $0x6c] sm:$0xf] %v5571_v59  ;;  %v6308_v30 = vsel %vm13316_vm11, %v10684_v38, %v6307_v23  ;;  %v6309_v5 = vrot.slane %v6307_v23, 4  ;;  %v5702_v16 = vshll.u32 %v15425_v15, 16  ;;  %v15449_v13 = vpop.f32.mrb[173].mxu0  ;;  %11848 = vmatpush3.bf16.msra.mxu1 %v12669_v19 }
 0x313   : > { %v5701_v10 = vrot.slane %v5699_v42, 4  ;;  %v5357_v44 = vrot.slane %v5355_v22, 7  ;;  %v5708_v35 = vshll.u32 %v15410_v41, 16  ;;  %v5712_v31 = vshrl.u32 %v15410_v41, 16  ;;  %v15454_v40 = vld [vmem:[#allocation3 + $0x18] sm:$0xf] }
 0x314   : > { %v5338_v6 = vshrl.u32 %v10996_v48, 16  ;;  %v5341_v43 = vshll.u32 %v10996_v48, 16  ;;  %v6311_v24 = vsel %vm13316_vm11, %v6309_v5, %v6310_v21  ;;  %v5704_v38 = vrot.slane %v5702_v16, 5  ;;  %v15456_v52 = vpop.f32.mrb[174].mxu0  ;;  %v12634_v21 = vld [vmem:[#allocation3 + $0x24] sm:$0xff]  }
 0x315   : > { %v5718_v51 = vshll.u32 %v5659_v11, 16  ;;  %v5360_v36 = vor.u32 %v5358_v1, %v5357_v44  ;;  %v5362_v63 = vrot.slane %v5357_v44, 4  ;;  %v10700_v39 = vcombine.low %v6308_v30, %v6311_v24  ;;  %v15458_v8 = vpop.f32.mrb[175].mxu0  ;;  %v15464_v1 = vld [vmem:[#allocation3 + $0x1c] sm:$0xf] }
 0x316   : > { %v5340_v37 = vrot.slane %v5338_v6, 7  ;;  %v5705_v23 = vor.u32 %v5704_v38, %v5701_v10  ;;  %v5710_v42 = vrot.slane %v5708_v35, 5  ;;  %v5714_v27 = vrot.slane %v5712_v31, 4  ;;  %v12670_v30 = vld [vmem:[#allocation9 + $0x1c0] sm:$0xff]   ;;  %v15470_v6 = vld [vmem:[#allocation3 + $0x20] sm:$0x1] }
 0x317   : > { %v5720_v59 = vrot.slane %v5718_v51, 5  ;;  %v5361_v22 = vsel %vm13280_vm9, %v5353_v18, %v5360_v36  ;;  %v5582_v11 = vsel %vm13263_vm2, %v5362_v63, %v5581_v53  ;;  %6771 = vmatmul.mubr.bf16.gmra.mrb[116].mxu1 %v10700_v39  ;;  %v10652_v44 = vcombine.low %v15425_v15, %v15410_v41  ;;  %v12671_v53 = vld [vmem:[#allocation9 + $0x180] sm:$0xff]   ;;  %11947 = vmatprep.subr.bf16.mxu0 %v12670_v30 }
 0x318   : > { %v5343_v48 = vor.u32 %v5341_v43, %v5340_v37  ;;  %v5345_v5 = vrot.slane %v5340_v37, 4  ;;  %5580 = vst [vmem:[#allocation3 + $0x7c] sm:$0xf] %v5361_v22  ;;  %5583 = vst [vmem:[#allocation3 + $0x80] sm:$0x1] %v5582_v11  ;;  %v5706_v16 = vrot.slane %v5705_v23, 4  ;;  %v5715_v10 = vor.u32 %v5714_v27, %v5710_v42  ;;  %6778 = vmatprep.mubr.bf16.mxu1 %v12634_v21 }
 0x319   : > { %v5016_v18 = vadd.f32 %v15375_v62, %v15222_v57  ;;  %v5723_v19 = vshrl.u32 %v15454_v40, 16  ;;  %v5726_v24 = vshll.u32 %v15454_v40, 16  ;;  %v5732_v15 = vshll.u32 %v15464_v1, 16  ;;  %11948 = vmatpush3.bf16.msra.mxu0 %v12671_v53  ;;  %v6252_v39 = vld [vmem:[#allocation3 + $0x18] sm:$0xe]  ;;  %v12672_v22 = vld [vmem:[#allocation9 + $0x1c8] sm:$0xff]  }
 0x31a   : > { %v5344_v43 = vsel %vm13280_vm9, %v5336_v17, %v5343_v48  ;;  %v5575_v35 = vsel %vm13263_vm2, %v5345_v5, %v5574_v49  ;;  %v5711_v41 = vsel %vm13484_vm14, %v5706_v16, %v5710_v42  ;;  %v5716_v57 = vrot.slane %v5715_v10, 4  ;;  %v12673_v11 = vld [vmem:[#allocation9 + $0x188] sm:$0xff]   ;;  %v12676_v16 = vld [vmem:[#allocation9 + $0x1d0] sm:$0xff]   ;;  %11949 = vmatprep.subr.bf16.mxu0 %v12672_v22 }
 0x31b   : > { %5573 = vst [vmem:[#allocation3 + $0x70] sm:$0xf] %v5344_v43  ;;  %5576 = vst [vmem:[#allocation3 + $0x74] sm:$0x1] %v5575_v35  ;;  %v5055_v62 = vadd.f32 %v15271_v7, %v5016_v18  ;;  %v5725_v17 = vrot.slane %v5723_v19, 4  ;;  %v5728_v38 = vrot.slane %v5726_v24, 5  ;;  %v5014_v37 = vadd.f32 %v15383_v50, %v15207_v45 }
 0x31c   : > { %v5736_v49 = vshrl.u32 %v15464_v1, 16  ;;  %v5742_v31 = vshll.u32 %v15470_v6, 16  ;;  %v5721_v51 = vsel %vm13484_vm14, %v5716_v57, %v5720_v59  ;;  %v5734_v63 = vrot.slane %v5732_v15, 5  ;;  %v12680_v24 = vld [vmem:[#allocation9 + $0x178] sm:$0xff]  }
 0x31d   : > { %v5087_v36 = vmax.f32 %v5055_v62, 0.0  ;;  %v10668_v23 = vcombine.low %v5711_v41, %v5721_v51  ;;  %v5729_v42 = vor.u32 %v5728_v38, %v5725_v17  ;;  %v5053_v5 = vadd.f32 %v15271_v7, %v5014_v37  ;;  %11950 = vmatpush3.bf16.msra.mxu0 %v12673_v11  ;;  %v12677_v41 = vld [vmem:[#allocation9 + $0x190] sm:$0xff]   ;;  %v12678_v17 = vld [vmem:[#allocation9 + $0x1d8] sm:$0xff]   ;;  %11849 = vmatprep.subr.bf16.mxu1 %v12680_v24  ;;  %v5595_v24 = vld [vmem:[#allocation3 + $0x98] sm:$0x1] }
 0x31e   : > { %v5738_v27 = vrot.slane %v5736_v49, 4  ;;  %v5744_v21 = vrot.slane %v5742_v31, 5  ;;  %v5017_v30 = vadd.f32 %v15389_v28, %v15226_v14  ;;  %v5015_v59 = vadd.f32 %v15394_v0, %v15211_v4  ;;  %11951 = vmatprep.subr.bf16.mxu0 %v12676_v16  ;;  %v12683_v38 = vld [vmem:[#allocation9 + $0x138] sm:$0xff]   ;;  %v15517_v16 = vld [vmem:[#allocation3 + $0x28] sm:$0xf] }
 0x31f   : > { %v11001_v48 = vpack.c.bf16 %v5087_v36, %v5087_v36  ;;  %7027 = vmatprep.mubr.bf16.mxu0 %v10668_v23  ;;  %v5730_v10 = vrot.slane %v5729_v42, 4  ;;  %v10685_v50 = vrot.slane %v6252_v39, 9  ;;  %v6314_v18 = vrot.slane %v15464_v1, 5  ;;  %v5591_v49 = vld [vmem:[#allocation3 + $0x90] sm:$0xf]  ;;  %11850 = vmatpush3.bf16.msra.mxu1 %v12683_v38 }
 0x320   : > { %v5739_v45 = vor.u32 %v5738_v27, %v5734_v63  ;;  %7028 = vmatmul.mubr.bf16.gmra.mrb[180].mxu0 %v10652_v44  ;;  %v5085_v35 = vmax.f32 %v5053_v5, 0.0  ;;  %v5056_v19 = vadd.f32 %v15271_v7, %v5017_v30  ;;  %v5054_v4 = vadd.f32 %v15271_v7, %v5015_v59  ;;  %v5584_v5 = vld [vmem:[#allocation3 + $0x84] sm:$0xf] }
 0x321   : > { %v5381_v53 = vshrl.u32 %v11001_v48, 16  ;;  %v5384_v43 = vshll.u32 %v11001_v48, 16  ;;  %v5735_v14 = vsel %vm13484_vm14, %v5730_v10, %v5734_v63  ;;  %v6315_v0 = vsel %vm13316_vm11, %v10685_v50, %v6314_v18  ;;  %11952 = vmatpush3.bf16.msra.mxu0 %v12677_v41  ;;  %v12684_v10 = vld [vmem:[#allocation9 + $0x1e0] sm:$0xff]  }
 0x322   : > { %v5740_v28 = vrot.slane %v5739_v45, 4  ;;  %v10999_v44 = vpack.c.bf16 %v5085_v35, %v5085_v35  ;;  %v5088_v62 = vmax.f32 %v5056_v19, 0.0  ;;  %v6316_v15 = vrot.slane %v6314_v18, 4  ;;  %11953 = vmatprep.subr.bf16.mxu0 %v12678_v17  ;;  %v12685_v41 = vld [vmem:[#allocation9 + $0x1a0] sm:$0xff]  }
 0x323   : > { %v15500_v57 = vrot.slane %v5381_v53, 7  ;;  %v5086_v51 = vmax.f32 %v5054_v4, 0.0  ;;  %v6317_v36 = vrot.slane %v15470_v6, 5  ;;  %v10653_v63 = vcombine.low %v15454_v40, %v15464_v1  ;;  %v12679_v6 = vld [vmem:[#allocation9 + $0x198] sm:$0xff]  }
 0x324   : > { %v5745_v31 = vsel %vm13484_vm14, %v5740_v28, %v5744_v21  ;;  %v5364_v42 = vshrl.u32 %v10999_v44, 16  ;;  %v5367_v27 = vshll.u32 %v10999_v44, 16  ;;  %v11002_v22 = vpack.c.bf16 %v5088_v62, %v5088_v62  ;;  %v15511_v21 = vld [vmem:[#allocation3 + $0x24] sm:$0xf]  ;;  %v5588_v44 = vld [vmem:[#allocation3 + $0x8c] sm:$0x1] }
 0x325   : > { %v5386_v37 = vor.u32 %v5384_v43, %v15500_v57  ;;  %v5387_v39 = vrot.slane %v15500_v57, 4  ;;  %v10669_v23 = vcombine.low %v5735_v14, %v5745_v31  ;;  %v11000_v11 = vpack.c.bf16 %v5086_v51, %v5086_v51  ;;  %v12637_v43 = vld [vmem:[#allocation3 + $0x30] sm:$0xff]   ;;  %11954 = vmatpush3.bf16.msra.mxu0 %v12679_v6  ;;  %v6253_v6 = vld [vmem:[#allocation3 + $0x24] sm:$0xe] }
 0x326   : > { %v6318_v48 = vsel %vm13316_vm11, %v6316_v15, %v6317_v36  ;;  %v5366_v1 = vrot.slane %v5364_v42, 7  ;;  %v5020_v59 = vadd.f32 %v15408_v46, %v15244_v26  ;;  %v5389_v45 = vshrl.u32 %v11002_v22, 16  ;;  %11955 = vmatprep.subr.bf16.mxu0 %v12684_v10 }
 0x327   : > { %v5592_v40 = vsel %vm13290_vm10, %v5386_v37, %v5591_v49  ;;  %7035 = vmatprep.mubr.bf16.mxu0 %v10669_v23  ;;  %v10701_v30 = vcombine.low %v6315_v0, %v6318_v48  ;;  %v5392_v50 = vshll.u32 %v11002_v22, 16  ;;  %v5372_v18 = vshrl.u32 %v11000_v11, 16 }
 0x328   : > { %5593 = vst [vmem:[#allocation3 + $0x90] sm:$0xf] %v5592_v40  ;;  %v5375_v53 = vshll.u32 %v11000_v11, 16  ;;  %v5369_v35 = vor.u32 %v5367_v27, %v5366_v1  ;;  %v5370_v19 = vrot.slane %v5366_v1, 4  ;;  %7036 = vmatmul.mubr.bf16.gmra.mrb[184].mxu0 %v10653_v63  ;;  %v5059_v14 = vadd.f32 %v15271_v7, %v5020_v59  ;;  %v12686_v7 = vld [vmem:[#allocation9 + $0x1e8] sm:$0xff]   ;;  %v12689_v59 = vld [vmem:[#allocation9 + $0x1f0] sm:$0xff]  }
 0x329   : > { %6779 = vmatmul.mubr.bf16.gmra.mrb[120].mxu1 %v10701_v30  ;;  %v5747_v28 = vshrl.u32 %v15511_v21, 16  ;;  %v5391_v26 = vrot.slane %v5389_v45, 7  ;;  %v5374_v46 = vrot.slane %v5372_v18, 7  ;;  %v5750_v4 = vshll.u32 %v15511_v21, 16  ;;  %v15526_v63 = vld [vmem:[#allocation3 + $0x2c] sm:$0x1]  ;;  %11956 = vmatpush3.bf16.msra.mxu0 %v12685_v41 }
 0x32a   : > { %6786 = vmatprep.mubr.bf16.mxu1 %v12637_v43  ;;  %v5756_v0 = vshll.u32 %v15517_v16, 16  ;;  %v5585_v57 = vsel %vm13290_vm10, %v5369_v35, %v5584_v5  ;;  %v5091_v62 = vmax.f32 %v5059_v14, 0.0  ;;  %v5760_v17 = vshrl.u32 %v15517_v16, 16  ;;  %v12687_v40 = vld [vmem:[#allocation9 + $0x1a8] sm:$0xff]   ;;  %11957 = vmatprep.subr.bf16.mxu0 %v12686_v7  ;;  %v5605_v14 = vld [vmem:[#allocation3 + $0xa8] sm:$0xf] }
 0x32b   : > { %v5749_v15 = vrot.slane %v5747_v28, 4  ;;  %5586 = vst [vmem:[#allocation3 + $0x84] sm:$0xf] %v5585_v57  ;;  %v5394_v38 = vor.u32 %v5392_v50, %v5391_v26  ;;  %v5396_v49 = vrot.slane %v5391_v26, 4  ;;  %v5377_v31 = vor.u32 %v5375_v53, %v5374_v46  ;;  %v12693_v53 = vld [vmem:[#allocation9 + $0x200] sm:$0xff]  }
 0x32c   : > { %v5379_v51 = vrot.slane %v5374_v46, 4  ;;  %v11005_v36 = vpack.c.bf16 %v5091_v62, %v5091_v62  ;;  %v5752_v37 = vrot.slane %v5750_v4, 5  ;;  %v5758_v23 = vrot.slane %v5756_v0, 5  ;;  %v15548_v26 = vld [vmem:[%s17241_s2] ss:$0 sm:$0xff]  ;;  %12155 = vmatprep.subr.bf16.mxu1 %v12693_v53  ;;  %v12691_v0 = vld [vmem:[#allocation9 + $0x1f8] sm:$0xff]  }
 0x32d   : > { %v5762_v42 = vrot.slane %v5760_v17, 4  ;;  %v5395_v27 = vsel %vm13280_vm9, %v5387_v39, %v5394_v38  ;;  %v5596_v22 = vsel %vm13263_vm2, %v5396_v49, %v5595_v24  ;;  %v5378_v11 = vsel %vm13280_vm9, %v5370_v19, %v5377_v31  ;;  %11958 = vmatpush3.bf16.msra.mxu0 %v12687_v40 }
 0x32e   : > { %v5589_v48 = vsel %vm13263_vm2, %v5379_v51, %v5588_v44  ;;  %5594 = vst [vmem:[#allocation3 + $0x94] sm:$0xf] %v5395_v27  ;;  %5597 = vst [vmem:[#allocation3 + $0x98] sm:$0x1] %v5596_v22  ;;  %v5415_v1 = vshrl.u32 %v11005_v36, 16  ;;  %v5418_v5 = vshll.u32 %v11005_v36, 16  ;;  %v5753_v30 = vor.u32 %v5752_v37, %v5749_v15  ;;  %11959 = vmatprep.subr.bf16.mxu0 %v12689_v59 }
 0x32f   : > { %5587 = vst [vmem:[#allocation3 + $0x88] sm:$0xf] %v5378_v11  ;;  %5590 = vst [vmem:[#allocation3 + $0x8c] sm:$0x1] %v5589_v48  ;;  %v5763_v39 = vor.u32 %v5762_v42, %v5758_v23  ;;  %v5766_v10 = vshll.u32 %v15526_v63, 16  ;;  %v5018_v45 = vadd.f32 %v15412_v12, %v15236_v54  ;;  %v5021_v50 = vadd.f32 %v15416_v55, %v15252_v29 }
 0x330   : > { %v5019_v18 = vadd.f32 %v15427_v3, %v15238_v33  ;;  %v15543_v43 = vrot.slane %v5415_v1, 7  ;;  %v5754_v35 = vrot.slane %v5753_v30, 4  ;;  %v10686_v24 = vrot.slane %v6253_v6, 9  ;;  %v12690_v33 = vld [vmem:[#allocation9 + $0x1b0] sm:$0xff]   ;;  %v15560_v15 = vld [vmem:[#allocation3 + $0x30] sm:$0xf] }
 0x331   : > { %v5764_v19 = vrot.slane %v5763_v39, 4  ;;  %v5768_v28 = vrot.slane %v5766_v10, 5  ;;  %v5057_v54 = vadd.f32 %v15548_v26, %v5018_v45  ;;  %v5060_v29 = vadd.f32 %v15548_v26, %v5021_v50  ;;  %11960 = vmatpush3.bf16.msra.mxu0 %v12690_v33  ;;  %v5609_v59 = vld [vmem:[#allocation3 + $0xb0] sm:$0x1] }
 0x332   : > { %v5058_v12 = vadd.f32 %v15548_v26, %v5019_v18  ;;  %v5420_v55 = vor.u32 %v5418_v5, %v15543_v43  ;;  %v5421_v3 = vrot.slane %v15543_v43, 4  ;;  %v5759_v46 = vsel %vm13484_vm14, %v5754_v35, %v5758_v23  ;;  %v12692_v23 = vld [vmem:[#allocation9 + $0x1b8] sm:$0xff]   ;;  %11961 = vmatprep.subr.bf16.mxu0 %v12691_v0  ;;  %v12640_v18 = vld [vmem:[#allocation3 + $0x3c] sm:$0xff]  }
 0x333   : > { %v6321_v4 = vrot.slane %v15517_v16, 5  ;;  %v5769_v41 = vsel %vm13484_vm14, %v5764_v19, %v5768_v28  ;;  %v5089_v57 = vmax.f32 %v5057_v54, 0.0  ;;  %v5092_v44 = vmax.f32 %v5060_v29, 0.0  ;;  %v15573_v5 = vld [vmem:[#allocation3 + $0x34] sm:$0xf] }
 0x334   : > { %v5090_v62 = vmax.f32 %v5058_v12, 0.0  ;;  %v5606_v17 = vsel %vm13290_vm10, %v5420_v55, %v5605_v14  ;;  %v10670_v7 = vcombine.low %v5759_v46, %v5769_v41  ;;  %v6324_v37 = vrot.slane %v15526_v63, 5  ;;  %v5598_v63 = vld [vmem:[#allocation3 + $0x9c] sm:$0xf]  ;;  %v5602_v29 = vld [vmem:[#allocation3 + $0xa4] sm:$0x1] }
 0x335   : > { %v6322_v38 = vsel %vm13316_vm11, %v10686_v24, %v6321_v4  ;;  %v6323_v49 = vrot.slane %v6321_v4, 4  ;;  %5607 = vst [vmem:[#allocation3 + $0xa8] sm:$0xf] %v5606_v17  ;;  %v11003_v31 = vpack.c.bf16 %v5089_v57, %v5089_v57  ;;  %v11006_v51 = vpack.c.bf16 %v5092_v44, %v5092_v44  ;;  %11962 = vmatpush3.bf16.msra.mxu0 %v12692_v23  ;;  %v5662_v46 = vld [vmem:[#allocation3 + $0x38] sm:$0x1] }
 0x336   : > { %v11004_v36 = vpack.c.bf16 %v5090_v62, %v5090_v62  ;;  %7043 = vmatprep.mubr.bf16.mxu0 %v10670_v7  ;;  %v10654_v42 = vcombine.low %v15511_v21, %v15517_v16  ;;  %v5024_v27 = vadd.f32 %v15446_v20, %v15280_v2  ;;  %v5771_v22 = vshrl.u32 %v15560_v15, 16  ;;  %v6254_v62 = vld [vmem:[#allocation3 + $0x30] sm:$0xe] }
 0x337   : > { %v5774_v11 = vshll.u32 %v15560_v15, 16  ;;  %v5398_v48 = vshrl.u32 %v11003_v31, 16  ;;  %v5401_v6 = vshll.u32 %v11003_v31, 16  ;;  %v5423_v40 = vshrl.u32 %v11006_v51, 16 }
 0x338   : > { %v5426_v1 = vshll.u32 %v11006_v51, 16  ;;  %v5406_v30 = vshrl.u32 %v11004_v36, 16  ;;  %v5409_v39 = vshll.u32 %v11004_v36, 16  ;;  %v6325_v21 = vsel %vm13316_vm11, %v6323_v49, %v6324_v37  ;;  %7044 = vmatmul.mubr.bf16.gmra.mrb[188].mxu0 %v10654_v42 }
 0x339   : > { %v5063_v2 = vadd.f32 %v15548_v26, %v5024_v27  ;;  %v5400_v20 = vrot.slane %v5398_v48, 7  ;;  %v5425_v16 = vrot.slane %v5423_v40, 7  ;;  %v10702_v10 = vcombine.low %v6322_v38, %v6325_v21  ;;  %v5619_v27 = vld [vmem:[#allocation3 + $0xc0] sm:$0xf] }
 0x33a   : > { %v5773_v45 = vrot.slane %v5771_v22, 4  ;;  %v5408_v50 = vrot.slane %v5406_v30, 7  ;;  %v5776_v35 = vrot.slane %v5774_v11, 5  ;;  %v5780_v19 = vshll.u32 %v15573_v5, 16 }
 0x33b   : > { %v5095_v53 = vmax.f32 %v5063_v2, 0.0  ;;  %v5403_v24 = vor.u32 %v5401_v6, %v5400_v20  ;;  %v5404_v14 = vrot.slane %v5400_v20, 4  ;;  %v5428_v28 = vor.u32 %v5426_v1, %v5425_v16  ;;  %6787 = vmatmul.mubr.bf16.gmra.mrb[124].mxu1 %v10702_v10 }
 0x33c   : > { %v5430_v54 = vrot.slane %v5425_v16, 4  ;;  %v5411_v12 = vor.u32 %v5409_v39, %v5408_v50  ;;  %v5413_v33 = vrot.slane %v5408_v50, 4  ;;  %6794 = vmatprep.mubr.bf16.mxu1 %v12640_v18  ;;  %v5777_v4 = vor.u32 %v5776_v35, %v5773_v45 }
 0x33d   : > { %v11009_v55 = vpack.c.bf16 %v5095_v53, %v5095_v53  ;;  %v5599_v0 = vsel %vm13290_vm10, %v5403_v24, %v5598_v63  ;;  %v5429_v41 = vsel %vm13280_vm9, %v5421_v3, %v5428_v28  ;;  %v5782_v44 = vrot.slane %v5780_v19, 5  ;;  %v15608_v63 = vld [vmem:[#allocation3 + $0x3c] sm:$0xf] }
 0x33e   : > { %v5610_v57 = vsel %vm13263_vm2, %v5430_v54, %v5609_v59  ;;  %5600 = vst [vmem:[#allocation3 + $0x9c] sm:$0xf] %v5599_v0  ;;  %5608 = vst [vmem:[#allocation3 + $0xac] sm:$0xf] %v5429_v41  ;;  %v5412_v17 = vsel %vm13280_vm9, %v5404_v14, %v5411_v12  ;;  %v5603_v7 = vsel %vm13263_vm2, %v5413_v33, %v5602_v29  ;;  %v5778_v43 = vrot.slane %v5777_v4, 4 }
 0x33f   : > { %5611 = vst [vmem:[#allocation3 + $0xb0] sm:$0x1] %v5610_v57  ;;  %v5449_v38 = vshrl.u32 %v11009_v55, 16  ;;  %v5452_v49 = vshll.u32 %v11009_v55, 16  ;;  %5601 = vst [vmem:[#allocation3 + $0xa0] sm:$0xf] %v5412_v17  ;;  %v5022_v51 = vadd.f32 %v15449_v13, %v15263_v47  ;;  %v5025_v37 = vadd.f32 %v15456_v52, %v15283_v32 }
 0x340   : > { %5604 = vst [vmem:[#allocation3 + $0xa4] sm:$0x1] %v5603_v7  ;;  %v5784_v3 = vshrl.u32 %v15573_v5, 16  ;;  %v5790_v31 = vshll.u32 %v5662_v46, 16  ;;  %v5023_v23 = vadd.f32 %v15458_v8, %v15266_v9  ;;  %v10687_v42 = vrot.slane %v6254_v62, 9 }
 0x341   : > { %v15594_v36 = vrot.slane %v5449_v38, 7  ;;  %v5783_v22 = vsel %vm13484_vm14, %v5778_v43, %v5782_v44  ;;  %v5061_v6 = vadd.f32 %v15548_v26, %v5022_v51  ;;  %v5064_v13 = vadd.f32 %v15548_v26, %v5025_v37  ;;  %v5612_v14 = vld [vmem:[#allocation3 + $0xb4] sm:$0xf]  ;;  %v15624_v12 = vld [vmem:[#allocation3 + $0x44] sm:$0x1] }
 0x342   : > { %v5786_v11 = vrot.slane %v5784_v3, 4  ;;  %v5792_v48 = vrot.slane %v5790_v31, 5  ;;  %v5062_v32 = vadd.f32 %v15548_v26, %v5023_v23  ;;  %v6328_v9 = vrot.slane %v15573_v5, 5  ;;  %v5623_v55 = vld [vmem:[#allocation3 + $0xc8] sm:$0x1] }
 0x343   : > { %v5454_v40 = vor.u32 %v5452_v49, %v15594_v36  ;;  %v5455_v47 = vrot.slane %v15594_v36, 4  ;;  %v5093_v1 = vmax.f32 %v5061_v6, 0.0  ;;  %v6331_v8 = vrot.slane %v5662_v46, 5  ;;  %v5616_v49 = vld [vmem:[#allocation3 + $0xbc] sm:$0x1] }
 0x344   : > { %v5787_v52 = vor.u32 %v5786_v11, %v5782_v44  ;;  %v5096_v39 = vmax.f32 %v5064_v13, 0.0  ;;  %v5094_v21 = vmax.f32 %v5062_v32, 0.0  ;;  %v10655_v2 = vcombine.low %v15560_v15, %v15573_v5  ;;  %v15622_v5 = vld [vmem:[#allocation3 + $0x40] sm:$0xf]  ;;  %v12643_v44 = vld [vmem:[#allocation3 + $0x48] sm:$0xff]  }
 0x345   : > { %v5620_v30 = vsel %vm13290_vm10, %v5454_v40, %v5619_v27  ;;  %v11007_v16 = vpack.c.bf16 %v5093_v1, %v5093_v1  ;;  %v6329_v26 = vsel %vm13316_vm11, %v10687_v42, %v6328_v9  ;;  %v6330_v59 = vrot.slane %v6328_v9, 4  ;;  %v15631_v6 = vld [vmem:[#allocation3 + $0x48] sm:$0xf] }
 0x346   : > { %5621 = vst [vmem:[#allocation3 + $0xc0] sm:$0xf] %v5620_v30  ;;  %v5788_v20 = vrot.slane %v5787_v52, 4  ;;  %v11010_v10 = vpack.c.bf16 %v5096_v39, %v5096_v39  ;;  %v11008_v45 = vpack.c.bf16 %v5094_v21, %v5094_v21  ;;  %v5795_v50 = vshrl.u32 %v15608_v63, 16  ;;  %v15643_v52 = vld [vmem:[#allocation3 + $0x4c] sm:$0xf] }
 0x347   : > { %v5798_v18 = vshll.u32 %v15608_v63, 16  ;;  %v5432_v35 = vshrl.u32 %v11007_v16, 16  ;;  %v5435_v19 = vshll.u32 %v11007_v16, 16  ;;  %v6332_v15 = vsel %vm13316_vm11, %v6330_v59, %v6331_v8  ;;  %v5664_v39 = vld [vmem:[#allocation3 + $0x50] sm:$0x1] }
 0x348   : > { %v5793_v53 = vsel %vm13484_vm14, %v5788_v20, %v5792_v48  ;;  %v5457_v28 = vshrl.u32 %v11010_v10, 16  ;;  %v5460_v54 = vshll.u32 %v11010_v10, 16  ;;  %v5440_v29 = vshrl.u32 %v11008_v45, 16  ;;  %v6255_v48 = vld [vmem:[#allocation3 + $0x3c] sm:$0xe] }
 0x349   : > { %v10671_v24 = vcombine.low %v5783_v22, %v5793_v53  ;;  %v5434_v33 = vrot.slane %v5432_v35, 7  ;;  %v5443_v46 = vshll.u32 %v11008_v45, 16  ;;  %v10703_v4 = vcombine.low %v6329_v26, %v6332_v15  ;;  %v15657_v15 = vld [vmem:[#allocation3 + $0x54] sm:$0xf] }
 0x34a   : > { %v5797_v0 = vrot.slane %v5795_v50, 4  ;;  %v5459_v41 = vrot.slane %v5457_v28, 7  ;;  %v5442_v57 = vrot.slane %v5440_v29, 7  ;;  %v5800_v62 = vrot.slane %v5798_v18, 5  ;;  %v6256_v50 = vld [vmem:[#allocation3 + $0x48] sm:$0xe] }
 0x34b   : > { %7051 = vmatprep.mubr.bf16.mxu0 %v10671_v24  ;;  %v5804_v17 = vshll.u32 %v15622_v5, 16  ;;  %v5437_v7 = vor.u32 %v5435_v19, %v5434_v33  ;;  %v5438_v38 = vrot.slane %v5434_v33, 4  ;;  %6795 = vmatmul.mubr.bf16.gmra.mrb[128].mxu1 %v10703_v4  ;;  %v5808_v43 = vshrl.u32 %v15622_v5, 16  ;;  %v15663_v28 = vld [vmem:[#allocation3 + $0x58] sm:$0xf] }
 0x34c   : > { %7052 = vmatmul.mubr.bf16.gmra.mrb[192].mxu0 %v10655_v2  ;;  %v5814_v3 = vshll.u32 %v15624_v12, 16  ;;  %v5462_v31 = vor.u32 %v5460_v54, %v5459_v41  ;;  %v5464_v51 = vrot.slane %v5459_v41, 4  ;;  %v5445_v37 = vor.u32 %v5443_v46, %v5442_v57  ;;  %6802 = vmatprep.mubr.bf16.mxu1 %v12643_v44  ;;  %v12646_v46 = vld [vmem:[#allocation3 + $0x54] sm:$0xff]  }
 0x34d   : > { %v5447_v23 = vrot.slane %v5442_v57, 4  ;;  %v5613_v42 = vsel %vm13290_vm10, %v5437_v7, %v5612_v14  ;;  %v5801_v27 = vor.u32 %v5800_v62, %v5797_v0  ;;  %v5806_v22 = vrot.slane %v5804_v17, 5 }
 0x34e   : > { %v5810_v11 = vrot.slane %v5808_v43, 4  ;;  %5614 = vst [vmem:[#allocation3 + $0xb4] sm:$0xf] %v5613_v42  ;;  %v5463_v40 = vsel %vm13280_vm9, %v5455_v47, %v5462_v31  ;;  %v5624_v13 = vsel %vm13263_vm2, %v5464_v51, %v5623_v55  ;;  %v5446_v32 = vsel %vm13280_vm9, %v5438_v38, %v5445_v37  ;;  %v5665_v55 = vld [vmem:[#allocation3 + $0x5c] sm:$0x1] }
 0x34f   : > { %v5617_v25 = vsel %vm13263_vm2, %v5447_v23, %v5616_v49  ;;  %5622 = vst [vmem:[#allocation3 + $0xc4] sm:$0xf] %v5463_v40  ;;  %5625 = vst [vmem:[#allocation3 + $0xc8] sm:$0x1] %v5624_v13  ;;  %v5802_v1 = vrot.slane %v5801_v27, 4  ;;  %v5816_v9 = vrot.slane %v5814_v3, 5  ;;  %v10656_v2 = vcombine.low %v15608_v63, %v15622_v5 }
 0x350   : > { %5615 = vst [vmem:[#allocation3 + $0xb8] sm:$0xf] %v5446_v32  ;;  %5618 = vst [vmem:[#allocation3 + $0xbc] sm:$0x1] %v5617_v25  ;;  %v5811_v36 = vor.u32 %v5810_v11, %v5806_v22  ;;  %v10688_v8 = vrot.slane %v6255_v48, 9  ;;  %v6335_v47 = vrot.slane %v15622_v5, 5  ;;  %v10657_v17 = vcombine.low %v15631_v6, %v15643_v52 }
 0x351   : > { %v6338_v30 = vrot.slane %v15624_v12, 5  ;;  %v5819_v58 = vshrl.u32 %v15631_v6, 16  ;;  %v5822_v20 = vshll.u32 %v15631_v6, 16  ;;  %v5828_v16 = vshll.u32 %v15643_v52, 16  ;;  %v6257_v42 = vld [vmem:[#allocation3 + $0x54] sm:$0xe] }
 0x352   : > { %v5812_v21 = vrot.slane %v5811_v36, 4  ;;  %v5807_v26 = vsel %vm13484_vm14, %v5802_v1, %v5806_v22  ;;  %v6337_v59 = vrot.slane %v6335_v47, 4  ;;  %v5832_v45 = vshrl.u32 %v15643_v52, 16  ;;  %v15680_v6 = vld [vmem:[#allocation3 + $0x60] sm:$0xf] }
 0x353   : > { %v5821_v10 = vrot.slane %v5819_v58, 4  ;;  %v5824_v53 = vrot.slane %v5822_v20, 5  ;;  %v5830_v35 = vrot.slane %v5828_v16, 5  ;;  %v5838_v19 = vshll.u32 %v5664_v39, 16  ;;  %v15682_v40 = vld [vmem:[#allocation3 + $0x64] sm:$0xf] }
 0x354   : > { %v5817_v18 = vsel %vm13484_vm14, %v5812_v21, %v5816_v9  ;;  %v6336_v5 = vsel %vm13316_vm11, %v10688_v8, %v6335_v47  ;;  %v6339_v24 = vsel %vm13316_vm11, %v6337_v59, %v6338_v30  ;;  %v5834_v14 = vrot.slane %v5832_v45, 4  ;;  %v5666_v30 = vld [vmem:[#allocation3 + $0x68] sm:$0x1] }
 0x355   : > { %v10672_v63 = vcombine.low %v5807_v26, %v5817_v18  ;;  %v10704_v54 = vcombine.low %v6336_v5, %v6339_v24  ;;  %v5825_v29 = vor.u32 %v5824_v53, %v5821_v10  ;;  %v10689_v12 = vrot.slane %v6256_v50, 9  ;;  %v6258_v53 = vld [vmem:[#allocation3 + $0x60] sm:$0xe]  ;;  %v15697_v24 = vld [vmem:[#allocation3 + $0x6c] sm:$0xf] }
 0x356   : > { %v6342_v33 = vrot.slane %v15643_v52, 5  ;;  %v5835_v4 = vor.u32 %v5834_v14, %v5830_v35  ;;  %v5840_v0 = vrot.slane %v5838_v19, 5  ;;  %v6345_v41 = vrot.slane %v5664_v39, 5 }
 0x357   : > { %7059 = vmatprep.mubr.bf16.mxu0 %v10672_v63  ;;  %v5843_v57 = vshrl.u32 %v15657_v15, 16  ;;  %6803 = vmatmul.mubr.bf16.gmra.mrb[132].mxu1 %v10704_v54  ;;  %v5826_v44 = vrot.slane %v5825_v29, 4  ;;  %v5846_v7 = vshll.u32 %v15657_v15, 16  ;;  %v5852_v43 = vshll.u32 %v15663_v28, 16 }
 0x358   : > { %7060 = vmatmul.mubr.bf16.gmra.mrb[196].mxu0 %v10656_v2  ;;  %v6344_v62 = vrot.slane %v6342_v33, 4  ;;  %6810 = vmatprep.mubr.bf16.mxu1 %v12646_v46  ;;  %v5836_v38 = vrot.slane %v5835_v4, 4  ;;  %v5856_v3 = vshrl.u32 %v15663_v28, 16  ;;  %v6343_v31 = vsel %vm13316_vm11, %v10689_v12, %v6342_v33  ;;  %v12649_v2 = vld [vmem:[#allocation3 + $0x60] sm:$0xff]   ;;  %v15701_v33 = vld [vmem:[#allocation3 + $0x70] sm:$0xf] }
 0x359   : > { %v5845_v49 = vrot.slane %v5843_v57, 4  ;;  %v5848_v37 = vrot.slane %v5846_v7, 5  ;;  %v5862_v23 = vshll.u32 %v5665_v55, 16  ;;  %v5831_v27 = vsel %vm13484_vm14, %v5826_v44, %v5830_v35  ;;  %v5667_v44 = vld [vmem:[#allocation3 + $0x74] sm:$0x1] }
 0x35a   : > { %v6346_v51 = vsel %vm13316_vm11, %v6344_v62, %v6345_v41  ;;  %v5841_v22 = vsel %vm13484_vm14, %v5836_v38, %v5840_v0  ;;  %v5854_v11 = vrot.slane %v5852_v43, 5  ;;  %v5858_v48 = vrot.slane %v5856_v3, 4 }
 0x35b   : > { %v10673_v13 = vcombine.low %v5831_v27, %v5841_v22  ;;  %v10705_v32 = vcombine.low %v6343_v31, %v6346_v51  ;;  %v5849_v25 = vor.u32 %v5848_v37, %v5845_v49  ;;  %v5864_v52 = vrot.slane %v5862_v23, 5  ;;  %v6259_v51 = vld [vmem:[#allocation3 + $0x6c] sm:$0xe] }
 0x35c   : > { %v5859_v1 = vor.u32 %v5858_v48, %v5854_v11  ;;  %v10690_v36 = vrot.slane %v6257_v42, 9  ;;  %v6349_v9 = vrot.slane %v15663_v28, 5  ;;  %v6352_v8 = vrot.slane %v5665_v55, 5  ;;  %v12652_v37 = vld [vmem:[#allocation3 + $0x6c] sm:$0xff]  }
 0x35d   : > { %7067 = vmatprep.mubr.bf16.mxu0 %v10673_v13  ;;  %v5850_v47 = vrot.slane %v5849_v25, 4  ;;  %v5867_v39 = vshrl.u32 %v15680_v6, 16  ;;  %v5870_v58 = vshll.u32 %v15680_v6, 16  ;;  %v5876_v21 = vshll.u32 %v15682_v40, 16 }
 0x35e   : > { %v5860_v20 = vrot.slane %v5859_v1, 4  ;;  %v6350_v16 = vsel %vm13316_vm11, %v10690_v36, %v6349_v9  ;;  %v6351_v26 = vrot.slane %v6349_v9, 4  ;;  %v5880_v59 = vshrl.u32 %v15682_v40, 16 }
 0x35f   : > { %6811 = vmatmul.mubr.bf16.gmra.mrb[136].mxu1 %v10705_v32  ;;  %v5855_v10 = vsel %vm13484_vm14, %v5850_v47, %v5854_v11  ;;  %v5869_v45 = vrot.slane %v5867_v39, 4  ;;  %v5872_v50 = vrot.slane %v5870_v58, 5  ;;  %v5878_v18 = vrot.slane %v5876_v21, 5  ;;  %v15716_v11 = vld [vmem:[#allocation3 + $0x78] sm:$0xf] }
 0x360   : > { %7068 = vmatmul.mubr.bf16.gmra.mrb[200].mxu0 %v10657_v17  ;;  %6818 = vmatprep.mubr.bf16.mxu1 %v12649_v2  ;;  %v5865_v35 = vsel %vm13484_vm14, %v5860_v20, %v5864_v52  ;;  %v6353_v19 = vsel %vm13316_vm11, %v6351_v26, %v6352_v8  ;;  %v5882_v63 = vrot.slane %v5880_v59, 4  ;;  %v5886_v5 = vshll.u32 %v5666_v30, 16  ;;  %v15720_v32 = vld [vmem:[#allocation3 + $0x7c] sm:$0xf] }
 0x361   : > { %v10674_v14 = vcombine.low %v5855_v10, %v5865_v35  ;;  %v10706_v54 = vcombine.low %v6350_v16, %v6353_v19  ;;  %v10658_v29 = vcombine.low %v15657_v15, %v15663_v28  ;;  %v5873_v12 = vor.u32 %v5872_v50, %v5869_v45  ;;  %v6260_v45 = vld [vmem:[#allocation3 + $0x78] sm:$0xe]  ;;  %v15733_v19 = vld [vmem:[#allocation3 + $0x84] sm:$0xf] }
 0x362   : > { %v5883_v55 = vor.u32 %v5882_v63, %v5878_v18  ;;  %v5888_v46 = vrot.slane %v5886_v5, 5  ;;  %v10691_v4 = vrot.slane %v6258_v53, 9  ;;  %v6356_v0 = vrot.slane %v15682_v40, 5 }
 0x363   : > { %7075 = vmatprep.mubr.bf16.mxu0 %v10674_v14  ;;  %v5874_v41 = vrot.slane %v5873_v12, 4  ;;  %v6359_v57 = vrot.slane %v5666_v30, 5  ;;  %v5891_v62 = vshrl.u32 %v15697_v24, 16  ;;  %v5894_v17 = vshll.u32 %v15697_v24, 16  ;;  %v5668_v30 = vld [vmem:[#allocation3 + $0x80] sm:$0x1] }
 0x364   : > { %v5884_v7 = vrot.slane %v5883_v55, 4  ;;  %v6358_v38 = vrot.slane %v6356_v0, 4  ;;  %v10659_v15 = vcombine.low %v15680_v6, %v15682_v40  ;;  %v5900_v28 = vshll.u32 %v15701_v33, 16 }
 0x365   : > { %v5879_v49 = vsel %vm13484_vm14, %v5874_v41, %v5878_v18  ;;  %v5893_v43 = vrot.slane %v5891_v62, 4  ;;  %v5896_v3 = vrot.slane %v5894_v17, 5  ;;  %v5904_v31 = vshrl.u32 %v15701_v33, 16  ;;  %v5669_v62 = vld [vmem:[#allocation3 + $0x8c] sm:$0x1] }
 0x366   : > { %v5889_v23 = vsel %vm13484_vm14, %v5884_v7, %v5888_v46  ;;  %v6360_v42 = vsel %vm13316_vm11, %v6358_v38, %v6359_v57  ;;  %v5902_v27 = vrot.slane %v5900_v28, 5  ;;  %v5910_v22 = vshll.u32 %v5667_v44, 16 }
 0x367   : > { %6819 = vmatmul.mubr.bf16.gmra.mrb[140].mxu1 %v10706_v54  ;;  %v10675_v48 = vcombine.low %v5879_v49, %v5889_v23  ;;  %v6357_v6 = vsel %vm13316_vm11, %v10691_v4, %v6356_v0  ;;  %v5897_v40 = vor.u32 %v5896_v3, %v5893_v43  ;;  %v5906_v13 = vrot.slane %v5904_v31, 4  ;;  %v15740_v0 = vld [vmem:[#allocation3 + $0x88] sm:$0xf] }
 0x368   : > { %7076 = vmatmul.mubr.bf16.gmra.mrb[204].mxu0 %v10658_v29  ;;  %6826 = vmatprep.mubr.bf16.mxu1 %v12652_v37  ;;  %v10707_v25 = vcombine.low %v6357_v6, %v6360_v42  ;;  %v5912_v52 = vrot.slane %v5910_v22, 5  ;;  %v10692_v1 = vrot.slane %v6259_v51, 9  ;;  %v6363_v36 = vrot.slane %v15701_v33, 5  ;;  %v12655_v29 = vld [vmem:[#allocation3 + $0x78] sm:$0xff]  }
 0x369   : > { %7083 = vmatprep.mubr.bf16.mxu0 %v10675_v48  ;;  %v5898_v9 = vrot.slane %v5897_v40, 4  ;;  %v5907_v8 = vor.u32 %v5906_v13, %v5902_v27  ;;  %v6366_v47 = vrot.slane %v5667_v44, 5  ;;  %v5915_v39 = vshrl.u32 %v15716_v11, 16  ;;  %v15760_v13 = vld [vmem:[#allocation3 + $0x90] sm:$0xf] }
 0x36a   : > { %v6365_v58 = vrot.slane %v6363_v36, 4  ;;  %v10660_v21 = vcombine.low %v15697_v24, %v15701_v33  ;;  %v5918_v2 = vshll.u32 %v15716_v11, 16  ;;  %v5924_v20 = vshll.u32 %v15720_v32, 16 }
 0x36b   : > { %v5908_v16 = vrot.slane %v5907_v8, 4  ;;  %v6364_v26 = vsel %vm13316_vm11, %v10692_v1, %v6363_v36  ;;  %v5917_v59 = vrot.slane %v5915_v39, 4  ;;  %v5928_v10 = vshrl.u32 %v15720_v32, 16  ;;  %v12658_v8 = vld [vmem:[#allocation3 + $0x84] sm:$0xff]  }
 0x36c   : > { %v6367_v50 = vsel %vm13316_vm11, %v6365_v58, %v6366_v47  ;;  %v5920_v18 = vrot.slane %v5918_v2, 5  ;;  %v5926_v53 = vrot.slane %v5924_v20, 5  ;;  %v5934_v35 = vshll.u32 %v5668_v30, 16  ;;  %v5670_v20 = vld [vmem:[#allocation3 + $0x98] sm:$0x1] }
 0x36d   : > { %v5903_v63 = vsel %vm13484_vm14, %v5898_v9, %v5902_v27  ;;  %v5913_v5 = vsel %vm13484_vm14, %v5908_v16, %v5912_v52  ;;  %v10708_v14 = vcombine.low %v6364_v26, %v6367_v50  ;;  %v5930_v54 = vrot.slane %v5928_v10, 4  ;;  %v6261_v27 = vld [vmem:[#allocation3 + $0x84] sm:$0xe] }
 0x36e   : > { %v10676_v12 = vcombine.low %v5903_v63, %v5913_v5  ;;  %v5921_v55 = vor.u32 %v5920_v18, %v5917_v59  ;;  %v10693_v46 = vrot.slane %v6260_v45, 9  ;;  %v6370_v4 = vrot.slane %v15720_v32, 5 }
 0x36f   : > { %6827 = vmatmul.mubr.bf16.gmra.mrb[144].mxu1 %v10707_v25  ;;  %v5931_v41 = vor.u32 %v5930_v54, %v5926_v53  ;;  %v5936_v57 = vrot.slane %v5934_v35, 5  ;;  %v6373_v44 = vrot.slane %v5668_v30, 5  ;;  %v5939_v17 = vshrl.u32 %v15733_v19, 16  ;;  %v15762_v25 = vld [vmem:[#allocation3 + $0x94] sm:$0xf] }
 0x370   : > { %7084 = vmatmul.mubr.bf16.gmra.mrb[208].mxu0 %v10659_v15  ;;  %6834 = vmatprep.mubr.bf16.mxu1 %v12655_v29  ;;  %v5922_v7 = vrot.slane %v5921_v55, 4  ;;  %v6372_v38 = vrot.slane %v6370_v4, 4  ;;  %v10661_v28 = vcombine.low %v15716_v11, %v15720_v32  ;;  %v5942_v49 = vshll.u32 %v15733_v19, 16  ;;  %v15786_v29 = vld [vmem:[#allocation3 + $0x9c] sm:$0xf] }
 0x371   : > { %7091 = vmatprep.mubr.bf16.mxu0 %v10676_v12  ;;  %v5932_v43 = vrot.slane %v5931_v41, 4  ;;  %v5941_v3 = vrot.slane %v5939_v17, 4  ;;  %v5948_v31 = vshll.u32 %v15740_v0, 16  ;;  %v5952_v15 = vshrl.u32 %v15740_v0, 16  ;;  %v15792_v41 = vld [vmem:[#allocation3 + $0xa0] sm:$0xf] }
 0x372   : > { %v15750_v51 = vsel %vm13316_vm11, %v10693_v46, %v6370_v4  ;;  %v15754_v37 = vsel %vm13316_vm11, %v6372_v38, %v6373_v44  ;;  %v5944_v23 = vrot.slane %v5942_v49, 5  ;;  %v5958_v42 = vshll.u32 %v5669_v62, 16  ;;  %v5671_v49 = vld [vmem:[#allocation3 + $0xa4] sm:$0x1] }
 0x373   : > { %v5927_v22 = vsel %vm13484_vm14, %v5922_v7, %v5926_v53  ;;  %v5937_v48 = vsel %vm13484_vm14, %v5932_v43, %v5936_v57  ;;  %v5950_v6 = vrot.slane %v5948_v31, 5  ;;  %v5954_v40 = vrot.slane %v5952_v15, 4 }
 0x374   : > { %v10677_v52 = vcombine.low %v5927_v22, %v5937_v48  ;;  %v10709_v1 = vcombine.low %v15750_v51, %v15754_v37  ;;  %v5945_v36 = vor.u32 %v5944_v23, %v5941_v3  ;;  %v5960_v9 = vrot.slane %v5958_v42, 5  ;;  %v12661_v23 = vld [vmem:[#allocation3 + $0x90] sm:$0xff]  }
 0x375   : > { %v5955_v47 = vor.u32 %v5954_v40, %v5950_v6  ;;  %v10694_v30 = vrot.slane %v6261_v27, 9  ;;  %v6377_v39 = vrot.slane %v15740_v0, 5  ;;  %v6380_v58 = vrot.slane %v5669_v62, 5 }
 0x376   : > { %v5946_v2 = vrot.slane %v5945_v36, 4  ;;  %v5963_v16 = vshrl.u32 %v15760_v13, 16  ;;  %v5966_v26 = vshll.u32 %v15760_v13, 16  ;;  %v5972_v59 = vshll.u32 %v15762_v25, 16 }
 0x377   : > { %6835 = vmatmul.mubr.bf16.gmra.mrb[148].mxu1 %v10708_v14  ;;  %v5956_v10 = vrot.slane %v5955_v47, 4  ;;  %v15775_v45 = vsel %vm13316_vm11, %v10694_v30, %v6377_v39  ;;  %v6379_v50 = vrot.slane %v6377_v39, 4  ;;  %v5976_v18 = vshrl.u32 %v15762_v25, 16  ;;  %v6262_v14 = vld [vmem:[#allocation3 + $0x90] sm:$0xe] }
 0x378   : > { %7092 = vmatmul.mubr.bf16.gmra.mrb[212].mxu0 %v10660_v21  ;;  %6842 = vmatprep.mubr.bf16.mxu1 %v12658_v8  ;;  %v5951_v53 = vsel %vm13484_vm14, %v5946_v2, %v5950_v6  ;;  %v5965_v35 = vrot.slane %v5963_v16, 4  ;;  %v5968_v63 = vrot.slane %v5966_v26, 5  ;;  %v5974_v5 = vrot.slane %v5972_v59, 5  ;;  %v6263_v6 = vld [vmem:[#allocation3 + $0x9c] sm:$0xe] }
 0x379   : > { %7099 = vmatprep.mubr.bf16.mxu0 %v10677_v52  ;;  %v5961_v24 = vsel %vm13484_vm14, %v5956_v10, %v5960_v9  ;;  %v15784_v33 = vsel %vm13316_vm11, %v6379_v50, %v6380_v58  ;;  %v5978_v21 = vrot.slane %v5976_v18, 4  ;;  %v5982_v54 = vshll.u32 %v5670_v20, 16  ;;  %v15812_v8 = vld [vmem:[#allocation3 + $0xa8] sm:$0xf]  ;;  %v5672_v59 = vld [vmem:[#allocation3 + $0xb0] sm:$0x1] }
 0x37a   : > { %v10678_v12 = vcombine.low %v5951_v53, %v5961_v24  ;;  %v10710_v55 = vcombine.low %v15775_v45, %v15784_v33  ;;  %v10662_v46 = vcombine.low %v15733_v19, %v15740_v0  ;;  %v5969_v4 = vor.u32 %v5968_v63, %v5965_v35 }
 0x37b   : > { %v5979_v57 = vor.u32 %v5978_v21, %v5974_v5  ;;  %v5984_v44 = vrot.slane %v5982_v54, 5  ;;  %v10695_v62 = vrot.slane %v6262_v14, 9  ;;  %v6384_v17 = vrot.slane %v15762_v25, 5  ;;  %v6264_v21 = vld [vmem:[#allocation3 + $0xa8] sm:$0xe] }
 0x37c   : > { %v5970_v7 = vrot.slane %v5969_v4, 4  ;;  %v6387_v38 = vrot.slane %v5670_v20, 5  ;;  %v5987_v43 = vshrl.u32 %v15786_v29, 16  ;;  %v5990_v3 = vshll.u32 %v15786_v29, 16 }
 0x37d   : > { %v5980_v31 = vrot.slane %v5979_v57, 4  ;;  %v6386_v15 = vrot.slane %v6384_v17, 4  ;;  %v10663_v51 = vcombine.low %v15760_v13, %v15762_v25  ;;  %v5996_v37 = vshll.u32 %v15792_v41, 16 }
 0x37e   : > { %v5975_v42 = vsel %vm13484_vm14, %v5970_v7, %v5974_v5  ;;  %v5989_v27 = vrot.slane %v5987_v43, 4  ;;  %v5992_v22 = vrot.slane %v5990_v3, 5  ;;  %v6000_v48 = vshrl.u32 %v15792_v41, 16 }
 0x37f   : > { %6843 = vmatmul.mubr.bf16.gmra.mrb[152].mxu1 %v10709_v1  ;;  %v5985_v40 = vsel %vm13484_vm14, %v5980_v31, %v5984_v44  ;;  %v15810_v52 = vsel %vm13316_vm11, %v6386_v15, %v6387_v38  ;;  %v5998_v36 = vrot.slane %v5996_v37, 5  ;;  %v6006_v9 = vshll.u32 %v5671_v49, 16  ;;  %v15837_v44 = vld [vmem:[#allocation3 + $0xb4] sm:$0xf]  ;;  %v15852_v37 = vld [vmem:[#allocation3 + $0xb8] sm:$0xf] }
 0x380   : > { %7100 = vmatmul.mubr.bf16.gmra.mrb[216].mxu0 %v10661_v28  ;;  %6850 = vmatprep.mubr.bf16.mxu1 %v12661_v23  ;;  %v10679_v47 = vcombine.low %v5975_v42, %v5985_v40  ;;  %v15816_v1 = vsel %vm13316_vm11, %v10695_v62, %v6384_v17  ;;  %v5993_v11 = vor.u32 %v5992_v22, %v5989_v27  ;;  %v6002_v32 = vrot.slane %v6000_v48, 4  ;;  %v15818_v28 = vld [vmem:[#allocation3 + $0xac] sm:$0xf]  ;;  %v12664_v62 = vld [vmem:[#allocation3 + $0x9c] sm:$0xff]  }
 0x381   : > { %7107 = vmatprep.mubr.bf16.mxu0 %v10678_v12  ;;  %v10711_v30 = vcombine.low %v15816_v1, %v15810_v52  ;;  %v6008_v39 = vrot.slane %v6006_v9, 5  ;;  %v10696_v58 = vrot.slane %v6263_v6, 9  ;;  %v6391_v2 = vrot.slane %v15792_v41, 5  ;;  %v5673_v22 = vld [vmem:[#allocation3 + $0xbc] sm:$0x1] }
 0x382   : > { %v5994_v20 = vrot.slane %v5993_v11, 4  ;;  %v6003_v16 = vor.u32 %v6002_v32, %v5998_v36  ;;  %v6394_v26 = vrot.slane %v5671_v49, 5  ;;  %v6011_v10 = vshrl.u32 %v15812_v8, 16  ;;  %v6265_v32 = vld [vmem:[#allocation3 + $0xb4] sm:$0xe] }
 0x383   : > { %v6393_v50 = vrot.slane %v6391_v2, 4  ;;  %v10664_v18 = vcombine.low %v15786_v29, %v15792_v41  ;;  %v6014_v53 = vshll.u32 %v15812_v8, 16  ;;  %v6020_v35 = vshll.u32 %v15818_v28, 16  ;;  %v15889_v1 = vld [vmem:[#allocation3 + $0x18] sm:$0xf] }
 0x384   : > { %v6004_v63 = vrot.slane %v6003_v16, 4  ;;  %v15830_v5 = vsel %vm13316_vm11, %v10696_v58, %v6391_v2  ;;  %v6013_v14 = vrot.slane %v6011_v10, 4  ;;  %v6024_v24 = vshrl.u32 %v15818_v28, 16  ;;  %v7149_v16 = vld [vmem:[#allocation3 + $0x10] sm:$0xf] }
 0x385   : > { %v15835_v54 = vsel %vm13316_vm11, %v6393_v50, %v6394_v26  ;;  %v6016_v12 = vrot.slane %v6014_v53, 5  ;;  %v6022_v4 = vrot.slane %v6020_v35, 5  ;;  %v6030_v57 = vshll.u32 %v5672_v59, 16  ;;  %v7150_v26 = vld [vmem:[#allocation3 + $0x14] sm:$0x1]  ;;  %v12667_v35 = vld [vmem:[#allocation3 + $0xa8] sm:$0xff]  }
 0x386   : > { %v5999_v17 = vsel %vm13484_vm14, %v5994_v20, %v5998_v36  ;;  %v6009_v7 = vsel %vm13484_vm14, %v6004_v63, %v6008_v39  ;;  %v10712_v38 = vcombine.low %v15830_v5, %v15835_v54  ;;  %v6026_v49 = vrot.slane %v6024_v24, 4 }
 0x387   : > { %6851 = vmatmul.mubr.bf16.gmra.mrb[156].mxu1 %v10710_v55  ;;  %v10680_v43 = vcombine.low %v5999_v17, %v6009_v7  ;;  %v6017_v3 = vor.u32 %v6016_v12, %v6013_v14  ;;  %v10697_v31 = vrot.slane %v6264_v21, 9  ;;  %v6398_v15 = vrot.slane %v15818_v28, 5  ;;  %v7580_v12 = vld [vmem:[#allocation3 + $0xc] sm:$0xe] }
 0x388   : > { %7108 = vmatmul.mubr.bf16.gmra.mrb[220].mxu0 %v10662_v46  ;;  %6858 = vmatprep.mubr.bf16.mxu1 %v12664_v62  ;;  %v6027_v23 = vor.u32 %v6026_v49, %v6022_v4  ;;  %v6032_v42 = vrot.slane %v6030_v57, 5  ;;  %v6401_v27 = vrot.slane %v5672_v59, 5  ;;  %v6035_v45 = vshrl.u32 %v15837_v44, 16 }
 0x389   : > { %7115 = vmatprep.mubr.bf16.mxu0 %v10679_v47  ;;  %v6018_v33 = vrot.slane %v6017_v3, 4  ;;  %v6400_v55 = vrot.slane %v6398_v15, 4  ;;  %v10665_v19 = vcombine.low %v15812_v8, %v15818_v28  ;;  %v6038_v0 = vshll.u32 %v15837_v44, 16  ;;  %v7582_v28 = vld [vmem:[#allocation3 + $0x24] sm:$0xe] }
 0x38a   : > { %v6028_v46 = vrot.slane %v6027_v23, 4  ;;  %v6037_v48 = vrot.slane %v6035_v45, 4  ;;  %v6044_v6 = vshll.u32 %v15852_v37, 16  ;;  %v6048_v40 = vshrl.u32 %v15852_v37, 16 }
 0x38b   : > { %v15862_v36 = vsel %vm13316_vm11, %v10697_v31, %v6398_v15  ;;  %v15866_v9 = vsel %vm13316_vm11, %v6400_v55, %v6401_v27  ;;  %v6040_v47 = vrot.slane %v6038_v0, 5  ;;  %v6054_v11 = vshll.u32 %v5673_v22, 16  ;;  %v15895_v31 = vld [vmem:[#allocation3 + $0x1c] sm:$0xf]  ;;  %v8238_v27 = vld [vmem:[#allocation3 + $0x20] sm:$0x1] }
 0x38c   : > { %v6023_v39 = vsel %vm13484_vm14, %v6018_v33, %v6022_v4  ;;  %v6033_v58 = vsel %vm13484_vm14, %v6028_v46, %v6032_v42  ;;  %v6046_v2 = vrot.slane %v6044_v6, 5  ;;  %v6050_v20 = vrot.slane %v6048_v40, 4  ;;  %v7148_v0 = vld [vmem:[#allocation3 + $0xc] sm:$0xf]  ;;  %v15909_v46 = vpop.f32.mrb[176].mxu0 }
 0x38d   : > { %v15872_v59 = vcombine.low %v6023_v39, %v6033_v58  ;;  %v10713_v10 = vcombine.low %v15862_v36, %v15866_v9  ;;  %v6041_v50 = vor.u32 %v6040_v47, %v6037_v48  ;;  %v6056_v53 = vrot.slane %v6054_v11, 5  ;;  %v15917_v11 = vld [vmem:[#allocation3 + $0x1c] sm:$0xf]  ;;  %v15919_v39 = vpop.f32.mrb[177].mxu0 }
 0x38e   : > { %v6051_v63 = vor.u32 %v6050_v20, %v6046_v2  ;;  %v10698_v14 = vrot.slane %v6265_v32, 9  ;;  %v6405_v24 = vrot.slane %v15852_v37, 5  ;;  %v6408_v21 = vrot.slane %v5673_v22, 5  ;;  %v7581_v32 = vld [vmem:[#allocation3 + $0x18] sm:$0xe] }
 0x38f   : > { %6859 = vmatmul.mubr.bf16.gmra.mrb[160].mxu1 %v10711_v30  ;;  %v6042_v4 = vrot.slane %v6041_v50, 4  ;;  %v7206_v57 = vshll.u32 %v7149_v16, 16  ;;  %v7210_v62 = vshrl.u32 %v7149_v16, 16  ;;  %v7216_v17 = vshll.u32 %v7150_v26, 16  ;;  %v12674_v50 = vld [vmem:[#allocation3 + $0xb4] sm:$0xff]  }
 0x390   : > { %7116 = vmatmul.mubr.bf16.gmra.mrb[224].mxu0 %v10663_v51  ;;  %6866 = vmatprep.mubr.bf16.mxu1 %v12667_v35  ;;  %v6052_v7 = vrot.slane %v6051_v63, 4  ;;  %v15885_v49 = vsel %vm13316_vm11, %v10698_v14, %v6405_v24  ;;  %v6407_v3 = vrot.slane %v6405_v24, 4  ;;  %v10666_v52 = vcombine.low %v15837_v44, %v15852_v37 }
 0x391   : > { %7123 = vmatprep.mubr.bf16.mxu0 %v10680_v43  ;;  %v6047_v13 = vsel %vm13484_vm14, %v6042_v4, %v6046_v2  ;;  %v15893_v25 = vrot.slane %v7206_v57, 5  ;;  %v7212_v51 = vrot.slane %v7210_v62, 4  ;;  %v10763_v30 = vrot.slane %v7580_v12, 9  ;;  %v15942_v62 = vld [vmem:[#allocation3 + $0x20] sm:$0x1] }
 0x392   : > { %v6057_v43 = vsel %vm13484_vm14, %v6052_v7, %v6056_v53  ;;  %v15901_v15 = vsel %vm13316_vm11, %v6407_v3, %v6408_v21  ;;  %v15903_v23 = vrot.slane %v7216_v17, 5  ;;  %v7646_v42 = vrot.slane %v7149_v16, 5  ;;  %v15944_v17 = vld [vmem:[#allocation3 + $0x24] sm:$0xf] }
 0x393   : > { %v15905_v22 = vcombine.low %v6047_v13, %v6057_v43  ;;  %v7213_v45 = vor.u32 %v7212_v51, %v15893_v25  ;;  %v7649_v33 = vrot.slane %v7150_v26, 5  ;;  %v8255_v55 = vshrl.u32 %v15889_v1, 16  ;;  %v15924_v26 = vpop.f32.mrb[178].mxu0  ;;  %v15952_v13 = vld [vmem:[#allocation3 + $0x28] sm:$0xf] }
 0x394   : > { %v15913_v48 = vsel %vm13316_vm11, %v10763_v30, %v7646_v42  ;;  %v7648_v6 = vrot.slane %v7646_v42, 4  ;;  %v8258_v40 = vshll.u32 %v15889_v1, 16  ;;  %v8264_v47 = vshll.u32 %v15895_v31, 16  ;;  %v15930_v24 = vpop.f32.mrb[179].mxu0 }
 0x395   : > { %v15921_v58 = vrot.slane %v7213_v45, 4  ;;  %v8257_v2 = vrot.slane %v8255_v55, 4  ;;  %v8268_v20 = vshrl.u32 %v15895_v31, 16  ;;  %v8274_v16 = vshll.u32 %v8238_v27, 16  ;;  %v8239_v55 = vld [vmem:[#allocation3 + $0x2c] sm:$0x1] }
 0x396   : > { %v15928_v53 = vsel %vm13316_vm11, %v7648_v6, %v7649_v33  ;;  %v8260_v35 = vrot.slane %v8258_v40, 5  ;;  %v8266_v63 = vrot.slane %v8264_v47, 5  ;;  %v7197_v14 = vshrl.u32 %v7148_v0, 16 }
 0x397   : > { %6867 = vmatmul.mubr.bf16.gmra.mrb[164].mxu1 %v10712_v38  ;;  %v10714_v21 = vcombine.low %v15885_v49, %v15901_v15  ;;  %v10795_v12 = vcombine.low %v15913_v48, %v15928_v53  ;;  %v8270_v4 = vrot.slane %v8268_v20, 4  ;;  %v7200_v57 = vshll.u32 %v7148_v0, 16  ;;  %v7151_v20 = vld [vmem:[#allocation3 + $0x18] sm:$0xf]  ;;  %v7583_v53 = vld [vmem:[#allocation3 + $0x30] sm:$0xe] }
 0x398   : > { %7124 = vmatmul.mubr.bf16.gmra.mrb[228].mxu0 %v10664_v18  ;;  %6874 = vmatprep.mubr.bf16.mxu1 %v12674_v50  ;;  %v8261_v5 = vor.u32 %v8260_v35, %v8257_v2  ;;  %v8276_v54 = vrot.slane %v8274_v16, 5  ;;  %v7199_v38 = vrot.slane %v7197_v14, 4  ;;  %v7219_v29 = vsel %vm13484_vm14, %v15921_v58, %v15903_v23  ;;  %v12681_v16 = vld [vmem:[#allocation3 + $0xc0] sm:$0xff]  }
 0x399   : > { %7131 = vmatprep.mubr.bf16.mxu0 %v15872_v59  ;;  %v8271_v41 = vor.u32 %v8270_v4, %v8266_v63  ;;  %v7202_v18 = vrot.slane %v7200_v57, 5  ;;  %v10764_v7 = vrot.slane %v7581_v32, 9  ;;  %v7653_v3 = vrot.slane %v15917_v11, 5 }
 0x39a   : > { %v8262_v51 = vrot.slane %v8261_v5, 4  ;;  %v7656_v30 = vrot.slane %v15942_v62, 5  ;;  %v8279_v59 = vshrl.u32 %v15944_v17, 16  ;;  %v8282_v43 = vshll.u32 %v15944_v17, 16 }
 0x39b   : > { %v8272_v42 = vrot.slane %v8271_v41, 4  ;;  %v7203_v27 = vor.u32 %v7202_v18, %v7199_v38  ;;  %v7655_v45 = vrot.slane %v7653_v3, 4  ;;  %v10827_v23 = vcombine.low %v15889_v1, %v15895_v31  ;;  %v15984_v38 = vld [vmem:[#allocation3 + $0x28] sm:$0xf] }
 0x39c   : > { %v8267_v33 = vsel %vm13484_vm14, %v8262_v51, %v8266_v63  ;;  %v8281_v0 = vrot.slane %v8279_v59, 4  ;;  %v8284_v6 = vrot.slane %v8282_v43, 5  ;;  %v8288_v40 = vshll.u32 %v15952_v13, 16 }
 0x39d   : > { %v8277_v47 = vsel %vm13484_vm14, %v8272_v42, %v8276_v54  ;;  %v7204_v32 = vrot.slane %v7203_v27, 4  ;;  %v15966_v58 = vsel %vm13316_vm11, %v7655_v45, %v7656_v30  ;;  %v8292_v2 = vshrl.u32 %v15952_v13, 16 }
 0x39e   : > { %v10843_v50 = vcombine.low %v8267_v33, %v8277_v47  ;;  %v15971_v35 = vsel %vm13316_vm11, %v10764_v7, %v7653_v3  ;;  %v8285_v63 = vor.u32 %v8284_v6, %v8281_v0  ;;  %v8290_v14 = vrot.slane %v8288_v40, 5  ;;  %v15991_v7 = vld [vmem:[#allocation3 + $0x2c] sm:$0x1]  ;;  %v16000_v0 = vld [vmem:[#allocation3 + $0x34] sm:$0xf] }
 0x39f   : > { %6875 = vmatmul.mubr.bf16.gmra.mrb[168].mxu1 %v10713_v10  ;;  %v7209_v4 = vsel %vm13484_vm14, %v7204_v32, %v15893_v25  ;;  %v10796_v57 = vcombine.low %v15971_v35, %v15966_v58  ;;  %v8294_v5 = vrot.slane %v8292_v2, 4  ;;  %v8298_v54 = vshll.u32 %v8239_v55, 16  ;;  %v8240_v47 = vld [vmem:[#allocation3 + $0x38] sm:$0x1]  ;;  %v12700_v35 = vld [vmem:[#allocation9 + $0x210] sm:$0xff]  }
 0x3a0   : > { %7132 = vmatmul.mubr.bf16.gmra.mrb[232].mxu0 %v10665_v19  ;;  %6882 = vmatprep.mubr.bf16.mxu1 %v12681_v16  ;;  %v15987_v36 = vcombine.low %v7209_v4, %v7219_v29  ;;  %v8286_v9 = vrot.slane %v8285_v63, 4  ;;  %v7221_v10 = vshrl.u32 %v7151_v20, 16  ;;  %v7224_v8 = vshll.u32 %v7151_v20, 16  ;;  %v15996_v29 = vld [vmem:[#allocation3 + $0x30] sm:$0xf] }
 0x3a1   : > { %7139 = vmatprep.mubr.bf16.mxu0 %v15905_v22  ;;  %v8295_v19 = vor.u32 %v8294_v5, %v8290_v14  ;;  %v8300_v41 = vrot.slane %v8298_v54, 5  ;;  %v7230_v25 = vshll.u32 %v15917_v11, 16  ;;  %v7234_v18 = vshrl.u32 %v15917_v11, 16 }
 0x3a2   : > { %v8291_v3 = vsel %vm13484_vm14, %v8286_v9, %v8290_v14  ;;  %v7223_v51 = vrot.slane %v7221_v10, 4  ;;  %v7226_v30 = vrot.slane %v7224_v8, 5  ;;  %v7240_v22 = vshll.u32 %v15942_v62, 16  ;;  %v7154_v9 = vld [vmem:[#allocation3 + $0x24] sm:$0xf] }
 0x3a3   : > { %v8296_v59 = vrot.slane %v8295_v19, 4  ;;  %v7232_v43 = vrot.slane %v7230_v25, 5  ;;  %v7236_v42 = vrot.slane %v7234_v18, 4  ;;  %v10765_v27 = vrot.slane %v7582_v28, 9  ;;  %v16035_v19 = vld [vmem:[#allocation3 + $0x34] sm:$0xf] }
 0x3a4   : > { %v7227_v45 = vor.u32 %v7226_v30, %v7223_v51  ;;  %v7242_v33 = vrot.slane %v7240_v22, 5  ;;  %v7660_v55 = vrot.slane %v15984_v38, 5  ;;  %v7663_v11 = vrot.slane %v15991_v7, 5  ;;  %v16039_v51 = vld [vmem:[#allocation3 + $0x38] sm:$0x1] }
 0x3a5   : > { %v8301_v6 = vsel %vm13484_vm14, %v8296_v59, %v8300_v41  ;;  %v7237_v40 = vor.u32 %v7236_v42, %v7232_v43  ;;  %v10828_v62 = vcombine.low %v15944_v17, %v15952_v13  ;;  %v8303_v32 = vshrl.u32 %v15996_v29, 16  ;;  %v16042_v42 = vld [vmem:[#allocation3 + $0x3c] sm:$0xf] }
 0x3a6   : > { %v10844_v2 = vcombine.low %v8291_v3, %v8301_v6  ;;  %v7228_v20 = vrot.slane %v7227_v45, 4  ;;  %v16009_v16 = vsel %vm13316_vm11, %v10765_v27, %v7660_v55  ;;  %v7662_v63 = vrot.slane %v7660_v55, 4 }
 0x3a7   : > { %6883 = vmatmul.mubr.bf16.gmra.mrb[172].mxu1 %v10714_v21  ;;  %v7238_v14 = vrot.slane %v7237_v40, 4  ;;  %v8305_v4 = vrot.slane %v8303_v32, 4  ;;  %v8306_v5 = vshll.u32 %v15996_v29, 16  ;;  %v8312_v54 = vshll.u32 %v16000_v0, 16 }
 0x3a8   : > { %7140 = vmatmul.mubr.bf16.gmra.mrb[236].mxu0 %v10666_v52  ;;  %8044 = vmatprep.mubr.bf16.mxu1 %v10795_v12  ;;  %v7233_v49 = vsel %vm13484_vm14, %v7228_v20, %v7232_v43  ;;  %v16026_v15 = vsel %vm13316_vm11, %v7662_v63, %v7663_v11  ;;  %v8316_v44 = vshrl.u32 %v16000_v0, 16  ;;  %v8322_v37 = vshll.u32 %v8240_v47, 16  ;;  %v12696_v11 = vld [vmem:[#allocation9 + $0x208] sm:$0xff]  }
 0x3a9   : > { %8958 = vmatprep.mubr.bf16.mxu0 %v10843_v50  ;;  %v7243_v52 = vsel %vm13484_vm14, %v7238_v14, %v7242_v33  ;;  %v10797_v21 = vcombine.low %v16009_v16, %v16026_v15  ;;  %v8308_v10 = vrot.slane %v8306_v5, 5  ;;  %v8314_v48 = vrot.slane %v8312_v54, 5  ;;  %v16052_v63 = vld [vmem:[#allocation3 + $0x40] sm:$0xf]  ;;  %v8241_v5 = vld [vmem:[#allocation3 + $0x44] sm:$0x1] }
 0x3aa   : > { %v16033_v12 = vcombine.low %v7233_v49, %v7243_v52  ;;  %v8318_v50 = vrot.slane %v8316_v44, 4  ;;  %v8324_v8 = vrot.slane %v8322_v37, 5  ;;  %v7245_v28 = vshrl.u32 %v7154_v9, 16 }
 0x3ab   : > { %v8309_v41 = vor.u32 %v8308_v10, %v8305_v4  ;;  %v7248_v25 = vshll.u32 %v7154_v9, 16  ;;  %v7254_v18 = vshll.u32 %v15984_v38, 16  ;;  %v7258_v3 = vshrl.u32 %v15984_v38, 16  ;;  %v12775_v4 = vld [vmem:[#allocation9 + $0x200] sm:$0xff]   ;;  %v7157_v10 = vld [vmem:[#allocation3 + $0x30] sm:$0xf] }
 0x3ac   : > { %v8319_v30 = vor.u32 %v8318_v50, %v8314_v48  ;;  %v7247_v22 = vrot.slane %v7245_v28, 4  ;;  %v7264_v59 = vshll.u32 %v15991_v7, 16  ;;  %v10766_v43 = vrot.slane %v7583_v53, 9 }
 0x3ad   : > { %v8310_v27 = vrot.slane %v8309_v41, 4  ;;  %v7250_v45 = vrot.slane %v7248_v25, 5  ;;  %v7256_v33 = vrot.slane %v7254_v18, 5  ;;  %v7260_v55 = vrot.slane %v7258_v3, 4  ;;  %v7584_v18 = vld [vmem:[#allocation3 + $0x3c] sm:$0xe] }
 0x3ae   : > { %v8320_v6 = vrot.slane %v8319_v30, 4  ;;  %v7266_v40 = vrot.slane %v7264_v59, 5  ;;  %v7667_v47 = vrot.slane %v16035_v19, 5  ;;  %v7670_v38 = vrot.slane %v16039_v51, 5 }
 0x3af   : > { %8045 = vmatmul.mubr.bf16.vlgmr.msra.gmra.mrb[176].mxu1 %v15987_v36  ;;  %v8315_v7 = vsel %vm13484_vm14, %v8310_v27, %v8314_v48  ;;  %v7251_v32 = vor.u32 %v7250_v45, %v7247_v22  ;;  %v7261_v20 = vor.u32 %v7260_v55, %v7256_v33  ;;  %v8327_v14 = vshrl.u32 %v16042_v42, 16 }
 0x3b0   : > { %8959 = vmatmul.mubr.bf16.vlgmr.msra.gmra.mrb[240].mxu0 %v10827_v23  ;;  %8052 = vmatprep.mubr.bf16.mxu1 %v10796_v57  ;;  %v8325_v36 = vsel %vm13484_vm14, %v8320_v6, %v8324_v8  ;;  %v16062_v1 = vsel %vm13316_vm11, %v10766_v43, %v7667_v47  ;;  %v7669_v31 = vrot.slane %v7667_v47, 4  ;;  %v10829_v23 = vcombine.low %v15996_v29, %v16000_v0  ;;  %v16082_v43 = vld [vmem:[#allocation3 + $0x40] sm:$0xf]  ;;  %v16086_v6 = vld [vmem:[#allocation3 + $0x44] sm:$0x1] }
 0x3b1   : > { %12156 = vmatpush3.bf16.msra.mxu1 %v12775_v4  ;;  %8966 = vmatprep.mubr.bf16.mxu0 %v10844_v2  ;;  %v10845_v54 = vcombine.low %v8315_v7, %v8325_v36  ;;  %v7252_v9 = vrot.slane %v7251_v32, 4  ;;  %v7262_v49 = vrot.slane %v7261_v20, 4  ;;  %v8329_v58 = vrot.slane %v8327_v14, 4  ;;  %v16092_v32 = vld [vmem:[#allocation3 + $0x48] sm:$0xf] }
 0x3b2   : > { %12157 = vmatprep.subr.bf16.mxu1 %v12696_v11  ;;  %v16068_v57 = vsel %vm13316_vm11, %v7669_v31, %v7670_v38  ;;  %v8330_v44 = vshll.u32 %v16042_v42, 16  ;;  %v8336_v37 = vshll.u32 %v16052_v63, 16  ;;  %v8340_v52 = vshrl.u32 %v16052_v63, 16  ;;  %v8242_v36 = vld [vmem:[#allocation3 + $0x50] sm:$0x1] }
 0x3b3   : > { %v7257_v2 = vsel %vm13484_vm14, %v7252_v9, %v7256_v33  ;;  %v7267_v48 = vsel %vm13484_vm14, %v7262_v49, %v7266_v40  ;;  %v10798_v53 = vcombine.low %v16062_v1, %v16068_v57  ;;  %v8346_v50 = vshll.u32 %v8241_v5, 16  ;;  %v12706_v5 = vld [vmem:[#allocation9 + $0x220] sm:$0xff]   ;;  %v16137_v29 = vld [vmem:[#allocation3 + $0x50] sm:$0x1] }
 0x3b4   : > { %v16079_v8 = vcombine.low %v7257_v2, %v7267_v48  ;;  %v8332_v28 = vrot.slane %v8330_v44, 5  ;;  %v8338_v41 = vrot.slane %v8336_v37, 5  ;;  %v8342_v25 = vrot.slane %v8340_v52, 4 }
 0x3b5   : > { %12158 = vmatpush3.bf16.msra.mxu1 %v12696_v11  ;;  %v8348_v3 = vrot.slane %v8346_v50, 5  ;;  %v7269_v30 = vshrl.u32 %v7157_v10, 16  ;;  %v7272_v22 = vshll.u32 %v7157_v10, 16  ;;  %v7278_v59 = vshll.u32 %v16035_v19, 16  ;;  %v12703_v11 = vld [vmem:[#allocation9 + $0x218] sm:$0xff]  }
 0x3b6   : > { %12159 = vmatprep.subr.bf16.mxu1 %v12700_v35  ;;  %v8333_v27 = vor.u32 %v8332_v28, %v8329_v58  ;;  %v8343_v45 = vor.u32 %v8342_v25, %v8338_v41  ;;  %v7282_v33 = vshrl.u32 %v16035_v19, 16  ;;  %v7288_v55 = vshll.u32 %v16039_v51, 16  ;;  %v7160_v28 = vld [vmem:[#allocation3 + $0x3c] sm:$0xf] }
 0x3b7   : > { %8053 = vmatmul.mubr.bf16.gmra.mrb[180].mxu1 %v16033_v12  ;;  %v7271_v40 = vrot.slane %v7269_v30, 4  ;;  %v7274_v47 = vrot.slane %v7272_v22, 5  ;;  %v7280_v38 = vrot.slane %v7278_v59, 5  ;;  %v10767_v7 = vrot.slane %v7584_v18, 9  ;;  %v7585_v30 = vld [vmem:[#allocation3 + $0x48] sm:$0xe] }
 0x3b8   : > { %8967 = vmatmul.mubr.bf16.gmra.mrb[244].mxu0 %v10828_v62  ;;  %8060 = vmatprep.mubr.bf16.mxu1 %v10797_v21  ;;  %v8334_v19 = vrot.slane %v8333_v27, 4  ;;  %v8344_v51 = vrot.slane %v8343_v45, 4  ;;  %v7284_v20 = vrot.slane %v7282_v33, 4  ;;  %v7290_v14 = vrot.slane %v7288_v55, 5  ;;  %v16101_v62 = vld [vmem:[#allocation3 + $0x4c] sm:$0xf] }
 0x3b9   : > { %8974 = vmatprep.mubr.bf16.mxu0 %v10845_v54  ;;  %v7275_v12 = vor.u32 %v7274_v47, %v7271_v40  ;;  %v7674_v4 = vrot.slane %v16082_v43, 5  ;;  %v7677_v17 = vrot.slane %v16086_v6, 5  ;;  %v10830_v13 = vcombine.low %v16042_v42, %v16052_v63  ;;  %12160 = vmatpush3.bf16.msra.mxu1 %v12700_v35  ;;  %v12709_v22 = vld [vmem:[#allocation9 + $0x228] sm:$0xff]   ;;  %v16131_v55 = vld [vmem:[#allocation3 + $0x4c] sm:$0xf] }
 0x3ba   : > { %v8339_v16 = vsel %vm13484_vm14, %v8334_v19, %v8338_v41  ;;  %v8349_v15 = vsel %vm13484_vm14, %v8344_v51, %v8348_v3  ;;  %v7285_v21 = vor.u32 %v7284_v20, %v7280_v38  ;;  %v8351_v31 = vshrl.u32 %v16092_v32, 16  ;;  %12161 = vmatprep.subr.bf16.mxu1 %v12703_v11  ;;  %v16141_v19 = vld [vmem:[#allocation3 + $0x54] sm:$0xf]  ;;  %v12712_v20 = vld [vmem:[#allocation9 + $0x230] sm:$0xff]  }
 0x3bb   : > { %v10846_v54 = vcombine.low %v8339_v16, %v8349_v15  ;;  %v7276_v9 = vrot.slane %v7275_v12, 4  ;;  %v16110_v49 = vsel %vm13316_vm11, %v10767_v7, %v7674_v4  ;;  %v7676_v58 = vrot.slane %v7674_v4, 4  ;;  %v16147_v15 = vld [vmem:[#allocation3 + $0x58] sm:$0xf] }
 0x3bc   : > { %v7286_v35 = vrot.slane %v7285_v21, 4  ;;  %v8353_v44 = vrot.slane %v8351_v31, 4  ;;  %v8354_v37 = vshll.u32 %v16092_v32, 16  ;;  %v8360_v52 = vshll.u32 %v16101_v62, 16 }
 0x3bd   : > { %v7281_v10 = vsel %vm13484_vm14, %v7276_v9, %v7280_v38  ;;  %v16118_v2 = vsel %vm13316_vm11, %v7676_v58, %v7677_v17  ;;  %v8364_v48 = vshrl.u32 %v16101_v62, 16  ;;  %v8370_v50 = vshll.u32 %v8242_v36, 16  ;;  %12162 = vmatpush3.bf16.msra.mxu1 %v12703_v11  ;;  %v8243_v9 = vld [vmem:[#allocation3 + $0x5c] sm:$0x1] }
 0x3be   : > { %v7291_v41 = vsel %vm13484_vm14, %v7286_v35, %v7290_v14  ;;  %v10799_v25 = vcombine.low %v16110_v49, %v16118_v2  ;;  %v8356_v18 = vrot.slane %v8354_v37, 5  ;;  %v8362_v3 = vrot.slane %v8360_v52, 5  ;;  %12163 = vmatprep.subr.bf16.mxu1 %v12706_v5  ;;  %v12715_v37 = vld [vmem:[#allocation9 + $0x238] sm:$0xff]  }
 0x3bf   : > { %8061 = vmatmul.mubr.bf16.gmra.mrb[184].mxu1 %v16079_v8  ;;  %v10782_v59 = vcombine.low %v7281_v10, %v7291_v41  ;;  %v8366_v27 = vrot.slane %v8364_v48, 4  ;;  %v8372_v45 = vrot.slane %v8370_v50, 5  ;;  %v10831_v33 = vcombine.low %v16092_v32, %v16101_v62  ;;  %v7163_v50 = vld [vmem:[#allocation3 + $0x48] sm:$0xf] }
 0x3c0   : > { %8975 = vmatmul.mubr.bf16.gmra.mrb[248].mxu0 %v10829_v23  ;;  %8068 = vmatprep.mubr.bf16.mxu1 %v10798_v53  ;;  %v8357_v11 = vor.u32 %v8356_v18, %v8353_v44  ;;  %v7293_v40 = vshrl.u32 %v7160_v28, 16  ;;  %v7296_v8 = vshll.u32 %v7160_v28, 16  ;;  %v7302_v47 = vshll.u32 %v16082_v43, 16 }
 0x3c1   : > { %8982 = vmatprep.mubr.bf16.mxu0 %v10846_v54  ;;  %v8367_v0 = vor.u32 %v8366_v27, %v8362_v3  ;;  %v7306_v23 = vshrl.u32 %v16082_v43, 16  ;;  %v7312_v38 = vshll.u32 %v16086_v6, 16  ;;  %v10768_v7 = vrot.slane %v7585_v30, 9  ;;  %12164 = vmatpush3.bf16.msra.mxu1 %v12706_v5 }
 0x3c2   : > { %v8358_v51 = vrot.slane %v8357_v11, 4  ;;  %v7295_v1 = vrot.slane %v7293_v40, 4  ;;  %v7298_v57 = vrot.slane %v7296_v8, 5  ;;  %v7304_v53 = vrot.slane %v7302_v47, 5  ;;  %12165 = vmatprep.subr.bf16.mxu1 %v12709_v22  ;;  %v16171_v11 = vld [vmem:[#allocation3 + $0x58] sm:$0xf] }
 0x3c3   : > { %v8368_v14 = vrot.slane %v8367_v0, 4  ;;  %v7308_v12 = vrot.slane %v7306_v23, 4  ;;  %v7314_v4 = vrot.slane %v7312_v38, 5  ;;  %v7681_v17 = vrot.slane %v16131_v55, 5  ;;  %v16173_v40 = vld [vmem:[#allocation3 + $0x60] sm:$0xf] }
 0x3c4   : > { %v8363_v43 = vsel %vm13484_vm14, %v8358_v51, %v8362_v3  ;;  %v7299_v16 = vor.u32 %v7298_v57, %v7295_v1  ;;  %v7684_v6 = vrot.slane %v16137_v29, 5  ;;  %v8375_v21 = vshrl.u32 %v16141_v19, 16 }
 0x3c5   : > { %v8373_v36 = vsel %vm13484_vm14, %v8368_v14, %v8372_v45  ;;  %v7309_v31 = vor.u32 %v7308_v12, %v7304_v53  ;;  %v16154_v5 = vsel %vm13316_vm11, %v10768_v7, %v7681_v17  ;;  %v7683_v54 = vrot.slane %v7681_v17, 4  ;;  %12166 = vmatpush3.bf16.msra.mxu1 %v12709_v22  ;;  %v7586_v22 = vld [vmem:[#allocation3 + $0x54] sm:$0xe]  ;;  %v16179_v7 = vld [vmem:[#allocation3 + $0x5c] sm:$0x1] }
 0x3c6   : > { %v10847_v49 = vcombine.low %v8363_v43, %v8373_v36  ;;  %v7300_v58 = vrot.slane %v7299_v16, 4  ;;  %v8377_v35 = vrot.slane %v8375_v21, 4  ;;  %v8378_v44 = vshll.u32 %v16141_v19, 16  ;;  %12167 = vmatprep.subr.bf16.mxu1 %v12712_v20 }
 0x3c7   : > { %8069 = vmatmul.mubr.bf16.gmra.mrb[188].mxu1 %v10782_v59  ;;  %v7310_v52 = vrot.slane %v7309_v31, 4  ;;  %v7685_v10 = vsel %vm13316_vm11, %v7683_v54, %v7684_v6  ;;  %v8384_v2 = vshll.u32 %v16147_v15, 16  ;;  %v8388_v48 = vshrl.u32 %v16147_v15, 16  ;;  %v16192_v31 = vld [vmem:[#allocation3 + $0x64] sm:$0xf] }
 0x3c8   : > { %8983 = vmatmul.mubr.bf16.gmra.mrb[252].mxu0 %v10830_v13  ;;  %8076 = vmatprep.mubr.bf16.mxu1 %v10799_v25  ;;  %v7305_v28 = vsel %vm13484_vm14, %v7300_v58, %v7304_v53  ;;  %v10800_v41 = vcombine.low %v16154_v5, %v7685_v10  ;;  %v8380_v18 = vrot.slane %v8378_v44, 5  ;;  %v8394_v3 = vshll.u32 %v8243_v9, 16  ;;  %v8244_v9 = vld [vmem:[#allocation3 + $0x68] sm:$0x1] }
 0x3c9   : > { %8990 = vmatprep.mubr.bf16.mxu0 %v10847_v49  ;;  %v7315_v42 = vsel %vm13484_vm14, %v7310_v52, %v7314_v4  ;;  %v8386_v63 = vrot.slane %v8384_v2, 5  ;;  %v8390_v13 = vrot.slane %v8388_v48, 4  ;;  %v10832_v30 = vcombine.low %v16141_v19, %v16147_v15  ;;  %12168 = vmatpush3.bf16.msra.mxu1 %v12712_v20 }
 0x3ca   : > { %v10783_v59 = vcombine.low %v7305_v28, %v7315_v42  ;;  %v8381_v25 = vor.u32 %v8380_v18, %v8377_v35  ;;  %v8396_v27 = vrot.slane %v8394_v3, 5  ;;  %v7317_v45 = vshrl.u32 %v7163_v50, 16  ;;  %12169 = vmatprep.subr.bf16.mxu1 %v12715_v37  ;;  %v7166_v28 = vld [vmem:[#allocation3 + $0x54] sm:$0xf] }
 0x3cb   : > { %v8391_v47 = vor.u32 %v8390_v13, %v8386_v63  ;;  %v7320_v0 = vshll.u32 %v7163_v50, 16  ;;  %v7326_v23 = vshll.u32 %v16131_v55, 16  ;;  %v7330_v38 = vshrl.u32 %v16131_v55, 16 }
 0x3cc   : > { %v16175_v8 = vpop.f32.mrb[112].mxu1  ;;  %v8382_v1 = vrot.slane %v8381_v25, 4  ;;  %v7319_v57 = vrot.slane %v7317_v45, 4  ;;  %v7336_v53 = vshll.u32 %v16137_v29, 16  ;;  %v10769_v20 = vrot.slane %v7586_v22, 9  ;;  %v12717_v45 = vld [vmem:[#allocation10] sm:$0xff]  }
 0x3cd   : > { %v16181_v51 = vpop.f32.mrb[113].mxu1  ;;  %v8392_v12 = vrot.slane %v8391_v47, 4  ;;  %v7322_v4 = vrot.slane %v7320_v0, 5  ;;  %v7328_v17 = vrot.slane %v7326_v23, 5  ;;  %v7332_v43 = vrot.slane %v7330_v38, 4  ;;  %12170 = vmatpush3.bf16.msra.mxu1 %v12715_v37 }
 0x3ce   : > { %v16184_v14 = vpop.f32.mrb[114].mxu1  ;;  %v8387_v55 = vsel %vm13484_vm14, %v8382_v1, %v8386_v63  ;;  %v7338_v6 = vrot.slane %v7336_v53, 5  ;;  %v7688_v21 = vrot.slane %v16171_v11, 5  ;;  %v7691_v36 = vrot.slane %v16179_v7, 5  ;;  %v16211_v25 = vld [vmem:[#allocation3 + $0x64] sm:$0xf]  ;;  %12203 = vmatprep.subr.bf16.mxu1 %v12717_v45 }
 0x3cf   : > { %v16186_v16 = vpop.f32.mrb[115].mxu1  ;;  %8077 = vmatmul.mubr.bf16.gmra.mrb[192].mxu1 %v10783_v59  ;;  %v8397_v29 = vsel %vm13484_vm14, %v8392_v12, %v8396_v27  ;;  %v7323_v5 = vor.u32 %v7322_v4, %v7319_v57  ;;  %v7333_v54 = vor.u32 %v7332_v43, %v7328_v17  ;;  %v8399_v49 = vshrl.u32 %v16173_v40, 16  ;;  %v7587_v27 = vld [vmem:[#allocation3 + $0x60] sm:$0xe]  ;;  %v16216_v1 = vld [vmem:[#allocation3 + $0x68] sm:$0x1] }
 0x3d0   : > { %8991 = vmatmul.mubr.bf16.gmra.mrb[0].mxu0 %v10831_v33  ;;  %8084 = vmatprep.mubr.bf16.mxu1 %v10800_v41  ;;  %v10848_v58 = vcombine.low %v8387_v55, %v8397_v29  ;;  %v7689_v35 = vsel %vm13316_vm11, %v10769_v20, %v7688_v21  ;;  %v7690_v44 = vrot.slane %v7688_v21, 4  ;;  %v8402_v37 = vshll.u32 %v16173_v40, 16  ;;  %v16220_v4 = vld [vmem:[#allocation3 + $0x6c] sm:$0xf]  ;;  %v16247_v45 = vld [vmem:[#allocation3 + $0x70] sm:$0xf] }
 0x3d1   : > { %v7324_v52 = vrot.slane %v7323_v5, 4  ;;  %v7334_v10 = vrot.slane %v7333_v54, 4  ;;  %v8401_v32 = vrot.slane %v8399_v49, 4  ;;  %v8408_v62 = vshll.u32 %v16192_v31, 16  ;;  %v8245_v54 = vld [vmem:[#allocation3 + $0x74] sm:$0x1] }
 0x3d2   : > { %8998 = vmatprep.mubr.bf16.mxu0 %v10848_v58  ;;  %v7692_v33 = vsel %vm13316_vm11, %v7690_v44, %v7691_v36  ;;  %v8404_v2 = vrot.slane %v8402_v37, 5  ;;  %v8412_v48 = vshrl.u32 %v16192_v31, 16  ;;  %v8418_v50 = vshll.u32 %v8244_v9, 16 }
 0x3d3   : > { %v7329_v41 = vsel %vm13484_vm14, %v7324_v52, %v7328_v17  ;;  %v7339_v18 = vsel %vm13484_vm14, %v7334_v10, %v7338_v6  ;;  %v10801_v3 = vcombine.low %v7689_v35, %v7692_v33  ;;  %v8410_v42 = vrot.slane %v8408_v62, 5  ;;  %v16225_v6 = vld [vmem:[#allocation3 + $0x70] sm:$0xf]  ;;  %v7169_v33 = vld [vmem:[#allocation3 + $0x60] sm:$0xf] }
 0x3d4   : > { %v10784_v63 = vcombine.low %v7329_v41, %v7339_v18  ;;  %v8405_v13 = vor.u32 %v8404_v2, %v8401_v32  ;;  %v8414_v22 = vrot.slane %v8412_v48, 4  ;;  %v8420_v59 = vrot.slane %v8418_v50, 5 }
 0x3d5   : > { %v10833_v47 = vcombine.low %v16173_v40, %v16192_v31  ;;  %v7341_v0 = vshrl.u32 %v7166_v28, 16  ;;  %v7344_v23 = vshll.u32 %v7166_v28, 16  ;;  %v7350_v38 = vshll.u32 %v16171_v11, 16 }
 0x3d6   : > { %v8406_v57 = vrot.slane %v8405_v13, 4  ;;  %v8415_v53 = vor.u32 %v8414_v22, %v8410_v42  ;;  %v7354_v20 = vshrl.u32 %v16171_v11, 16  ;;  %v7360_v12 = vshll.u32 %v16179_v7, 16 }
 0x3d7   : > { %8085 = vmatmul.mubr.bf16.gmra.mrb[196].mxu1 %v10784_v63  ;;  %v7343_v40 = vrot.slane %v7341_v0, 4  ;;  %v7346_v17 = vrot.slane %v7344_v23, 5  ;;  %v7352_v43 = vrot.slane %v7350_v38, 5  ;;  %v10770_v55 = vrot.slane %v7587_v27, 9  ;;  %v7588_v63 = vld [vmem:[#allocation3 + $0x6c] sm:$0xe] }
 0x3d8   : > { %8999 = vmatmul.mubr.bf16.gmra.mrb[4].mxu0 %v10832_v30  ;;  %8092 = vmatprep.mubr.bf16.mxu1 %v10801_v3  ;;  %v8411_v11 = vsel %vm13484_vm14, %v8406_v57, %v8410_v42  ;;  %v8416_v21 = vrot.slane %v8415_v53, 4  ;;  %v7356_v7 = vrot.slane %v7354_v20, 4  ;;  %v7362_v36 = vrot.slane %v7360_v12, 5  ;;  %v16251_v53 = vld [vmem:[#allocation3 + $0x74] sm:$0x1] }
 0x3d9   : > { %v7347_v31 = vor.u32 %v7346_v17, %v7343_v40  ;;  %v7695_v29 = vrot.slane %v16211_v25, 5  ;;  %v7698_v5 = vrot.slane %v16216_v1, 5  ;;  %v8423_v19 = vshrl.u32 %v16220_v4, 16 }
 0x3da   : > { %v8421_v15 = vsel %vm13484_vm14, %v8416_v21, %v8420_v59  ;;  %v7357_v30 = vor.u32 %v7356_v7, %v7352_v43  ;;  %v8426_v9 = vshll.u32 %v16220_v4, 16  ;;  %v8432_v49 = vshll.u32 %v16225_v6, 16 }
 0x3db   : > { %v10849_v58 = vcombine.low %v8411_v11, %v8421_v15  ;;  %v7348_v35 = vrot.slane %v7347_v31, 4  ;;  %v7696_v44 = vsel %vm13316_vm11, %v10770_v55, %v7695_v29  ;;  %v7697_v37 = vrot.slane %v7695_v29, 4  ;;  %v16258_v11 = vld [vmem:[#allocation3 + $0x7c] sm:$0xf] }
 0x3dc   : > { %v7358_v52 = vrot.slane %v7357_v30, 4  ;;  %v8425_v10 = vrot.slane %v8423_v19, 4  ;;  %v8428_v32 = vrot.slane %v8426_v9, 5  ;;  %v8434_v62 = vrot.slane %v8432_v49, 5 }
 0x3dd   : > { %9006 = vmatprep.mubr.bf16.mxu0 %v10849_v58  ;;  %v7353_v2 = vsel %vm13484_vm14, %v7348_v35, %v7352_v43  ;;  %v7699_v48 = vsel %vm13316_vm11, %v7697_v37, %v7698_v5  ;;  %v8436_v50 = vshrl.u32 %v16225_v6, 16  ;;  %v8442_v28 = vshll.u32 %v8245_v54, 16  ;;  %v8246_v54 = vld [vmem:[#allocation3 + $0x80] sm:$0x1] }
 0x3de   : > { %v7363_v41 = vsel %vm13484_vm14, %v7358_v52, %v7362_v36  ;;  %v10802_v18 = vcombine.low %v7696_v44, %v7699_v48  ;;  %v8429_v3 = vor.u32 %v8428_v32, %v8425_v10  ;;  %v10834_v42 = vcombine.low %v16220_v4, %v16225_v6 }
 0x3df   : > { %v10785_v13 = vcombine.low %v7353_v2, %v7363_v41  ;;  %v8438_v22 = vrot.slane %v8436_v50, 4  ;;  %v8444_v59 = vrot.slane %v8442_v28, 5  ;;  %v7365_v27 = vshrl.u32 %v7169_v33, 16 }
 0x3e0   : > { %9007 = vmatmul.mubr.bf16.gmra.mrb[8].mxu0 %v10833_v47  ;;  %v8430_v0 = vrot.slane %v8429_v3, 4  ;;  %v7368_v23 = vshll.u32 %v7169_v33, 16  ;;  %v7374_v38 = vshll.u32 %v16211_v25, 16  ;;  %v7378_v57 = vshrl.u32 %v16211_v25, 16  ;;  %v16254_v47 = vld [vmem:[#allocation3 + $0x78] sm:$0xf] }
 0x3e1   : > { %8093 = vmatmul.mubr.bf16.gmra.mrb[200].mxu1 %v10785_v13  ;;  %v8439_v20 = vor.u32 %v8438_v22, %v8434_v62  ;;  %v7367_v12 = vrot.slane %v7365_v27, 4  ;;  %v7384_v4 = vshll.u32 %v16216_v1, 16  ;;  %v10771_v40 = vrot.slane %v7588_v63, 9  ;;  %v16278_v63 = vld [vmem:[#allocation3 + $0x7c] sm:$0xf] }
 0x3e2   : > { %8100 = vmatprep.mubr.bf16.mxu1 %v10802_v18  ;;  %v8435_v17 = vsel %vm13484_vm14, %v8430_v0, %v8434_v62  ;;  %v7370_v43 = vrot.slane %v7368_v23, 5  ;;  %v7376_v55 = vrot.slane %v7374_v38, 5  ;;  %v7380_v6 = vrot.slane %v7378_v57, 4  ;;  %v7172_v62 = vld [vmem:[#allocation3 + $0x6c] sm:$0xf] }
 0x3e3   : > { %v8440_v25 = vrot.slane %v8439_v20, 4  ;;  %v7386_v21 = vrot.slane %v7384_v4, 5  ;;  %v7702_v7 = vrot.slane %v16247_v45, 5  ;;  %v7705_v36 = vrot.slane %v16251_v53, 5  ;;  %v16280_v13 = vld [vmem:[#allocation3 + $0x80] sm:$0x1] }
 0x3e4   : > { %v7371_v31 = vor.u32 %v7370_v43, %v7367_v12  ;;  %v7381_v1 = vor.u32 %v7380_v6, %v7376_v55  ;;  %v8447_v29 = vshrl.u32 %v16254_v47, 16  ;;  %v8450_v5 = vshll.u32 %v16254_v47, 16  ;;  %v7589_v22 = vld [vmem:[#allocation3 + $0x78] sm:$0xe] }
 0x3e5   : > { %v8445_v19 = vsel %vm13484_vm14, %v8440_v25, %v8444_v59  ;;  %v7703_v15 = vsel %vm13316_vm11, %v10771_v40, %v7702_v7  ;;  %v7704_v30 = vrot.slane %v7702_v7, 4  ;;  %v8456_v9 = vshll.u32 %v16258_v11, 16  ;;  %v16282_v59 = vld [vmem:[#allocation3 + $0x84] sm:$0xf]  ;;  %v16289_v40 = vld [vmem:[#allocation3 + $0x88] sm:$0xf] }
 0x3e6   : > { %v10850_v49 = vcombine.low %v8435_v17, %v8445_v19  ;;  %v7372_v58 = vrot.slane %v7371_v31, 4  ;;  %v7382_v35 = vrot.slane %v7381_v1, 4  ;;  %v8449_v44 = vrot.slane %v8447_v29, 4 }
 0x3e7   : > { %v7706_v37 = vsel %vm13316_vm11, %v7704_v30, %v7705_v36  ;;  %v8452_v52 = vrot.slane %v8450_v5, 5  ;;  %v8458_v10 = vrot.slane %v8456_v9, 5  ;;  %v8460_v32 = vshrl.u32 %v16258_v11, 16 }
 0x3e8   : > { %9014 = vmatprep.mubr.bf16.mxu0 %v10850_v49  ;;  %v7377_v33 = vsel %vm13484_vm14, %v7372_v58, %v7376_v55  ;;  %v7387_v2 = vsel %vm13484_vm14, %v7382_v35, %v7386_v21  ;;  %v10803_v48 = vcombine.low %v7703_v15, %v7706_v37  ;;  %v8466_v50 = vshll.u32 %v8246_v54, 16  ;;  %v8247_v15 = vld [vmem:[#allocation3 + $0x8c] sm:$0x1] }
 0x3e9   : > { %v10786_v28 = vcombine.low %v7377_v33, %v7387_v2  ;;  %9015 = vmatmul.mubr.bf16.gmra.mrb[12].mxu0 %v10834_v42  ;;  %v8453_v41 = vor.u32 %v8452_v52, %v8449_v44  ;;  %v8462_v18 = vrot.slane %v8460_v32, 4  ;;  %v10835_v3 = vcombine.low %v16254_v47, %v16258_v11  ;;  %v9128_v32 = vld [vmem:[#allocation3 + $0x84] sm:$0xe] }
 0x3ea   : > { %v8468_v27 = vrot.slane %v8466_v50, 5  ;;  %v7389_v0 = vshrl.u32 %v7172_v62, 16  ;;  %v7392_v23 = vshll.u32 %v7172_v62, 16  ;;  %v7398_v38 = vshll.u32 %v16247_v45, 16  ;;  %v16285_v57 = vpop.f32.mrb[116].mxu1 }
 0x3eb   : > { %8101 = vmatmul.mubr.bf16.gmra.mrb[204].mxu1 %v10786_v28  ;;  %v8454_v42 = vrot.slane %v8453_v41, 4  ;;  %v8463_v20 = vor.u32 %v8462_v18, %v8458_v10  ;;  %v7402_v12 = vshrl.u32 %v16247_v45, 16  ;;  %v7408_v4 = vshll.u32 %v16251_v53, 16  ;;  %v16291_v47 = vpop.f32.mrb[117].mxu1  ;;  %v7175_v50 = vld [vmem:[#allocation3 + $0x78] sm:$0xf] }
 0x3ec   : > { %8108 = vmatprep.mubr.bf16.mxu1 %v10803_v48  ;;  %v7391_v17 = vrot.slane %v7389_v0, 4  ;;  %v7394_v43 = vrot.slane %v7392_v23, 5  ;;  %v7400_v55 = vrot.slane %v7398_v38, 5  ;;  %v10772_v6 = vrot.slane %v7589_v22, 9  ;;  %v16293_v11 = vpop.f32.mrb[118].mxu1 }
 0x3ed   : > { %v8459_v25 = vsel %vm13484_vm14, %v8454_v42, %v8458_v10  ;;  %v8464_v21 = vrot.slane %v8463_v20, 4  ;;  %v7404_v7 = vrot.slane %v7402_v12, 4  ;;  %v7410_v36 = vrot.slane %v7408_v4, 5  ;;  %v16297_v45 = vpop.f32.mrb[119].mxu1  ;;  %v7590_v20 = vld [vmem:[#allocation3 + $0x84] sm:$0xe] }
 0x3ee   : > { %v7395_v53 = vor.u32 %v7394_v43, %v7391_v17  ;;  %v7709_v31 = vrot.slane %v16278_v63, 5  ;;  %v7712_v1 = vrot.slane %v16280_v13, 5  ;;  %v8471_v29 = vshrl.u32 %v16282_v59, 16 }
 0x3ef   : > { %v8469_v5 = vsel %vm13484_vm14, %v8464_v21, %v8468_v27  ;;  %v7405_v19 = vor.u32 %v7404_v7, %v7400_v55  ;;  %v8474_v30 = vshll.u32 %v16282_v59, 16  ;;  %v8480_v54 = vshll.u32 %v16289_v40, 16 }
 0x3f0   : > { %v10851_v9 = vcombine.low %v8459_v25, %v8469_v5  ;;  %v7396_v49 = vrot.slane %v7395_v53, 4  ;;  %v7710_v58 = vsel %vm13316_vm11, %v10772_v6, %v7709_v31  ;;  %v7711_v35 = vrot.slane %v7709_v31, 4 }
 0x3f1   : > { %v7406_v44 = vrot.slane %v7405_v19, 4  ;;  %v8473_v37 = vrot.slane %v8471_v29, 4  ;;  %v8476_v52 = vrot.slane %v8474_v30, 5  ;;  %v8482_v10 = vrot.slane %v8480_v54, 5 }
 0x3f2   : > { %9022 = vmatprep.mubr.bf16.mxu0 %v10851_v9  ;;  %v7401_v62 = vsel %vm13484_vm14, %v7396_v49, %v7400_v55  ;;  %v7713_v33 = vsel %vm13316_vm11, %v7711_v35, %v7712_v1  ;;  %v8484_v2 = vshrl.u32 %v16289_v40, 16  ;;  %v8490_v48 = vshll.u32 %v8247_v15, 16  ;;  %v16336_v9 = vld [vmem:[#allocation3 + $0x90] sm:$0xf] }
 0x3f3   : > { %v7411_v28 = vsel %vm13484_vm14, %v7406_v44, %v7410_v36  ;;  %v10804_v41 = vcombine.low %v7710_v58, %v7713_v33  ;;  %9023 = vmatmul.mubr.bf16.gmra.mrb[16].mxu0 %v10835_v3  ;;  %v8477_v18 = vor.u32 %v8476_v52, %v8473_v37  ;;  %v10836_v22 = vcombine.low %v16282_v59, %v16289_v40  ;;  %v16317_v27 = vpop.f32.mrb[180].mxu0  ;;  %v16326_v36 = vld [vmem:[#allocation3 + $0x88] sm:$0xf]  ;;  %v16343_v58 = vld [vmem:[#allocation3 + $0x8c] sm:$0x1] }
 0x3f4   : > { %v10787_v0 = vcombine.low %v7401_v62, %v7411_v28  ;;  %v8486_v23 = vrot.slane %v8484_v2, 4  ;;  %v8492_v38 = vrot.slane %v8490_v48, 5  ;;  %v10884_v42 = vrot.slane %v9128_v32, 9  ;;  %v16319_v12 = vpop.f32.mrb[181].mxu0  ;;  %v16350_v62 = vld [vmem:[#allocation3 + $0x94] sm:$0xf] }
 0x3f5   : > { %v8478_v4 = vrot.slane %v8477_v18, 4  ;;  %v9232_v17 = vrot.slane %v16289_v40, 5  ;;  %v9235_v43 = vrot.slane %v8247_v15, 5  ;;  %v7413_v55 = vshrl.u32 %v7175_v50, 16  ;;  %v16322_v6 = vpop.f32.mrb[182].mxu0 }
 0x3f6   : > { %8109 = vmatmul.mubr.bf16.gmra.mrb[208].mxu1 %v10787_v0  ;;  %v8487_v3 = vor.u32 %v8486_v23, %v8482_v10  ;;  %v7416_v25 = vshll.u32 %v7175_v50, 16  ;;  %v7422_v21 = vshll.u32 %v16278_v63, 16  ;;  %v7426_v7 = vshrl.u32 %v16278_v63, 16  ;;  %v16328_v53 = vpop.f32.mrb[183].mxu0  ;;  %v8248_v33 = vld [vmem:[#allocation3 + $0x98] sm:$0x1] }
 0x3f7   : > { %8116 = vmatprep.mubr.bf16.mxu1 %v10804_v41  ;;  %v8483_v31 = vsel %vm13484_vm14, %v8478_v4, %v8482_v10  ;;  %v16334_v1 = vsel %vm13316_vm11, %v10884_v42, %v9232_v17  ;;  %v9234_v29 = vrot.slane %v9232_v17, 4  ;;  %v7415_v5 = vrot.slane %v7413_v55, 4  ;;  %v7178_v28 = vld [vmem:[#allocation3 + $0x84] sm:$0xf] }
 0x3f8   : > { %v8488_v19 = vrot.slane %v8487_v3, 4  ;;  %v7418_v15 = vrot.slane %v7416_v25, 5  ;;  %v7424_v30 = vrot.slane %v7422_v21, 5  ;;  %v7428_v54 = vrot.slane %v7426_v7, 4 }
 0x3f9   : > { %v16340_v63 = vsel %vm13316_vm11, %v9234_v29, %v9235_v43  ;;  %v7432_v49 = vshll.u32 %v16280_v13, 16  ;;  %v10773_v35 = vrot.slane %v7590_v20, 9  ;;  %v7716_v44 = vrot.slane %v16326_v36, 5 }
 0x3fa   : > { %v8493_v37 = vsel %vm13484_vm14, %v8488_v19, %v8492_v38  ;;  %v7419_v10 = vor.u32 %v7418_v15, %v7415_v5  ;;  %v7429_v32 = vor.u32 %v7428_v54, %v7424_v30  ;;  %v7719_v38 = vrot.slane %v16343_v58, 5 }
 0x3fb   : > { %v10852_v2 = vcombine.low %v8483_v31, %v8493_v37  ;;  %v7434_v48 = vrot.slane %v7432_v49, 5  ;;  %v7717_v13 = vsel %vm13316_vm11, %v10773_v35, %v7716_v44  ;;  %v7718_v50 = vrot.slane %v7716_v44, 4  ;;  %v16356_v18 = vpop.f32.mrb[184].mxu0 }
 0x3fc   : > { %v16354_v41 = vpop.f32.mrb[120].mxu1  ;;  %v7420_v0 = vrot.slane %v7419_v10, 4  ;;  %v7430_v23 = vrot.slane %v7429_v32, 4  ;;  %v8495_v42 = vshrl.u32 %v16336_v9, 16  ;;  %v16362_v4 = vpop.f32.mrb[185].mxu0  ;;  %v8498_v17 = vshll.u32 %v16336_v9, 16 }
 0x3fd   : > { %v16360_v20 = vpop.f32.mrb[121].mxu1  ;;  %9030 = vmatprep.mubr.bf16.mxu0 %v10852_v2  ;;  %v8504_v43 = vshll.u32 %v16350_v62, 16  ;;  %v8508_v55 = vshrl.u32 %v16350_v62, 16  ;;  %v8514_v3 = vshll.u32 %v8248_v33, 16  ;;  %v16369_v21 = vpop.f32.mrb[186].mxu0  ;;  %v7720_v29 = vsel %vm13316_vm11, %v7718_v50, %v7719_v38 }
 0x3fe   : > { %v16367_v25 = vpop.f32.mrb[122].mxu1  ;;  %v7425_v7 = vsel %vm13484_vm14, %v7420_v0, %v7424_v30  ;;  %v7435_v31 = vsel %vm13484_vm14, %v7430_v23, %v7434_v48  ;;  %9031 = vmatmul.mubr.bf16.gmra.mrb[20].mxu0 %v10836_v22  ;;  %v8497_v5 = vrot.slane %v8495_v42, 4  ;;  %v16382_v15 = vpop.f32.mrb[187].mxu0  ;;  %v10805_v49 = vcombine.low %v7717_v13, %v7720_v29  ;;  %v7591_v30 = vld [vmem:[#allocation3 + $0x90] sm:$0xe] }
 0x3ff   : > { %v16380_v19 = vpop.f32.mrb[123].mxu1  ;;  %v10788_v54 = vcombine.low %v7425_v7, %v7435_v31  ;;  %v8500_v35 = vrot.slane %v8498_v17, 5  ;;  %v8506_v44 = vrot.slane %v8504_v43, 5  ;;  %v8510_v37 = vrot.slane %v8508_v55, 4  ;;  %v16386_v2 = vld [vmem:[#allocation3 + $0x94] sm:$0xf] }
 0x400   : > { %v8516_v10 = vrot.slane %v8514_v3, 5  ;;  %v10837_v32 = vcombine.low %v16336_v9, %v16350_v62  ;;  %v7437_v33 = vshrl.u32 %v7178_v28, 16  ;;  %v7440_v40 = vshll.u32 %v7178_v28, 16  ;;  %v16390_v50 = vld [vmem:[#allocation3 + $0x98] sm:$0x1] }
 0x401   : > { %8117 = vmatmul.mubr.bf16.gmra.mrb[212].mxu1 %v10788_v54  ;;  %v8501_v59 = vor.u32 %v8500_v35, %v8497_v5  ;;  %v7446_v22 = vshll.u32 %v16326_v36, 16  ;;  %v7450_v48 = vshrl.u32 %v16326_v36, 16  ;;  %v8511_v13 = vor.u32 %v8510_v37, %v8506_v44  ;;  %v16393_v42 = vld [vmem:[#allocation3 + $0x9c] sm:$0xf]  ;;  %v16399_v5 = vld [vmem:[#allocation3 + $0xa0] sm:$0xf] }
 0x402   : > { %8124 = vmatprep.mubr.bf16.mxu1 %v10805_v49  ;;  %v7439_v0 = vrot.slane %v7437_v33, 4  ;;  %v7456_v23 = vshll.u32 %v16343_v58, 16  ;;  %v10774_v38 = vrot.slane %v7591_v30, 9  ;;  %v7442_v62 = vrot.slane %v7440_v40, 5  ;;  %v8249_v30 = vld [vmem:[#allocation3 + $0xa4] sm:$0x1] }
 0x403   : > { %v8502_v9 = vrot.slane %v8501_v59, 4  ;;  %v7448_v17 = vrot.slane %v7446_v22, 5  ;;  %v7452_v43 = vrot.slane %v7450_v48, 4  ;;  %v8512_v55 = vrot.slane %v8511_v13, 4 }
 0x404   : > { %v7458_v28 = vrot.slane %v7456_v23, 5  ;;  %v7723_v3 = vrot.slane %v16386_v2, 5  ;;  %v7726_v36 = vrot.slane %v16390_v50, 5  ;;  %v7443_v31 = vor.u32 %v7442_v62, %v7439_v0 }
 0x405   : > { %v8507_v7 = vsel %vm13484_vm14, %v8502_v9, %v8506_v44  ;;  %v7453_v29 = vor.u32 %v7452_v43, %v7448_v17  ;;  %v8519_v58 = vshrl.u32 %v16393_v42, 16  ;;  %v8517_v54 = vsel %vm13484_vm14, %v8512_v55, %v8516_v10  ;;  %v9130_v10 = vld [vmem:[#allocation3 + $0x9c] sm:$0xe] }
 0x406   : > { %v7724_v49 = vsel %vm13316_vm11, %v10774_v38, %v7723_v3  ;;  %v7725_v35 = vrot.slane %v7723_v3, 4  ;;  %v8522_v37 = vshll.u32 %v16393_v42, 16  ;;  %v10853_v33 = vcombine.low %v8507_v7, %v8517_v54  ;;  %v7181_v54 = vld [vmem:[#allocation3 + $0x90] sm:$0xf] }
 0x407   : > { %v7444_v59 = vrot.slane %v7443_v31, 4  ;;  %v7454_v40 = vrot.slane %v7453_v29, 4  ;;  %v8521_v44 = vrot.slane %v8519_v58, 4  ;;  %v8528_v13 = vshll.u32 %v16399_v5, 16 }
 0x408   : > { %v7727_v22 = vsel %vm13316_vm11, %v7725_v35, %v7726_v36  ;;  %v8524_v48 = vrot.slane %v8522_v37, 5  ;;  %v8532_v0 = vshrl.u32 %v16399_v5, 16  ;;  %9038 = vmatprep.mubr.bf16.mxu0 %v10853_v33  ;;  %v8538_v62 = vshll.u32 %v8249_v30, 16 }
 0x409   : > { %v7449_v23 = vsel %vm13484_vm14, %v7444_v59, %v7448_v17  ;;  %v7459_v38 = vsel %vm13484_vm14, %v7454_v40, %v7458_v28  ;;  %v10806_v9 = vcombine.low %v7724_v49, %v7727_v22  ;;  %9039 = vmatmul.mubr.bf16.gmra.mrb[24].mxu0 %v10837_v32  ;;  %v8530_v3 = vrot.slane %v8528_v13, 5  ;;  %v7592_v40 = vld [vmem:[#allocation3 + $0x9c] sm:$0xe] }
 0x40a   : > { %v10789_v43 = vcombine.low %v7449_v23, %v7459_v38  ;;  %v8525_v55 = vor.u32 %v8524_v48, %v8521_v44  ;;  %v8534_v36 = vrot.slane %v8532_v0, 4  ;;  %v8540_v7 = vrot.slane %v8538_v62, 5  ;;  %v16438_v48 = vld [vmem:[#allocation3 + $0xa0] sm:$0xf]  ;;  %v16461_v62 = vld [vmem:[#allocation3 + $0xa8] sm:$0xf] }
 0x40b   : > { %v10838_v31 = vcombine.low %v16393_v42, %v16399_v5  ;;  %v10886_v29 = vrot.slane %v9130_v10, 9  ;;  %v9246_v58 = vrot.slane %v16399_v5, 5  ;;  %v16418_v35 = vpop.f32.mrb[188].mxu0  ;;  %v9249_v49 = vrot.slane %v8249_v30, 5  ;;  %v16451_v10 = vld [vmem:[#allocation3 + $0xa4] sm:$0x1] }
 0x40c   : > { %8125 = vmatmul.mubr.bf16.gmra.mrb[216].mxu1 %v10789_v43  ;;  %v8526_v17 = vrot.slane %v8525_v55, 4  ;;  %v8535_v28 = vor.u32 %v8534_v36, %v8530_v3  ;;  %v11629_v32 = vadd.f32 %v16181_v51, %v16175_v8  ;;  %v16422_v37 = vpop.f32.mrb[189].mxu0  ;;  %v11741_v5 = vadd.f32 %v15919_v39, %v15909_v46 }
 0x40d   : > { %8132 = vmatprep.mubr.bf16.mxu1 %v10806_v9  ;;  %v16426_v33 = vsel %vm13316_vm11, %v10886_v29, %v9246_v58  ;;  %v9248_v42 = vrot.slane %v9246_v58, 4  ;;  %v11632_v59 = vadd.f32 %v16186_v16, %v16184_v14  ;;  %v16432_v44 = vpop.f32.mrb[190].mxu0  ;;  %v11744_v30 = vadd.f32 %v15930_v24, %v15924_v26  ;;  %v16466_v58 = vld [vmem:[#allocation3 + $0xac] sm:$0xf] }
 0x40e   : > { %17347 = vst [vmem:[#allocation30_spill] sm:$0xff] %v16426_v33  ;;  %v8531_v8 = vsel %vm13484_vm14, %v8526_v17, %v8530_v3  ;;  %v8536_v51 = vrot.slane %v8535_v28, 4  ;;  %v7461_v22 = vshrl.u32 %v7181_v54, 16  ;;  %v16440_v13 = vpop.f32.mrb[124].mxu1  ;;  %v16442_v0 = vpop.f32.mrb[191].mxu0  ;;  %v16448_v39 = vadd.f32 %v11741_v5, %v11629_v32 }
 0x40f   : > { %v16446_v46 = vsel %vm13316_vm11, %v9248_v42, %v9249_v49  ;;  %v7464_v14 = vshll.u32 %v7181_v54, 16  ;;  %v7470_v16 = vshll.u32 %v16386_v2, 16  ;;  %v16453_v23 = vpop.f32.mrb[125].mxu1  ;;  %v16459_v38 = vadd.f32 %v11744_v30, %v11632_v59  ;;  %v16473_v5 = vld [vmem:[#allocation3 + $0xb0] sm:$0x1] }
 0x410   : > { %17348 = vst [vmem:[#allocation31_spill] sm:$0xff] %v16446_v46  ;;  %17349 = vst [vmem:[#allocation32_spill] sm:$0xff] %v16448_v39  ;;  %v8541_v26 = vsel %vm13484_vm14, %v8536_v51, %v8540_v7  ;;  %v7463_v9 = vrot.slane %v7461_v22, 4  ;;  %v16463_v43 = vpop.f32.mrb[126].mxu1  ;;  %v7474_v29 = vshrl.u32 %v16386_v2, 16  ;;  %v7480_v7 = vshll.u32 %v16390_v50, 16 }
 0x411   : > { %17350 = vst [vmem:[#allocation33_spill] sm:$0xff] %v16459_v38  ;;  %v10854_v55 = vcombine.low %v8531_v8, %v8541_v26  ;;  %v7466_v3 = vrot.slane %v7464_v14, 5  ;;  %v7472_v36 = vrot.slane %v7470_v16, 5  ;;  %v16468_v54 = vpop.f32.mrb[127].mxu1  ;;  %v10775_v17 = vrot.slane %v7592_v40, 9 }
 0x412   : > { %v7730_v28 = vrot.slane %v16438_v48, 5  ;;  %v7733_v49 = vrot.slane %v16451_v10, 5  ;;  %v7476_v42 = vrot.slane %v7474_v29, 4  ;;  %v8543_v59 = vshrl.u32 %v16461_v62, 16 }
 0x413   : > { %9046 = vmatprep.mubr.bf16.mxu0 %v10854_v55  ;;  %v7467_v32 = vor.u32 %v7466_v3, %v7463_v9  ;;  %v8546_v2 = vshll.u32 %v16461_v62, 16  ;;  %v7482_v8 = vrot.slane %v7480_v7, 5  ;;  %v8552_v50 = vshll.u32 %v16466_v58, 16 }
 0x414   : > { %v7731_v51 = vsel %vm13316_vm11, %v10775_v17, %v7730_v28  ;;  %v7732_v30 = vrot.slane %v7730_v28, 4  ;;  %9047 = vmatmul.mubr.bf16.gmra.mrb[28].mxu0 %v10838_v31  ;;  %v7477_v22 = vor.u32 %v7476_v42, %v7472_v36  ;;  %v8545_v14 = vrot.slane %v8543_v59, 4  ;;  %v7184_v28 = vld [vmem:[#allocation3 + $0x9c] sm:$0xf] }
 0x415   : > { %v7468_v40 = vrot.slane %v7467_v32, 4  ;;  %v8548_v16 = vrot.slane %v8546_v2, 5  ;;  %v8554_v9 = vrot.slane %v8552_v50, 5  ;;  %v8556_v55 = vshrl.u32 %v16466_v58, 16 }
 0x416   : > { %v7734_v26 = vsel %vm13316_vm11, %v7732_v30, %v7733_v49  ;;  %v8562_v3 = vshll.u32 %v16473_v5, 16  ;;  %v7478_v7 = vrot.slane %v7477_v22, 4  ;;  %v10839_v42 = vcombine.low %v16461_v62, %v16466_v58  ;;  %v7593_v62 = vld [vmem:[#allocation3 + $0xa8] sm:$0xe] }
 0x417   : > { %v7473_v29 = vsel %vm13484_vm14, %v7468_v40, %v7472_v36  ;;  %v10807_v17 = vcombine.low %v7731_v51, %v7734_v26  ;;  %v8549_v31 = vor.u32 %v8548_v16, %v8545_v14  ;;  %v8558_v24 = vrot.slane %v8556_v55, 4  ;;  %v16503_v16 = vld [vmem:[#allocation3 + $0xac] sm:$0xf] }
 0x418   : > { %v8564_v32 = vrot.slane %v8562_v3, 5  ;;  %v11635_v49 = vadd.f32 %v16291_v47, %v16285_v57  ;;  %v7483_v59 = vsel %vm13484_vm14, %v7478_v7, %v7482_v8  ;;  %v11747_v30 = vadd.f32 %v16319_v12, %v16317_v27  ;;  %v16505_v27 = vld [vmem:[#allocation3 + $0xb0] sm:$0x1]  ;;  %v16513_v3 = vld [vmem:[#allocation3 + $0xb8] sm:$0xf] }
 0x419   : > { %v8550_v2 = vrot.slane %v8549_v31, 4  ;;  %v11638_v36 = vadd.f32 %v16297_v45, %v16293_v11  ;;  %v10790_v51 = vcombine.low %v7473_v29, %v7483_v59  ;;  %v8559_v50 = vor.u32 %v8558_v24, %v8554_v9 }
 0x41a   : > { %v11750_v40 = vadd.f32 %v16328_v53, %v16322_v6  ;;  %v7485_v22 = vshrl.u32 %v7184_v28, 16  ;;  %v16500_v47 = vadd.f32 %v11747_v30, %v11635_v49  ;;  %v7488_v8 = vshll.u32 %v7184_v28, 16  ;;  %v16510_v53 = vld [vmem:[#allocation3 + $0xb4] sm:$0xf]  ;;  %v8251_v30 = vld [vmem:[#allocation3 + $0xbc] sm:$0x1] }
 0x41b   : > { %v8555_v57 = vsel %vm13484_vm14, %v8550_v2, %v8554_v9  ;;  %v7494_v14 = vshll.u32 %v16438_v48, 16  ;;  %8133 = vmatmul.mubr.bf16.gmra.mrb[220].mxu1 %v10790_v51  ;;  %v8560_v11 = vrot.slane %v8559_v50, 4  ;;  %v7498_v6 = vshrl.u32 %v16438_v48, 16 }
 0x41c   : > { %17351 = vst [vmem:[#allocation34_spill] sm:$0xff] %v16500_v47  ;;  %v16507_v45 = vadd.f32 %v11750_v40, %v11638_v36  ;;  %v7487_v12 = vrot.slane %v7485_v22, 4  ;;  %8140 = vmatprep.mubr.bf16.mxu1 %v10807_v17  ;;  %v7490_v24 = vrot.slane %v7488_v8, 5  ;;  %v7504_v9 = vshll.u32 %v16451_v10, 16 }
 0x41d   : > { %v7496_v26 = vrot.slane %v7494_v14, 5  ;;  %v10776_v55 = vrot.slane %v7593_v62, 9  ;;  %v8565_v29 = vsel %vm13484_vm14, %v8560_v11, %v8564_v32  ;;  %v7500_v7 = vrot.slane %v7498_v6, 4 }
 0x41e   : > { %17352 = vst [vmem:[#allocation35_spill] sm:$0xff] %v16507_v45  ;;  %v7737_v31 = vrot.slane %v16503_v16, 5  ;;  %v7740_v28 = vrot.slane %v16505_v27, 5  ;;  %v16519_v49 = vpop.f32.mrb[128].mxu1  ;;  %v10855_v17 = vcombine.low %v8555_v57, %v8565_v29  ;;  %v7491_v59 = vor.u32 %v7490_v24, %v7487_v12 }
 0x41f   : > { %v16521_v48 = vpop.f32.mrb[192].mxu0  ;;  %v7506_v2 = vrot.slane %v7504_v9, 5  ;;  %v8567_v10 = vshrl.u32 %v16510_v53, 16  ;;  %v16524_v36 = vpop.f32.mrb[129].mxu1  ;;  %v7501_v32 = vor.u32 %v7500_v7, %v7496_v26  ;;  %v8570_v22 = vshll.u32 %v16510_v53, 16 }
 0x420   : > { %v16526_v51 = vpop.f32.mrb[193].mxu0  ;;  %v7738_v50 = vsel %vm13316_vm11, %v10776_v55, %v7737_v31  ;;  %v7739_v40 = vrot.slane %v7737_v31, 4  ;;  %v16531_v62 = vpop.f32.mrb[130].mxu1  ;;  %9054 = vmatprep.mubr.bf16.mxu0 %v10855_v17  ;;  %v7492_v57 = vrot.slane %v7491_v59, 4  ;;  %v8576_v11 = vshll.u32 %v16513_v3, 16 }
 0x421   : > { %v16533_v8 = vpop.f32.mrb[194].mxu0  ;;  %v8569_v14 = vrot.slane %v8567_v10, 4  ;;  %v8580_v12 = vshrl.u32 %v16513_v3, 16  ;;  %v16537_v6 = vpop.f32.mrb[131].mxu1  ;;  %v7502_v9 = vrot.slane %v7501_v32, 4  ;;  %9055 = vmatmul.mubr.bf16.gmra.mrb[32].mxu0 %v10839_v42  ;;  %v8572_v29 = vrot.slane %v8570_v22, 5 }
 0x422   : > { %v16539_v24 = vpop.f32.mrb[195].mxu0  ;;  %v7741_v55 = vsel %vm13316_vm11, %v7739_v40, %v7740_v28  ;;  %v8586_v7 = vshll.u32 %v8251_v30, 16  ;;  %v9132_v31 = vld [vmem:[#allocation3 + $0xb4] sm:$0xe]  ;;  %v7497_v17 = vsel %vm13484_vm14, %v7492_v57, %v7496_v26  ;;  %v8578_v10 = vrot.slane %v8576_v11, 5 }
 0x423   : > { %v10808_v59 = vcombine.low %v7738_v50, %v7741_v55  ;;  %v8582_v52 = vrot.slane %v8580_v12, 4  ;;  %v7507_v45 = vsel %vm13484_vm14, %v7502_v9, %v7506_v2  ;;  %v8573_v47 = vor.u32 %v8572_v29, %v8569_v14  ;;  %v7187_v22 = vld [vmem:[#allocation3 + $0xa8] sm:$0xf]  ;;  %v16583_v12 = vld [vmem:[#allocation3 + $0xbc] sm:$0x1] }
 0x424   : > { %v8588_v38 = vrot.slane %v8586_v7, 5  ;;  %v10840_v32 = vcombine.low %v16510_v53, %v16513_v3  ;;  %v10791_v39 = vcombine.low %v7497_v17, %v7507_v45  ;;  %v10888_v42 = vrot.slane %v9132_v31, 9  ;;  %v16591_v31 = vld [vmem:[#allocation3 + $0xc8] sm:$0x1] }
 0x425   : > { %v8583_v28 = vor.u32 %v8582_v52, %v8578_v10  ;;  %v9260_v40 = vrot.slane %v16513_v3, 5  ;;  %v8574_v46 = vrot.slane %v8573_v47, 4  ;;  %v9263_v33 = vrot.slane %v8251_v30, 5  ;;  %v16577_v30 = vld [vmem:[#allocation3 + $0xc4] sm:$0xf] }
 0x426   : > { %v11641_v26 = vadd.f32 %v16360_v20, %v16354_v41  ;;  %v11753_v50 = vadd.f32 %v16362_v4, %v16356_v18  ;;  %8141 = vmatmul.mubr.bf16.gmra.mrb[224].mxu1 %v10791_v39  ;;  %v11644_v52 = vadd.f32 %v16380_v19, %v16367_v25  ;;  %v11756_v41 = vadd.f32 %v16382_v15, %v16369_v21  ;;  %v7594_v20 = vld [vmem:[#allocation3 + $0xb4] sm:$0xe]  ;;  %v16566_v4 = vld [vmem:[#allocation3 + $0xc0] sm:$0xf] }
 0x427   : > { %v8584_v2 = vrot.slane %v8583_v28, 4  ;;  %v16556_v57 = vsel %vm13316_vm11, %v10888_v42, %v9260_v40  ;;  %v9262_v45 = vrot.slane %v9260_v40, 4  ;;  %8148 = vmatprep.mubr.bf16.mxu1 %v10808_v59  ;;  %v8579_v47 = vsel %vm13484_vm14, %v8574_v46, %v8578_v10  ;;  %v16575_v46 = vld [vmem:[#allocation3 + $0xb8] sm:$0xf] }
 0x428   : > { %v16562_v53 = vadd.f32 %v11753_v50, %v11641_v26  ;;  %v7509_v18 = vshrl.u32 %v7187_v22, 16  ;;  %v7512_v25 = vshll.u32 %v7187_v22, 16  ;;  %v7518_v19 = vshll.u32 %v16503_v16, 16 }
 0x429   : > { %v8589_v39 = vsel %vm13484_vm14, %v8584_v2, %v8588_v38  ;;  %v16572_v3 = vsel %vm13316_vm11, %v9262_v45, %v9263_v33  ;;  %v16581_v15 = vadd.f32 %v11756_v41, %v11644_v52  ;;  %v7522_v29 = vshrl.u32 %v16503_v16, 16 }
 0x42a   : > { %v10856_v14 = vcombine.low %v8579_v47, %v8589_v39  ;;  %v7511_v11 = vrot.slane %v7509_v18, 4  ;;  %v16585_v38 = vpop.f32.mrb[132].mxu1  ;;  %v7514_v9 = vrot.slane %v7512_v25, 5  ;;  %v7520_v55 = vrot.slane %v7518_v19, 5 }
 0x42b   : > { %17353 = vst [vmem:[#allocation36_spill] sm:$0xff] %v16581_v15  ;;  %v16587_v33 = vpop.f32.mrb[196].mxu0  ;;  %v7528_v7 = vshll.u32 %v16505_v27, 16  ;;  %v16593_v17 = vpop.f32.mrb[133].mxu1  ;;  %v10777_v10 = vrot.slane %v7594_v20, 9  ;;  %v7744_v28 = vrot.slane %v16575_v46, 5 }
 0x42c   : > { %v16595_v59 = vpop.f32.mrb[197].mxu0  ;;  %9062 = vmatprep.mubr.bf16.mxu0 %v10856_v14  ;;  %v8591_v42 = vshrl.u32 %v16566_v4, 16  ;;  %v16599_v40 = vpop.f32.mrb[134].mxu1  ;;  %v7515_v26 = vor.u32 %v7514_v9, %v7511_v11  ;;  %v7524_v16 = vrot.slane %v7522_v29, 4  ;;  %v7747_v27 = vrot.slane %v16583_v12, 5 }
 0x42d   : > { %v16601_v22 = vpop.f32.mrb[198].mxu0  ;;  %9063 = vmatmul.mubr.bf16.gmra.mrb[36].mxu0 %v10840_v32  ;;  %v8594_v50 = vshll.u32 %v16566_v4, 16  ;;  %v16605_v2 = vpop.f32.mrb[135].mxu1  ;;  %v7530_v52 = vrot.slane %v7528_v7, 5  ;;  %v7746_v47 = vrot.slane %v7744_v28, 4  ;;  %v8600_v18 = vshll.u32 %v16577_v30, 16 }
 0x42e   : > { %v16607_v45 = vpop.f32.mrb[199].mxu0  ;;  %v8593_v41 = vrot.slane %v8591_v42, 4  ;;  %v7516_v20 = vrot.slane %v7515_v26, 4  ;;  %v7525_v39 = vor.u32 %v7524_v16, %v7520_v55  ;;  %v8604_v19 = vshrl.u32 %v16577_v30, 16  ;;  %v7190_v16 = vld [vmem:[#allocation3 + $0xb4] sm:$0xf] }
 0x42f   : > { %v8596_v25 = vrot.slane %v8594_v50, 5  ;;  %v7745_v14 = vsel %vm13316_vm11, %v10777_v10, %v7744_v28  ;;  %v7748_v32 = vsel %vm13316_vm11, %v7746_v47, %v7747_v27  ;;  %v8602_v11 = vrot.slane %v8600_v18, 5 }
 0x430   : > { %v8610_v9 = vshll.u32 %v16591_v31, 16  ;;  %v7521_v29 = vsel %vm13484_vm14, %v7516_v20, %v7520_v55  ;;  %v7526_v7 = vrot.slane %v7525_v39, 4  ;;  %v10809_v50 = vcombine.low %v7745_v14, %v7748_v32  ;;  %v16634_v39 = vld [vmem:[#allocation3 + $0xc4] sm:$0xf]  ;;  %v7595_v14 = vld [vmem:[#allocation3 + $0xc0] sm:$0xe] }
 0x431   : > { %v8597_v42 = vor.u32 %v8596_v25, %v8593_v41  ;;  %v8606_v21 = vrot.slane %v8604_v19, 4  ;;  %v11647_v10 = vadd.f32 %v16453_v23, %v16440_v13  ;;  %v11759_v28 = vadd.f32 %v16422_v37, %v16418_v35 }
 0x432   : > { %v16624_v27 = vpop.f32.mrb[136].mxu1  ;;  %v7531_v55 = vsel %vm13484_vm14, %v7526_v7, %v7530_v52  ;;  %v11650_v18 = vadd.f32 %v16468_v54, %v16463_v43  ;;  %v11762_v20 = vadd.f32 %v16442_v0, %v16432_v44  ;;  %v7533_v19 = vshrl.u32 %v7190_v16, 16 }
 0x433   : > { %v16626_v47 = vpop.f32.mrb[200].mxu0  ;;  %v8598_v41 = vrot.slane %v8597_v42, 4  ;;  %v16636_v13 = vpop.f32.mrb[137].mxu1  ;;  %v10792_v35 = vcombine.low %v7521_v29, %v7531_v55  ;;  %v8607_v37 = vor.u32 %v8606_v21, %v8602_v11  ;;  %v16640_v25 = vadd.f32 %v11759_v28, %v11647_v10  ;;  %v16655_v55 = vld [vmem:[#allocation3 + $0xc8] sm:$0x1] }
 0x434   : > { %v16638_v23 = vpop.f32.mrb[201].mxu0  ;;  %v16642_v52 = vpop.f32.mrb[138].mxu1  ;;  %v8612_v43 = vrot.slane %v8610_v9, 5  ;;  %v16646_v54 = vadd.f32 %v11762_v20, %v11650_v18  ;;  %v7536_v44 = vshll.u32 %v7190_v16, 16  ;;  %v7542_v0 = vshll.u32 %v16575_v46, 16 }
 0x435   : > { %17354 = vst [vmem:[#allocation37_spill] sm:$0xff] %v16640_v25  ;;  %v16644_v32 = vpop.f32.mrb[202].mxu0  ;;  %v16649_v7 = vpop.f32.mrb[139].mxu1  ;;  %8149 = vmatmul.mubr.bf16.gmra.mrb[228].mxu1 %v10792_v35  ;;  %v8608_v21 = vrot.slane %v8607_v37, 4  ;;  %v7535_v29 = vrot.slane %v7533_v19, 4  ;;  %v7546_v10 = vshrl.u32 %v16575_v46, 16  ;;  %v8603_v9 = vsel %vm13484_vm14, %v8598_v41, %v8602_v11 }
 0x436   : > { %17355 = vst [vmem:[#allocation38_spill] sm:$0xff] %v16646_v54  ;;  %v16651_v42 = vpop.f32.mrb[203].mxu0  ;;  %v7552_v28 = vshll.u32 %v16583_v12, 16  ;;  %8156 = vmatprep.mubr.bf16.mxu1 %v10809_v50  ;;  %v7538_v16 = vrot.slane %v7536_v44, 5  ;;  %v7544_v18 = vrot.slane %v7542_v0, 5  ;;  %v7751_v20 = vrot.slane %v16634_v39, 5 }
 0x437   : > { %v8613_v26 = vsel %vm13484_vm14, %v8608_v21, %v8612_v43  ;;  %v7548_v35 = vrot.slane %v7546_v10, 4  ;;  %v10778_v19 = vrot.slane %v7595_v14, 9  ;;  %v7193_v54 = vld [vmem:[#allocation3 + $0xc0] sm:$0xf]  ;;  %v7754_v15 = vrot.slane %v16655_v55, 5 }
 0x438   : > { %v7554_v37 = vrot.slane %v7552_v28, 5  ;;  %v10857_v46 = vcombine.low %v8603_v9, %v8613_v26  ;;  %v7539_v25 = vor.u32 %v7538_v16, %v7535_v29  ;;  %v7753_v12 = vrot.slane %v7751_v20, 4  ;;  %v574_v28 = vld [vmem:[#allocation3 + $0xd4] sm:$0x1] }
 0x439   : > { %v7549_v50 = vor.u32 %v7548_v35, %v7544_v18  ;;  %v11653_v11 = vadd.f32 %v16524_v36, %v16519_v49  ;;  %v11765_v41 = vadd.f32 %v16526_v51, %v16521_v48  ;;  %v11656_v44 = vadd.f32 %v16537_v6, %v16531_v62  ;;  %v520_v49 = vld [vmem:[#allocation3 + $0xcc] sm:$0x1]  ;;  %v16697_v35 = vld [vmem:[#allocation3 + $0xd0] sm:$0xf] }
 0x43a   : > { %v16669_v43 = vpop.f32.mrb[140].mxu1  ;;  %9070 = vmatprep.mubr.bf16.mxu0 %v10857_v46  ;;  %v7540_v26 = vrot.slane %v7539_v25, 4  ;;  %v7752_v14 = vsel %vm13316_vm11, %v10778_v19, %v7751_v20  ;;  %v11768_v21 = vadd.f32 %v16539_v24, %v16533_v8  ;;  %v7557_v29 = vshrl.u32 %v7193_v54, 16 }
 0x43b   : > { %v16671_v0 = vpop.f32.mrb[204].mxu0  ;;  %v16677_v36 = vpop.f32.mrb[141].mxu1  ;;  %v7550_v51 = vrot.slane %v7549_v50, 4  ;;  %v7755_v62 = vsel %vm13316_vm11, %v7753_v12, %v7754_v15  ;;  %v17356_v6 = vcombine.low %v16566_v4, %v16577_v30  ;;  %v16686_v25 = vadd.f32 %v11765_v41, %v11653_v11 }
 0x43c   : > { %v16679_v48 = vpop.f32.mrb[205].mxu0  ;;  %v7560_v10 = vshll.u32 %v7193_v54, 16  ;;  %v16688_v9 = vpop.f32.mrb[142].mxu1  ;;  %v7545_v24 = vsel %vm13484_vm14, %v7540_v26, %v7544_v18  ;;  %v16694_v16 = vadd.f32 %v11768_v21, %v11656_v44  ;;  %v7559_v20 = vrot.slane %v7557_v29, 4 }
 0x43d   : > { %9071 = vmatmul.mubr.bf16.gmra.mrb[40].mxu0 %v17356_v6  ;;  %17357 = vst [vmem:[#allocation39_spill] sm:$0xff] %v16686_v25  ;;  %v16690_v8 = vpop.f32.mrb[206].mxu0  ;;  %v7566_v15 = vshll.u32 %v16634_v39, 16  ;;  %v16699_v4 = vpop.f32.mrb[143].mxu1  ;;  %v7555_v54 = vsel %vm13484_vm14, %v7550_v51, %v7554_v37  ;;  %v7570_v12 = vshrl.u32 %v16634_v39, 16  ;;  %v7576_v50 = vshll.u32 %v16655_v55, 16 }
 0x43e   : > { %17358 = vst [vmem:[#allocation22_spill] sm:$0xff] %v16694_v16  ;;  %v16701_v19 = vpop.f32.mrb[207].mxu0  ;;  %v7562_v46 = vrot.slane %v7560_v10, 5  ;;  %v10793_v18 = vcombine.low %v7545_v24, %v7555_v54  ;;  %v521_v41 = vsel %vm13263_vm2, 0, %v520_v49  ;;  %v575_v44 = vsel %vm13268_vm4, 0, %v574_v28 }
 0x43f   : > { %v7568_v11 = vrot.slane %v7566_v15, 5  ;;  %v10810_v26 = vcombine.low %v7752_v14, %v7755_v62  ;;  %v7572_v29 = vrot.slane %v7570_v12, 4  ;;  %522 = vst [vmem:[#allocation3 + $0xcc] sm:$0x1] %v521_v41  ;;  %576 = vst [vmem:[#allocation3 + $0xd4] sm:$0x1] %v575_v44  ;;  %v11671_v60 = vadd.f32 %v16677_v36, %v16669_v43 }
 0x440   : > { %v7563_v21 = vor.u32 %v7562_v46, %v7559_v20  ;;  %v8624_v37 = vshll.u32 %v16697_v35, 16  ;;  %8157 = vmatmul.mubr.bf16.gmra.mrb[232].mxu1 %v10793_v18  ;;  %v8628_v39 = vshrl.u32 %v16697_v35, 16  ;;  %v9119_v51 = vld [vmem:[#allocation3 + $0x18] sm:$0xe]  ;;  %v9169_v49 = vrot.slane %v12776_v34, 5 }
 0x441   : > { %8164 = vmatprep.mubr.bf16.mxu1 %v10810_v26  ;;  %v7573_v6 = vor.u32 %v7572_v29, %v7568_v11  ;;  %v7578_v62 = vrot.slane %v7576_v50, 5  ;;  %v10875_v54 = vrot.slane %v9119_v51, 9  ;;  %v12777_v12 = vld [vmem:[#allocation3 + $0x20] sm:$0x1]  ;;  %v11771_v50 = vadd.f32 %v16595_v59, %v16587_v33  ;;  %v9120_v33 = vld [vmem:[#allocation3 + $0x24] sm:$0xe] }
 0x442   : > { %v7564_v55 = vrot.slane %v7563_v21, 4  ;;  %v16713_v10 = vrot.slane %v8624_v37, 5  ;;  %v16715_v56 = vpop.f32.mrb[144].mxu1  ;;  %v8630_v28 = vrot.slane %v8628_v39, 4  ;;  %v9171_v46 = vrot.slane %v9169_v49, 4 }
 0x443   : > { %v16717_v14 = vpop.f32.mrb[208].mxu0  ;;  %v16719_v24 = vpop.f32.mrb[145].mxu1  ;;  %v7574_v15 = vrot.slane %v7573_v6, 4  ;;  %v9172_v18 = vrot.slane %v12777_v12, 5  ;;  %v11659_v21 = vadd.f32 %v16593_v17, %v16585_v38  ;;  %v11662_v29 = vadd.f32 %v16605_v2, %v16599_v40 }
 0x444   : > { %v16721_v20 = vpop.f32.mrb[209].mxu0  ;;  %v16723_v41 = vpop.f32.mrb[146].mxu1  ;;  %v8631_v26 = vor.u32 %v8630_v28, %v16713_v10  ;;  %v7569_v51 = vsel %vm13484_vm14, %v7564_v55, %v7568_v11  ;;  %v11774_v38 = vadd.f32 %v16607_v45, %v16601_v22  ;;  %v9170_v28 = vsel %vm13316_vm11, %v10875_v54, %v9169_v49  ;;  %v9121_v22 = vld [vmem:[#allocation3 + $0x30] sm:$0xe]  ;;  %v12779_v49 = vld [vmem:[#allocation3 + $0x34] sm:$0xf] }
 0x445   : > { %v16725_v44 = vpop.f32.mrb[210].mxu0  ;;  %v16734_v37 = vpop.f32.mrb[147].mxu1  ;;  %v7579_v6 = vsel %vm13484_vm14, %v7574_v15, %v7578_v62  ;;  %v9173_v34 = vsel %vm13316_vm11, %v9171_v46, %v9172_v18  ;;  %v16752_v11 = vadd.f32 %v11771_v50, %v11659_v21  ;;  %v10876_v12 = vrot.slane %v9120_v33, 9  ;;  %v12778_v18 = vld [vmem:[#allocation3 + $0x28] sm:$0xf] }
 0x446   : > { %v16736_v39 = vpop.f32.mrb[211].mxu0  ;;  %v10794_v17 = vcombine.low %v7569_v51, %v7579_v6  ;;  %v16746_v59 = vld [vmem:[#allocation3 + $0xcc] sm:$0xf]  ;;  %v16748_v40 = vld [vmem:[#allocation3 + $0xd4] sm:$0x1]  ;;  %v8632_v2 = vrot.slane %v8631_v26, 4  ;;  %v10891_v46 = vcombine.low %v9170_v28, %v9173_v34  ;;  %v16757_v45 = vadd.f32 %v11774_v38, %v11662_v29 }
 0x447   : > { %17359 = vst [vmem:[#allocation23_spill] sm:$0xff] %v16752_v11  ;;  %v8615_v55 = vshrl.u32 %v16746_v59, 16  ;;  %v8618_v62 = vshll.u32 %v16746_v59, 16  ;;  %v8634_v15 = vshll.u32 %v16748_v40, 16  ;;  %v9176_v51 = vrot.slane %v12778_v18, 5 }
 0x448   : > { %8165 = vmatmul.mubr.bf16.gmra.mrb[236].mxu1 %v10794_v17  ;;  %v9183_v54 = vrot.slane %v12779_v49, 5  ;;  %v12780_v11 = vld [vmem:[#allocation3 + $0x2c] sm:$0x1]  ;;  %v10877_v28 = vrot.slane %v9121_v22, 9  ;;  %v11665_v49 = vadd.f32 %v16636_v13, %v16624_v27 }
 0x449   : > { %v8617_v26 = vrot.slane %v8615_v55, 4  ;;  %v8620_v6 = vrot.slane %v8618_v62, 5  ;;  %v8636_v16 = vrot.slane %v8634_v15, 5  ;;  %12171 = vmatprep.mubr.bf16.mxu1 %v10891_v46  ;;  %v9179_v25 = vrot.slane %v12780_v11, 5  ;;  %v12781_v62 = vld [vmem:[#allocation3 + $0x38] sm:$0x1] }
 0x44a   : > { %v16759_v21 = vpop.f32.mrb[148].mxu1  ;;  %v9178_v34 = vrot.slane %v9176_v51, 4  ;;  %v9177_v55 = vsel %vm13316_vm11, %v10876_v12, %v9176_v51  ;;  %v9186_v15 = vrot.slane %v12781_v62, 5  ;;  %v9185_v22 = vrot.slane %v9183_v54, 4  ;;  %v12718_v62 = vld [vmem:[#allocation10 + $0x8] sm:$0xff]  }
 0x44b   : > { %v16761_v50 = vpop.f32.mrb[212].mxu0  ;;  %v16763_v17 = vpop.f32.mrb[149].mxu1  ;;  %v8621_v38 = vor.u32 %v8620_v6, %v8617_v26  ;;  %v8637_v33 = vsel %vm13484_vm14, %v8632_v2, %v8636_v16  ;;  %v11777_v26 = vadd.f32 %v16638_v23, %v16626_v47  ;;  %v9184_v51 = vsel %vm13316_vm11, %v10877_v28, %v9183_v54  ;;  %v12782_v47 = vld [vmem:[#allocation3 + $0x40] sm:$0xf] }
 0x44c   : > { %v16765_v29 = vpop.f32.mrb[213].mxu0  ;;  %v16771_v46 = vpop.f32.mrb[150].mxu1  ;;  %v9180_v11 = vsel %vm13316_vm11, %v9178_v34, %v9179_v25  ;;  %v11668_v6 = vadd.f32 %v16649_v7, %v16642_v52  ;;  %v11780_v25 = vadd.f32 %v16651_v42, %v16644_v32  ;;  %v9187_v27 = vsel %vm13316_vm11, %v9185_v22, %v9186_v15  ;;  %v9122_v32 = vld [vmem:[#allocation3 + $0x3c] sm:$0xe]  ;;  %v9123_v42 = vld [vmem:[#allocation3 + $0x48] sm:$0xe] }
 0x44d   : > { %v16773_v18 = vpop.f32.mrb[214].mxu0  ;;  %v16781_v16 = vpop.f32.mrb[151].mxu1  ;;  %v8622_v12 = vrot.slane %v8621_v38, 4  ;;  %v10892_v34 = vcombine.low %v9177_v55, %v9180_v11  ;;  %v16793_v13 = vadd.f32 %v11777_v26, %v11665_v49  ;;  %v9190_v23 = vrot.slane %v12782_v47, 5  ;;  %v12783_v15 = vld [vmem:[#allocation10] sm:$0xff]  }
 0x44e   : > { %v16783_v2 = vpop.f32.mrb[215].mxu0  ;;  %v10842_v54 = vcombine.low %v16746_v59, %v16697_v35  ;;  %v10893_v52 = vcombine.low %v9184_v51, %v9187_v27  ;;  %v16800_v7 = vadd.f32 %v11780_v25, %v11668_v6  ;;  %v12784_v11 = vld [vmem:[#allocation3 + $0x44] sm:$0x1]  ;;  %v12785_v49 = vld [vmem:[#allocation3 + $0x4c] sm:$0xf]  ;;  %v10879_v51 = vrot.slane %v9123_v42, 9 }
 0x44f   : > { %v8627_v38 = vsel %vm13484_vm14, %v8622_v12, %v16713_v10  ;;  %v9192_v55 = vrot.slane %v9190_v23, 4  ;;  %v9193_v22 = vrot.slane %v12784_v11, 5  ;;  %v9197_v26 = vrot.slane %v12785_v49, 5 }
 0x450   : > { %v10858_v28 = vcombine.low %v8627_v38, %v8637_v33  ;;  %12172 = vmatmul.mubr.bf16.vlgmr.msra.gmra.mrb[240].mxu1 %v10892_v34  ;;  %v11783_v10 = vadd.f32 %v16679_v48, %v16671_v0  ;;  %v10878_v33 = vrot.slane %v9122_v32, 9  ;;  %v11674_v6 = vadd.f32 %v16699_v4, %v16688_v9  ;;  %v12719_v34 = vld [vmem:[#allocation10 + $0x10] sm:$0xff]   ;;  %v12786_v48 = vld [vmem:[#allocation3 + $0x50] sm:$0x1] }
 0x451   : > { %12175 = vmatprep.mubr.bf16.mxu1 %v10893_v52  ;;  %12204 = vmatpush3.bf16.msra.mxu1 %v12783_v15  ;;  %v11786_v25 = vadd.f32 %v16701_v19, %v16690_v8  ;;  %v9194_v0 = vsel %vm13316_vm11, %v9192_v55, %v9193_v22  ;;  %v9199_v36 = vrot.slane %v9197_v26, 4  ;;  %v9200_v47 = vrot.slane %v12786_v48, 5  ;;  %v12787_v19 = vld [vmem:[#allocation3 + $0x58] sm:$0xf]  ;;  %v12788_v15 = vld [vmem:[#allocation3 + $0x64] sm:$0xf] }
 0x452   : > { %v16806_v59 = vpop.f32.mrb[152].mxu1  ;;  %9078 = vmatprep.mubr.bf16.mxu0 %v10858_v28  ;;  %12205 = vmatprep.subr.bf16.mxu1 %v12718_v62  ;;  %v16820_v38 = vadd.f32 %v11783_v10, %v11671_v60  ;;  %v9191_v8 = vsel %vm13316_vm11, %v10878_v33, %v9190_v23  ;;  %v9204_v32 = vrot.slane %v12787_v19, 5  ;;  %v9198_v28 = vsel %vm13316_vm11, %v10879_v51, %v9197_v26  ;;  %v12720_v10 = vld [vmem:[#allocation10 + $0x18] sm:$0xff]  }
 0x453   : > { %v16808_v12 = vpop.f32.mrb[216].mxu0  ;;  %v16814_v27 = vpop.f32.mrb[153].mxu1  ;;  %9079 = vmatmul.mubr.bf16.gmra.mrb[44].mxu0 %v10842_v54  ;;  %v16828_v4 = vadd.f32 %v11786_v25, %v11674_v6  ;;  %v9201_v55 = vsel %vm13316_vm11, %v9199_v36, %v9200_v47  ;;  %v9211_v11 = vrot.slane %v12788_v15, 5  ;;  %v11677_v23 = vadd.f32 %v16719_v24, %v16715_v56  ;;  %v9124_v33 = vld [vmem:[#allocation3 + $0x54] sm:$0xe] }
 0x454   : > { %v16816_v43 = vpop.f32.mrb[217].mxu0  ;;  %v16822_v52 = vpop.f32.mrb[154].mxu1  ;;  %v10894_v22 = vcombine.low %v9191_v8, %v9194_v0  ;;  %v10895_v49 = vcombine.low %v9198_v28, %v9201_v55  ;;  %v11789_v60 = vadd.f32 %v16721_v20, %v16717_v14  ;;  %v9206_v6 = vrot.slane %v9204_v32, 4  ;;  %v9125_v25 = vld [vmem:[#allocation3 + $0x60] sm:$0xe] }
 0x455   : > { %v16824_v9 = vpop.f32.mrb[218].mxu0  ;;  %v16830_v54 = vpop.f32.mrb[155].mxu1  ;;  %12206 = vmatpush3.bf16.msra.mxu1 %v12718_v62  ;;  %v9213_v26 = vrot.slane %v9211_v11, 4  ;;  %v11680_v51 = vadd.f32 %v16734_v37, %v16723_v41  ;;  %v11792_v62 = vadd.f32 %v16736_v39, %v16725_v44  ;;  %v12789_v56 = vld [vmem:[#allocation3 + $0x70] sm:$0xf]  ;;  %v10880_v41 = vrot.slane %v9124_v33, 9 }
 0x456   : > { %v16832_v42 = vpop.f32.mrb[219].mxu0  ;;  %12207 = vmatprep.subr.bf16.mxu1 %v12719_v34  ;;  %v16846_v36 = vadd.f32 %v11789_v60, %v11677_v23  ;;  %v9218_v24 = vrot.slane %v12789_v56, 5  ;;  %v12790_v0 = vld [vmem:[#allocation3 + $0x5c] sm:$0x1]  ;;  %v12791_v14 = vld [vmem:[#allocation3 + $0x68] sm:$0x1] }
 0x457   : > { %v9207_v48 = vrot.slane %v12790_v0, 5  ;;  %v9214_v20 = vrot.slane %v12791_v14, 5  ;;  %v16848_v47 = vadd.f32 %v11792_v62, %v11680_v51  ;;  %v9126_v8 = vld [vmem:[#allocation3 + $0x6c] sm:$0xe]  ;;  %v10881_v37 = vrot.slane %v9125_v25, 9  ;;  %v12721_v44 = vld [vmem:[#allocation10 + $0x20] sm:$0xff]  }
 0x458   : > { %12176 = vmatmul.mubr.bf16.gmra.mrb[244].mxu1 %v10894_v22  ;;  %v11795_v22 = vadd.f32 %v16765_v29, %v16761_v50  ;;  %v9220_v33 = vrot.slane %v9218_v24, 4  ;;  %v12792_v25 = vld [vmem:[#allocation3 + $0x7c] sm:$0xf]  ;;  %v11686_v62 = vadd.f32 %v16781_v16, %v16771_v46  ;;  %v10882_v50 = vrot.slane %v9126_v8, 9  ;;  %v9127_v8 = vld [vmem:[#allocation3 + $0x78] sm:$0xe] }
 0x459   : > { %12179 = vmatprep.mubr.bf16.mxu1 %v10895_v49  ;;  %12208 = vmatpush3.bf16.msra.mxu1 %v12719_v34  ;;  %v9208_v15 = vsel %vm13316_vm11, %v9206_v6, %v9207_v48  ;;  %v9215_v23 = vsel %vm13316_vm11, %v9213_v26, %v9214_v20  ;;  %v11683_v34 = vadd.f32 %v16763_v17, %v16759_v21  ;;  %v9225_v51 = vrot.slane %v12792_v25, 5  ;;  %v12793_v48 = vld [vmem:[#allocation3 + $0x74] sm:$0x1] }
 0x45a   : > { %v11693_v19 = vpop.f32.mrb[156].mxu1  ;;  %12209 = vmatprep.subr.bf16.mxu1 %v12720_v10  ;;  %v11798_v6 = vadd.f32 %v16783_v2, %v16773_v18  ;;  %v9205_v26 = vsel %vm13316_vm11, %v10880_v41, %v9204_v32  ;;  %v9212_v21 = vsel %vm13316_vm11, %v10881_v37, %v9211_v11  ;;  %v9221_v14 = vrot.slane %v12793_v48, 5  ;;  %v12722_v18 = vld [vmem:[#allocation10 + $0x28] sm:$0xff]  }
 0x45b   : > { %v11805_v28 = vpop.f32.mrb[220].mxu0  ;;  %v11694_v39 = vpop.f32.mrb[157].mxu1  ;;  %v16866_v17 = vadd.f32 %v11795_v22, %v11683_v34  ;;  %v10896_v29 = vcombine.low %v9205_v26, %v9208_v15  ;;  %v11689_v46 = vadd.f32 %v16814_v27, %v16806_v59  ;;  %v10897_v16 = vcombine.low %v9212_v21, %v9215_v23  ;;  %v12723_v23 = vld [vmem:[#allocation10 + $0x30] sm:$0xff]   ;;  %v12795_v21 = vld [vmem:[#allocation3 + $0x94] sm:$0xf] }
 0x45c   : > { %v11806_v55 = vpop.f32.mrb[221].mxu0  ;;  %v11696_v49 = vpop.f32.mrb[158].mxu1  ;;  %v16868_v20 = vadd.f32 %v11798_v6, %v11686_v62  ;;  %v11801_v2 = vadd.f32 %v16816_v43, %v16808_v12  ;;  %v11692_v32 = vadd.f32 %v16830_v54, %v16822_v52  ;;  %v11804_v11 = vadd.f32 %v16832_v42, %v16824_v9  ;;  %v12794_v54 = vld [vmem:[#allocation3 + $0x80] sm:$0x1] }
 0x45d   : > { %v11808_v60 = vpop.f32.mrb[222].mxu0  ;;  %v11697_v56 = vpop.f32.mrb[159].mxu1  ;;  %12210 = vmatpush3.bf16.msra.mxu1 %v12720_v10  ;;  %v9222_v10 = vsel %vm13316_vm11, %v9220_v33, %v9221_v14  ;;  %v9227_v41 = vrot.slane %v9225_v51, 4  ;;  %v9219_v59 = vsel %vm13316_vm11, %v10882_v50, %v9218_v24  ;;  %v9228_v37 = vrot.slane %v12794_v54, 5  ;;  %v9133_v24 = vld [vmem:[#allocation3 + $0xc0] sm:$0xe] }
 0x45e   : > { %v11809_v0 = vpop.f32.mrb[223].mxu0  ;;  %12211 = vmatprep.subr.bf16.mxu1 %v12721_v44  ;;  %v16882_v27 = vadd.f32 %v11801_v2, %v11689_v46  ;;  %v16884_v12 = vadd.f32 %v11804_v11, %v11692_v32  ;;  %v11695_v9 = vadd.f32 %v11694_v39, %v11693_v19  ;;  %v11807_v42 = vadd.f32 %v11806_v55, %v11805_v28 }
 0x45f   : > { %v11698_v15 = vadd.f32 %v11697_v56, %v11696_v49  ;;  %v10898_v33 = vcombine.low %v9219_v59, %v9222_v10  ;;  %v10883_v25 = vrot.slane %v9127_v8, 9  ;;  %v11810_v62 = vadd.f32 %v11809_v0, %v11808_v60  ;;  %v9129_v10 = vld [vmem:[#allocation3 + $0x90] sm:$0xe] }
 0x460   : > { %12180 = vmatmul.mubr.bf16.gmra.mrb[248].mxu1 %v10896_v29  ;;  %v9229_v26 = vsel %vm13316_vm11, %v9227_v41, %v9228_v37  ;;  %v9239_v50 = vrot.slane %v12795_v21, 5  ;;  %v16888_v29 = vadd.f32 %v11807_v42, %v11695_v9  ;;  %v9267_v19 = vrot.slane %v16577_v30, 5 }
 0x461   : > { %12183 = vmatprep.mubr.bf16.mxu1 %v10897_v16  ;;  %12212 = vmatpush3.bf16.msra.mxu1 %v12721_v44  ;;  %v9226_v55 = vsel %vm13316_vm11, %v10883_v25, %v9225_v51  ;;  %v16893_v49 = vadd.f32 %v11810_v62, %v11698_v15  ;;  %v10889_v0 = vrot.slane %v9133_v24, 9  ;;  %v9270_v14 = vrot.slane %v16591_v31, 5  ;;  %v12724_v16 = vld [vmem:[#allocation10 + $0x38] sm:$0xff]  }
 0x462   : > { %v11699_v43 = vpop.f32.mrb[160].mxu1  ;;  %12213 = vmatprep.subr.bf16.mxu1 %v12722_v18  ;;  %v9269_v48 = vrot.slane %v9267_v19, 4  ;;  %v10899_v2 = vcombine.low %v9226_v55, %v9229_v26  ;;  %v9241_v11 = vrot.slane %v9239_v50, 4  ;;  %v9253_v25 = vrot.slane %v16466_v58, 5  ;;  %v9131_v58 = vld [vmem:[#allocation3 + $0xa8] sm:$0xe] }
 0x463   : > { %v11811_v52 = vpop.f32.mrb[224].mxu0  ;;  %v11700_v34 = vpop.f32.mrb[161].mxu1  ;;  %v16900_v51 = vsel %vm13316_vm11, %v10889_v0, %v9267_v19 }
 0x464   : > { %v11812_v22 = vpop.f32.mrb[225].mxu0  ;;  %v11702_v44 = vpop.f32.mrb[162].mxu1  ;;  %v11701_v60 = vadd.f32 %v11700_v34, %v11699_v43  ;;  %v12796_v43 = vld [vmem:[#allocation3 + $0x98] sm:$0x1] }
 0x465   : > { %v11814_v6 = vpop.f32.mrb[226].mxu0  ;;  %v11703_v28 = vpop.f32.mrb[163].mxu1  ;;  %12214 = vmatpush3.bf16.msra.mxu1 %v12722_v18  ;;  %v11813_v56 = vadd.f32 %v11812_v22, %v11811_v52  ;;  %v16904_v18 = vsel %vm13316_vm11, %v9269_v48, %v9270_v14  ;;  %v9242_v52 = vrot.slane %v12796_v43, 5  ;;  %v10885_v22 = vrot.slane %v9129_v10, 9 }
 0x466   : > { %v11815_v39 = vpop.f32.mrb[227].mxu0  ;;  %12215 = vmatprep.subr.bf16.mxu1 %v12723_v23  ;;  %v11704_v46 = vadd.f32 %v11703_v28, %v11702_v44  ;;  %v10905_v31 = vcombine.low %v16900_v51, %v16904_v18  ;;  %v17360_v28 = vcombine.low %v16334_v1, %v16340_v63  ;;  %v17366_v51 = vld [vmem:[#allocation33_spill] sm:$0xff] }
 0x467   : > { %v16896_v32 = vadd.f32 %v11813_v56, %v11701_v60  ;;  %v11816_v30 = vadd.f32 %v11815_v39, %v11814_v6  ;;  %v9240_v26 = vsel %vm13316_vm11, %v10885_v22, %v9239_v50  ;;  %v9255_v39 = vrot.slane %v9253_v25, 4 }
 0x468   : > { %12184 = vmatmul.mubr.bf16.gmra.mrb[252].mxu1 %v10898_v33  ;;  %v9243_v33 = vsel %vm13316_vm11, %v9241_v11, %v9242_v52  ;;  %v9256_v56 = vrot.slane %v16473_v5, 5  ;;  %v9274_v52 = vrot.slane %v16697_v35, 5  ;;  %v9277_v35 = vrot.slane %v16748_v40, 5 }
 0x469   : > { %12187 = vmatprep.mubr.bf16.mxu1 %v10899_v2  ;;  %12216 = vmatpush3.bf16.msra.mxu1 %v12723_v23  ;;  %v16908_v8 = vadd.f32 %v11816_v30, %v11704_v46  ;;  %v10901_v21 = vcombine.low %v9240_v26, %v9243_v33  ;;  %v10887_v2 = vrot.slane %v9131_v58, 9 }
 0x46a   : > { %v11705_v41 = vpop.f32.mrb[164].mxu1  ;;  %12217 = vmatprep.subr.bf16.mxu1 %v12724_v16  ;;  %v9257_v30 = vsel %vm13316_vm11, %v9255_v39, %v9256_v56  ;;  %v9276_v26 = vrot.slane %v9274_v52, 4  ;;  %v17364_v56 = vcombine.low %v16556_v57, %v16572_v3 }
 0x46b   : > { %v11817_v59 = vpop.f32.mrb[228].mxu0  ;;  %v11706_v54 = vpop.f32.mrb[165].mxu1 }
 0x46c   : > { %v11818_v37 = vpop.f32.mrb[229].mxu0  ;;  %v11707_v9 = vadd.f32 %v11706_v54, %v11705_v41  ;;  %v11708_v42 = vpop.f32.mrb[166].mxu1  ;;  %v17361_v54 = vld [vmem:[#allocation30_spill] sm:$0xff] }
 0x46d   : > { %v11819_v15 = vadd.f32 %v11818_v37, %v11817_v59  ;;  %v11820_v34 = vpop.f32.mrb[230].mxu0  ;;  %v11709_v23 = vpop.f32.mrb[167].mxu1  ;;  %12218 = vmatpush3.bf16.msra.mxu1 %v12724_v16  ;;  %v9254_v59 = vsel %vm13316_vm11, %v10887_v2, %v9253_v25  ;;  %v17362_v37 = vld [vmem:[#allocation31_spill] sm:$0xff] }
 0x46e   : > { %v11821_v62 = vpop.f32.mrb[231].mxu0  ;;  %v11710_v44 = vadd.f32 %v11709_v23, %v11708_v42  ;;  %v10903_v5 = vcombine.low %v9254_v59, %v9257_v30  ;;  %v9134_v42 = vld [vmem:[#allocation3 + $0xcc] sm:$0xe] }
 0x46f   : > { %v16913_v24 = vadd.f32 %v11819_v15, %v11707_v9  ;;  %v11822_v6 = vadd.f32 %v11821_v62, %v11820_v34  ;;  %v17363_v9 = vcombine.low %v17361_v54, %v17362_v37  ;;  %v10890_v25 = vrot.slane %v9134_v42, 9 }
 0x470   : > { %12188 = vmatmul.mubr.bf16.gmra.mrb[0].mxu1 %v17360_v28 }
 0x471   : > { %v16917_v19 = vadd.f32 %v11822_v6, %v11710_v44  ;;  %12191 = vmatprep.mubr.bf16.mxu1 %v10901_v21 }
 0x472   : > { %v11711_v55 = vpop.f32.mrb[168].mxu1 }
 0x473   : > { %v11823_v60 = vpop.f32.mrb[232].mxu0  ;;  %v11712_v0 = vpop.f32.mrb[169].mxu1 }
 0x474   : > { %v11824_v48 = vpop.f32.mrb[233].mxu0  ;;  %v11713_v14 = vadd.f32 %v11712_v0, %v11711_v55  ;;  %v11714_v46 = vpop.f32.mrb[170].mxu1  ;;  %v9275_v0 = vsel %vm13316_vm11, %v10890_v25, %v9274_v52  ;;  %v17367_v25 = vld [vmem:[#allocation34_spill] sm:$0xff] }
 0x475   : > { %v11825_v16 = vadd.f32 %v11824_v48, %v11823_v60  ;;  %v11826_v50 = vpop.f32.mrb[234].mxu0  ;;  %v11715_v11 = vpop.f32.mrb[171].mxu1  ;;  %v9278_v48 = vsel %vm13316_vm11, %v9276_v26, %v9277_v35 }
 0x476   : > { %v11827_v1 = vpop.f32.mrb[235].mxu0  ;;  %v11716_v10 = vadd.f32 %v11715_v11, %v11714_v46  ;;  %v10906_v3 = vcombine.low %v9275_v0, %v9278_v48 }
 0x477   : > { %v16925_v63 = vadd.f32 %v11825_v16, %v11713_v14  ;;  %v11828_v41 = vadd.f32 %v11827_v1, %v11826_v50 }
 0x478   : > { %12192 = vmatmul.mubr.bf16.gmra.mrb[4].mxu1 %v17363_v9 }
 0x479   : > { %v16929_v43 = vadd.f32 %v11828_v41, %v11716_v10  ;;  %12195 = vmatprep.mubr.bf16.mxu1 %v10903_v5  ;;  %v12725_v10 = vld [vmem:[%s13248_s8] sm:$0xff]   ;;  %v17365_v41 = vld [vmem:[#allocation32_spill] sm:$0xff] }
 0x47a   : > { %v11717_v15 = vpop.f32.mrb[172].mxu1 }
 0x47b   : > { %v11829_v34 = vpop.f32.mrb[236].mxu0  ;;  %v11718_v22 = vpop.f32.mrb[173].mxu1 }
 0x47c   : > { %v11830_v33 = vpop.f32.mrb[237].mxu0  ;;  %v11719_v23 = vadd.f32 %v11718_v22, %v11717_v15  ;;  %v11720_v62 = vpop.f32.mrb[174].mxu1 }
 0x47d   : > { %v11831_v44 = vadd.f32 %v11830_v33, %v11829_v34  ;;  %v11832_v6 = vpop.f32.mrb[238].mxu0  ;;  %v11721_v21 = vpop.f32.mrb[175].mxu1 }
 0x47e   : > { %v11833_v28 = vpop.f32.mrb[239].mxu0  ;;  %v11722_v58 = vadd.f32 %v11721_v21, %v11720_v62 }
 0x47f   : > { %v16936_v39 = vadd.f32 %v11831_v44, %v11719_v23  ;;  %v11834_v55 = vadd.f32 %v11833_v28, %v11832_v6  ;;  %v12726_v23 = vld [vmem:[%s13248_s8 + $0x8] sm:$0xff]   ;;  %v12727_v6 = vld [vmem:[%s13248_s8 + $0x10] sm:$0xff]  }
 0x480   : > { %12196 = vmatmul.mubr.bf16.gmra.mrb[8].mxu1 %v17364_v56 }
 0x481   : > { %v16938_v60 = vadd.f32 %v11834_v55, %v11722_v58  ;;  %12199 = vmatprep.mubr.bf16.mxu1 %v10905_v31  ;;  %v17368_v58 = vld [vmem:[#allocation35_spill] sm:$0xff] }
 0x482   : > { %v11851_v40 = vpop.f32.mrb[176].mxu1 }
 0x483   : > { %v11963_v14 = vpop.f32.mrb[240].mxu0  ;;  %v11852_v46 = vpop.f32.mrb[177].mxu1 }
 0x484   : > { %v11964_v16 = vpop.f32.mrb[241].mxu0  ;;  %v11853_v50 = vadd.f32 %v11852_v46, %v11851_v40  ;;  %v11854_v2 = vpop.f32.mrb[178].mxu1 }
 0x485   : > { %v11965_v30 = vadd.f32 %v11964_v16, %v11963_v14  ;;  %v11966_v57 = vpop.f32.mrb[242].mxu0  ;;  %v11855_v11 = vpop.f32.mrb[179].mxu1 }
 0x486   : > { %v11967_v1 = vpop.f32.mrb[243].mxu0  ;;  %v8173_v59 = vadd.f32 %v11853_v50, %v17365_v41  ;;  %v11856_v61 = vadd.f32 %v11855_v11, %v11854_v2  ;;  %v12729_v11 = vld [vmem:[%s13248_s8 + $0x20] sm:$0xff]  }
 0x487   : > { %v11968_v5 = vadd.f32 %v11967_v1, %v11966_v57 }
 0x488   : > { %v16952_v52 = vadd.f32 %v11965_v30, %v8173_v59  ;;  %v8174_v18 = vadd.f32 %v11856_v61, %v17366_v51  ;;  %12200 = vmatmul.mubr.bf16.gmra.mrb[12].mxu1 %v10906_v3  ;;  %v12728_v30 = vld [vmem:[%s13248_s8 + $0x18] sm:$0xff]   ;;  %v17369_v61 = vld [vmem:[#allocation36_spill] sm:$0xff] }
 0x489   : > { %12219 = vmatprep.mubr.bf16.mxu1 %v12725_v10 }
 0x48a   : > { %v16955_v31 = vadd.f32 %v11968_v5, %v8174_v18  ;;  %v11857_v54 = vpop.f32.mrb[180].mxu1 }
 0x48b   : > { %v11969_v37 = vpop.f32.mrb[244].mxu0  ;;  %v11858_v9 = vpop.f32.mrb[181].mxu1 }
 0x48c   : > { %v11970_v42 = vpop.f32.mrb[245].mxu0  ;;  %v11859_v15 = vadd.f32 %v11858_v9, %v11857_v54  ;;  %v11860_v34 = vpop.f32.mrb[182].mxu1 }
 0x48d   : > { %v11971_v22 = vadd.f32 %v11970_v42, %v11969_v37  ;;  %v11972_v33 = vpop.f32.mrb[246].mxu0  ;;  %v11861_v62 = vpop.f32.mrb[183].mxu1 }
 0x48e   : > { %v11973_v44 = vpop.f32.mrb[247].mxu0  ;;  %v8175_v26 = vadd.f32 %v11859_v15, %v17367_v25  ;;  %v11862_v21 = vadd.f32 %v11861_v62, %v11860_v34  ;;  %v12731_v62 = vld [vmem:[%s13248_s8 + $0x30] sm:$0xff]  }
 0x48f   : > { %v11974_v28 = vadd.f32 %v11973_v44, %v11972_v33  ;;  %v17370_v44 = vld [vmem:[#allocation37_spill] sm:$0xff] }
 0x490   : > { %v16960_v35 = vadd.f32 %v11971_v22, %v8175_v26  ;;  %v8176_v55 = vadd.f32 %v11862_v21, %v17368_v58  ;;  %12220 = vmatmul.mubr.bf16.vlgmr.msra.gmra.mrb[240].mxu1 %v12726_v23  ;;  %v12730_v22 = vld [vmem:[%s13248_s8 + $0x28] sm:$0xff]  }
 0x491   : > { %12223 = vmatprep.mubr.bf16.mxu1 %v12727_v6 }
 0x492   : > { %v16963_v56 = vadd.f32 %v11974_v28, %v8176_v55  ;;  %v11863_v0 = vpop.f32.mrb[184].mxu1  ;;  %v17371_v28 = vld [vmem:[#allocation38_spill] sm:$0xff] }
 0x493   : > { %v11975_v48 = vpop.f32.mrb[248].mxu0  ;;  %v11864_v40 = vpop.f32.mrb[185].mxu1 }
 0x494   : > { %v11976_v14 = vpop.f32.mrb[249].mxu0  ;;  %v11865_v46 = vadd.f32 %v11864_v40, %v11863_v0  ;;  %v11866_v16 = vpop.f32.mrb[186].mxu1 }
 0x495   : > { %v11977_v50 = vadd.f32 %v11976_v14, %v11975_v48  ;;  %v11978_v2 = vpop.f32.mrb[250].mxu0  ;;  %v11867_v57 = vpop.f32.mrb[187].mxu1 }
 0x496   : > { %v11979_v3 = vpop.f32.mrb[251].mxu0  ;;  %v8177_v1 = vadd.f32 %v11865_v46, %v16562_v53  ;;  %v11868_v10 = vadd.f32 %v11867_v57, %v11866_v16 }
 0x497   : > { %v11980_v41 = vadd.f32 %v11979_v3, %v11978_v2 }
 0x498   : > { %v16968_v59 = vadd.f32 %v11977_v50, %v8177_v1  ;;  %v8178_v5 = vadd.f32 %v11868_v10, %v17369_v61  ;;  %12224 = vmatmul.mubr.bf16.gmra.mrb[244].mxu1 %v12728_v30  ;;  %v12732_v30 = vld [vmem:[%s13248_s8 + $0x38] sm:$0xff]   ;;  %v17372_v1 = vld [vmem:[#allocation39_spill] sm:$0xff] }
 0x499   : > { %12227 = vmatprep.mubr.bf16.mxu1 %v12729_v11  ;;  %v12733_v11 = vld [vmem:[%s13248_s8 + $0x40] sm:$0xff]  }
 0x49a   : > { %v16971_v51 = vadd.f32 %v11980_v41, %v8178_v5  ;;  %v11869_v18 = vpop.f32.mrb[188].mxu1 }
 0x49b   : > { %v11981_v54 = vpop.f32.mrb[252].mxu0  ;;  %v11870_v37 = vpop.f32.mrb[189].mxu1 }
 0x49c   : > { %v11982_v9 = vpop.f32.mrb[253].mxu0  ;;  %v11871_v42 = vadd.f32 %v11870_v37, %v11869_v18  ;;  %v11872_v15 = vpop.f32.mrb[190].mxu1  ;;  %v17373_v18 = vld [vmem:[#allocation22_spill] sm:$0xff] }
 0x49d   : > { %v11983_v34 = vadd.f32 %v11982_v9, %v11981_v54  ;;  %v11984_v53 = vpop.f32.mrb[254].mxu0  ;;  %v11873_v33 = vpop.f32.mrb[191].mxu1 }
 0x49e   : > { %v11985_v23 = vpop.f32.mrb[255].mxu0  ;;  %v8179_v6 = vadd.f32 %v11871_v42, %v17370_v44  ;;  %v11874_v25 = vadd.f32 %v11873_v33, %v11872_v15 }
 0x49f   : > { %v11986_v26 = vadd.f32 %v11985_v23, %v11984_v53 }
 0x4a0   : > { %v16976_v21 = vadd.f32 %v11983_v34, %v8179_v6  ;;  %v8180_v58 = vadd.f32 %v11874_v25, %v17371_v28  ;;  %12228 = vmatmul.mubr.bf16.gmra.mrb[248].mxu1 %v12730_v22  ;;  %v12735_v25 = vld [vmem:[%s13248_s8 + $0x50] sm:$0xff]  }
 0x4a1   : > { %12231 = vmatprep.mubr.bf16.mxu1 %v12731_v62  ;;  %v12734_v62 = vld [vmem:[%s13248_s8 + $0x48] sm:$0xff]  }
 0x4a2   : > { %v16979_v55 = vadd.f32 %v11986_v26, %v8180_v58  ;;  %v11875_v0 = vpop.f32.mrb[192].mxu1  ;;  %v17374_v26 = vld [vmem:[#allocation23_spill] sm:$0xff] }
 0x4a3   : > { %v11987_v48 = vpop.f32.mrb[0].mxu0  ;;  %v11876_v40 = vpop.f32.mrb[193].mxu1 }
 0x4a4   : > { %v11988_v14 = vpop.f32.mrb[1].mxu0  ;;  %v11877_v46 = vadd.f32 %v11876_v40, %v11875_v0  ;;  %v11878_v16 = vpop.f32.mrb[194].mxu1 }
 0x4a5   : > { %v11989_v50 = vadd.f32 %v11988_v14, %v11987_v48  ;;  %v11990_v2 = vpop.f32.mrb[2].mxu0  ;;  %v11879_v57 = vpop.f32.mrb[195].mxu1 }
 0x4a6   : > { %v11991_v3 = vpop.f32.mrb[3].mxu0  ;;  %v8181_v10 = vadd.f32 %v11877_v46, %v17372_v1  ;;  %v11880_v41 = vadd.f32 %v11879_v57, %v11878_v16  ;;  %v12736_v57 = vld [vmem:[%s13248_s8 + $0x58] sm:$0xff]   ;;  %v12737_v1 = vld [vmem:[%s13248_s8 + $0x60] sm:$0xff]  }
 0x4a7   : > { %v11992_v61 = vadd.f32 %v11991_v3, %v11990_v2 }
 0x4a8   : > { %v16984_v5 = vadd.f32 %v11989_v50, %v8181_v10  ;;  %v8182_v54 = vadd.f32 %v11880_v41, %v17373_v18  ;;  %12232 = vmatmul.mubr.bf16.gmra.mrb[252].mxu1 %v12732_v30 }
 0x4a9   : > { %12235 = vmatprep.mubr.bf16.mxu1 %v12733_v11 }
 0x4aa   : > { %v16987_v37 = vadd.f32 %v11992_v61, %v8182_v54  ;;  %v11881_v9 = vpop.f32.mrb[196].mxu1 }
 0x4ab   : > { %v11993_v42 = vpop.f32.mrb[4].mxu0  ;;  %v11882_v15 = vpop.f32.mrb[197].mxu1 }
 0x4ac   : > { %v11994_v34 = vpop.f32.mrb[5].mxu0  ;;  %v11883_v53 = vadd.f32 %v11882_v15, %v11881_v9  ;;  %v11884_v22 = vpop.f32.mrb[198].mxu1 }
 0x4ad   : > { %v11995_v33 = vadd.f32 %v11994_v34, %v11993_v42  ;;  %v11996_v23 = vpop.f32.mrb[6].mxu0  ;;  %v11885_v44 = vpop.f32.mrb[199].mxu1 }
 0x4ae   : > { %v11997_v6 = vpop.f32.mrb[7].mxu0  ;;  %v8183_v28 = vadd.f32 %v11883_v53, %v17374_v26  ;;  %v11886_v58 = vadd.f32 %v11885_v44, %v11884_v22  ;;  %v12738_v53 = vld [vmem:[%s13248_s8 + $0x68] sm:$0xff]  }
 0x4af   : > { %v11998_v0 = vadd.f32 %v11997_v6, %v11996_v23 }
 0x4b0   : > { %v16992_v48 = vadd.f32 %v11995_v33, %v8183_v28  ;;  %v8184_v40 = vadd.f32 %v11886_v58, %v16757_v45  ;;  %12236 = vmatmul.mubr.bf16.gmra.mrb[0].mxu1 %v12734_v62  ;;  %v12739_v33 = vld [vmem:[%s13248_s8 + $0x70] sm:$0xff]  }
 0x4b1   : > { %12239 = vmatprep.mubr.bf16.mxu1 %v12735_v25 }
 0x4b2   : > { %v16995_v14 = vadd.f32 %v11998_v0, %v8184_v40 }
 0x4b3   : > { %v11999_v46 = vpop.f32.mrb[8].mxu0 }
 0x4b4   : > { %v12000_v16 = vpop.f32.mrb[9].mxu0  ;;  %v11887_v50 = vpop.f32.mrb[200].mxu1 }
 0x4b5   : > { %v12001_v2 = vadd.f32 %v12000_v16, %v11999_v46  ;;  %v12002_v30 = vpop.f32.mrb[10].mxu0  ;;  %v11888_v3 = vpop.f32.mrb[201].mxu1  ;;  %v12740_v16 = vld [vmem:[%s13248_s8 + $0x78] sm:$0xff]   ;;  %s17191_s8 = scalar_lea.hbm %s17246_s7, %s11043_s16 }
 0x4b6   : > { %v12003_v11 = vpop.f32.mrb[11].mxu0  ;;  %v11889_v10 = vadd.f32 %v11888_v3, %v11887_v50  ;;  %v11890_v41 = vpop.f32.mrb[202].mxu1 }
 0x4b7   : > { %v12004_v61 = vadd.f32 %v12003_v11, %v12002_v30  ;;  %v11891_v18 = vpop.f32.mrb[203].mxu1 }
 0x4b8   : > { %v8185_v45 = vadd.f32 %v11889_v10, %v16793_v13  ;;  %v11892_v54 = vadd.f32 %v11891_v18, %v11890_v41  ;;  %12240 = vmatmul.mubr.bf16.gmra.mrb[4].mxu1 %v12736_v57 }
 0x4b9   : > { %12243 = vmatprep.mubr.bf16.mxu1 %v12737_v1 }
 0x4ba   : > { %v17000_v9 = vadd.f32 %v12001_v2, %v8185_v45  ;;  %v8186_v42 = vadd.f32 %v11892_v54, %v16800_v7 }
 0x4bc   : > { %v17003_v15 = vadd.f32 %v12004_v61, %v8186_v42  ;;  %v12005_v34 = vpop.f32.mrb[12].mxu0 }
 0x4bd   : > { %v12006_v22 = vpop.f32.mrb[13].mxu0 }
 0x4be   : > { %v11893_v23 = vpop.f32.mrb[204].mxu1  ;;  %v12007_v62 = vadd.f32 %v12006_v22, %v12005_v34  ;;  %v12008_v44 = vpop.f32.mrb[14].mxu0 }
 0x4bf   : > { %v11894_v6 = vpop.f32.mrb[205].mxu1  ;;  %v12009_v25 = vpop.f32.mrb[15].mxu0 }
 0x4c0   : > { %v11895_v13 = vadd.f32 %v11894_v6, %v11893_v23  ;;  %v11896_v26 = vpop.f32.mrb[206].mxu1  ;;  %v12010_v28 = vadd.f32 %v12009_v25, %v12008_v44  ;;  %12244 = vmatmul.mubr.bf16.gmra.mrb[8].mxu1 %v12738_v53 }
 0x4c1   : > { %v11897_v58 = vpop.f32.mrb[207].mxu1  ;;  %12247 = vmatprep.mubr.bf16.mxu1 %v12739_v33 }
 0x4c2   : > { %v8187_v7 = vadd.f32 %v11895_v13, %v16820_v38  ;;  %v11898_v0 = vadd.f32 %v11897_v58, %v11896_v26 }
 0x4c4   : > { %v17008_v40 = vadd.f32 %v12007_v62, %v8187_v7  ;;  %v8188_v46 = vadd.f32 %v11898_v0, %v16828_v4 }
 0x4c6   : > { %v17012_v50 = vadd.f32 %v12010_v28, %v8188_v46  ;;  %v12011_v2 = vpop.f32.mrb[16].mxu0 }
 0x4c7   : > { %v12012_v30 = vpop.f32.mrb[17].mxu0 }
 0x4c8   : > { %v12013_v57 = vadd.f32 %v12012_v30, %v12011_v2  ;;  %v12014_v3 = vpop.f32.mrb[18].mxu0  ;;  %12248 = vmatmul.mubr.bf16.gmra.mrb[12].mxu1 %v12740_v16 }
 0x4c9   : > { %v11899_v11 = vpop.f32.mrb[208].mxu1  ;;  %v12015_v1 = vpop.f32.mrb[19].mxu0 }
 0x4ca   : > { %v11900_v10 = vpop.f32.mrb[209].mxu1  ;;  %v12016_v41 = vadd.f32 %v12015_v1, %v12014_v3 }
 0x4cb   : > { %v11901_v61 = vadd.f32 %v11900_v10, %v11899_v11  ;;  %v11902_v18 = vpop.f32.mrb[210].mxu1 }
 0x4cc   : > { %v11903_v38 = vpop.f32.mrb[211].mxu1 }
 0x4cd   : > { %v8189_v45 = vadd.f32 %v11901_v61, %v16846_v36  ;;  %v11904_v54 = vadd.f32 %v11903_v38, %v11902_v18 }
 0x4cf   : > { %v17015_v42 = vadd.f32 %v12013_v57, %v8189_v45  ;;  %v8190_v4 = vadd.f32 %v11904_v54, %v16848_v47 }
 0x4d1   : > { %v17018_v34 = vadd.f32 %v12016_v41, %v8190_v4  ;;  %v12017_v53 = vpop.f32.mrb[20].mxu0 }
 0x4d2   : > { %v12018_v22 = vpop.f32.mrb[21].mxu0 }
 0x4d3   : > { %v12019_v33 = vadd.f32 %v12018_v22, %v12017_v53  ;;  %v12020_v23 = vpop.f32.mrb[22].mxu0 }
 0x4d4   : > { %v11905_v62 = vpop.f32.mrb[212].mxu1  ;;  %v12021_v44 = vpop.f32.mrb[23].mxu0 }
 0x4d5   : > { %v11906_v6 = vpop.f32.mrb[213].mxu1  ;;  %v12022_v25 = vadd.f32 %v12021_v44, %v12020_v23 }
 0x4d6   : > { %v11907_v13 = vadd.f32 %v11906_v6, %v11905_v62  ;;  %v11908_v26 = vpop.f32.mrb[214].mxu1 }
 0x4d7   : > { %v11909_v28 = vpop.f32.mrb[215].mxu1 }
 0x4d8   : > { %v8191_v36 = vadd.f32 %v11907_v13, %v16866_v17  ;;  %v11910_v58 = vadd.f32 %v11909_v28, %v11908_v26 }
 0x4da   : > { %v17021_v7 = vadd.f32 %v12019_v33, %v8191_v36  ;;  %v8192_v47 = vadd.f32 %v11910_v58, %v16868_v20 }
 0x4dc   : > { %v17024_v0 = vadd.f32 %v12022_v25, %v8192_v47  ;;  %v12023_v46 = vpop.f32.mrb[24].mxu0 }
 0x4dd   : > { %v12024_v16 = vpop.f32.mrb[25].mxu0 }
 0x4de   : > { %v12025_v30 = vadd.f32 %v12024_v16, %v12023_v46  ;;  %v12026_v57 = vpop.f32.mrb[26].mxu0 }
 0x4df   : > { %v11911_v2 = vpop.f32.mrb[216].mxu1  ;;  %v12027_v11 = vpop.f32.mrb[27].mxu0 }
 0x4e0   : > { %v11912_v3 = vpop.f32.mrb[217].mxu1  ;;  %v12028_v41 = vadd.f32 %v12027_v11, %v12026_v57 }
 0x4e1   : > { %v11913_v1 = vadd.f32 %v11912_v3, %v11911_v2  ;;  %v11914_v10 = vpop.f32.mrb[218].mxu1 }
 0x4e2   : > { %v11915_v61 = vpop.f32.mrb[219].mxu1 }
 0x4e3   : > { %v8193_v17 = vadd.f32 %v11913_v1, %v16882_v27  ;;  %v11916_v18 = vadd.f32 %v11915_v61, %v11914_v10 }
 0x4e5   : > { %v17027_v38 = vadd.f32 %v12025_v30, %v8193_v17  ;;  %v8194_v20 = vadd.f32 %v11916_v18, %v16884_v12 }
 0x4e7   : > { %v17030_v45 = vadd.f32 %v12028_v41, %v8194_v20  ;;  %v12029_v54 = vpop.f32.mrb[28].mxu0 }
 0x4e8   : > { %v12030_v4 = vpop.f32.mrb[29].mxu0 }
 0x4e9   : > { %v12031_v53 = vadd.f32 %v12030_v4, %v12029_v54  ;;  %v12032_v22 = vpop.f32.mrb[30].mxu0 }
 0x4ea   : > { %v12033_v33 = vpop.f32.mrb[31].mxu0 }
 0x4eb   : > { %v12034_v23 = vadd.f32 %v12033_v33, %v12032_v22 }
 0x4ee   : > { %v11917_v62 = vpop.f32.mrb[220].mxu1 }
 0x4ef   : > { %v11918_v44 = vpop.f32.mrb[221].mxu1 }
 0x4f0   : > { %v11919_v6 = vadd.f32 %v11918_v44, %v11917_v62  ;;  %v11920_v25 = vpop.f32.mrb[222].mxu1 }
 0x4f1   : > { %v11921_v13 = vpop.f32.mrb[223].mxu1 }
 0x4f2   : > { %v8195_v27 = vadd.f32 %v11919_v6, %v16888_v29  ;;  %v11922_v26 = vadd.f32 %v11921_v13, %v11920_v25 }
 0x4f4   : > { %v17033_v28 = vadd.f32 %v12031_v53, %v8195_v27  ;;  %v8196_v12 = vadd.f32 %v11922_v26, %v16893_v49  ;;  %v12035_v36 = vpop.f32.mrb[32].mxu0 }
 0x4f5   : > { %v12036_v58 = vpop.f32.mrb[33].mxu0 }
 0x4f6   : > { %v17036_v47 = vadd.f32 %v12034_v23, %v8196_v12  ;;  %v12037_v46 = vadd.f32 %v12036_v58, %v12035_v36  ;;  %v12038_v16 = vpop.f32.mrb[34].mxu0 }
 0x4f7   : > { %v12039_v2 = vpop.f32.mrb[35].mxu0 }
 0x4f8   : > { %v12040_v30 = vadd.f32 %v12039_v2, %v12038_v16 }
 0x4f9   : > { %v11923_v57 = vpop.f32.mrb[224].mxu1 }
 0x4fa   : > { %v11924_v3 = vpop.f32.mrb[225].mxu1 }
 0x4fb   : > { %v11925_v11 = vadd.f32 %v11924_v3, %v11923_v57  ;;  %v11926_v1 = vpop.f32.mrb[226].mxu1 }
 0x4fc   : > { %v11927_v10 = vpop.f32.mrb[227].mxu1 }
 0x4fd   : > { %v8197_v29 = vadd.f32 %v11925_v11, %v16896_v32  ;;  %v11928_v41 = vadd.f32 %v11927_v10, %v11926_v1 }
 0x4ff   : > { %v17039_v61 = vadd.f32 %v12037_v46, %v8197_v29  ;;  %v8198_v49 = vadd.f32 %v11928_v41, %v16908_v8 }
 0x500   : > { %v12041_v17 = vpop.f32.mrb[36].mxu0 }
 0x501   : > { %v12042_v18 = vpop.f32.mrb[37].mxu0  ;;  %v17042_v20 = vadd.f32 %v12040_v30, %v8198_v49 }
 0x502   : > { %v12043_v54 = vadd.f32 %v12042_v18, %v12041_v17  ;;  %v12044_v4 = vpop.f32.mrb[38].mxu0 }
 0x503   : > { %v12045_v53 = vpop.f32.mrb[39].mxu0 }
 0x504   : > { %v12046_v22 = vadd.f32 %v12045_v53, %v12044_v4 }
 0x508   : > { %v11929_v33 = vpop.f32.mrb[228].mxu1 }
 0x509   : > { %v11930_v23 = vpop.f32.mrb[229].mxu1 }
 0x50a   : > { %v11931_v62 = vadd.f32 %v11930_v23, %v11929_v33  ;;  %v11932_v44 = vpop.f32.mrb[230].mxu1 }
 0x50b   : > { %v11933_v6 = vpop.f32.mrb[231].mxu1 }
 0x50c   : > { %v8199_v32 = vadd.f32 %v11931_v62, %v16913_v24  ;;  %v11934_v25 = vadd.f32 %v11933_v6, %v11932_v44 }
 0x50e   : > { %v17045_v13 = vadd.f32 %v12043_v54, %v8199_v32  ;;  %v8200_v8 = vadd.f32 %v11934_v25, %v16917_v19  ;;  %v17065_v25 = vld [vmem:[%s17243_s4] ss:$0 sm:$0xff] }
 0x510   : > { %v12047_v27 = vpop.f32.mrb[40].mxu0  ;;  %v17048_v12 = vadd.f32 %v12046_v22, %v8200_v8  ;;  %v17074_v8 = vld [vmem:[%s17245_s6] ss:$0 sm:$0xff] }
 0x511   : > { %v12048_v26 = vpop.f32.mrb[41].mxu0 }
 0x512   : > { %v12049_v36 = vadd.f32 %v12048_v26, %v12047_v27  ;;  %v12050_v58 = vpop.f32.mrb[42].mxu0  ;;  %v12267_v27 = vadd.f32 %v17065_v25, %v16960_v35  ;;  %v12279_v35 = vadd.f32 %v17065_v25, %v16976_v21 }
 0x513   : > { %v12051_v46 = vpop.f32.mrb[43].mxu0  ;;  %v11935_v2 = vpop.f32.mrb[232].mxu1 }
 0x514   : > { %v12052_v16 = vadd.f32 %v12051_v46, %v12050_v58  ;;  %v11936_v30 = vpop.f32.mrb[233].mxu1 }
 0x515   : > { %v11937_v57 = vadd.f32 %v11936_v30, %v11935_v2  ;;  %v11938_v3 = vpop.f32.mrb[234].mxu1 }
 0x516   : > { %v11939_v11 = vpop.f32.mrb[235].mxu1 }
 0x517   : > { %v8201_v24 = vadd.f32 %v11937_v57, %v16925_v63  ;;  %v11940_v1 = vadd.f32 %v11939_v11, %v11938_v3 }
 0x519   : > { %v17051_v10 = vadd.f32 %v12049_v36, %v8201_v24  ;;  %v8202_v19 = vadd.f32 %v11940_v1, %v16929_v43  ;;  %v12270_v36 = vadd.f32 %v17065_v25, %v16952_v52  ;;  %v12282_v52 = vadd.f32 %v17065_v25, %v16968_v59 }
 0x51b   : > { %v17054_v29 = vadd.f32 %v12052_v16, %v8202_v19  ;;  %v11941_v41 = vpop.f32.mrb[236].mxu1 }
 0x51c   : > { %v11942_v49 = vpop.f32.mrb[237].mxu1 }
 0x51d   : > { %v11943_v17 = vadd.f32 %v11942_v49, %v11941_v41  ;;  %v11944_v18 = vpop.f32.mrb[238].mxu1  ;;  %v12285_v41 = vadd.f32 %v17065_v25, %v16979_v55 }
 0x51e   : > { %v11945_v54 = vpop.f32.mrb[239].mxu1 }
 0x51f   : > { %v8203_v4 = vadd.f32 %v11943_v17, %v16936_v39  ;;  %v11946_v53 = vadd.f32 %v11945_v54, %v11944_v18  ;;  %v12273_v39 = vadd.f32 %v17065_v25, %v16963_v56  ;;  %v12288_v18 = vadd.f32 %v17065_v25, %v16971_v51 }
 0x521   : > { %v8204_v22 = vadd.f32 %v11946_v53, %v16938_v60  ;;  %v12276_v60 = vadd.f32 %v17065_v25, %v16955_v31  ;;  %v12274_v16 = vadd.f32 %v12273_v39, %v17074_v8 }
 0x523   : > { %v12277_v31 = vadd.f32 %v12276_v60, %v17074_v8  ;;  %v12294_v60 = vadd.f32 %v17065_v25, %v16984_v5 }
 0x526   : > { %v12053_v33 = vpop.f32.mrb[44].mxu0 }
 0x527   : > { %v12054_v23 = vpop.f32.mrb[45].mxu0 }
 0x528   : > { %v12055_v63 = vadd.f32 %v12054_v23, %v12053_v33  ;;  %v12056_v62 = vpop.f32.mrb[46].mxu0  ;;  %v12286_v33 = vadd.f32 %v12285_v41, %v17074_v8 }
 0x529   : > { %v12057_v44 = vpop.f32.mrb[47].mxu0 }
 0x52a   : > { %v17058_v6 = vadd.f32 %v12055_v63, %v8203_v4  ;;  %v12058_v43 = vadd.f32 %v12057_v44, %v12056_v62  ;;  %v12280_v4 = vadd.f32 %v12279_v35, %v17074_v8  ;;  %v12289_v63 = vadd.f32 %v12288_v18, %v17074_v8 }
 0x52c   : > { %v17060_v32 = vadd.f32 %v12058_v43, %v8204_v22  ;;  %v12283_v22 = vadd.f32 %v12282_v52, %v17074_v8  ;;  %v12291_v43 = vadd.f32 %v17065_v25, %v16992_v48  ;;  %v12303_v52 = vadd.f32 %v17065_v25, %v17008_v40 }
 0x563   : > { %v12221_v26 = vpop.f32.mrb[240].mxu1 }
 0x564   : > { %v12268_v58 = vadd.f32 %v12267_v27, %v12221_v26  ;;  %v9872_v46 = vpop.f32.mrb[241].mxu1 }
 0x565   : > { %v12271_v56 = vadd.f32 %v12270_v36, %v9872_v46  ;;  %v12222_v2 = vpop.f32.mrb[242].mxu1  ;;  %v12297_v36 = vadd.f32 %v17065_v25, %v16995_v14 }
 0x566   : > { %v12269_v30 = vadd.f32 %v12268_v58, %v17074_v8  ;;  %v12275_v57 = vadd.f32 %v12274_v16, %v12222_v2  ;;  %v9875_v3 = vpop.f32.mrb[243].mxu1  ;;  %v12300_v16 = vadd.f32 %v17065_v25, %v16987_v37  ;;  %v12292_v2 = vadd.f32 %v12291_v43, %v17074_v8 }
 0x567   : > { %v12272_v11 = vadd.f32 %v12271_v56, %v17074_v8  ;;  %v12278_v24 = vadd.f32 %v12277_v31, %v9875_v3  ;;  %v12298_v3 = vadd.f32 %v12297_v36, %v17074_v8  ;;  %v12318_v43 = vadd.f32 %v17065_v25, %v17015_v42 }
 0x568   : > { %v10033_v1 = vmax.f32 %v12269_v30, 0.0  ;;  %v10034_v19 = vmax.f32 %v12275_v57, 0.0  ;;  %v12295_v30 = vadd.f32 %v12294_v60, %v17074_v8 }
 0x569   : > { %v10031_v49 = vmax.f32 %v12272_v11, 0.0  ;;  %v10032_v17 = vmax.f32 %v12278_v24, 0.0  ;;  %v12301_v11 = vadd.f32 %v12300_v16, %v17074_v8 }
 0x56a   : > { %v11052_v54 = vpack.c.bf16 %v10034_v19, %v10033_v1  ;;  %v12306_v19 = vadd.f32 %v17065_v25, %v17000_v9 }
 0x56b   : > { %v11047_v21 = vpack.c.bf16 %v10032_v17, %v10031_v49  ;;  %v12225_v53 = vpop.f32.mrb[244].mxu1  ;;  %v12309_v17 = vadd.f32 %v17065_v25, %v17012_v50 }
 0x56c   : > { %11124 = vst [vmem:[%s17096_s21 + $0x8] sm:$0xff] %v11052_v54   ;;  %v12281_v59 = vadd.f32 %v12280_v4, %v12225_v53  ;;  %v9888_v55 = vpop.f32.mrb[245].mxu1  ;;  %v12312_v4 = vadd.f32 %v17065_v25, %v17003_v15  ;;  %v12304_v53 = vadd.f32 %v12303_v52, %v17074_v8 }
 0x56d   : > { %11048 = vst [vmem:[%s17096_s21] sm:$0xff] %v11047_v21   ;;  %v12284_v23 = vadd.f32 %v12283_v22, %v9888_v55  ;;  %v12226_v51 = vpop.f32.mrb[246].mxu1 }
 0x56e   : > { %v12287_v62 = vadd.f32 %v12286_v33, %v12226_v51  ;;  %v9891_v44 = vpop.f32.mrb[247].mxu1  ;;  %v10037_v27 = vmax.f32 %v12281_v59, 0.0  ;;  %v12307_v59 = vadd.f32 %v12306_v19, %v17074_v8  ;;  %v12310_v33 = vadd.f32 %v12309_v17, %v17074_v8 }
 0x56f   : > { %v12290_v39 = vadd.f32 %v12289_v63, %v9891_v44  ;;  %v10035_v58 = vmax.f32 %v12284_v23, 0.0  ;;  %v12313_v51 = vadd.f32 %v12312_v4, %v17074_v8  ;;  %v12336_v19 = vadd.f32 %v17065_v25, %v17030_v45 }
 0x570   : > { %v10038_v26 = vmax.f32 %v12287_v62, 0.0  ;;  %v12315_v62 = vadd.f32 %v17065_v25, %v17021_v7 }
 0x571   : > { %v10036_v46 = vmax.f32 %v12290_v39, 0.0 }
 0x572   : > { %v11062_v56 = vpack.c.bf16 %v10038_v26, %v10037_v27  ;;  %v12321_v27 = vadd.f32 %v17065_v25, %v17024_v0  ;;  %v12316_v16 = vadd.f32 %v12315_v62, %v17074_v8 }
 0x573   : > { %v11057_v31 = vpack.c.bf16 %v10036_v46, %v10035_v58  ;;  %v12229_v48 = vpop.f32.mrb[248].mxu1  ;;  %v12324_v58 = vadd.f32 %v17065_v25, %v17018_v34 }
 0x574   : > { %11126 = vst [vmem:[%s17096_s21 + $0x18] sm:$0xff] %v11062_v56   ;;  %v12293_v5 = vadd.f32 %v12292_v2, %v12229_v48  ;;  %v9904_v57 = vpop.f32.mrb[249].mxu1  ;;  %v12319_v2 = vadd.f32 %v12318_v43, %v17074_v8  ;;  %v12322_v48 = vadd.f32 %v12321_v27, %v17074_v8 }
 0x575   : > { %11125 = vst [vmem:[%s17096_s21 + $0x10] sm:$0xff] %v11057_v31   ;;  %v12296_v35 = vadd.f32 %v12295_v30, %v9904_v57  ;;  %v12230_v14 = vpop.f32.mrb[250].mxu1 }
 0x576   : > { %v12299_v24 = vadd.f32 %v12298_v3, %v12230_v14  ;;  %v9907_v37 = vpop.f32.mrb[251].mxu1  ;;  %v10041_v41 = vmax.f32 %v12293_v5, 0.0  ;;  %v12325_v5 = vadd.f32 %v12324_v58, %v17074_v8  ;;  %v12327_v3 = vadd.f32 %v17065_v25, %v17033_v28 }
 0x577   : > { %v12302_v1 = vadd.f32 %v12301_v11, %v9907_v37  ;;  %v10039_v18 = vmax.f32 %v12296_v35, 0.0  ;;  %v12330_v14 = vadd.f32 %v17065_v25, %v17027_v38  ;;  %v12333_v37 = vadd.f32 %v17065_v25, %v17036_v47 }
 0x578   : > { %v10042_v49 = vmax.f32 %v12299_v24, 0.0  ;;  %v12351_v58 = vadd.f32 %v17065_v25, %v17058_v6 }
 0x579   : > { %v10040_v54 = vmax.f32 %v12302_v1, 0.0  ;;  %v12334_v4 = vadd.f32 %v12333_v37, %v17074_v8 }
 0x57a   : > { %v11072_v21 = vpack.c.bf16 %v10042_v49, %v10041_v41  ;;  %v12328_v49 = vadd.f32 %v12327_v3, %v17074_v8 }
 0x57b   : > { %v11067_v22 = vpack.c.bf16 %v10040_v54, %v10039_v18  ;;  %v12233_v40 = vpop.f32.mrb[252].mxu1  ;;  %v12331_v18 = vadd.f32 %v12330_v14, %v17074_v8 }
 0x57c   : > { %11128 = vst [vmem:[%s17096_s21 + $0x28] sm:$0xff] %v11072_v21   ;;  %v12305_v9 = vadd.f32 %v12304_v53, %v12233_v40  ;;  %v9920_v55 = vpop.f32.mrb[253].mxu1  ;;  %v12337_v53 = vadd.f32 %v12336_v19, %v17074_v8  ;;  %v12339_v40 = vadd.f32 %v17065_v25, %v17045_v13 }
 0x57d   : > { %11127 = vst [vmem:[%s17096_s21 + $0x20] sm:$0xff] %v11067_v22   ;;  %v12308_v23 = vadd.f32 %v12307_v59, %v9920_v55  ;;  %v12234_v50 = vpop.f32.mrb[254].mxu1 }
 0x57e   : > { %v12311_v63 = vadd.f32 %v12310_v33, %v12234_v50  ;;  %v9923_v15 = vpop.f32.mrb[255].mxu1  ;;  %v10045_v39 = vmax.f32 %v12305_v9, 0.0  ;;  %v12342_v9 = vadd.f32 %v17065_v25, %v17039_v61  ;;  %v12340_v62 = vadd.f32 %v12339_v40, %v17074_v8 }
 0x57f   : > { %v12314_v44 = vadd.f32 %v12313_v51, %v9923_v15  ;;  %v10043_v26 = vmax.f32 %v12308_v23, 0.0  ;;  %v12345_v23 = vadd.f32 %v17065_v25, %v17048_v12 }
 0x580   : > { %v10046_v60 = vmax.f32 %v12311_v63, 0.0  ;;  %v12348_v63 = vadd.f32 %v17065_v25, %v17042_v20  ;;  %v12343_v43 = vadd.f32 %v12342_v9, %v17074_v8 }
 0x581   : > { %v10044_v36 = vmax.f32 %v12314_v44, 0.0 }
 0x582   : > { %v11082_v46 = vpack.c.bf16 %v10046_v60, %v10045_v39  ;;  %v12346_v60 = vadd.f32 %v12345_v23, %v17074_v8 }
 0x583   : > { %v11077_v56 = vpack.c.bf16 %v10044_v36, %v10043_v26  ;;  %v12237_v7 = vpop.f32.mrb[0].mxu1  ;;  %v12349_v26 = vadd.f32 %v12348_v63, %v17074_v8 }
 0x584   : > { %11130 = vst [vmem:[%s17096_s21 + $0x38] sm:$0xff] %v11082_v46   ;;  %v12317_v42 = vadd.f32 %v12316_v16, %v12237_v7  ;;  %v9936_v31 = vpop.f32.mrb[1].mxu1  ;;  %v12354_v16 = vadd.f32 %v17065_v25, %v17051_v10 }
 0x585   : > { %11129 = vst [vmem:[%s17096_s21 + $0x30] sm:$0xff] %v11077_v56   ;;  %v12320_v30 = vadd.f32 %v12319_v2, %v9936_v31  ;;  %v12238_v0 = vpop.f32.mrb[2].mxu1  ;;  %v12357_v2 = vadd.f32 %v17065_v25, %v17060_v32 }
 0x586   : > { %v12323_v57 = vadd.f32 %v12322_v48, %v12238_v0  ;;  %v9939_v34 = vpop.f32.mrb[3].mxu1  ;;  %v10049_v11 = vmax.f32 %v12317_v42, 0.0  ;;  %v12360_v48 = vadd.f32 %v17065_v25, %v17054_v29  ;;  %v12352_v0 = vadd.f32 %v12351_v58, %v17074_v8 }
 0x587   : > { %v12326_v35 = vadd.f32 %v12325_v5, %v9939_v34  ;;  %v10047_v52 = vmax.f32 %v12320_v30, 0.0  ;;  %v12355_v10 = vadd.f32 %v12354_v16, %v17074_v8  ;;  %v12358_v3 = vadd.f32 %v12357_v2, %v17074_v8 }
 0x588   : > { %v10050_v24 = vmax.f32 %v12323_v57, 0.0  ;;  %v12361_v29 = vadd.f32 %v12360_v48, %v17074_v8 }
 0x589   : > { %v10048_v1 = vmax.f32 %v12326_v35, 0.0 }
 0x58a   : > { %v11092_v41 = vpack.c.bf16 %v10050_v24, %v10049_v11 }
 0x58b   : > { %v11087_v17 = vpack.c.bf16 %v10048_v1, %v10047_v52  ;;  %v12241_v28 = vpop.f32.mrb[4].mxu1 }
 0x58c   : > { %11132 = vst [vmem:[%s17096_s21 + $0x48] sm:$0xff] %v11092_v41   ;;  %v12329_v38 = vadd.f32 %v12328_v49, %v12241_v28  ;;  %v9952_v54 = vpop.f32.mrb[5].mxu1 }
 0x58d   : > { %11131 = vst [vmem:[%s17096_s21 + $0x40] sm:$0xff] %v11087_v17   ;;  %v12332_v21 = vadd.f32 %v12331_v18, %v9952_v54  ;;  %v12242_v47 = vpop.f32.mrb[6].mxu1 }
 0x58e   : > { %v12335_v22 = vadd.f32 %v12334_v4, %v12242_v47  ;;  %v9955_v45 = vpop.f32.mrb[7].mxu1  ;;  %v10053_v55 = vmax.f32 %v12329_v38, 0.0 }
 0x58f   : > { %v12338_v59 = vadd.f32 %v12337_v53, %v9955_v45  ;;  %v10051_v50 = vmax.f32 %v12332_v21, 0.0 }
 0x590   : > { %v10054_v33 = vmax.f32 %v12335_v22, 0.0 }
 0x591   : > { %v10052_v51 = vmax.f32 %v12338_v59, 0.0 }
 0x592   : > { %v11102_v15 = vpack.c.bf16 %v10054_v33, %v10053_v55 }
 0x593   : > { %v11097_v44 = vpack.c.bf16 %v10052_v51, %v10051_v50  ;;  %v12245_v13 = vpop.f32.mrb[8].mxu1 }
 0x594   : > { %11134 = vst [vmem:[%s17096_s21 + $0x58] sm:$0xff] %v11102_v15   ;;  %v12341_v61 = vadd.f32 %v12340_v62, %v12245_v13  ;;  %v9968_v39 = vpop.f32.mrb[9].mxu1 }
 0x595   : > { %11133 = vst [vmem:[%s17096_s21 + $0x50] sm:$0xff] %v11097_v44   ;;  %v12344_v27 = vadd.f32 %v12343_v43, %v9968_v39  ;;  %v12246_v12 = vpop.f32.mrb[10].mxu1 }
 0x596   : > { %v12347_v36 = vadd.f32 %v12346_v60, %v12246_v12  ;;  %v9971_v20 = vpop.f32.mrb[11].mxu1  ;;  %v10057_v56 = vmax.f32 %v12341_v61, 0.0 }
 0x597   : > { %v12350_v46 = vadd.f32 %v12349_v26, %v9971_v20  ;;  %v10055_v42 = vmax.f32 %v12344_v27, 0.0 }
 0x598   : > { %v10058_v7 = vmax.f32 %v12347_v36, 0.0 }
 0x599   : > { %v10056_v31 = vmax.f32 %v12350_v46, 0.0 }
 0x59a   : > { %v11112_v30 = vpack.c.bf16 %v10058_v7, %v10057_v56 }
 0x59b   : > { %v11107_v6 = vpack.c.bf16 %v10056_v31, %v10055_v42  ;;  %v12249_v5 = vpop.f32.mrb[12].mxu1 }
 0x59c   : > { %11136 = vst [vmem:[%s17096_s21 + $0x68] sm:$0xff] %v11112_v30   ;;  %v12353_v57 = vadd.f32 %v12352_v0, %v12249_v5  ;;  %v9984_v34 = vpop.f32.mrb[13].mxu1 }
 0x59d   : > { %11135 = vst [vmem:[%s17096_s21 + $0x60] sm:$0xff] %v11107_v6   ;;  %v12356_v32 = vadd.f32 %v12355_v10, %v9984_v34  ;;  %v12250_v35 = vpop.f32.mrb[14].mxu1 }
 0x59e   : > { %v12359_v25 = vadd.f32 %v12358_v3, %v12250_v35  ;;  %v9987_v14 = vpop.f32.mrb[15].mxu1  ;;  %v10061_v24 = vmax.f32 %v12353_v57, 0.0 }
 0x59f   : > { %v12362_v11 = vadd.f32 %v12361_v29, %v9987_v14  ;;  %v10059_v52 = vmax.f32 %v12356_v32, 0.0 }
 0x5a0   : > { %v10062_v37 = vmax.f32 %v12359_v25, 0.0 }
 0x5a1   : > { %v10060_v1 = vmax.f32 %v12362_v11, 0.0 }
 0x5a2   : > { %v11122_v19 = vpack.c.bf16 %v10062_v37, %v10061_v24 }
 0x5a3   : > { %v11117_v8 = vpack.c.bf16 %v10060_v1, %v10059_v52 }
 0x5a4   : > { %11138 = vst [vmem:[%s17096_s21 + $0x78] sm:$0xff] %v11122_v19  }
 0x5a5   : > { %11137 = vst [vmem:[%s17096_s21 + $0x70] sm:$0xff] %v11117_v8  }
 0x5a6   : > { %12924 = shalt.err (!%p12921_p4)
}
 0x5a7   : > { %s12925_s10 = scalar_lea.hbm %s17191_s8, 2048  ;;  %s12929_s20 = scalar_lea.hbm %s17246_s7, 4096 }
 0x5a8   : > { %p12926_p9 = scmp.ne.s32.totalorder %s17191_s8, %s12925_s10  ;;  %p12930_p8 = scmp.lt.u32.totalorder %s17191_s8, %s17246_s7 }
 0x5a9   : > { %p12931_p13 = scmp.lt.u32.totalorder %s12929_s20, %s12925_s10  ;;  %p12933_p10 = scmp.lt.u32.totalorder %s12925_s10, %s17191_s8 }
 0x5aa   : > { %p12927_p0 = pnand %p12926_p9, %p13191_p5 }
 0x5ab   : > { %p12932_p6 = por %p12931_p13, %p12930_p8 }
 0x5ac   : > { %p12928_p11 = pneg %p12927_p0 }
 0x5ad   : > { %p12934_p3 = por %p12933_p10, %p12932_p6 }
 0x5af   : > { %p12935_p7 = pnand %p12934_p3, %p12928_p11 }
 0x5b1   : > { %12938 = shalt.err (!%p12935_p7)
}
 0x5b2   : > { %s12995_s23 = smov 64   ;;  %s12996_s11 = smov 4  }
 0x5b3   : > { %12409 = dma.vmem_to_hbm [thread:$0]  (%p13191_p5), %s17193_s29, 2048, %s17191_s8, %s10224_s28, %s12995_s23, %s12995_s23, %s12996_s11  }
 0x5b4 PF: > { %s17375_s30 = sld [smem:[#allocation17_spill]]  ;;  %s10252_s9 = sand.u32 1, %s12973_s24  }
 0x5b5   : > { %p17377_p1 = scmp.ge.s32.totalorder %s12985_s27, 2  ;;  %s10253_s13 = scalar_lea.sflag [#allocation6], %s10252_s9 }
 0x5ba   : > { %p17376_p12 = scmp.ne.s32.totalorder %s17375_s30, 0 }
 0x5bc   : > { %p12426_p2 = pnand %p17377_p1, %p17376_p12 }
 0x5be   : > { %12968 = dma.done.wait (!%p12426_p2), %s10253_s13, 2048  }
 0x5bf   : > { %12970 = vsyncadd (!%p12426_p2), %s10253_s13, 4294965248  ;;  %p22_p4 = scmp.ge.s32.totalorder %s13177_s22, 4   ;;  %s17378_s24 = smov %s12977_s25 }
 0x5c0   : > { %s17379_s25 = smov %s12981_s26  ;;  %s17380_s26 = smov %s13187_s18 }
 0x5c1   : > { %s17381_s27 = smov %s13177_s22  ;;  %24 = sbr.rel (!%p22_p4) target bundleno = 7 (0x7), region = 111 }
 0x5c8   :  { %10258 = vsyncpa [#allocation5], 1 }
 0x5c9   :  { %10260 = vsyncpa [#allocation5 + $0x1], 1 }
 0x5ca   :  { %10261 = vsyncpa [#allocation8], 1 }
 0x5cb   :  { %10262 = vsyncpa [#allocation11], 1 }
 0x5cc   :  { %10263 = vsyncpa [#allocation6], 1 }
 0x5cd   :  { %10265 = vsyncpa [#allocation6 + $0x1], 1 }

</bundles_post_ra>
